<compile_context>
chip_gen: v5e
topology: v5e:2x2
jax: 0.10.0
libtpu: 0.0.40
codegen_flags: <defaults>
</compile_context>

<pallas_src>
import jax
import jax.numpy as jnp
from jax.experimental import pallas as pl
from jax.experimental.pallas import tpu as pltpu


# ----------------------------------------------------------------------------
# Small helpers
# ----------------------------------------------------------------------------
def _round_up(v, m):
    return ((v + m - 1) // m) * m


def _vmem_limit_bytes():
    """Scoped-VMEM ceiling, derived per generation (v5e/v6e: 128 MiB physical,
    v7x: 64 MiB per TensorCore)."""
    try:
        cap = int(pltpu.get_tpu_info().vmem_capacity_bytes)
    except Exception:
        cap = 64 * 1024 * 1024          # conservative fallback (v7x-sized)
    return max(32 * 1024 * 1024, min(96 * 1024 * 1024, (cap * 3) // 4))


def _estimate_step_vmem(chunk, batch, dims):
    """Rough per-grid-step VMEM footprint used to auto-size the sample chunk."""
    n_linear = len(dims) - 1
    total = 0
    for l in range(n_linear):
        di, do = dims[l], dims[l + 1]
        total += 2 * chunk * do * di * 2                       # bf16 noise stream, x2 buffers
        total += 2 * chunk * _round_up(do, 128) * 4            # f32 bias stream, x2 buffers
        if l == 0:
            total += 4 * (do * do + batch * di + batch * do)   # Vo^T, u0, mu0
        else:
            total += 4 * (di * di + di * do + do * do)         # Vi, muW^T, Vo^T
    total += 6 * chunk * batch * max(dims) * 4                 # activations / matmul temps
    total += 2 * chunk * _round_up(batch * dims[-1], 128) * 4  # output block, x2 buffers
    return total


def _pick_chunk(ns, fits):
    """Largest VMEM-feasible chunk (multiple of 8, <=64), preferring small
    padding waste and an even grid length (v7x two-TensorCore balance)."""
    cands = [c for c in (64, 56, 48, 40, 32, 24, 16, 8)
             if c <= _round_up(ns, 8) and fits(c)]
    if not cands:
        return 8

    def key(c):
        g = -(-ns // c)
        waste = g * c - ns
        return ((8 * waste) // max(ns, 1),   # padding-waste bucket first
                g % 2,                       # then prefer even grid length
                -c)                          # then bigger chunks (fewer steps)

    return min(cands, key=key)


# ----------------------------------------------------------------------------
# Pallas kernel: grid = (ns_pad / chunk,).  One grid step = `chunk` MC samples.
# Ref order: [u0, mu0] + layer0:[R, Vo^T, b] + layer l>=1:[Vi, muW^T, R, Vo^T, b]
# followed by the output ref.
# ----------------------------------------------------------------------------
def _make_kernel(n_linear, use_bf16_noise):
    noise_dt = jnp.bfloat16 if use_bf16_noise else jnp.float32

    def kernel(*refs):
        u0_ref, mu0_ref = refs[0], refs[1]
        out_ref = refs[-1]
        B = u0_ref.shape[0]

        idx = 2
        h2 = None          # carried activations, (S*B, d) f32
        h3 = None          # carried activations, (S, B, d) f32
        for l in range(n_linear):
            if l == 0:
                r_ref, voT_ref, b_ref = refs[idx:idx + 3]
                idx += 3
            else:
                vi_ref, muwT_ref, r_ref, voT_ref, b_ref = refs[idx:idx + 5]
                idx += 5
            S, do, di = r_ref.shape

            r = r_ref[...]                               # (S, do, di) bf16 (eps * exp(vW))
            if not use_bf16_noise:
                r = r.astype(jnp.float32)

            if l == 0:
                # Layer-0 projections (x @ Vi0, x @ muW0^T) are hoisted to the
                # wrapper: only broadcast them over the sample chunk here.
                u3 = jnp.broadcast_to(u0_ref[...].astype(noise_dt), (S, B, di))
                mu = mu0_ref[...][None, :, :]            # (1, B, do), broadcasts below
            else:
                u = jnp.dot(h2, vi_ref[...],
                            preferred_element_type=jnp.float32)      # (S*B, di)
                mu = jnp.dot(h2, muwT_ref[...],
                             preferred_element_type=jnp.float32)     # (S*B, do)
                u3 = u.reshape(S, B, di).astype(noise_dt)
                mu = mu.reshape(S, B, do)

            # Noise path:  h @ W^T  with  W = Vo R Vi^T + muW  rewritten as
            #   ((h @ Vi) @ R^T) @ Vo^T + h @ muW^T   (no W materialized).
            w = jnp.einsum('sbi,soi->sbo', u3, r,
                           preferred_element_type=jnp.float32)       # (S, B, do)
            z = jnp.dot(w.reshape(S * B, do), voT_ref[...],
                        preferred_element_type=jnp.float32)          # (S*B, do)

            h3 = z.reshape(S, B, do) + mu + b_ref[...][:, None, :]
            if l < n_linear - 1:
                h3 = jnp.maximum(h3, 0.0)                # ReLU
                h2 = h3.reshape(S * B, do)

        S, B, C = h3.shape
        # Lane-flattened store (B*C lanes instead of C lanes).
        out_ref[...] = h3.reshape(S, B * C).astype(out_ref.dtype)

    return kernel


def _const_spec(arr, single_buffer):
    nd = arr.ndim
    if single_buffer:
        # Block index never changes -> a single buffer is enough (VMEM saver,
        # most valuable on v7x's 64 MiB VMEM at large H).
        return pl.BlockSpec(arr.shape, lambda s, _nd=nd: (0,) * _nd,
                            pipeline_mode=pl.Buffered(1))
    return pl.BlockSpec(arr.shape, lambda s, _nd=nd: (0,) * _nd)


def _chunk_spec(arr, chunk):
    nd = arr.ndim
    return pl.BlockSpec((chunk,) + arr.shape[1:],
                        lambda s, _nd=nd: (s,) + (0,) * (_nd - 1))


# ----------------------------------------------------------------------------
# JAX wrapper
# ----------------------------------------------------------------------------
def bayesian_nn_forward(x, layer_params, eigspaces, eps, *, chunk=None,
                        noise_compute_dtype=jnp.bfloat16):
    """Pallas implementation of bayesian_nn.forward.

    layer_params[l] = (muW, vW, mub, vb)  muW,vW: (d_out,d_in); mub,vb: (1,d_out)
    eigspaces[l]    = (Vo, Vi, Vb)         Vo:(d_out,d_out), Vi:(d_in,d_in), Vb:(d_out,d_out)
    eps[l]          = (epsW, epsb)         epsW:(ns,d_out,d_in), epsb:(ns,1,d_out)

    noise_compute_dtype: dtype of the noise contraction operands inside the
    kernel (bf16 = MXU-friendly default; f32 = tight-accuracy mode).  The noise
    stream (epsW * exp(vW)) is always shipped as bf16.
    """
    n_linear = len(layer_params)
    ns = eps[0][0].shape[0]
    B = x.shape[0]
    dims = [layer_params[0][0].shape[1]] + [p[0].shape[0] for p in layer_params]
    C = dims[-1]
    use_bf16_noise = (noise_compute_dtype == jnp.bfloat16)

    vmem_limit = _vmem_limit_bytes()
    if chunk is None:
        budget = int(vmem_limit * 0.6)
        chunk = _pick_chunk(ns, lambda c: _estimate_step_vmem(c, B, dims) <= budget)
    assert chunk % 8 == 0 and chunk >= 8, \
        "chunk must be a multiple of 8 (sublane tiling of the per-sample blocks)"
    ns_pad = _round_up(ns, chunk)          # extra samples computed then dropped
    pad = ns_pad - ns
    grid_len = ns_pad // chunk

    xf = x.astype(jnp.float32)

    # --- Hoisted sample-invariant layer-0 work (done once by XLA) ---
    muW0 = layer_params[0][0]
    Vi0 = eigspaces[0][1]
    u0 = jnp.dot(xf, Vi0.astype(jnp.float32))        # (B, d_in0)
    mu0 = jnp.dot(xf, muW0.T.astype(jnp.float32))    # (B, d_out0)

    entries = [(u0, "const"), (mu0, "const")]
    for l in range(n_linear):
        muW, vW, mub, vb = layer_params[l]
        Vo, Vi, Vb = eigspaces[l]
        epsW, epsb = eps[l]
        do, di = muW.shape

        # Noise with exp(vW) folded in, shipped bf16 (the only O(ns) HBM stream).
        R = (epsW.astype(jnp.float32)
             * jnp.exp(vW.astype(jnp.float32))[None]).astype(jnp.bfloat16)  # (ns, do, di)
        # Effective bias per sample, fully precomputed in f32 by XLA.
        b_eff = (epsb.reshape(ns, do).astype(jnp.float32)
                 * jnp.exp(vb.astype(jnp.float32)).reshape(1, do))
        b_eff = b_eff @ Vb.T.astype(jnp.float32) + mub.reshape(1, do).astype(jnp.float32)
        if pad:
            R = jnp.pad(R, ((0, pad), (0, 0), (0, 0)))
            b_eff = jnp.pad(b_eff, ((0, pad), (0, 0)))

        VoT = Vo.T.astype(jnp.float32)
        if l == 0:
            entries += [(R, "chunk"), (VoT, "const"), (b_eff, "chunk")]
        else:
            entries += [(Vi.astype(jnp.float32), "const"),
                        (muW.T.astype(jnp.float32), "const"),
                        (R, "chunk"),
                        (VoT, "const"),
                        (b_eff, "chunk")]

    kernel = _make_kernel(n_linear, use_bf16_noise)
    out_shape = jax.ShapeDtypeStruct((ns_pad, B * C), jnp.float32)

    def build_and_call(single_buffer_consts):
        in_specs = []
        for arr, kind in entries:
            if kind == "const":
                in_specs.append(_const_spec(arr, single_buffer_consts))
            else:
                in_specs.append(_chunk_spec(arr, chunk))
        grid_spec = pltpu.PrefetchScalarGridSpec(
            num_scalar_prefetch=0,
            grid=(grid_len,),
            in_specs=in_specs,
            out_specs=pl.BlockSpec((chunk, B * C), lambda s: (s, 0)),
        )
        return pl.pallas_call(
            kernel,
            out_shape=out_shape,
            grid_spec=grid_spec,
            compiler_params=pltpu.CompilerParams(
                dimension_semantics=("parallel",),
                vmem_limit_bytes=vmem_limit,
            ),
        )(*(arr for arr, _ in entries))

    try:
        y = build_and_call(True)
    except Exception:
        # pipeline_mode=pl.Buffered(1) not supported by this jax version ->
        # fall back to default (double-buffered) constants.
        y = build_and_call(False)

    return y[:ns].reshape(ns, B, C)


# ----------------------------------------------------------------------------
# Pure-JAX reference (mirrors the PyTorch math literally)
# ----------------------------------------------------------------------------
def reference_forward(x, layer_params, eigspaces, eps, noise_dtype=None):
    """Literal port of bayesian_nn.forward (per-sample weight materialization).

    noise_dtype: optionally round the per-sample weight-noise product
    epsW*exp(vW) to this dtype, mirroring the kernel's bf16 HBM noise stream.
    """
    n_linear = len(layer_params)
    ns = eps[0][0].shape[0]
    ys = []
    for s in range(ns):
        h = x
        for l in range(n_linear):
            muW, vW, mub, vb = layer_params[l]
            Vo, Vi, Vb = eigspaces[l]
            epsW, epsb = eps[l]
            rW = epsW[s] * jnp.exp(vW)
            if noise_dtype is not None:
                rW = rW.astype(noise_dtype).astype(jnp.float32)
            W = Vo @ rW @ Vi.T + muW
            rb = epsb[s] * jnp.exp(vb)
            b = rb @ Vb.T + mub
            h = h @ W.T + b
            if l < n_linear - 1:
                h = jax.nn.relu(h)
        ys.append(h)
    return jnp.stack(ys)


# ----------------------------------------------------------------------------
# Deterministic parameter / input construction
# ----------------------------------------------------------------------------
def init_everything(key, d_in, hidden, num_layers, num_classes, ns, batch):
    dims = [d_in] + [hidden] * num_layers + [num_classes]
    params, eigs, eps = [], [], []
    for l in range(len(dims) - 1):
        di, do = dims[l], dims[l + 1]
        key, *ks = jax.random.split(key, 10)
        muW = 0.1 * jax.random.normal(ks[0], (do, di), jnp.float32)
        vW = -1.0 + 0.1 * jax.random.normal(ks[1], (do, di), jnp.float32)
        mub = 0.1 * jax.random.normal(ks[2], (1, do), jnp.float32)
        vb = -1.0 + 0.1 * jax.random.normal(ks[3], (1, do), jnp.float32)
        # KFAC eigenspaces: deterministic orthogonal matrices
        Vo = jnp.linalg.qr(jax.random.normal(ks[4], (do, do), jnp.float32))[0]
        Vi = jnp.linalg.qr(jax.random.normal(ks[5], (di, di), jnp.float32))[0]
        Vb = jnp.linalg.qr(jax.random.normal(ks[6], (do, do), jnp.float32))[0]
        epsW = jax.random.normal(ks[7], (ns, do, di), jnp.float32)
        epsb = jax.random.normal(ks[8], (ns, 1, do), jnp.float32)
        params.append((muW, vW, mub, vb))
        eigs.append((Vo, Vi, Vb))
        eps.append((epsW, epsb))
    key, kx = jax.random.split(key)
    x = jax.random.normal(kx, (batch, d_in), jnp.float32)
    return x, params, eigs, eps


if __name__ == "__main__":
    # Shapes consistent with the module: num_classes=2, num_layers=2,
    # num_neurons=32; batch=8 (multiple of 8 keeps the in-kernel reshapes
    # sublane-aligned), input features=16; ns=64 Monte-Carlo samples (module
    # default is 150 - kept small for the smoke test).  The auto-picked chunk
    # is 32 -> grid length 2 (even, balanced on v7x) and S*B = 256 MXU rows.
    NUM_CLASSES = 2
    NUM_LAYERS = 2
    NUM_NEURONS = 32
    D_IN = 16
    BATCH = 8
    NS = 64

    key = jax.random.PRNGKey(0)
    x, params, eigs, eps = init_everything(
        key, D_IN, NUM_NEURONS, NUM_LAYERS, NUM_CLASSES, NS, BATCH)

    # Reference models the kernel's bf16 rounding of the folded noise product
    # (the only deliberate precision trade; it perturbs only the MC noise term).
    y_ref = reference_forward(x, params, eigs, eps, noise_dtype=jnp.bfloat16)

    # Default path: bf16 noise stream + bf16 noise matmul (MXU-friendly).
    y = jax.block_until_ready(bayesian_nn_forward(x, params, eigs, eps))
    assert y.shape == (NS, BATCH, NUM_CLASSES), y.shape
    assert bool(jnp.all(jnp.isfinite(y)))
    assert jnp.allclose(y, y_ref, rtol=5e-2, atol=5e-2), \
        float(jnp.max(jnp.abs(y - y_ref)))

    # Precise path: bf16 noise stream, f32 noise matmul -> tight match.
    y32 = jax.block_until_ready(
        bayesian_nn_forward(x, params, eigs, eps,
                            noise_compute_dtype=jnp.float32))
    assert y32.shape == (NS, BATCH, NUM_CLASSES), y32.shape
    assert jnp.allclose(y32, y_ref, rtol=1e-3, atol=1e-3), \
        float(jnp.max(jnp.abs(y32 - y_ref)))

    print("KERNEL_OK")
</pallas_src>

<mosaic_0001>
module attributes {stable_mosaic.version = 11 : i64} {
  func.func @kernel(%arg0: i32, %arg1: memref<8x16xf32, #tpu.memory_space<vmem>>, %arg2: memref<8x32xf32, #tpu.memory_space<vmem>>, %arg3: memref<32x32x16xbf16, #tpu.memory_space<vmem>>, %arg4: memref<32x32xf32, #tpu.memory_space<vmem>>, %arg5: memref<32x32xf32, #tpu.memory_space<vmem>>, %arg6: memref<32x32xf32, #tpu.memory_space<vmem>>, %arg7: memref<32x32xf32, #tpu.memory_space<vmem>>, %arg8: memref<32x32x32xbf16, #tpu.memory_space<vmem>>, %arg9: memref<32x32xf32, #tpu.memory_space<vmem>>, %arg10: memref<32x32xf32, #tpu.memory_space<vmem>>, %arg11: memref<32x32xf32, #tpu.memory_space<vmem>>, %arg12: memref<32x2xf32, #tpu.memory_space<vmem>>, %arg13: memref<32x2x32xbf16, #tpu.memory_space<vmem>>, %arg14: memref<2x2xf32, #tpu.memory_space<vmem>>, %arg15: memref<32x2xf32, #tpu.memory_space<vmem>>, %arg16: memref<32x16xf32, #tpu.memory_space<vmem>>) attributes {dimension_semantics = [#tpu.dimension_semantics<parallel>], iteration_bounds = array<i64: 2>, scalar_prefetch = 0 : i64, scratch_operands = 0 : i64, tpu.core_type = #tpu.core_type<tc>, window_params = [{pipeline_mode = #tpu.pipeline_mode<synchronous>, transform_indices = @transform_0, window_bounds = array<i64: 8, 16>}, {pipeline_mode = #tpu.pipeline_mode<synchronous>, transform_indices = @transform_1, window_bounds = array<i64: 8, 32>}, {transform_indices = @transform_2, window_bounds = array<i64: 32, 32, 16>}, {pipeline_mode = #tpu.pipeline_mode<synchronous>, transform_indices = @transform_3, window_bounds = array<i64: 32, 32>}, {transform_indices = @transform_4, window_bounds = array<i64: 32, 32>}, {pipeline_mode = #tpu.pipeline_mode<synchronous>, transform_indices = @transform_5, window_bounds = array<i64: 32, 32>}, {pipeline_mode = #tpu.pipeline_mode<synchronous>, transform_indices = @transform_6, window_bounds = array<i64: 32, 32>}, {transform_indices = @transform_7, window_bounds = array<i64: 32, 32, 32>}, {pipeline_mode = #tpu.pipeline_mode<synchronous>, transform_indices = @transform_8, window_bounds = array<i64: 32, 32>}, {transform_indices = @transform_9, window_bounds = array<i64: 32, 32>}, {pipeline_mode = #tpu.pipeline_mode<synchronous>, transform_indices = @transform_10, window_bounds = array<i64: 32, 32>}, {pipeline_mode = #tpu.pipeline_mode<synchronous>, transform_indices = @transform_11, window_bounds = array<i64: 32, 2>}, {transform_indices = @transform_12, window_bounds = array<i64: 32, 2, 32>}, {pipeline_mode = #tpu.pipeline_mode<synchronous>, transform_indices = @transform_13, window_bounds = array<i64: 2, 2>}, {transform_indices = @transform_14, window_bounds = array<i64: 32, 2>}, {transform_indices = @transform_15, window_bounds = array<i64: 32, 16>}]} {
    %c0 = arith.constant 0 : index
    %c0_0 = arith.constant 0 : index
    %c0_1 = arith.constant 0 : index
    %0 = vector.load %arg3[%c0, %c0_0, %c0_1] : memref<32x32x16xbf16, #tpu.memory_space<vmem>>, vector<32x32x16xbf16>
    %c0_2 = arith.constant 0 : index
    %c0_3 = arith.constant 0 : index
    %1 = vector.load %arg1[%c0_2, %c0_3] : memref<8x16xf32, #tpu.memory_space<vmem>>, vector<8x16xf32>
    %2 = arith.truncf %1 : vector<8x16xf32> to vector<8x16xbf16>
    %3 = vector.shape_cast %2 : vector<8x16xbf16> to vector<1x8x16xbf16>
    %4 = vector.broadcast %3 : vector<1x8x16xbf16> to vector<32x8x16xbf16>
    %c0_4 = arith.constant 0 : index
    %c0_5 = arith.constant 0 : index
    %5 = vector.load %arg2[%c0_4, %c0_5] : memref<8x32xf32, #tpu.memory_space<vmem>>, vector<8x32xf32>
    %6 = vector.shape_cast %5 : vector<8x32xf32> to vector<1x8x32xf32>
    "tpu.trace_start"() <{level = 10 : i32, message = "sbi,soi->sbo"}> : () -> ()
    %cst = arith.constant dense<0.000000e+00> : vector<32x8x32xf32>
    %7 = tpu.matmul %4, %0, %cst {dimension_numbers = #tpu.dot_dimension_numbers<[2], [2], [1], [1], [0, 0, 0, 1, 1, 1], [0], [0]>} : vector<32x8x16xbf16>, vector<32x32x16xbf16>, vector<32x8x32xf32> -> vector<32x8x32xf32>
    "tpu.trace_stop"() : () -> ()
    %8 = vector.shape_cast %7 : vector<32x8x32xf32> to vector<256x32xf32>
    %c0_6 = arith.constant 0 : index
    %c0_7 = arith.constant 0 : index
    %9 = vector.load %arg4[%c0_6, %c0_7] : memref<32x32xf32, #tpu.memory_space<vmem>>, vector<32x32xf32>
    %cst_8 = arith.constant dense<0.000000e+00> : vector<256x32xf32>
    %10 = tpu.matmul %8, %9, %cst_8 {dimension_numbers = #tpu.dot_dimension_numbers<[1], [0], [0], [1], [0, 0, 1, 1], [], []>} : vector<256x32xf32>, vector<32x32xf32>, vector<256x32xf32> -> vector<256x32xf32>
    %11 = vector.shape_cast %10 : vector<256x32xf32> to vector<32x8x32xf32>
    %12 = vector.broadcast %6 : vector<1x8x32xf32> to vector<32x8x32xf32>
    %13 = arith.addf %11, %12 : vector<32x8x32xf32>
    %c0_9 = arith.constant 0 : index
    %c0_10 = arith.constant 0 : index
    %14 = vector.load %arg5[%c0_9, %c0_10] : memref<32x32xf32, #tpu.memory_space<vmem>>, vector<32x32xf32>
    %15 = vector.shape_cast %14 : vector<32x32xf32> to vector<32x1x32xf32>
    %16 = vector.broadcast %15 : vector<32x1x32xf32> to vector<32x8x32xf32>
    %17 = arith.addf %13, %16 : vector<32x8x32xf32>
    %cst_11 = arith.constant 0.000000e+00 : f32
    %18 = vector.broadcast %cst_11 : f32 to vector<32x8x32xf32>
    %19 = arith.maximumf %17, %18 : vector<32x8x32xf32>
    %20 = vector.shape_cast %19 : vector<32x8x32xf32> to vector<256x32xf32>
    %c0_12 = arith.constant 0 : index
    %c0_13 = arith.constant 0 : index
    %c0_14 = arith.constant 0 : index
    %21 = vector.load %arg8[%c0_12, %c0_13, %c0_14] : memref<32x32x32xbf16, #tpu.memory_space<vmem>>, vector<32x32x32xbf16>
    %c0_15 = arith.constant 0 : index
    %c0_16 = arith.constant 0 : index
    %22 = vector.load %arg6[%c0_15, %c0_16] : memref<32x32xf32, #tpu.memory_space<vmem>>, vector<32x32xf32>
    %cst_17 = arith.constant dense<0.000000e+00> : vector<256x32xf32>
    %23 = tpu.matmul %20, %22, %cst_17 {dimension_numbers = #tpu.dot_dimension_numbers<[1], [0], [0], [1], [0, 0, 1, 1], [], []>} : vector<256x32xf32>, vector<32x32xf32>, vector<256x32xf32> -> vector<256x32xf32>
    %c0_18 = arith.constant 0 : index
    %c0_19 = arith.constant 0 : index
    %24 = vector.load %arg7[%c0_18, %c0_19] : memref<32x32xf32, #tpu.memory_space<vmem>>, vector<32x32xf32>
    %cst_20 = arith.constant dense<0.000000e+00> : vector<256x32xf32>
    %25 = tpu.matmul %20, %24, %cst_20 {dimension_numbers = #tpu.dot_dimension_numbers<[1], [0], [0], [1], [0, 0, 1, 1], [], []>} : vector<256x32xf32>, vector<32x32xf32>, vector<256x32xf32> -> vector<256x32xf32>
    %26 = vector.shape_cast %23 : vector<256x32xf32> to vector<32x8x32xf32>
    %27 = arith.truncf %26 : vector<32x8x32xf32> to vector<32x8x32xbf16>
    %28 = vector.shape_cast %25 : vector<256x32xf32> to vector<32x8x32xf32>
    "tpu.trace_start"() <{level = 10 : i32, message = "sbi,soi->sbo"}> : () -> ()
    %cst_21 = arith.constant dense<0.000000e+00> : vector<32x8x32xf32>
    %29 = tpu.matmul %27, %21, %cst_21 {dimension_numbers = #tpu.dot_dimension_numbers<[2], [2], [1], [1], [0, 0, 0, 1, 1, 1], [0], [0]>} : vector<32x8x32xbf16>, vector<32x32x32xbf16>, vector<32x8x32xf32> -> vector<32x8x32xf32>
    "tpu.trace_stop"() : () -> ()
    %30 = vector.shape_cast %29 : vector<32x8x32xf32> to vector<256x32xf32>
    %c0_22 = arith.constant 0 : index
    %c0_23 = arith.constant 0 : index
    %31 = vector.load %arg9[%c0_22, %c0_23] : memref<32x32xf32, #tpu.memory_space<vmem>>, vector<32x32xf32>
    %cst_24 = arith.constant dense<0.000000e+00> : vector<256x32xf32>
    %32 = tpu.matmul %30, %31, %cst_24 {dimension_numbers = #tpu.dot_dimension_numbers<[1], [0], [0], [1], [0, 0, 1, 1], [], []>} : vector<256x32xf32>, vector<32x32xf32>, vector<256x32xf32> -> vector<256x32xf32>
    %33 = vector.shape_cast %32 : vector<256x32xf32> to vector<32x8x32xf32>
    %34 = arith.addf %33, %28 : vector<32x8x32xf32>
    %c0_25 = arith.constant 0 : index
    %c0_26 = arith.constant 0 : index
    %35 = vector.load %arg10[%c0_25, %c0_26] : memref<32x32xf32, #tpu.memory_space<vmem>>, vector<32x32xf32>
    %36 = vector.shape_cast %35 : vector<32x32xf32> to vector<32x1x32xf32>
    %37 = vector.broadcast %36 : vector<32x1x32xf32> to vector<32x8x32xf32>
    %38 = arith.addf %34, %37 : vector<32x8x32xf32>
    %cst_27 = arith.constant 0.000000e+00 : f32
    %39 = vector.broadcast %cst_27 : f32 to vector<32x8x32xf32>
    %40 = arith.maximumf %38, %39 : vector<32x8x32xf32>
    %41 = vector.shape_cast %40 : vector<32x8x32xf32> to vector<256x32xf32>
    %c0_28 = arith.constant 0 : index
    %c0_29 = arith.constant 0 : index
    %c0_30 = arith.constant 0 : index
    %42 = vector.load %arg13[%c0_28, %c0_29, %c0_30] : memref<32x2x32xbf16, #tpu.memory_space<vmem>>, vector<32x2x32xbf16>
    %c0_31 = arith.constant 0 : index
    %c0_32 = arith.constant 0 : index
    %43 = vector.load %arg11[%c0_31, %c0_32] : memref<32x32xf32, #tpu.memory_space<vmem>>, vector<32x32xf32>
    %cst_33 = arith.constant dense<0.000000e+00> : vector<256x32xf32>
    %44 = tpu.matmul %41, %43, %cst_33 {dimension_numbers = #tpu.dot_dimension_numbers<[1], [0], [0], [1], [0, 0, 1, 1], [], []>} : vector<256x32xf32>, vector<32x32xf32>, vector<256x32xf32> -> vector<256x32xf32>
    %c0_34 = arith.constant 0 : index
    %c0_35 = arith.constant 0 : index
    %45 = vector.load %arg12[%c0_34, %c0_35] : memref<32x2xf32, #tpu.memory_space<vmem>>, vector<32x2xf32>
    %cst_36 = arith.constant dense<0.000000e+00> : vector<256x2xf32>
    %46 = tpu.matmul %41, %45, %cst_36 {dimension_numbers = #tpu.dot_dimension_numbers<[1], [0], [0], [1], [0, 0, 1, 1], [], []>} : vector<256x32xf32>, vector<32x2xf32>, vector<256x2xf32> -> vector<256x2xf32>
    %47 = vector.shape_cast %44 : vector<256x32xf32> to vector<32x8x32xf32>
    %48 = arith.truncf %47 : vector<32x8x32xf32> to vector<32x8x32xbf16>
    %49 = vector.shape_cast %46 : vector<256x2xf32> to vector<32x8x2xf32>
    "tpu.trace_start"() <{level = 10 : i32, message = "sbi,soi->sbo"}> : () -> ()
    %cst_37 = arith.constant dense<0.000000e+00> : vector<32x8x2xf32>
    %50 = tpu.matmul %48, %42, %cst_37 {dimension_numbers = #tpu.dot_dimension_numbers<[2], [2], [1], [1], [0, 0, 0, 1, 1, 1], [0], [0]>} : vector<32x8x32xbf16>, vector<32x2x32xbf16>, vector<32x8x2xf32> -> vector<32x8x2xf32>
    "tpu.trace_stop"() : () -> ()
    %51 = vector.shape_cast %50 : vector<32x8x2xf32> to vector<256x2xf32>
    %c0_38 = arith.constant 0 : index
    %c0_39 = arith.constant 0 : index
    %52 = vector.load %arg14[%c0_38, %c0_39] : memref<2x2xf32, #tpu.memory_space<vmem>>, vector<2x2xf32>
    %cst_40 = arith.constant dense<0.000000e+00> : vector<256x2xf32>
    %53 = tpu.matmul %51, %52, %cst_40 {dimension_numbers = #tpu.dot_dimension_numbers<[1], [0], [0], [1], [0, 0, 1, 1], [], []>} : vector<256x2xf32>, vector<2x2xf32>, vector<256x2xf32> -> vector<256x2xf32>
    %54 = vector.shape_cast %53 : vector<256x2xf32> to vector<32x8x2xf32>
    %55 = arith.addf %54, %49 : vector<32x8x2xf32>
    %c0_41 = arith.constant 0 : index
    %c0_42 = arith.constant 0 : index
    %56 = vector.load %arg15[%c0_41, %c0_42] : memref<32x2xf32, #tpu.memory_space<vmem>>, vector<32x2xf32>
    %57 = vector.shape_cast %56 : vector<32x2xf32> to vector<32x1x2xf32>
    %58 = vector.broadcast %57 : vector<32x1x2xf32> to vector<32x8x2xf32>
    %59 = arith.addf %55, %58 : vector<32x8x2xf32>
    %60 = vector.shape_cast %59 : vector<32x8x2xf32> to vector<32x16xf32>
    %c0_43 = arith.constant 0 : index
    %c0_44 = arith.constant 0 : index
    %61 = vector.load %arg16[%c0_43, %c0_44] : memref<32x16xf32, #tpu.memory_space<vmem>>, vector<32x16xf32>
    tpu.vector_store %arg16[%c0_43, %c0_44], %60 {strides = array<i32>} : memref<32x16xf32, #tpu.memory_space<vmem>>, vector<32x16xf32>,
    return
  }
  func.func @transform_0(%arg0: i32) -> (i32, i32) {
    %c0_i32 = arith.constant 0 : i32
    %c0_i32_0 = arith.constant 0 : i32
    %c0_i32_1 = arith.constant 0 : i32
    return %c0_i32, %c0_i32_0 : i32, i32
  }
  func.func @transform_1(%arg0: i32) -> (i32, i32) {
    %c0_i32 = arith.constant 0 : i32
    %c0_i32_0 = arith.constant 0 : i32
    %c0_i32_1 = arith.constant 0 : i32
    return %c0_i32, %c0_i32_0 : i32, i32
  }
  func.func @transform_2(%arg0: i32) -> (i32, i32, i32) {
    %c0_i32 = arith.constant 0 : i32
    %c0_i32_0 = arith.constant 0 : i32
    %c0_i32_1 = arith.constant 0 : i32
    return %arg0, %c0_i32, %c0_i32_0 : i32, i32, i32
  }
  func.func @transform_3(%arg0: i32) -> (i32, i32) {
    %c0_i32 = arith.constant 0 : i32
    %c0_i32_0 = arith.constant 0 : i32
    %c0_i32_1 = arith.constant 0 : i32
    return %c0_i32, %c0_i32_0 : i32, i32
  }
  func.func @transform_4(%arg0: i32) -> (i32, i32) {
    %c0_i32 = arith.constant 0 : i32
    %c0_i32_0 = arith.constant 0 : i32
    return %arg0, %c0_i32 : i32, i32
  }
  func.func @transform_5(%arg0: i32) -> (i32, i32) {
    %c0_i32 = arith.constant 0 : i32
    %c0_i32_0 = arith.constant 0 : i32
    %c0_i32_1 = arith.constant 0 : i32
    return %c0_i32, %c0_i32_0 : i32, i32
  }
  func.func @transform_6(%arg0: i32) -> (i32, i32) {
    %c0_i32 = arith.constant 0 : i32
    %c0_i32_0 = arith.constant 0 : i32
    %c0_i32_1 = arith.constant 0 : i32
    return %c0_i32, %c0_i32_0 : i32, i32
  }
  func.func @transform_7(%arg0: i32) -> (i32, i32, i32) {
    %c0_i32 = arith.constant 0 : i32
    %c0_i32_0 = arith.constant 0 : i32
    %c0_i32_1 = arith.constant 0 : i32
    return %arg0, %c0_i32, %c0_i32_0 : i32, i32, i32
  }
  func.func @transform_8(%arg0: i32) -> (i32, i32) {
    %c0_i32 = arith.constant 0 : i32
    %c0_i32_0 = arith.constant 0 : i32
    %c0_i32_1 = arith.constant 0 : i32
    return %c0_i32, %c0_i32_0 : i32, i32
  }
  func.func @transform_9(%arg0: i32) -> (i32, i32) {
    %c0_i32 = arith.constant 0 : i32
    %c0_i32_0 = arith.constant 0 : i32
    return %arg0, %c0_i32 : i32, i32
  }
  func.func @transform_10(%arg0: i32) -> (i32, i32) {
    %c0_i32 = arith.constant 0 : i32
    %c0_i32_0 = arith.constant 0 : i32
    %c0_i32_1 = arith.constant 0 : i32
    return %c0_i32, %c0_i32_0 : i32, i32
  }
  func.func @transform_11(%arg0: i32) -> (i32, i32) {
    %c0_i32 = arith.constant 0 : i32
    %c0_i32_0 = arith.constant 0 : i32
    %c0_i32_1 = arith.constant 0 : i32
    return %c0_i32, %c0_i32_0 : i32, i32
  }
  func.func @transform_12(%arg0: i32) -> (i32, i32, i32) {
    %c0_i32 = arith.constant 0 : i32
    %c0_i32_0 = arith.constant 0 : i32
    %c0_i32_1 = arith.constant 0 : i32
    return %arg0, %c0_i32, %c0_i32_0 : i32, i32, i32
  }
  func.func @transform_13(%arg0: i32) -> (i32, i32) {
    %c0_i32 = arith.constant 0 : i32
    %c0_i32_0 = arith.constant 0 : i32
    %c0_i32_1 = arith.constant 0 : i32
    return %c0_i32, %c0_i32_0 : i32, i32
  }
  func.func @transform_14(%arg0: i32) -> (i32, i32) {
    %c0_i32 = arith.constant 0 : i32
    %c0_i32_0 = arith.constant 0 : i32
    return %arg0, %c0_i32 : i32, i32
  }
  func.func @transform_15(%arg0: i32) -> (i32, i32) {
    %c0_i32 = arith.constant 0 : i32
    %c0_i32_0 = arith.constant 0 : i32
    return %arg0, %c0_i32 : i32, i32
  }
}

module attributes {stable_mosaic.version = 11 : i64} {
  func.func @kernel(%arg0: i32, %arg1: memref<8x16xf32, #tpu.memory_space<vmem>>, %arg2: memref<8x32xf32, #tpu.memory_space<vmem>>, %arg3: memref<32x32x16xbf16, #tpu.memory_space<vmem>>, %arg4: memref<32x32xf32, #tpu.memory_space<vmem>>, %arg5: memref<32x32xf32, #tpu.memory_space<vmem>>, %arg6: memref<32x32xf32, #tpu.memory_space<vmem>>, %arg7: memref<32x32xf32, #tpu.memory_space<vmem>>, %arg8: memref<32x32x32xbf16, #tpu.memory_space<vmem>>, %arg9: memref<32x32xf32, #tpu.memory_space<vmem>>, %arg10: memref<32x32xf32, #tpu.memory_space<vmem>>, %arg11: memref<32x32xf32, #tpu.memory_space<vmem>>, %arg12: memref<32x2xf32, #tpu.memory_space<vmem>>, %arg13: memref<32x2x32xbf16, #tpu.memory_space<vmem>>, %arg14: memref<2x2xf32, #tpu.memory_space<vmem>>, %arg15: memref<32x2xf32, #tpu.memory_space<vmem>>, %arg16: memref<32x16xf32, #tpu.memory_space<vmem>>) attributes {dimension_semantics = [#tpu.dimension_semantics<parallel>], iteration_bounds = array<i64: 2>, scalar_prefetch = 0 : i64, scratch_operands = 0 : i64, tpu.core_type = #tpu.core_type<tc>, window_params = [{pipeline_mode = #tpu.pipeline_mode<synchronous>, transform_indices = @transform_0, window_bounds = array<i64: 8, 16>}, {pipeline_mode = #tpu.pipeline_mode<synchronous>, transform_indices = @transform_1, window_bounds = array<i64: 8, 32>}, {transform_indices = @transform_2, window_bounds = array<i64: 32, 32, 16>}, {pipeline_mode = #tpu.pipeline_mode<synchronous>, transform_indices = @transform_3, window_bounds = array<i64: 32, 32>}, {transform_indices = @transform_4, window_bounds = array<i64: 32, 32>}, {pipeline_mode = #tpu.pipeline_mode<synchronous>, transform_indices = @transform_5, window_bounds = array<i64: 32, 32>}, {pipeline_mode = #tpu.pipeline_mode<synchronous>, transform_indices = @transform_6, window_bounds = array<i64: 32, 32>}, {transform_indices = @transform_7, window_bounds = array<i64: 32, 32, 32>}, {pipeline_mode = #tpu.pipeline_mode<synchronous>, transform_indices = @transform_8, window_bounds = array<i64: 32, 32>}, {transform_indices = @transform_9, window_bounds = array<i64: 32, 32>}, {pipeline_mode = #tpu.pipeline_mode<synchronous>, transform_indices = @transform_10, window_bounds = array<i64: 32, 32>}, {pipeline_mode = #tpu.pipeline_mode<synchronous>, transform_indices = @transform_11, window_bounds = array<i64: 32, 2>}, {transform_indices = @transform_12, window_bounds = array<i64: 32, 2, 32>}, {pipeline_mode = #tpu.pipeline_mode<synchronous>, transform_indices = @transform_13, window_bounds = array<i64: 2, 2>}, {transform_indices = @transform_14, window_bounds = array<i64: 32, 2>}, {transform_indices = @transform_15, window_bounds = array<i64: 32, 16>}]} {
    %c0 = arith.constant 0 : index
    %c0_0 = arith.constant 0 : index
    %c0_1 = arith.constant 0 : index
    %0 = vector.load %arg3[%c0, %c0_0, %c0_1] : memref<32x32x16xbf16, #tpu.memory_space<vmem>>, vector<32x32x16xbf16>
    %c0_2 = arith.constant 0 : index
    %c0_3 = arith.constant 0 : index
    %1 = vector.load %arg1[%c0_2, %c0_3] : memref<8x16xf32, #tpu.memory_space<vmem>>, vector<8x16xf32>
    %2 = arith.truncf %1 : vector<8x16xf32> to vector<8x16xbf16>
    %3 = vector.shape_cast %2 : vector<8x16xbf16> to vector<1x8x16xbf16>
    %4 = vector.broadcast %3 : vector<1x8x16xbf16> to vector<32x8x16xbf16>
    %c0_4 = arith.constant 0 : index
    %c0_5 = arith.constant 0 : index
    %5 = vector.load %arg2[%c0_4, %c0_5] : memref<8x32xf32, #tpu.memory_space<vmem>>, vector<8x32xf32>
    %6 = vector.shape_cast %5 : vector<8x32xf32> to vector<1x8x32xf32>
    "tpu.trace_start"() <{level = 10 : i32, message = "sbi,soi->sbo"}> : () -> ()
    %cst = arith.constant dense<0.000000e+00> : vector<32x8x32xf32>
    %7 = tpu.matmul %4, %0, %cst {dimension_numbers = #tpu.dot_dimension_numbers<[2], [2], [1], [1], [0, 0, 0, 1, 1, 1], [0], [0]>} : vector<32x8x16xbf16>, vector<32x32x16xbf16>, vector<32x8x32xf32> -> vector<32x8x32xf32>
    "tpu.trace_stop"() : () -> ()
    %8 = vector.shape_cast %7 : vector<32x8x32xf32> to vector<256x32xf32>
    %c0_6 = arith.constant 0 : index
    %c0_7 = arith.constant 0 : index
    %9 = vector.load %arg4[%c0_6, %c0_7] : memref<32x32xf32, #tpu.memory_space<vmem>>, vector<32x32xf32>
    %cst_8 = arith.constant dense<0.000000e+00> : vector<256x32xf32>
    %10 = tpu.matmul %8, %9, %cst_8 {dimension_numbers = #tpu.dot_dimension_numbers<[1], [0], [0], [1], [0, 0, 1, 1], [], []>} : vector<256x32xf32>, vector<32x32xf32>, vector<256x32xf32> -> vector<256x32xf32>
    %11 = vector.shape_cast %10 : vector<256x32xf32> to vector<32x8x32xf32>
    %12 = vector.broadcast %6 : vector<1x8x32xf32> to vector<32x8x32xf32>
    %13 = arith.addf %11, %12 : vector<32x8x32xf32>
    %c0_9 = arith.constant 0 : index
    %c0_10 = arith.constant 0 : index
    %14 = vector.load %arg5[%c0_9, %c0_10] : memref<32x32xf32, #tpu.memory_space<vmem>>, vector<32x32xf32>
    %15 = vector.shape_cast %14 : vector<32x32xf32> to vector<32x1x32xf32>
    %16 = vector.broadcast %15 : vector<32x1x32xf32> to vector<32x8x32xf32>
    %17 = arith.addf %13, %16 : vector<32x8x32xf32>
    %cst_11 = arith.constant 0.000000e+00 : f32
    %18 = vector.broadcast %cst_11 : f32 to vector<32x8x32xf32>
    %19 = arith.maximumf %17, %18 : vector<32x8x32xf32>
    %20 = vector.shape_cast %19 : vector<32x8x32xf32> to vector<256x32xf32>
    %c0_12 = arith.constant 0 : index
    %c0_13 = arith.constant 0 : index
    %c0_14 = arith.constant 0 : index
    %21 = vector.load %arg8[%c0_12, %c0_13, %c0_14] : memref<32x32x32xbf16, #tpu.memory_space<vmem>>, vector<32x32x32xbf16>
    %c0_15 = arith.constant 0 : index
    %c0_16 = arith.constant 0 : index
    %22 = vector.load %arg6[%c0_15, %c0_16] : memref<32x32xf32, #tpu.memory_space<vmem>>, vector<32x32xf32>
    %cst_17 = arith.constant dense<0.000000e+00> : vector<256x32xf32>
    %23 = tpu.matmul %20, %22, %cst_17 {dimension_numbers = #tpu.dot_dimension_numbers<[1], [0], [0], [1], [0, 0, 1, 1], [], []>} : vector<256x32xf32>, vector<32x32xf32>, vector<256x32xf32> -> vector<256x32xf32>
    %c0_18 = arith.constant 0 : index
    %c0_19 = arith.constant 0 : index
    %24 = vector.load %arg7[%c0_18, %c0_19] : memref<32x32xf32, #tpu.memory_space<vmem>>, vector<32x32xf32>
    %cst_20 = arith.constant dense<0.000000e+00> : vector<256x32xf32>
    %25 = tpu.matmul %20, %24, %cst_20 {dimension_numbers = #tpu.dot_dimension_numbers<[1], [0], [0], [1], [0, 0, 1, 1], [], []>} : vector<256x32xf32>, vector<32x32xf32>, vector<256x32xf32> -> vector<256x32xf32>
    %26 = vector.shape_cast %23 : vector<256x32xf32> to vector<32x8x32xf32>
    %27 = arith.truncf %26 : vector<32x8x32xf32> to vector<32x8x32xbf16>
    %28 = vector.shape_cast %25 : vector<256x32xf32> to vector<32x8x32xf32>
    "tpu.trace_start"() <{level = 10 : i32, message = "sbi,soi->sbo"}> : () -> ()
    %cst_21 = arith.constant dense<0.000000e+00> : vector<32x8x32xf32>
    %29 = tpu.matmul %27, %21, %cst_21 {dimension_numbers = #tpu.dot_dimension_numbers<[2], [2], [1], [1], [0, 0, 0, 1, 1, 1], [0], [0]>} : vector<32x8x32xbf16>, vector<32x32x32xbf16>, vector<32x8x32xf32> -> vector<32x8x32xf32>
    "tpu.trace_stop"() : () -> ()
    %30 = vector.shape_cast %29 : vector<32x8x32xf32> to vector<256x32xf32>
    %c0_22 = arith.constant 0 : index
    %c0_23 = arith.constant 0 : index
    %31 = vector.load %arg9[%c0_22, %c0_23] : memref<32x32xf32, #tpu.memory_space<vmem>>, vector<32x32xf32>
    %cst_24 = arith.constant dense<0.000000e+00> : vector<256x32xf32>
    %32 = tpu.matmul %30, %31, %cst_24 {dimension_numbers = #tpu.dot_dimension_numbers<[1], [0], [0], [1], [0, 0, 1, 1], [], []>} : vector<256x32xf32>, vector<32x32xf32>, vector<256x32xf32> -> vector<256x32xf32>
    %33 = vector.shape_cast %32 : vector<256x32xf32> to vector<32x8x32xf32>
    %34 = arith.addf %33, %28 : vector<32x8x32xf32>
    %c0_25 = arith.constant 0 : index
    %c0_26 = arith.constant 0 : index
    %35 = vector.load %arg10[%c0_25, %c0_26] : memref<32x32xf32, #tpu.memory_space<vmem>>, vector<32x32xf32>
    %36 = vector.shape_cast %35 : vector<32x32xf32> to vector<32x1x32xf32>
    %37 = vector.broadcast %36 : vector<32x1x32xf32> to vector<32x8x32xf32>
    %38 = arith.addf %34, %37 : vector<32x8x32xf32>
    %cst_27 = arith.constant 0.000000e+00 : f32
    %39 = vector.broadcast %cst_27 : f32 to vector<32x8x32xf32>
    %40 = arith.maximumf %38, %39 : vector<32x8x32xf32>
    %41 = vector.shape_cast %40 : vector<32x8x32xf32> to vector<256x32xf32>
    %c0_28 = arith.constant 0 : index
    %c0_29 = arith.constant 0 : index
    %c0_30 = arith.constant 0 : index
    %42 = vector.load %arg13[%c0_28, %c0_29, %c0_30] : memref<32x2x32xbf16, #tpu.memory_space<vmem>>, vector<32x2x32xbf16>
    %c0_31 = arith.constant 0 : index
    %c0_32 = arith.constant 0 : index
    %43 = vector.load %arg11[%c0_31, %c0_32] : memref<32x32xf32, #tpu.memory_space<vmem>>, vector<32x32xf32>
    %cst_33 = arith.constant dense<0.000000e+00> : vector<256x32xf32>
    %44 = tpu.matmul %41, %43, %cst_33 {dimension_numbers = #tpu.dot_dimension_numbers<[1], [0], [0], [1], [0, 0, 1, 1], [], []>} : vector<256x32xf32>, vector<32x32xf32>, vector<256x32xf32> -> vector<256x32xf32>
    %c0_34 = arith.constant 0 : index
    %c0_35 = arith.constant 0 : index
    %45 = vector.load %arg12[%c0_34, %c0_35] : memref<32x2xf32, #tpu.memory_space<vmem>>, vector<32x2xf32>
    %cst_36 = arith.constant dense<0.000000e+00> : vector<256x2xf32>
    %46 = tpu.matmul %41, %45, %cst_36 {dimension_numbers = #tpu.dot_dimension_numbers<[1], [0], [0], [1], [0, 0, 1, 1], [], []>} : vector<256x32xf32>, vector<32x2xf32>, vector<256x2xf32> -> vector<256x2xf32>
    %47 = vector.shape_cast %44 : vector<256x32xf32> to vector<32x8x32xf32>
    %48 = arith.truncf %47 : vector<32x8x32xf32> to vector<32x8x32xbf16>
    %49 = vector.shape_cast %46 : vector<256x2xf32> to vector<32x8x2xf32>
    "tpu.trace_start"() <{level = 10 : i32, message = "sbi,soi->sbo"}> : () -> ()
    %cst_37 = arith.constant dense<0.000000e+00> : vector<32x8x2xf32>
    %50 = tpu.matmul %48, %42, %cst_37 {dimension_numbers = #tpu.dot_dimension_numbers<[2], [2], [1], [1], [0, 0, 0, 1, 1, 1], [0], [0]>} : vector<32x8x32xbf16>, vector<32x2x32xbf16>, vector<32x8x2xf32> -> vector<32x8x2xf32>
    "tpu.trace_stop"() : () -> ()
    %51 = vector.shape_cast %50 : vector<32x8x2xf32> to vector<256x2xf32>
    %c0_38 = arith.constant 0 : index
    %c0_39 = arith.constant 0 : index
    %52 = vector.load %arg14[%c0_38, %c0_39] : memref<2x2xf32, #tpu.memory_space<vmem>>, vector<2x2xf32>
    %cst_40 = arith.constant dense<0.000000e+00> : vector<256x2xf32>
    %53 = tpu.matmul %51, %52, %cst_40 {dimension_numbers = #tpu.dot_dimension_numbers<[1], [0], [0], [1], [0, 0, 1, 1], [], []>} : vector<256x2xf32>, vector<2x2xf32>, vector<256x2xf32> -> vector<256x2xf32>
    %54 = vector.shape_cast %53 : vector<256x2xf32> to vector<32x8x2xf32>
    %55 = arith.addf %54, %49 : vector<32x8x2xf32>
    %c0_41 = arith.constant 0 : index
    %c0_42 = arith.constant 0 : index
    %56 = vector.load %arg15[%c0_41, %c0_42] : memref<32x2xf32, #tpu.memory_space<vmem>>, vector<32x2xf32>
    %57 = vector.shape_cast %56 : vector<32x2xf32> to vector<32x1x2xf32>
    %58 = vector.broadcast %57 : vector<32x1x2xf32> to vector<32x8x2xf32>
    %59 = arith.addf %55, %58 : vector<32x8x2xf32>
    %60 = vector.shape_cast %59 : vector<32x8x2xf32> to vector<32x16xf32>
    %c0_43 = arith.constant 0 : index
    %c0_44 = arith.constant 0 : index
    %61 = vector.load %arg16[%c0_43, %c0_44] : memref<32x16xf32, #tpu.memory_space<vmem>>, vector<32x16xf32>
    tpu.vector_store %arg16[%c0_43, %c0_44], %60 {strides = array<i32>} : memref<32x16xf32, #tpu.memory_space<vmem>>, vector<32x16xf32>,
    return
  }
  func.func @transform_0(%arg0: i32) -> (i32, i32) {
    %c0_i32 = arith.constant 0 : i32
    %c0_i32_0 = arith.constant 0 : i32
    %c0_i32_1 = arith.constant 0 : i32
    return %c0_i32, %c0_i32_0 : i32, i32
  }
  func.func @transform_1(%arg0: i32) -> (i32, i32) {
    %c0_i32 = arith.constant 0 : i32
    %c0_i32_0 = arith.constant 0 : i32
    %c0_i32_1 = arith.constant 0 : i32
    return %c0_i32, %c0_i32_0 : i32, i32
  }
  func.func @transform_2(%arg0: i32) -> (i32, i32, i32) {
    %c0_i32 = arith.constant 0 : i32
    %c0_i32_0 = arith.constant 0 : i32
    %c0_i32_1 = arith.constant 0 : i32
    return %arg0, %c0_i32, %c0_i32_0 : i32, i32, i32
  }
  func.func @transform_3(%arg0: i32) -> (i32, i32) {
    %c0_i32 = arith.constant 0 : i32
    %c0_i32_0 = arith.constant 0 : i32
    %c0_i32_1 = arith.constant 0 : i32
    return %c0_i32, %c0_i32_0 : i32, i32
  }
  func.func @transform_4(%arg0: i32) -> (i32, i32) {
    %c0_i32 = arith.constant 0 : i32
    %c0_i32_0 = arith.constant 0 : i32
    return %arg0, %c0_i32 : i32, i32
  }
  func.func @transform_5(%arg0: i32) -> (i32, i32) {
    %c0_i32 = arith.constant 0 : i32
    %c0_i32_0 = arith.constant 0 : i32
    %c0_i32_1 = arith.constant 0 : i32
    return %c0_i32, %c0_i32_0 : i32, i32
  }
  func.func @transform_6(%arg0: i32) -> (i32, i32) {
    %c0_i32 = arith.constant 0 : i32
    %c0_i32_0 = arith.constant 0 : i32
    %c0_i32_1 = arith.constant 0 : i32
    return %c0_i32, %c0_i32_0 : i32, i32
  }
  func.func @transform_7(%arg0: i32) -> (i32, i32, i32) {
    %c0_i32 = arith.constant 0 : i32
    %c0_i32_0 = arith.constant 0 : i32
    %c0_i32_1 = arith.constant 0 : i32
    return %arg0, %c0_i32, %c0_i32_0 : i32, i32, i32
  }
  func.func @transform_8(%arg0: i32) -> (i32, i32) {
    %c0_i32 = arith.constant 0 : i32
    %c0_i32_0 = arith.constant 0 : i32
    %c0_i32_1 = arith.constant 0 : i32
    return %c0_i32, %c0_i32_0 : i32, i32
  }
  func.func @transform_9(%arg0: i32) -> (i32, i32) {
    %c0_i32 = arith.constant 0 : i32
    %c0_i32_0 = arith.constant 0 : i32
    return %arg0, %c0_i32 : i32, i32
  }
  func.func @transform_10(%arg0: i32) -> (i32, i32) {
    %c0_i32 = arith.constant 0 : i32
    %c0_i32_0 = arith.constant 0 : i32
    %c0_i32_1 = arith.constant 0 : i32
    return %c0_i32, %c0_i32_0 : i32, i32
  }
  func.func @transform_11(%arg0: i32) -> (i32, i32) {
    %c0_i32 = arith.constant 0 : i32
    %c0_i32_0 = arith.constant 0 : i32
    %c0_i32_1 = arith.constant 0 : i32
    return %c0_i32, %c0_i32_0 : i32, i32
  }
  func.func @transform_12(%arg0: i32) -> (i32, i32, i32) {
    %c0_i32 = arith.constant 0 : i32
    %c0_i32_0 = arith.constant 0 : i32
    %c0_i32_1 = arith.constant 0 : i32
    return %arg0, %c0_i32, %c0_i32_0 : i32, i32, i32
  }
  func.func @transform_13(%arg0: i32) -> (i32, i32) {
    %c0_i32 = arith.constant 0 : i32
    %c0_i32_0 = arith.constant 0 : i32
    %c0_i32_1 = arith.constant 0 : i32
    return %c0_i32, %c0_i32_0 : i32, i32
  }
  func.func @transform_14(%arg0: i32) -> (i32, i32) {
    %c0_i32 = arith.constant 0 : i32
    %c0_i32_0 = arith.constant 0 : i32
    return %arg0, %c0_i32 : i32, i32
  }
  func.func @transform_15(%arg0: i32) -> (i32, i32) {
    %c0_i32 = arith.constant 0 : i32
    %c0_i32_0 = arith.constant 0 : i32
    return %arg0, %c0_i32 : i32, i32
  }
}

</mosaic_0001>

<bundles_post_ra>
// kernel: tpu_custom_call.1
= control target key start
LH: loop header
LB: loop body
LE: loop exit
PB: predicated region body
PF: predicated region fallthrough
CT: control target
= control target key end

     0   :  { %s7212_s18 = smov 0   ;;  %s8881_s0 = inlined_call_operand.vmem [shape: f32[8,16], index: 0, kind: input, shape index: {}]   ;;  %s8882_s1 = inlined_call_operand.vmem [shape: f32[8,32], index: 1, kind: input, shape index: {}]   ;;  %s8883_s2 = inlined_call_operand.vmem [shape: bf16[64,32,16], index: 2, kind: input, shape index: {}]   ;;  %s8884_s3 = inlined_call_operand.vmem [shape: f32[32,32], index: 3, kind: input, shape index: {}]   ;;  %s8885_s4 = inlined_call_operand.vmem [shape: f32[64,32], index: 4, kind: input, shape index: {}]   ;;  %s8886_s5 = inlined_call_operand.vmem [shape: f32[32,32], index: 5, kind: input, shape index: {}]   ;;  %s8887_s6 = inlined_call_operand.vmem [shape: f32[32,32], index: 6, kind: input, shape index: {}]   ;;  %s8888_s7 = inlined_call_operand.vmem [shape: bf16[64,32,32], index: 7, kind: input, shape index: {}]   ;;  %s8889_s8 = inlined_call_operand.vmem [shape: f32[32,32], index: 8, kind: input, shape index: {}]   ;;  %s8890_s9 = inlined_call_operand.vmem [shape: f32[64,32], index: 9, kind: input, shape index: {}]   ;;  %s8891_s10 = inlined_call_operand.vmem [shape: f32[32,32], index: 10, kind: input, shape index: {}]   ;;  %s8892_s11 = inlined_call_operand.vmem [shape: f32[32,2], index: 11, kind: input, shape index: {}]   ;;  %s8893_s12 = inlined_call_operand.vmem [shape: bf16[64,2,32], index: 12, kind: input, shape index: {}]   ;;  %s8894_s13 = inlined_call_operand.vmem [shape: f32[2,2], index: 13, kind: input, shape index: {}]   ;;  %s8895_s14 = inlined_call_operand.vmem [shape: f32[64,2], index: 14, kind: input, shape index: {}]   ;;  %s8896_s15 = inlined_call_operand.vmem [shape: f32[64,16], index: 15, kind: output, shape index: {}]  }
   0x1 LB: > { %s6101_s19 = sadd.s32 4294967295, %s7121_s18   ;;  %p6105_p0 = scmp.ge.s32.totalorder %s7121_s18, 1  ;;  %s7121_s18 = sphi %s7212_s18, %s25_s18  }
   0x2   : > { %p494_p1 = scmp.lt.s32.totalorder %s7121_s18, 3 }
   0x4   : > { %p495_p2 = pnand %p6105_p0, %p494_p1 }
   0x6   : > { %498 = sbr.rel (%p495_p2) target bundleno = 1704 (0x6a8), region = 80 }
   0xb   : > { %s6106_s20 = sshll.u32 %s6101_s19, 5  ;;  %vm753_vm0 = vcmask 130048   ;;  %v740_v22 = vld [vmem:[%s8881_s0] sm:$0xff]  ;;  %vm1679_vm1 = vcmask 261120   ;;  %s6109_s29 = sshll.u32 %s6101_s19, 2  ;;  %vm5108_vm2 = vcmask 1041408  }
   0xc   : > { %p569_p3 = scmp.lt.s32.totalorder %s6106_s20, 63  ;;  %v7260_v26 = vpack.c.bf16 %v740_v22, %v740_v22  ;;  %p576_p4 = scmp.lt.s32.totalorder %s6109_s29, 7  ;;  %vm5011_vm3 = vcmask 15360   ;;  %vm5390_vm4 = vcmask 1047556   ;;  %vm5954_vm5 = vcmask 31744  }
   0xd   : > { %s7125_s26 = smov 14   ;;  %s7128_s27 = smov 10   ;;  %vm5959_vm6 = vcmask 48128   ;;  %vm5964_vm7 = vcmask 64512   ;;  %vm5969_vm8 = vcmask 80896   ;;  %vm5974_vm9 = vcmask 97280  }
   0xe   : > { %s8900_s20 = smov (!%p569_p3, %s6106_s20), 63  ;;  %s8902_s29 = smov (!%p576_p4, %s6109_s29), 7  ;;  %vm5979_vm10 = vcmask 113664  }
   0xf   : > { %s6956_s21 = sshll.u32 %s8900_s20, 4  ;;  %s7517_s30 = sshll.u32 %s8902_s29, 3 }
  0x10   : > { %s7230_s24 = scalar_lea.vmem %s8883_s2, %s6956_s21  ;;  %s7525_s17 = scalar_lea.vmem %s8885_s4, %s7517_s30 }
  0x11   : > { %v6959_v0 = vld [vmem:[%s7230_s24 + $0x8] sm:$0xff]  ;;  %v6961_v1 = vld [vmem:[%s7230_s24 + $0x18] sm:$0xff]  ;;  %v6958_v7 = vld [vmem:[%s7230_s24] sm:$0xff]  ;;  %s8086_s28 = scalar_lea.vmem %s8890_s9, %s7517_s30  ;;  %s8123_s16 = scalar_lea.vmem %s8893_s12, %s8900_s20 }
  0x12   : > { %v6963_v2 = vld [vmem:[%s7230_s24 + $0x28] sm:$0xff]  ;;  %v761_v3 = vsel %vm753_vm0, %v6959_v0, 0  ;;  %v790_v4 = vsel %vm753_vm0, %v6961_v1, 0  ;;  %v6965_v6 = vld [vmem:[%s7230_s24 + $0x38] sm:$0xff]  ;;  %v6960_v8 = vld [vmem:[%s7230_s24 + $0x10] sm:$0xff]  ;;  %v758_v16 = vsel %vm753_vm0, %v6958_v7, 0  ;;  %s8549_s25 = scalar_lea.vmem %s8895_s14, %s7517_s30 }
  0x13   : > { %v819_v5 = vsel %vm753_vm0, %v6963_v2, 0  ;;  %769 = vmatpush.bf16.xpose.msra.mxu0 %v761_v3  ;;  %798 = vmatpush.bf16.xpose.msra.mxu1 %v790_v4  ;;  %v848_v9 = vsel %vm753_vm0, %v6965_v6, 0  ;;  %v6962_v10 = vld [vmem:[%s7230_s24 + $0x20] sm:$0xff]  ;;  %v6967_v11 = vld [vmem:[%s7230_s24 + $0x48] sm:$0xff]  ;;  %v6964_v12 = vld [vmem:[%s7230_s24 + $0x30] sm:$0xff]  ;;  %v787_v17 = vsel %vm753_vm0, %v6960_v8, 0 }
  0x14   : > { %827 = vmatpush.bf16.xpose.msra.mxu2 %v819_v5  ;;  %856 = vmatpush.bf16.xpose.msra.mxu3 %v848_v9  ;;  %v6969_v13 = vld [vmem:[%s7230_s24 + $0x58] sm:$0xff]  ;;  %v6971_v14 = vld [vmem:[%s7230_s24 + $0x68] sm:$0xff]  ;;  %v816_v18 = vsel %vm753_vm0, %v6962_v10, 0  ;;  %v877_v19 = vsel %vm753_vm0, %v6967_v11, 0  ;;  %v845_v20 = vsel %vm753_vm0, %v6964_v12, 0  ;;  %v6966_v25 = vld [vmem:[%s7230_s24 + $0x40] sm:$0xff] }
  0x15   : > { %v6973_v15 = vld [vmem:[%s7230_s24 + $0x78] sm:$0xff]  ;;  %v906_v21 = vsel %vm753_vm0, %v6969_v13, 0  ;;  %v935_v23 = vsel %vm753_vm0, %v6971_v14, 0  ;;  %v6975_v27 = vld [vmem:[%s7230_s24 + $0x88] sm:$0xff]  ;;  %v6968_v28 = vld [vmem:[%s7230_s24 + $0x50] sm:$0xff]  ;;  %v874_v33 = vsel %vm753_vm0, %v6966_v25, 0 }
  0x16   : > { %v964_v24 = vsel %vm753_vm0, %v6973_v15, 0  ;;  %v6970_v29 = vld [vmem:[%s7230_s24 + $0x60] sm:$0xff]  ;;  %v6977_v30 = vld [vmem:[%s7230_s24 + $0x98] sm:$0xff]  ;;  %v6972_v31 = vld [vmem:[%s7230_s24 + $0x70] sm:$0xff]  ;;  %v993_v34 = vsel %vm753_vm0, %v6975_v27, 0  ;;  %v903_v35 = vsel %vm753_vm0, %v6968_v28, 0 }
  0x17   : > { %v6979_v32 = vld [vmem:[%s7230_s24 + $0xa8] sm:$0xff]  ;;  %v6981_v36 = vld [vmem:[%s7230_s24 + $0xb8] sm:$0xff]  ;;  %v932_v37 = vsel %vm753_vm0, %v6970_v29, 0  ;;  %v1022_v38 = vsel %vm753_vm0, %v6977_v30, 0  ;;  %v961_v39 = vsel %vm753_vm0, %v6972_v31, 0  ;;  %v6974_v42 = vld [vmem:[%s7230_s24 + $0x80] sm:$0xff] }
  0x18   : > { %v1051_v40 = vsel %vm753_vm0, %v6979_v32, 0  ;;  %v1080_v41 = vsel %vm753_vm0, %v6981_v36, 0  ;;  %v6976_v43 = vld [vmem:[%s7230_s24 + $0x90] sm:$0xff]  ;;  %v6978_v44 = vld [vmem:[%s7230_s24 + $0xa0] sm:$0xff]  ;;  %v990_v46 = vsel %vm753_vm0, %v6974_v42, 0  ;;  %v6983_v48 = vld [vmem:[%s7230_s24 + $0xc8] sm:$0xff] }
  0x19   : > { %v6980_v45 = vld [vmem:[%s7230_s24 + $0xb0] sm:$0xff]  ;;  %v1019_v47 = vsel %vm753_vm0, %v6976_v43, 0  ;;  %v1048_v49 = vsel %vm753_vm0, %v6978_v44, 0  ;;  %v6985_v50 = vld [vmem:[%s7230_s24 + $0xd8] sm:$0xff]  ;;  %v6987_v52 = vld [vmem:[%s7230_s24 + $0xe8] sm:$0xff]  ;;  %v1109_v53 = vsel %vm753_vm0, %v6983_v48, 0 }
  0x1a   : > { %v1077_v51 = vsel %vm753_vm0, %v6980_v45, 0  ;;  %v1138_v54 = vsel %vm753_vm0, %v6985_v50, 0  ;;  %v1167_v55 = vsel %vm753_vm0, %v6987_v52, 0  ;;  %v6989_v56 = vld [vmem:[%s7230_s24 + $0xf8] sm:$0xff]  ;;  %v6982_v57 = vld [vmem:[%s7230_s24 + $0xc0] sm:$0xff]  ;;  %v6984_v59 = vld [vmem:[%s7230_s24 + $0xd0] sm:$0xff] }
  0x1b   : > { %770 = vmatpush.bf16.xpose.msra.mxu0 %v758_v16  ;;  %799 = vmatpush.bf16.xpose.msra.mxu1 %v787_v17  ;;  %v1196_v58 = vsel %vm753_vm0, %v6989_v56, 0  ;;  %v6986_v60 = vld [vmem:[%s7230_s24 + $0xe0] sm:$0xff]  ;;  %v6988_v61 = vld [vmem:[%s7230_s24 + $0xf0] sm:$0xff]  ;;  %v1106_v62 = vsel %vm753_vm0, %v6982_v57, 0  ;;  %v1135_v63 = vsel %vm753_vm0, %v6984_v59, 0  ;;  %v6991_v2 = vld [vmem:[%s7230_s24 + $0x108] sm:$0xff] }
  0x1c   : > { %828 = vmatpush.bf16.xpose.msra.mxu2 %v816_v18  ;;  %857 = vmatpush.bf16.xpose.msra.mxu3 %v845_v20  ;;  %v1164_v0 = vsel %vm753_vm0, %v6986_v60, 0  ;;  %v1193_v1 = vsel %vm753_vm0, %v6988_v61, 0  ;;  %v6993_v3 = vld [vmem:[%s7230_s24 + $0x118] sm:$0xff]  ;;  %v6995_v4 = vld [vmem:[%s7230_s24 + $0x128] sm:$0xff]  ;;  %v1225_v5 = vsel %vm753_vm0, %v6991_v2, 0  ;;  %v6990_v9 = vld [vmem:[%s7230_s24 + $0x100] sm:$0xff] }
  0x1d   : > { %v1254_v6 = vsel %vm753_vm0, %v6993_v3, 0  ;;  %v1283_v7 = vsel %vm753_vm0, %v6995_v4, 0  ;;  %v6997_v8 = vld [vmem:[%s7230_s24 + $0x138] sm:$0xff]  ;;  %v6992_v11 = vld [vmem:[%s7230_s24 + $0x110] sm:$0xff]  ;;  %v6994_v12 = vld [vmem:[%s7230_s24 + $0x120] sm:$0xff]  ;;  %v1222_v14 = vsel %vm753_vm0, %v6990_v9, 0 }
  0x1e   : > { %v1312_v10 = vsel %vm753_vm0, %v6997_v8, 0  ;;  %v6996_v13 = vld [vmem:[%s7230_s24 + $0x130] sm:$0xff]  ;;  %v1251_v15 = vsel %vm753_vm0, %v6992_v11, 0  ;;  %v1280_v16 = vsel %vm753_vm0, %v6994_v12, 0  ;;  %v6999_v18 = vld [vmem:[%s7230_s24 + $0x148] sm:$0xff]  ;;  %v6998_v25 = vld [vmem:[%s7230_s24 + $0x140] sm:$0xff] }
  0x1f   : > { %v1309_v17 = vsel %vm753_vm0, %v6996_v13, 0  ;;  %v7003_v20 = vld [vmem:[%s7230_s24 + $0x168] sm:$0xff]  ;;  %v7000_v28 = vld [vmem:[%s7230_s24 + $0x150] sm:$0xff]  ;;  %v7002_v29 = vld [vmem:[%s7230_s24 + $0x160] sm:$0xff]  ;;  %v1338_v31 = vsel %vm753_vm0, %v6998_v25, 0  ;;  %s7130_s29 = smov 12  }
  0x20   : > { %v7004_v30 = vld [vmem:[%s7230_s24 + $0x170] sm:$0xff]  ;;  %v1367_v32 = vsel %vm753_vm0, %v7000_v28, 0  ;;  %v7009_v36 = vld [vmem:[%s7230_s24 + $0x198] sm:$0xff]  ;;  %v7006_v42 = vld [vmem:[%s7230_s24 + $0x180] sm:$0xff]  ;;  %s7131_s19 = smov 4  }
  0x21   : > { %v7008_v44 = vld [vmem:[%s7230_s24 + $0x190] sm:$0xff]  ;;  %v7010_v45 = vld [vmem:[%s7230_s24 + $0x1a0] sm:$0xff]  ;;  %v7405_v56 = vld [vmem:[%s8884_s3 + $0x18] sm:$0xff] }
  0x22   : > { %6129 = vmatmul.msk.bf16.vlgmr.msra.gmra.mxu0 %vm753_vm0, %v7260_v26  ;;  %6138 = vmatmul.msk.bf16.vlgmr.msra.gmra.mxu1 %vm753_vm0, %v7260_v26  ;;  %v1483_v48 = vsel %vm753_vm0, %v7008_v44, 0  ;;  %v7425_v59 = vld [vmem:[%s8884_s3 + $0x8] sm:$0xff]  ;;  %v7431_v60 = vld [vmem:[%s8884_s3] sm:$0xff]  ;;  %v7016_v61 = vld [vmem:[%s7230_s24 + $0x1d0] sm:$0xff] }
  0x23   : > { %885 = vmatpush.bf16.xpose.msrb.mxu0 %v877_v19  ;;  %914 = vmatpush.bf16.xpose.msrb.mxu1 %v906_v21  ;;  %v7001_v19 = vld [vmem:[%s7230_s24 + $0x158] sm:$0xff]  ;;  %v1341_v21 = vsel %vm753_vm0, %v6999_v18, 0  ;;  %v7018_v4 = vld [vmem:[%s7230_s24 + $0x1e0] sm:$0xff]  ;;  %v7020_v25 = vld [vmem:[%s7230_s24 + $0x1f0] sm:$0xff] }
  0x24   : > { %943 = vmatpush.bf16.xpose.msrb.mxu2 %v935_v23  ;;  %972 = vmatpush.bf16.xpose.msrb.mxu3 %v964_v24  ;;  %v1370_v22 = vsel %vm753_vm0, %v7001_v19, 0  ;;  %v1399_v23 = vsel %vm753_vm0, %v7003_v20, 0  ;;  %v7005_v24 = vld [vmem:[%s7230_s24 + $0x178] sm:$0xff]  ;;  %v1628_v8 = vsel %vm753_vm0, %v7018_v4, 0 }
  0x25   : > { %6147 = vmatmul.msk.bf16.vlgmr.msra.gmra.mxu2 %vm753_vm0, %v7260_v26  ;;  %6156 = vmatmul.msk.bf16.vlgmr.msra.gmra.mxu3 %vm753_vm0, %v7260_v26  ;;  %v1428_v27 = vsel %vm753_vm0, %v7005_v24, 0  ;;  %v7021_v18 = vld [vmem:[%s7230_s24 + $0x1f8] sm:$0xff] }
  0x2b   : > { %886 = vmatpush.bf16.xpose.msrb.mxu0 %v874_v33  ;;  %915 = vmatpush.bf16.xpose.msrb.mxu1 %v903_v35  ;;  %v1396_v33 = vsel %vm753_vm0, %v7002_v29, 0  ;;  %v7007_v35 = vld [vmem:[%s7230_s24 + $0x188] sm:$0xff] }
  0x2c   : > { %944 = vmatpush.bf16.xpose.msrb.mxu2 %v932_v37  ;;  %973 = vmatpush.bf16.xpose.msrb.mxu3 %v961_v39  ;;  %v7011_v37 = vld [vmem:[%s7230_s24 + $0x1a8] sm:$0xff]  ;;  %v1486_v39 = vsel %vm753_vm0, %v7009_v36, 0 }
  0x32   : > { %6165 = vmatmul.msk.bf16.vlgmr.msrb.gmra.mxu0 %vm753_vm0, %v7260_v26  ;;  %6174 = vmatmul.msk.bf16.vlgmr.msrb.gmra.mxu1 %vm753_vm0, %v7260_v26 }
  0x33   : > { %1001 = vmatpush.bf16.xpose.msra.mxu0 %v993_v34  ;;  %1030 = vmatpush.bf16.xpose.msra.mxu1 %v1022_v38  ;;  %v1425_v34 = vsel %vm753_vm0, %v7004_v30, 0  ;;  %v1457_v38 = vsel %vm753_vm0, %v7007_v35, 0  ;;  %v1657_v30 = vsel %vm753_vm0, %v7020_v25, 0  ;;  %v2215_v35 = vld [vmem:[%s8886_s5 + $0x10] sm:$0xff] }
  0x34   : > { %1059 = vmatpush.bf16.xpose.msra.mxu2 %v1051_v40  ;;  %1088 = vmatpush.bf16.xpose.msra.mxu3 %v1080_v41  ;;  %v1515_v40 = vsel %vm753_vm0, %v7011_v37, 0  ;;  %v7013_v41 = vld [vmem:[%s7230_s24 + $0x1b8] sm:$0xff] }
  0x35   : > { %6183 = vmatmul.msk.bf16.vlgmr.msrb.gmra.mxu2 %vm753_vm0, %v7260_v26  ;;  %6192 = vmatmul.msk.bf16.vlgmr.msrb.gmra.mxu3 %vm753_vm0, %v7260_v26  ;;  %v1544_v43 = vsel %vm753_vm0, %v7013_v41, 0 }
  0x3b   : > { %1002 = vmatpush.bf16.xpose.msra.mxu0 %v990_v46  ;;  %1031 = vmatpush.bf16.xpose.msra.mxu1 %v1019_v47  ;;  %v7012_v46 = vld [vmem:[%s7230_s24 + $0x1b0] sm:$0xff]  ;;  %v1454_v47 = vsel %vm753_vm0, %v7006_v42, 0 }
  0x3c   : > { %1060 = vmatpush.bf16.xpose.msra.mxu2 %v1048_v49  ;;  %1089 = vmatpush.bf16.xpose.msra.mxu3 %v1077_v51  ;;  %v1512_v49 = vsel %vm753_vm0, %v7010_v45, 0  ;;  %v1541_v50 = vsel %vm753_vm0, %v7012_v46, 0  ;;  %v7015_v51 = vld [vmem:[%s7230_s24 + $0x1c8] sm:$0xff] }
  0x3d   : > { %v1573_v52 = vsel %vm753_vm0, %v7015_v51, 0 }
  0x42   : > { %6201 = vmatmul.msk.bf16.vlgmr.msra.gmra.mxu0 %vm753_vm0, %v7260_v26  ;;  %6210 = vmatmul.msk.bf16.vlgmr.msra.gmra.mxu1 %vm753_vm0, %v7260_v26 }
  0x43   : > { %1117 = vmatpush.bf16.xpose.msrb.mxu0 %v1109_v53  ;;  %1146 = vmatpush.bf16.xpose.msrb.mxu1 %v1138_v54  ;;  %v7014_v53 = vld [vmem:[%s7230_s24 + $0x1c0] sm:$0xff] }
  0x44   : > { %1175 = vmatpush.bf16.xpose.msrb.mxu2 %v1167_v55  ;;  %1204 = vmatpush.bf16.xpose.msrb.mxu3 %v1196_v58  ;;  %v1570_v54 = vsel %vm753_vm0, %v7014_v53, 0  ;;  %v7017_v55 = vld [vmem:[%s7230_s24 + $0x1d8] sm:$0xff]  ;;  %v7415_v58 = vld [vmem:[%s8884_s3 + $0x10] sm:$0xff] }
  0x45   : > { %6219 = vmatmul.msk.bf16.vlgmr.msra.gmra.mxu2 %vm753_vm0, %v7260_v26  ;;  %6228 = vmatmul.msk.bf16.vlgmr.msra.gmra.mxu3 %vm753_vm0, %v7260_v26  ;;  %v1602_v57 = vsel %vm753_vm0, %v7017_v55, 0 }
  0x4b   : > { %1118 = vmatpush.bf16.xpose.msrb.mxu0 %v1106_v62  ;;  %1147 = vmatpush.bf16.xpose.msrb.mxu1 %v1135_v63  ;;  %v1599_v62 = vsel %vm753_vm0, %v7016_v61, 0  ;;  %v7019_v63 = vld [vmem:[%s7230_s24 + $0x1e8] sm:$0xff]  ;;  %s7562_s24 = scalar_lea.vmem %s8888_s7, %s6956_s21  ;;  %s7127_s21 = smov 2  }
  0x4c   : > { %1176 = vmatpush.bf16.xpose.msrb.mxu2 %v1164_v0  ;;  %1205 = vmatpush.bf16.xpose.msrb.mxu3 %v1193_v1  ;;  %v1631_v2 = vsel %vm753_vm0, %v7019_v63, 0  ;;  %v2427_v63 = vld [vmem:[%s8887_s6 + $0x8] sm:$0xff] }
  0x52   : > { %6237 = vmatmul.msk.bf16.vlgmr.msrb.gmra.mxu0 %vm753_vm0, %v7260_v26  ;;  %6246 = vmatmul.msk.bf16.vlgmr.msrb.gmra.mxu1 %vm753_vm0, %v7260_v26 }
  0x53   : > { %1233 = vmatpush.bf16.xpose.msra.mxu0 %v1225_v5  ;;  %1262 = vmatpush.bf16.xpose.msra.mxu1 %v1254_v6 }
  0x54   : > { %1291 = vmatpush.bf16.xpose.msra.mxu2 %v1283_v7  ;;  %1320 = vmatpush.bf16.xpose.msra.mxu3 %v1312_v10 }
  0x55   : > { %6255 = vmatmul.msk.bf16.vlgmr.msrb.gmra.mxu2 %vm753_vm0, %v7260_v26  ;;  %6264 = vmatmul.msk.bf16.vlgmr.msrb.gmra.mxu3 %vm753_vm0, %v7260_v26 }
  0x5b   : > { %1234 = vmatpush.bf16.xpose.msra.mxu0 %v1222_v14  ;;  %1263 = vmatpush.bf16.xpose.msra.mxu1 %v1251_v15 }
  0x5c   : > { %1292 = vmatpush.bf16.xpose.msra.mxu2 %v1280_v16  ;;  %1321 = vmatpush.bf16.xpose.msra.mxu3 %v1309_v17 }
  0x62   : > { %6273 = vmatmul.msk.bf16.vlgmr.msra.gmra.mxu0 %vm753_vm0, %v7260_v26  ;;  %6282 = vmatmul.msk.bf16.vlgmr.msra.gmra.mxu1 %vm753_vm0, %v7260_v26 }
  0x63   : > { %1349 = vmatpush.bf16.xpose.msrb.mxu0 %v1341_v21  ;;  %1378 = vmatpush.bf16.xpose.msrb.mxu1 %v1370_v22  ;;  %v1660_v22 = vsel %vm753_vm0, %v7021_v18, 0 }
  0x64   : > { %1407 = vmatpush.bf16.xpose.msrb.mxu2 %v1399_v23  ;;  %1436 = vmatpush.bf16.xpose.msrb.mxu3 %v1428_v27  ;;  %v2216_v23 = vld [vmem:[%s8886_s5 + $0x18] sm:$0xff] }
  0x65   : > { %6291 = vmatmul.msk.bf16.vlgmr.msra.gmra.mxu2 %vm753_vm0, %v7260_v26  ;;  %6300 = vmatmul.msk.bf16.vlgmr.msra.gmra.mxu3 %vm753_vm0, %v7260_v26 }
  0x6b   : > { %1350 = vmatpush.bf16.xpose.msrb.mxu0 %v1338_v31  ;;  %1379 = vmatpush.bf16.xpose.msrb.mxu1 %v1367_v32 }
  0x6c   : > { %1408 = vmatpush.bf16.xpose.msrb.mxu2 %v1396_v33  ;;  %1437 = vmatpush.bf16.xpose.msrb.mxu3 %v1425_v34 }
  0x72   : > { %6309 = vmatmul.msk.bf16.vlgmr.msrb.gmra.mxu0 %vm753_vm0, %v7260_v26  ;;  %6318 = vmatmul.msk.bf16.vlgmr.msrb.gmra.mxu1 %vm753_vm0, %v7260_v26 }
  0x73   : > { %1465 = vmatpush.bf16.xpose.msra.mxu0 %v1457_v38  ;;  %1494 = vmatpush.bf16.xpose.msra.mxu1 %v1486_v39 }
  0x74   : > { %1523 = vmatpush.bf16.xpose.msra.mxu2 %v1515_v40  ;;  %1552 = vmatpush.bf16.xpose.msra.mxu3 %v1544_v43  ;;  %v2214_v43 = vld [vmem:[%s8886_s5 + $0x8] sm:$0xff] }
  0x75   : > { %6327 = vmatmul.msk.bf16.vlgmr.msrb.gmra.mxu2 %vm753_vm0, %v7260_v26  ;;  %6336 = vmatmul.msk.bf16.vlgmr.msrb.gmra.mxu3 %vm753_vm0, %v7260_v26 }
  0x7b   : > { %1466 = vmatpush.bf16.xpose.msra.mxu0 %v1454_v47  ;;  %1495 = vmatpush.bf16.xpose.msra.mxu1 %v1483_v48 }
  0x7c   : > { %1524 = vmatpush.bf16.xpose.msra.mxu2 %v1512_v49  ;;  %1553 = vmatpush.bf16.xpose.msra.mxu3 %v1541_v50 }
  0x82   : > { %6345 = vmatmul.msk.bf16.vlgmr.msra.gmra.mxu0 %vm753_vm0, %v7260_v26  ;;  %6354 = vmatmul.msk.bf16.vlgmr.msra.gmra.mxu1 %vm753_vm0, %v7260_v26 }
  0x83   : > { %1581 = vmatpush.bf16.xpose.msrb.mxu0 %v1573_v52  ;;  %1610 = vmatpush.bf16.xpose.msrb.mxu1 %v1602_v57  ;;  %v2213_v52 = vld [vmem:[%s8886_s5] sm:$0xff] }
  0x84   : > { %1639 = vmatpush.bf16.xpose.msrb.mxu2 %v1631_v2  ;;  %1668 = vmatpush.bf16.xpose.msrb.mxu3 %v1660_v22 }
  0x85   : > { %6363 = vmatmul.msk.bf16.vlgmr.msra.gmra.mxu2 %vm753_vm0, %v7260_v26  ;;  %6372 = vmatmul.msk.bf16.vlgmr.msra.gmra.mxu3 %vm753_vm0, %v7260_v26 }
  0x8b   : > { %1582 = vmatpush.bf16.xpose.msrb.mxu0 %v1570_v54  ;;  %1611 = vmatpush.bf16.xpose.msrb.mxu1 %v1599_v62  ;;  %v2428_v62 = vld [vmem:[%s8887_s6 + $0x10] sm:$0xff] }
  0x8c   : > { %1640 = vmatpush.bf16.xpose.msrb.mxu2 %v1628_v8  ;;  %1669 = vmatpush.bf16.xpose.msrb.mxu3 %v1657_v30 }
  0x92   : > { %6381 = vmatmul.msk.bf16.vlgmr.msrb.gmra.mxu0 %vm753_vm0, %v7260_v26  ;;  %6390 = vmatmul.msk.bf16.vlgmr.msrb.gmra.mxu1 %vm753_vm0, %v7260_v26 }
  0x93   : > { %1788 = vmatpush.msra.mxu0 %v7405_v56  ;;  %7086 = vmatpush.msra.mxu1 %v7405_v56 }
  0x94   : > { %7087 = vmatpush.msra.mxu2 %v7405_v56  ;;  %7088 = vmatpush.msra.mxu3 %v7405_v56 }
  0x95   : > { %1789 = vmatpush.msra.mxu0 %v7415_v58  ;;  %7089 = vmatpush.msra.mxu1 %v7415_v58 }
  0x96   : > { %7090 = vmatpush.msra.mxu2 %v7415_v58  ;;  %7091 = vmatpush.msra.mxu3 %v7415_v58  ;;  %v2429_v58 = vld [vmem:[%s8887_s6 + $0x18] sm:$0xff] }
  0x97   : > { %1790 = vmatpush.msra.mxu0 %v7425_v59  ;;  %7092 = vmatpush.msra.mxu1 %v7425_v59 }
  0x98   : > { %7093 = vmatpush.msra.mxu2 %v7425_v59  ;;  %7094 = vmatpush.msra.mxu3 %v7425_v59 }
  0x99   : > { %1791 = vmatpush.msra.mxu0 %v7431_v60  ;;  %7095 = vmatpush.msra.mxu1 %v7431_v60 }
  0x9a   : > { %6399 = vmatmul.msk.bf16.vlgmr.msrb.gmra.mxu2 %vm753_vm0, %v7260_v26  ;;  %6408 = vmatmul.msk.bf16.vlgmr.msrb.gmra.mxu3 %vm753_vm0, %v7260_v26 }
  0x9b   : > { %7096 = vmatpush.msra.mxu2 %v7431_v60  ;;  %2325 = vmatpush.msrb.mxu1 %v2216_v23 }
  0x9c   : > { %7097 = vmatpush.msra.mxu3 %v7431_v60 }
  0x9d   : > { %2326 = vmatpush.msrb.mxu1 %v2215_v35  ;;  %2442 = vmatpush.msrb.mxu2 %v2429_v58 }
  0x9f   : > { %v772_v0 = vpop.f32.mrf.mxu0  ;;  %v801_v1 = vpop.f32.mrf.mxu1  ;;  %2327 = vmatpush.msrb.mxu1 %v2214_v43  ;;  %2443 = vmatpush.msrb.mxu2 %v2428_v62 }
  0xa1   : > { %2328 = vmatpush.msrb.mxu1 %v2213_v52  ;;  %2444 = vmatpush.msrb.mxu2 %v2427_v63 }
  0xa2   : > { %6409 = vmatmul.msk.f32.vlgmr.msra.gmra.mxu0 %vm1679_vm1, %v772_v0  ;;  %v2426_v0 = vld [vmem:[%s8887_s6] sm:$0xff] }
  0xa3   : > { %2445 = vmatpush.msrb.mxu2 %v2426_v0 }
  0xa7   : > { %v774_v5 = vpop.f32.mrf.mxu0  ;;  %v803_v6 = vpop.f32.mrf.mxu1 }
  0xa8   : > { %v830_v3 = vpop.f32.mrf.mxu2  ;;  %v859_v7 = vpop.f32.mrf.mxu3 }
  0xaa   : > { %6410 = vmatmul.msk.f32.gmra.mxu0 %vm1679_vm1, %v801_v1 }
  0xaf   : > { %v888_v10 = vpop.f32.mrf.mxu0  ;;  %v917_v11 = vpop.f32.mrf.mxu1 }
  0xb0   : > { %v832_v9 = vpop.f32.mrf.mxu2  ;;  %v861_v12 = vpop.f32.mrf.mxu3 }
  0xb1   : > { %v7533_v12 = vld [vmem:[%s8882_s1] sm:$0xff] }
  0xb2   : > { %6411 = vmatmul.msk.f32.gmra.mxu0 %vm1679_vm1, %v830_v3 }
  0xb7   : > { %v890_v14 = vpop.f32.mrf.mxu0  ;;  %v919_v15 = vpop.f32.mrf.mxu1 }
  0xb8   : > { %v946_v13 = vpop.f32.mrf.mxu2  ;;  %v975_v16 = vpop.f32.mrf.mxu3 }
  0xba   : > { %6412 = vmatmul.msk.f32.gmra.mxu0 %vm1679_vm1, %v859_v7 }
  0xbf   : > { %v1004_v19 = vpop.f32.mrf.mxu0  ;;  %v1033_v20 = vpop.f32.mrf.mxu1 }
  0xc0   : > { %v948_v17 = vpop.f32.mrf.mxu2  ;;  %6417 = vmatmul.msk.f32.vlgmr.msra.gmra.mxu1 %vm1679_vm1, %v1004_v19  ;;  %v977_v21 = vpop.f32.mrf.mxu3 }
  0xc2   : > { %6413 = vmatmul.msk.f32.gmra.mxu0 %vm1679_vm1, %v888_v10 }
  0xc7   : > { %v1006_v27 = vpop.f32.mrf.mxu0  ;;  %v1035_v28 = vpop.f32.mrf.mxu1 }
  0xc8   : > { %v1062_v24 = vpop.f32.mrf.mxu2  ;;  %6418 = vmatmul.msk.f32.gmra.mxu1 %vm1679_vm1, %v1033_v20  ;;  %v1091_v29 = vpop.f32.mrf.mxu3 }
  0xca   : > { %6414 = vmatmul.msk.f32.gmra.mxu0 %vm1679_vm1, %v917_v11  ;;  %v7528_v11 = vld [vmem:[%s7525_s17] sm:$0xff] }
  0xcb   : > { %v1929_v17 = vrot.slane %v7528_v11, 1  ;;  %v1930_v23 = vrot.slane %v7528_v11, 2  ;;  %v1931_v30 = vrot.slane %v7528_v11, 3  ;;  %v1933_v43 = vrot.slane %v7528_v11, 5 }
  0xcc   : > { %v1935_v58 = vrot.slane %v7528_v11, 7 }
  0xcd   : > { %v1958_v19 = vperm.slane %v1929_v17, 0  ;;  %v1959_v25 = vperm.slane %v1930_v23, 0  ;;  %v7022_v17 = vld [vmem:[%s7562_s24] sm:$0xff] }
  0xce   : > { %v1964_v62 = vperm.slane %v1935_v58, 0  ;;  %v7059_v58 = vld [vmem:[%s7562_s24 + $0x128] sm:$0xff] }
  0xcf   : > { %v1120_v32 = vpop.f32.mrf.mxu0  ;;  %v1149_v33 = vpop.f32.mrf.mxu1 }
  0xd0   : > { %v1064_v31 = vpop.f32.mrf.mxu2  ;;  %6419 = vmatmul.msk.f32.gmra.mxu1 %vm1679_vm1, %v1062_v24  ;;  %v1093_v34 = vpop.f32.mrf.mxu3 }
  0xd2   : > { %6415 = vmatmul.msk.f32.gmra.mxu0 %vm1679_vm1, %v946_v13  ;;  %v1957_v13 = vperm.slane %v7528_v11, 0 }
  0xd7   : > { %v1122_v37 = vpop.f32.mrf.mxu0  ;;  %v1151_v38 = vpop.f32.mrf.mxu1 }
  0xd8   : > { %v1178_v36 = vpop.f32.mrf.mxu2  ;;  %6420 = vmatmul.msk.f32.gmra.mxu1 %vm1679_vm1, %v1091_v29  ;;  %v1207_v39 = vpop.f32.mrf.mxu3  ;;  %v1932_v37 = vrot.slane %v7528_v11, 4 }
  0xda   : > { %6416 = vmatmul.msk.f32.gmra.mxu0 %vm1679_vm1, %v975_v16 }
  0xdf   : > { %v1236_v41 = vpop.f32.mrf.mxu0  ;;  %v1265_v26 = vpop.f32.mrf.mxu1 }
  0xe0   : > { %v1180_v40 = vpop.f32.mrf.mxu2  ;;  %6421 = vmatmul.msk.f32.gmra.mxu1 %vm1679_vm1, %v1120_v32  ;;  %6425 = vmatmul.msk.f32.vlgmr.msra.gmra.mxu2 %vm1679_vm1, %v1236_v41  ;;  %v1209_v42 = vpop.f32.mrf.mxu3 }
  0xe1   : > { %v1961_v40 = vperm.slane %v1932_v37, 0 }
  0xe7   : > { %v1238_v45 = vpop.f32.mrf.mxu0  ;;  %v1267_v46 = vpop.f32.mrf.mxu1 }
  0xe8   : > { %v1294_v44 = vpop.f32.mrf.mxu2  ;;  %6426 = vmatmul.msk.f32.gmra.mxu2 %vm1679_vm1, %v1265_v26  ;;  %v1323_v47 = vpop.f32.mrf.mxu3  ;;  %6422 = vmatmul.msk.f32.gmra.mxu1 %vm1679_vm1, %v1149_v33  ;;  %v1960_v33 = vperm.slane %v1931_v30, 0  ;;  %v1962_v45 = vperm.slane %v1933_v43, 0 }
  0xef   : > { %v1352_v49 = vpop.f32.mrf.mxu0  ;;  %v1381_v50 = vpop.f32.mrf.mxu1 }
  0xf0   : > { %v1296_v48 = vpop.f32.mrf.mxu2  ;;  %6427 = vmatmul.msk.f32.gmra.mxu2 %vm1679_vm1, %v1294_v44  ;;  %v1325_v51 = vpop.f32.mrf.mxu3  ;;  %6423 = vmatmul.msk.f32.gmra.mxu1 %vm1679_vm1, %v1178_v36 }
  0xf1   : > { %v7023_v48 = vld [vmem:[%s7562_s24 + $0x8] sm:$0xff] }
  0xf2   : > { %v2592_v51 = vsel %vm1679_vm1, %v7023_v48, 0 }
  0xf3   : > { %2600 = vmatpush.bf16.xpose.msrb.mxu3 %v2592_v51 }
  0xf7   : > { %v1354_v54 = vpop.f32.mrf.mxu0  ;;  %v1383_v55 = vpop.f32.mrf.mxu1 }
  0xf8   : > { %v1410_v53 = vpop.f32.mrf.mxu2  ;;  %6428 = vmatmul.msk.f32.gmra.mxu2 %vm1679_vm1, %v1323_v47  ;;  %v1439_v56 = vpop.f32.mrf.mxu3  ;;  %6424 = vmatmul.msk.f32.gmra.mxu1 %vm1679_vm1, %v1207_v39 }
  0xff   : > { %v1468_v59 = vpop.f32.mrf.mxu0  ;;  %v1497_v60 = vpop.f32.mrf.mxu1 }
 0x100   : > { %v1412_v57 = vpop.f32.mrf.mxu2  ;;  %6429 = vmatmul.msk.f32.gmra.mxu2 %vm1679_vm1, %v1352_v49  ;;  %6433 = vmatmul.msk.f32.vlgmr.msra.gmra.mxu3 %vm1679_vm1, %v1468_v59  ;;  %v1441_v61 = vpop.f32.mrf.mxu3 }
 0x107   : > { %v1470_v2 = vpop.f32.mrf.mxu0  ;;  %v1499_v3 = vpop.f32.mrf.mxu1 }
 0x108   : > { %v1526_v1 = vpop.f32.mrf.mxu2  ;;  %6434 = vmatmul.msk.f32.gmra.mxu3 %vm1679_vm1, %v1497_v60  ;;  %6430 = vmatmul.msk.f32.gmra.mxu2 %vm1679_vm1, %v1381_v50  ;;  %v1555_v4 = vpop.f32.mrf.mxu3  ;;  %v1934_v50 = vrot.slane %v7528_v11, 6 }
 0x10a   : > { %v1963_v54 = vperm.slane %v1934_v50, 0 }
 0x10f   : > { %v1584_v6 = vpop.f32.mrf.mxu0  ;;  %v1613_v7 = vpop.f32.mrf.mxu1 }
 0x110   : > { %v1528_v5 = vpop.f32.mrf.mxu2  ;;  %6435 = vmatmul.msk.f32.gmra.mxu3 %vm1679_vm1, %v1526_v1  ;;  %6431 = vmatmul.msk.f32.gmra.mxu2 %vm1679_vm1, %v1410_v53  ;;  %v1557_v8 = vpop.f32.mrf.mxu3  ;;  %v7579_v1 = vld [vmem:[%s7525_s17 + $0x8] sm:$0xff] }
 0x111   : > { %v1965_v5 = vperm.slane %v7579_v1, 0 }
 0x117   : > { %v1586_v9 = vpop.f32.mrf.mxu0  ;;  %v1615_v10 = vpop.f32.mrf.mxu1 }
 0x118   : > { %6436 = vmatmul.msk.f32.gmra.mxu3 %vm1679_vm1, %v1555_v4  ;;  %6432 = vmatmul.msk.f32.gmra.mxu2 %vm1679_vm1, %v1439_v56 }
 0x11d   : > { %v1642_v31 = vpop.f32.mrf.mxu2  ;;  %v1671_v59 = vpop.f32.mrf.mxu3 }
 0x11f   : > { %v1793_v14 = vpop.f32.mrf.mxu0 }
 0x120   : > { %v1889_v15 = vadd.f32 %v1793_v14, %v7533_v12  ;;  %6437 = vmatmul.msk.f32.gmra.mxu3 %vm1679_vm1, %v1584_v6 }
 0x122   : > { %v2021_v16 = vadd.f32 %v1957_v13, %v1889_v15 }
 0x124   : > { %v2053_v18 = vmax.f32 %v2021_v16, 0.0  ;;  %v1937_v16 = vrot.slane %v7579_v1, 2 }
 0x125   : > { %v1644_v38 = vpop.f32.mrf.mxu2  ;;  %v1673_v3 = vpop.f32.mrf.mxu3 }
 0x126   : > { %6441 = vmatmul.msk.f32.vlgmr.msrb.gmra.mxu1 %vm1679_vm1, %v2053_v18  ;;  %6473 = vmatmul.msk.f32.vlgmr.msrb.gmra.mxu2 %vm1679_vm1, %v2053_v18  ;;  %v7638_v3 = vld [vmem:[%s7525_s17 + $0x10] sm:$0xff] }
 0x127   : > { %v1796_v20 = vpop.f32.mrf.mxu0 }
 0x128   : > { %v1890_v21 = vadd.f32 %v1796_v20, %v7533_v12  ;;  %6438 = vmatmul.msk.f32.gmra.mxu3 %vm1679_vm1, %v1613_v7  ;;  %v1936_v7 = vrot.slane %v7579_v1, 1 }
 0x12a   : > { %v2022_v22 = vadd.f32 %v1958_v19, %v1890_v21  ;;  %v1966_v11 = vperm.slane %v1936_v7, 0  ;;  %v1967_v21 = vperm.slane %v1937_v16, 0 }
 0x12c   : > { %v2054_v24 = vmax.f32 %v2022_v22, 0.0  ;;  %v2589_v22 = vsel %vm1679_vm1, %v7022_v17, 0 }
 0x12d   : > { %2601 = vmatpush.bf16.xpose.msrb.mxu3 %v2589_v22 }
 0x12e   : > { %6442 = vmatmul.msk.f32.gmra.mxu1 %vm1679_vm1, %v2054_v24  ;;  %6474 = vmatmul.msk.f32.gmra.mxu2 %vm1679_vm1, %v2054_v24 }
 0x12f   : > { %v1799_v27 = vpop.f32.mrf.mxu0 }
 0x130   : > { %v1891_v28 = vadd.f32 %v1799_v27, %v7533_v12  ;;  %6439 = vmatmul.msk.f32.gmra.mxu3 %vm1679_vm1, %v1642_v31 }
 0x132   : > { %v2023_v29 = vadd.f32 %v1959_v25, %v1891_v28  ;;  %v1938_v25 = vrot.slane %v7579_v1, 3 }
 0x134   : > { %v2055_v32 = vmax.f32 %v2023_v29, 0.0  ;;  %v1968_v29 = vperm.slane %v1938_v25, 0 }
 0x136   : > { %6443 = vmatmul.msk.f32.gmra.mxu1 %vm1679_vm1, %v2055_v32  ;;  %6475 = vmatmul.msk.f32.gmra.mxu2 %vm1679_vm1, %v2055_v32 }
 0x137   : > { %v1802_v34 = vpop.f32.mrf.mxu0 }
 0x138   : > { %v1892_v35 = vadd.f32 %v1802_v34, %v7533_v12  ;;  %6440 = vmatmul.msk.f32.gmra.mxu3 %vm1679_vm1, %v1671_v59 }
 0x13a   : > { %v2024_v36 = vadd.f32 %v1960_v33, %v1892_v35  ;;  %v1939_v33 = vrot.slane %v7579_v1, 4 }
 0x13c   : > { %v2056_v39 = vmax.f32 %v2024_v36, 0.0  ;;  %v1969_v38 = vperm.slane %v1939_v33, 0 }
 0x13d   : > { %v1817_v52 = vpop.f32.mrf.mxu1 }
 0x13e   : > { %6444 = vmatmul.msk.f32.gmra.mxu1 %vm1679_vm1, %v2056_v39  ;;  %6476 = vmatmul.msk.f32.gmra.mxu2 %vm1679_vm1, %v2056_v39  ;;  %v1897_v4 = vadd.f32 %v1817_v52, %v7533_v12  ;;  %v1940_v39 = vrot.slane %v7579_v1, 5 }
 0x13f   : > { %v1805_v41 = vpop.f32.mrf.mxu0 }
 0x140   : > { %v1893_v26 = vadd.f32 %v1805_v41, %v7533_v12  ;;  %v2029_v9 = vadd.f32 %v1965_v5, %v1897_v4 }
 0x142   : > { %v2025_v42 = vadd.f32 %v1961_v40, %v1893_v26  ;;  %v2061_v14 = vmax.f32 %v2029_v9, 0.0  ;;  %v1970_v26 = vperm.slane %v1940_v39, 0  ;;  %v1943_v9 = vrot.slane %v7638_v3, 1 }
 0x144   : > { %v2057_v44 = vmax.f32 %v2025_v42, 0.0  ;;  %v1974_v16 = vperm.slane %v1943_v9, 0 }
 0x145   : > { %v1820_v61 = vpop.f32.mrf.mxu1 }
 0x146   : > { %6445 = vmatmul.msk.f32.gmra.mxu1 %vm1679_vm1, %v2057_v44  ;;  %6477 = vmatmul.msk.f32.gmra.mxu2 %vm1679_vm1, %v2057_v44  ;;  %v1898_v10 = vadd.f32 %v1820_v61, %v7533_v12  ;;  %v3168_v61 = vsel %vm1679_vm1, %v7059_v58, 0 }
 0x147   : > { %v1808_v46 = vpop.f32.mrf.mxu0  ;;  %3176 = vmatpush.bf16.xpose.msra.mxu2 %v3168_v61 }
 0x148   : > { %v1894_v47 = vadd.f32 %v1808_v46, %v7533_v12  ;;  %v2030_v15 = vadd.f32 %v1966_v11, %v1898_v10  ;;  %v7027_v10 = vld [vmem:[%s7562_s24 + $0x28] sm:$0xff] }
 0x149   : > { %v2656_v17 = vsel %vm1679_vm1, %v7027_v10, 0 }
 0x14a   : > { %v2026_v49 = vadd.f32 %v1962_v45, %v1894_v47  ;;  %v2062_v19 = vmax.f32 %v2030_v15, 0.0  ;;  %v7025_v45 = vld [vmem:[%s7562_s24 + $0x18] sm:$0xff]  ;;  %v1941_v47 = vrot.slane %v7579_v1, 6 }
 0x14b   : > { %v2624_v48 = vsel %vm1679_vm1, %v7025_v45, 0 }
 0x14c   : > { %v2058_v53 = vmax.f32 %v2026_v49, 0.0  ;;  %2632 = vmatpush.bf16.xpose.msra.mxu3 %v2624_v48  ;;  %v1971_v51 = vperm.slane %v1941_v47, 0  ;;  %v1947_v48 = vrot.slane %v7638_v3, 5 }
 0x14d   : > { %v1823_v8 = vpop.f32.mrf.mxu1 }
 0x14e   : > { %6446 = vmatmul.msk.f32.gmra.mxu1 %vm1679_vm1, %v2058_v53  ;;  %6478 = vmatmul.msk.f32.gmra.mxu2 %vm1679_vm1, %v2058_v53  ;;  %v1899_v20 = vadd.f32 %v1823_v8, %v7533_v12  ;;  %v7057_v53 = vld [vmem:[%s7562_s24 + $0x118] sm:$0xff] }
 0x14f   : > { %v1811_v55 = vpop.f32.mrf.mxu0 }
 0x150   : > { %v1895_v56 = vadd.f32 %v1811_v55, %v7533_v12  ;;  %v2031_v24 = vadd.f32 %v1967_v21, %v1899_v20  ;;  %v7026_v21 = vld [vmem:[%s7562_s24 + $0x20] sm:$0xff] }
 0x152   : > { %v2027_v57 = vadd.f32 %v1963_v54, %v1895_v56  ;;  %v2063_v27 = vmax.f32 %v2031_v24, 0.0  ;;  %v7024_v54 = vld [vmem:[%s7562_s24 + $0x10] sm:$0xff]  ;;  %v1942_v56 = vrot.slane %v7579_v1, 7 }
 0x154   : > { %v2059_v60 = vmax.f32 %v2027_v57, 0.0  ;;  %v3136_v57 = vsel %vm1679_vm1, %v7057_v53, 0 }
 0x155   : > { %v1826_v18 = vpop.f32.mrf.mxu1  ;;  %3144 = vmatpush.bf16.xpose.msra.mxu1 %v3136_v57  ;;  %v1948_v57 = vrot.slane %v7638_v3, 6 }
 0x156   : > { %6447 = vmatmul.msk.f32.gmra.mxu1 %vm1679_vm1, %v2059_v60  ;;  %6479 = vmatmul.msk.f32.gmra.mxu2 %vm1679_vm1, %v2059_v60  ;;  %v1900_v28 = vadd.f32 %v1826_v18, %v7533_v12  ;;  %v2621_v60 = vsel %vm1679_vm1, %v7024_v54, 0  ;;  %v1944_v18 = vrot.slane %v7638_v3, 2  ;;  %v1978_v54 = vperm.slane %v1947_v48, 0 }
 0x157   : > { %v1814_v63 = vpop.f32.mrf.mxu0  ;;  %2633 = vmatpush.bf16.xpose.msra.mxu3 %v2621_v60  ;;  %v7030_v60 = vld [vmem:[%s7562_s24 + $0x40] sm:$0xff]  ;;  %v1979_v61 = vperm.slane %v1948_v57, 0 }
 0x158   : > { %v1896_v0 = vadd.f32 %v1814_v63, %v7533_v12  ;;  %v2032_v32 = vadd.f32 %v1968_v29, %v1900_v28  ;;  %v1945_v29 = vrot.slane %v7638_v3, 3 }
 0x15a   : > { %v2028_v2 = vadd.f32 %v1964_v62, %v1896_v0  ;;  %v2064_v34 = vmax.f32 %v2032_v32, 0.0  ;;  %v1972_v0 = vperm.slane %v1942_v56, 0  ;;  %v7029_v32 = vld [vmem:[%s7562_s24 + $0x38] sm:$0xff] }
 0x15c   : > { %v2060_v6 = vmax.f32 %v2028_v2, 0.0 }
 0x15d   : > { %v1829_v30 = vpop.f32.mrf.mxu1 }
 0x15e   : > { %6448 = vmatmul.msk.f32.gmra.mxu1 %vm1679_vm1, %v2060_v6  ;;  %6480 = vmatmul.msk.f32.gmra.mxu2 %vm1679_vm1, %v2060_v6  ;;  %v1901_v37 = vadd.f32 %v1829_v30, %v7533_v12  ;;  %v1973_v6 = vperm.slane %v7638_v3, 0 }
 0x160   : > { %v2033_v40 = vadd.f32 %v1969_v38, %v1901_v37  ;;  %v2688_v38 = vsel %vm1679_vm1, %v7029_v32, 0 }
 0x162   : > { %v2065_v43 = vmax.f32 %v2033_v40, 0.0  ;;  %v1946_v40 = vrot.slane %v7638_v3, 4 }
 0x163   : > { %v7587_v13 = vpop.f32.mrf.mxu2 }
 0x164   : > { %v1905_v5 = vadd.f32 %v7587_v13, %v7533_v12  ;;  %v1977_v45 = vperm.slane %v1946_v40, 0 }
 0x165   : > { %v1832_v36 = vpop.f32.mrf.mxu1 }
 0x166   : > { %6449 = vmatmul.msk.f32.gmra.mxu1 %vm1679_vm1, %v2061_v14  ;;  %6481 = vmatmul.msk.f32.gmra.mxu2 %vm1679_vm1, %v2061_v14  ;;  %v1902_v41 = vadd.f32 %v1832_v36, %v7533_v12  ;;  %v2037_v8 = vadd.f32 %v1973_v6, %v1905_v5 }
 0x168   : > { %v2034_v46 = vadd.f32 %v1970_v26, %v1902_v41  ;;  %v2069_v14 = vmax.f32 %v2037_v8, 0.0  ;;  %v7028_v26 = vld [vmem:[%s7562_s24 + $0x30] sm:$0xff] }
 0x16a   : > { %v2066_v49 = vmax.f32 %v2034_v46, 0.0  ;;  %v2685_v46 = vsel %vm1679_vm1, %v7028_v26, 0  ;;  %v7034_v26 = vld [vmem:[%s7562_s24 + $0x60] sm:$0xff] }
 0x16b   : > { %v7595_v23 = vpop.f32.mrf.mxu2 }
 0x16c   : > { %v1906_v15 = vadd.f32 %v7595_v23, %v7533_v12  ;;  %v1975_v23 = vperm.slane %v1944_v18, 0 }
 0x16d   : > { %v1835_v44 = vpop.f32.mrf.mxu1 }
 0x16e   : > { %6450 = vmatmul.msk.f32.gmra.mxu1 %vm1679_vm1, %v2062_v19  ;;  %6482 = vmatmul.msk.f32.gmra.mxu2 %vm1679_vm1, %v2062_v19  ;;  %v1903_v50 = vadd.f32 %v1835_v44, %v7533_v12  ;;  %v2038_v19 = vadd.f32 %v1974_v16, %v1906_v15  ;;  %v7719_v16 = vld [vmem:[%s7525_s17 + $0x18] sm:$0xff]  ;;  %s8770_s17 = scalar_lea.vmem %s8896_s15, %s7517_s30 }
 0x170   : > { %v2035_v55 = vadd.f32 %v1971_v51, %v1903_v50  ;;  %v2070_v25 = vmax.f32 %v2038_v19, 0.0  ;;  %v7031_v50 = vld [vmem:[%s7562_s24 + $0x48] sm:$0xff] }
 0x171   : > { %v2720_v56 = vsel %vm1679_vm1, %v7031_v50, 0  ;;  %v1952_v50 = vrot.slane %v7719_v16, 3 }
 0x172   : > { %v2067_v62 = vmax.f32 %v2035_v55, 0.0 }
 0x173   : > { %v7601_v31 = vpop.f32.mrf.mxu2 }
 0x174   : > { %v1907_v22 = vadd.f32 %v7601_v31, %v7533_v12 }
 0x175   : > { %v1838_v59 = vpop.f32.mrf.mxu1 }
 0x176   : > { %6451 = vmatmul.msk.f32.gmra.mxu1 %vm1679_vm1, %v2063_v27  ;;  %6483 = vmatmul.msk.f32.gmra.mxu2 %vm1679_vm1, %v2063_v27  ;;  %v1904_v63 = vadd.f32 %v1838_v59, %v7533_v12  ;;  %v2653_v27 = vsel %vm1679_vm1, %v7026_v21, 0  ;;  %v2039_v28 = vadd.f32 %v1975_v23, %v1907_v22  ;;  %v1981_v22 = vperm.slane %v7719_v16, 0 }
 0x178   : > { %v2036_v1 = vadd.f32 %v1972_v0, %v1904_v63  ;;  %v2071_v33 = vmax.f32 %v2039_v28, 0.0  ;;  %v2717_v0 = vsel %vm1679_vm1, %v7030_v60, 0  ;;  %v7035_v28 = vld [vmem:[%s7562_s24 + $0x68] sm:$0xff] }
 0x179   : > { %v7055_v60 = vld [vmem:[%s7562_s24 + $0x108] sm:$0xff] }
 0x17a   : > { %v2068_v4 = vmax.f32 %v2036_v1, 0.0 }
 0x17b   : > { %v7606_v35 = vpop.f32.mrf.mxu2 }
 0x17c   : > { %v1908_v31 = vadd.f32 %v7606_v35, %v7533_v12 }
 0x17e   : > { %6452 = vmatmul.msk.f32.gmra.mxu1 %vm1679_vm1, %v2064_v34  ;;  %6484 = vmatmul.msk.f32.gmra.mxu2 %vm1679_vm1, %v2064_v34  ;;  %v1976_v34 = vperm.slane %v1945_v29, 0 }
 0x180   : > { %v2040_v39 = vadd.f32 %v1976_v34, %v1908_v31 }
 0x182   : > { %v2072_v35 = vmax.f32 %v2040_v39, 0.0 }
 0x183   : > { %v7613_v42 = vpop.f32.mrf.mxu2  ;;  %v1865_v5 = vpop.f32.mrf.mxu3 }
 0x184   : > { %v1909_v44 = vadd.f32 %v7613_v42, %v7533_v12  ;;  %v1913_v21 = vadd.f32 %v1865_v5, %v7533_v12 }
 0x186   : > { %6453 = vmatmul.msk.f32.gmra.mxu1 %vm1679_vm1, %v2065_v43  ;;  %6485 = vmatmul.msk.f32.gmra.mxu2 %vm1679_vm1, %v2065_v43  ;;  %v2041_v47 = vadd.f32 %v1977_v45, %v1909_v44 }
 0x188   : > { %v2073_v53 = vmax.f32 %v2041_v47, 0.0  ;;  %v2781_v47 = vsel %vm1679_vm1, %v7034_v26, 0 }
 0x18b   : > { %v7621_v52 = vpop.f32.mrf.mxu2 }
 0x18c   : > { %v1910_v42 = vadd.f32 %v7621_v52, %v7533_v12 }
 0x18e   : > { %6454 = vmatmul.msk.f32.gmra.mxu1 %vm1679_vm1, %v2066_v49  ;;  %6486 = vmatmul.msk.f32.gmra.mxu2 %vm1679_vm1, %v2066_v49  ;;  %v2042_v58 = vadd.f32 %v1978_v54, %v1910_v42 }
 0x190   : > { %v2074_v63 = vmax.f32 %v2042_v58, 0.0 }
 0x193   : > { %v7633_v2 = vpop.f32.mrf.mxu2 }
 0x194   : > { %v1911_v52 = vadd.f32 %v7633_v2, %v7533_v12  ;;  %v7033_v2 = vld [vmem:[%s7562_s24 + $0x58] sm:$0xff] }
 0x196   : > { %6455 = vmatmul.msk.f32.gmra.mxu1 %vm1679_vm1, %v2067_v62  ;;  %6487 = vmatmul.msk.f32.gmra.mxu2 %vm1679_vm1, %v2067_v62  ;;  %v2043_v1 = vadd.f32 %v1979_v61, %v1911_v52 }
 0x198   : > { %v2075_v8 = vmax.f32 %v2043_v1, 0.0 }
 0x19b   : > { %v7645_v7 = vpop.f32.mrf.mxu2 }
 0x19c   : > { %v1912_v9 = vadd.f32 %v7645_v7, %v7533_v12  ;;  %v7032_v7 = vld [vmem:[%s7562_s24 + $0x50] sm:$0xff] }
 0x19d   : > { %v2749_v23 = vsel %vm1679_vm1, %v7032_v7, 0 }
 0x19e   : > { %6456 = vmatmul.msk.f32.gmra.mxu1 %vm1679_vm1, %v2068_v4  ;;  %6488 = vmatmul.msk.f32.gmra.mxu2 %vm1679_vm1, %v2068_v4  ;;  %v1949_v4 = vrot.slane %v7638_v3, 7  ;;  %v2752_v3 = vsel %vm1679_vm1, %v7033_v2, 0 }
 0x1a0   : > { %v1980_v10 = vperm.slane %v1949_v4, 0 }
 0x1a2   : > { %v2044_v15 = vadd.f32 %v1980_v10, %v1912_v9  ;;  %v7054_v9 = vld [vmem:[%s7562_s24 + $0x100] sm:$0xff] }
 0x1a3   : > { %v2330_v11 = vpop.f32.mrf.mxu1 }
 0x1a4   : > { %v2543_v13 = vpack.c.bf16 %v2330_v11, %v2330_v11  ;;  %v2076_v18 = vmax.f32 %v2044_v15, 0.0 }
 0x1a6   : > { %6457 = vmatmul.msk.f32.gmra.mxu1 %vm1679_vm1, %v2069_v14  ;;  %6489 = vmatmul.msk.f32.gmra.mxu2 %vm1679_vm1, %v2069_v14 }
 0x1a7   : > { %6513 = vmatmul.msk.bf16.vlgmr.msrb.gmra.mxu3 %vm1679_vm1, %v2543_v13  ;;  %v1868_v13 = vpop.f32.mrf.mxu3 }
 0x1a8   : > { %2664 = vmatpush.bf16.xpose.msrb.mxu3 %v2656_v17  ;;  %v1914_v31 = vadd.f32 %v1868_v13, %v7533_v12  ;;  %v1954_v13 = vrot.slane %v7719_v16, 5 }
 0x1a9   : > { %v7656_v20 = vpop.f32.mrf.mxu2 }
 0x1ab   : > { %v2333_v24 = vpop.f32.mrf.mxu1 }
 0x1ac   : > { %v2544_v37 = vpack.c.bf16 %v2333_v24, %v2333_v24  ;;  %v2045_v24 = vadd.f32 %v1981_v22, %v1913_v21 }
 0x1ae   : > { %6458 = vmatmul.msk.f32.gmra.mxu1 %vm1679_vm1, %v2070_v25  ;;  %6490 = vmatmul.msk.f32.gmra.mxu2 %vm1679_vm1, %v2070_v25  ;;  %v1950_v25 = vrot.slane %v7719_v16, 1 }
 0x1af   : > { %v1871_v29 = vpop.f32.mrf.mxu3 }
 0x1b0   : > { %2665 = vmatpush.bf16.xpose.msrb.mxu3 %v2653_v27  ;;  %v1982_v34 = vperm.slane %v1950_v25, 0 }
 0x1b1   : > { %v7665_v30 = vpop.f32.mrf.mxu2 }
 0x1b2   : > { %v2046_v39 = vadd.f32 %v1982_v34, %v1914_v31 }
 0x1b3   : > { %v2336_v36 = vpop.f32.mrf.mxu1 }
 0x1b4   : > { %v2545_v55 = vpack.c.bf16 %v2336_v36, %v2336_v36  ;;  %v2078_v45 = vmax.f32 %v2046_v39, 0.0 }
 0x1b6   : > { %6459 = vmatmul.msk.f32.gmra.mxu1 %vm1679_vm1, %v2071_v33  ;;  %6491 = vmatmul.msk.f32.gmra.mxu2 %vm1679_vm1, %v2071_v33  ;;  %v2077_v33 = vmax.f32 %v2045_v24, 0.0  ;;  %v1986_v24 = vperm.slane %v1954_v13, 0 }
 0x1b7   : > { %6522 = vmatmul.msk.bf16.vlgmr.msra.gmra.mxu3 %vm1679_vm1, %v2544_v37  ;;  %v2784_v37 = vsel %vm1679_vm1, %v7035_v28, 0 }
 0x1b8   : > { %2696 = vmatpush.bf16.xpose.msra.mxu3 %v2688_v38  ;;  %v1951_v38 = vrot.slane %v7719_v16, 2 }
 0x1b9   : > { %v7675_v41 = vpop.f32.mrf.mxu2 }
 0x1bb   : > { %v2339_v43 = vpop.f32.mrf.mxu1 }
 0x1bc   : > { %v2546_v14 = vpack.c.bf16 %v2339_v43, %v2339_v43  ;;  %v1983_v43 = vperm.slane %v1951_v38, 0 }
 0x1be   : > { %6460 = vmatmul.msk.f32.gmra.mxu1 %vm1679_vm1, %v2072_v35  ;;  %6492 = vmatmul.msk.f32.gmra.mxu2 %vm1679_vm1, %v2072_v35  ;;  %v1915_v35 = vadd.f32 %v1871_v29, %v7533_v12  ;;  %v7056_v29 = vld [vmem:[%s7562_s24 + $0x110] sm:$0xff] }
 0x1bf   : > { %v3133_v34 = vsel %vm1679_vm1, %v7056_v29, 0 }
 0x1c0   : > { %2697 = vmatpush.bf16.xpose.msra.mxu3 %v2685_v46  ;;  %v1874_v46 = vpop.f32.mrf.mxu3  ;;  %v2047_v48 = vadd.f32 %v1983_v43, %v1915_v35  ;;  %3145 = vmatpush.bf16.xpose.msra.mxu1 %v3133_v34 }
 0x1c1   : > { %v7684_v49 = vpop.f32.mrf.mxu2  ;;  %v1916_v54 = vadd.f32 %v1874_v46, %v7533_v12 }
 0x1c2   : > { %v2079_v42 = vmax.f32 %v2047_v48, 0.0 }
 0x1c3   : > { %v7687_v51 = vpop.f32.mrf.mxu1 }
 0x1c4   : > { %v2547_v36 = vpack.c.bf16 %v7687_v51, %v7687_v51 }
 0x1c6   : > { %6461 = vmatmul.msk.f32.gmra.mxu1 %vm1679_vm1, %v2073_v53  ;;  %6493 = vmatmul.msk.f32.gmra.mxu2 %vm1679_vm1, %v2073_v53  ;;  %v7037_v53 = vld [vmem:[%s7562_s24 + $0x78] sm:$0xff] }
 0x1c7   : > { %6531 = vmatmul.msk.bf16.vlgmr.msrb.gmra.mxu3 %vm1679_vm1, %v2545_v55  ;;  %v1984_v55 = vperm.slane %v1952_v50, 0  ;;  %v2816_v58 = vsel %vm1679_vm1, %v7037_v53, 0 }
 0x1c8   : > { %2728 = vmatpush.bf16.xpose.msrb.mxu3 %v2720_v56  ;;  %v1877_v61 = vpop.f32.mrf.mxu3 }
 0x1c9   : > { %v7696_v59 = vpop.f32.mrf.mxu2  ;;  %v2048_v52 = vadd.f32 %v1984_v55, %v1916_v54  ;;  %v1917_v2 = vadd.f32 %v1877_v61, %v7533_v12 }
 0x1cb   : > { %v7701_v62 = vpop.f32.mrf.mxu1  ;;  %v2080_v4 = vmax.f32 %v2048_v52, 0.0  ;;  %v7063_v52 = vld [vmem:[%s7562_s24 + $0x148] sm:$0xff] }
 0x1cc   : > { %v2548_v57 = vpack.c.bf16 %v7701_v62, %v7701_v62  ;;  %v7036_v62 = vld [vmem:[%s7562_s24 + $0x70] sm:$0xff] }
 0x1cd   : > { %v2813_v10 = vsel %vm1679_vm1, %v7036_v62, 0 }
 0x1ce   : > { %6462 = vmatmul.msk.f32.gmra.mxu1 %vm1679_vm1, %v2074_v63  ;;  %6494 = vmatmul.msk.f32.gmra.mxu2 %vm1679_vm1, %v2074_v63  ;;  %v3104_v63 = vsel %vm1679_vm1, %v7055_v60, 0 }
 0x1cf   : > { %3112 = vmatpush.bf16.xpose.msrb.mxu0 %v3104_v63 }
 0x1d0   : > { %2729 = vmatpush.bf16.xpose.msrb.mxu3 %v2717_v0  ;;  %v1953_v0 = vrot.slane %v7719_v16, 4 }
 0x1d1   : > { %v7707_v6 = vpop.f32.mrf.mxu2 }
 0x1d3   : > { %v7712_v11 = vpop.f32.mrf.mxu1 }
 0x1d4   : > { %v2549_v25 = vpack.c.bf16 %v7712_v11, %v7712_v11  ;;  %v7038_v11 = vld [vmem:[%s7562_s24 + $0x80] sm:$0xff] }
 0x1d5   : > { %v2845_v43 = vsel %vm1679_vm1, %v7038_v11, 0  ;;  %v7066_v11 = vld [vmem:[%s7562_s24 + $0x160] sm:$0xff] }
 0x1d6   : > { %6463 = vmatmul.msk.f32.gmra.mxu1 %vm1679_vm1, %v2075_v8  ;;  %6495 = vmatmul.msk.f32.gmra.mxu2 %vm1679_vm1, %v2075_v8  ;;  %v1985_v8 = vperm.slane %v1953_v0, 0  ;;  %v7040_v0 = vld [vmem:[%s7562_s24 + $0x90] sm:$0xff] }
 0x1d7   : > { %6540 = vmatmul.msk.bf16.vlgmr.msra.gmra.mxu3 %vm1679_vm1, %v2546_v14  ;;  %v3101_v14 = vsel %vm1679_vm1, %v7054_v9, 0 }
 0x1d8   : > { %2760 = vmatpush.bf16.xpose.msra.mxu3 %v2752_v3  ;;  %v1880_v3 = vpop.f32.mrf.mxu3  ;;  %v2049_v15 = vadd.f32 %v1985_v8, %v1917_v2  ;;  %3113 = vmatpush.bf16.xpose.msrb.mxu0 %v3101_v14  ;;  %v7065_v2 = vld [vmem:[%s7562_s24 + $0x158] sm:$0xff]  ;;  %v2877_v8 = vsel %vm1679_vm1, %v7040_v0, 0 }
 0x1d9   : > { %v7721_v17 = vpop.f32.mrf.mxu2 }
 0x1da   : > { %v2081_v22 = vmax.f32 %v2049_v15, 0.0 }
 0x1db   : > { %v7724_v19 = vpop.f32.mrf.mxu1 }
 0x1de   : > { %6464 = vmatmul.msk.f32.gmra.mxu1 %vm1679_vm1, %v2076_v18  ;;  %6496 = vmatmul.msk.f32.gmra.mxu2 %vm1679_vm1, %v2076_v18  ;;  %v7039_v18 = vld [vmem:[%s7562_s24 + $0x88] sm:$0xff] }
 0x1df   : > { %v2848_v28 = vsel %vm1679_vm1, %v7039_v18, 0 }
 0x1e0   : > { %2761 = vmatpush.bf16.xpose.msra.mxu3 %v2749_v23  ;;  %v1918_v23 = vadd.f32 %v1880_v3, %v7533_v12  ;;  %v1883_v31 = vpop.f32.mrf.mxu3  ;;  %v7043_v3 = vld [vmem:[%s7562_s24 + $0xa8] sm:$0xff] }
 0x1e1   : > { %v7732_v27 = vpop.f32.mrf.mxu2  ;;  %v1919_v38 = vadd.f32 %v1883_v31, %v7533_v12 }
 0x1e3   : > { %v7735_v32 = vpop.f32.mrf.mxu1 }
 0x1e4   : > { %v2551_v18 = vpack.c.bf16 %v7735_v32, %v7735_v32 }
 0x1e6   : > { %6465 = vmatmul.msk.f32.gmra.mxu1 %vm1679_vm1, %v2077_v33  ;;  %6497 = vmatmul.msk.f32.gmra.mxu2 %vm1679_vm1, %v2077_v33  ;;  %v1955_v33 = vrot.slane %v7719_v16, 6 }
 0x1e7   : > { %6549 = vmatmul.msk.bf16.vlgmr.msrb.gmra.mxu3 %vm1679_vm1, %v2547_v36  ;;  %v2050_v36 = vadd.f32 %v1986_v24, %v1918_v23  ;;  %v7064_v23 = vld [vmem:[%s7562_s24 + $0x150] sm:$0xff]  ;;  %v7067_v24 = vld [vmem:[%s7562_s24 + $0x168] sm:$0xff] }
 0x1e8   : > { %2792 = vmatpush.bf16.xpose.msrb.mxu3 %v2784_v37  ;;  %v1987_v39 = vperm.slane %v1955_v33, 0  ;;  %v1886_v48 = vpop.f32.mrf.mxu3  ;;  %v7042_v33 = vld [vmem:[%s7562_s24 + $0xa0] sm:$0xff] }
 0x1e9   : > { %v7745_v40 = vpop.f32.mrf.mxu2  ;;  %v2082_v35 = vmax.f32 %v2050_v36, 0.0  ;;  %v1920_v55 = vadd.f32 %v1886_v48, %v7533_v12  ;;  %v3232_v12 = vsel %vm1679_vm1, %v7063_v52, 0  ;;  %v2909_v36 = vsel %vm1679_vm1, %v7042_v33, 0  ;;  %v7074_v33 = vld [vmem:[%s7562_s24 + $0x1a0] sm:$0xff] }
 0x1ea   : > { %v2051_v46 = vadd.f32 %v1987_v39, %v1919_v38  ;;  %3240 = vmatpush.bf16.xpose.msra.mxu0 %v3232_v12  ;;  %v3293_v38 = vsel %vm1679_vm1, %v7066_v11, 0 }
 0x1eb   : > { %v7749_v44 = vpop.f32.mrf.mxu1 }
 0x1ec   : > { %v2083_v54 = vmax.f32 %v2051_v46, 0.0 }
 0x1ee   : > { %6466 = vmatmul.msk.f32.gmra.mxu1 %vm1679_vm1, %v2078_v45  ;;  %6498 = vmatmul.msk.f32.gmra.mxu2 %vm1679_vm1, %v2078_v45  ;;  %v7058_v45 = vld [vmem:[%s7562_s24 + $0x120] sm:$0xff] }
 0x1ef   : > { %v3165_v50 = vsel %vm1679_vm1, %v7058_v45, 0 }
 0x1f0   : > { %2793 = vmatpush.bf16.xpose.msrb.mxu3 %v2781_v47  ;;  %v1956_v47 = vrot.slane %v7719_v16, 7  ;;  %3177 = vmatpush.bf16.xpose.msra.mxu2 %v3165_v50  ;;  %v2550_v16 = vpack.c.bf16 %v7724_v19, %v7724_v19  ;;  %v7071_v50 = vld [vmem:[%s7562_s24 + $0x188] sm:$0xff] }
 0x1f1   : > { %v7755_v51 = vpop.f32.mrf.mxu2 }
 0x1f3   : > { %v7759_v56 = vpop.f32.mrf.mxu1 }
 0x1f6   : > { %6467 = vmatmul.msk.f32.gmra.mxu1 %vm1679_vm1, %v2079_v42  ;;  %6499 = vmatmul.msk.f32.gmra.mxu2 %vm1679_vm1, %v2079_v42  ;;  %v7041_v42 = vld [vmem:[%s7562_s24 + $0x98] sm:$0xff] }
 0x1f7   : > { %6558 = vmatmul.msk.bf16.vlgmr.msra.gmra.mxu3 %vm1679_vm1, %v2548_v57  ;;  %v1988_v57 = vperm.slane %v1956_v47, 0  ;;  %v2880_v60 = vsel %vm1679_vm1, %v7041_v42, 0  ;;  %v2552_v47 = vpack.c.bf16 %v7749_v44, %v7749_v44  ;;  %v3360_v42 = vsel %vm1679_vm1, %v7071_v50, 0  ;;  %v7070_v44 = vld [vmem:[%s7562_s24 + $0x180] sm:$0xff] }
 0x1f8   : > { %2824 = vmatpush.bf16.xpose.msra.mxu3 %v2816_v58 }
 0x1f9   : > { %v7770_v1 = vpop.f32.mrf.mxu2  ;;  %v2052_v61 = vadd.f32 %v1988_v57, %v1920_v55  ;;  %v7044_v55 = vld [vmem:[%s7562_s24 + $0xb0] sm:$0xff] }
 0x1fa   : > { %v2941_v52 = vsel %vm1679_vm1, %v7044_v55, 0 }
 0x1fb   : > { %v7773_v5 = vpop.f32.mrf.mxu1  ;;  %v2084_v62 = vmax.f32 %v2052_v61, 0.0  ;;  %v3357_v61 = vsel %vm1679_vm1, %v7070_v44, 0  ;;  %v7081_v44 = vld [vmem:[%s7562_s24 + $0x1d8] sm:$0xff] }
 0x1fe   : > { %6468 = vmatmul.msk.f32.gmra.mxu1 %vm1679_vm1, %v2080_v4  ;;  %6500 = vmatmul.msk.f32.gmra.mxu2 %vm1679_vm1, %v2080_v4  ;;  %v7062_v4 = vld [vmem:[%s7562_s24 + $0x140] sm:$0xff] }
 0x1ff   : > { %v3229_v9 = vsel %vm1679_vm1, %v7062_v4, 0 }
 0x200   : > { %2825 = vmatpush.bf16.xpose.msra.mxu3 %v2813_v10  ;;  %v3264_v10 = vsel %vm1679_vm1, %v7065_v2, 0  ;;  %3241 = vmatpush.bf16.xpose.msra.mxu0 %v3229_v9  ;;  %v2553_v9 = vpack.c.bf16 %v7759_v56, %v7759_v56 }
 0x201   : > { %v7782_v7 = vpop.f32.mrf.mxu2  ;;  %3272 = vmatpush.bf16.xpose.msrb.mxu1 %v3264_v10 }
 0x203   : > { %v7785_v21 = vpop.f32.mrf.mxu1 }
 0x206   : > { %6469 = vmatmul.msk.f32.gmra.mxu1 %vm1679_vm1, %v2081_v22  ;;  %6501 = vmatmul.msk.f32.gmra.mxu2 %vm1679_vm1, %v2081_v22  ;;  %v2912_v22 = vsel %vm1679_vm1, %v7043_v3, 0  ;;  %v7072_v3 = vld [vmem:[%s7562_s24 + $0x190] sm:$0xff] }
 0x207   : > { %6567 = vmatmul.msk.bf16.vlgmr.msrb.gmra.mxu3 %vm1679_vm1, %v2549_v25  ;;  %v3261_v25 = vsel %vm1679_vm1, %v7064_v23, 0  ;;  %v7046_v23 = vld [vmem:[%s7562_s24 + $0xc0] sm:$0xff] }
 0x208   : > { %2856 = vmatpush.bf16.xpose.msrb.mxu3 %v2848_v28  ;;  %v3296_v28 = vsel %vm1679_vm1, %v7067_v24, 0 }
 0x209   : > { %v7797_v37 = vpop.f32.mrf.mxu2  ;;  %3273 = vmatpush.bf16.xpose.msrb.mxu1 %v3261_v25  ;;  %3304 = vmatpush.bf16.xpose.msrb.mxu2 %v3296_v28  ;;  %v2973_v28 = vsel %vm1679_vm1, %v7046_v23, 0 }
 0x20b   : > { %v7801_v26 = vpop.f32.mrf.mxu1 }
 0x20e   : > { %6470 = vmatmul.msk.f32.gmra.mxu1 %vm1679_vm1, %v2082_v35  ;;  %6502 = vmatmul.msk.f32.gmra.mxu2 %vm1679_vm1, %v2082_v35  ;;  %v7045_v35 = vld [vmem:[%s7562_s24 + $0xb8] sm:$0xff] }
 0x20f   : > { %v2944_v48 = vsel %vm1679_vm1, %v7045_v35, 0 }
 0x210   : > { %2857 = vmatpush.bf16.xpose.msrb.mxu3 %v2845_v43 }
 0x211   : > { %v7809_v53 = vpop.f32.mrf.mxu2  ;;  %3305 = vmatpush.bf16.xpose.msrb.mxu2 %v3293_v38 }
 0x213   : > { %v7813_v58 = vpop.f32.mrf.mxu1 }
 0x216   : > { %6471 = vmatmul.msk.f32.gmra.mxu1 %vm1679_vm1, %v2083_v54  ;;  %6503 = vmatmul.msk.f32.gmra.mxu2 %vm1679_vm1, %v2083_v54 }
 0x217   : > { %6576 = vmatmul.msk.bf16.vlgmr.msra.gmra.mxu3 %vm1679_vm1, %v2550_v16 }
 0x218   : > { %2888 = vmatpush.bf16.xpose.msra.mxu3 %v2880_v60  ;;  %v7073_v60 = vld [vmem:[%s7562_s24 + $0x198] sm:$0xff] }
 0x219   : > { %v7823_v63 = vpop.f32.mrf.mxu2  ;;  %v3392_v12 = vsel %vm1679_vm1, %v7073_v60, 0 }
 0x21b   : > { %v7826_v19 = vpop.f32.mrf.mxu1 }
 0x21e   : > { %6472 = vmatmul.msk.f32.gmra.mxu1 %vm1679_vm1, %v2084_v62  ;;  %6504 = vmatmul.msk.f32.gmra.mxu2 %vm1679_vm1, %v2084_v62  ;;  %v7047_v62 = vld [vmem:[%s7562_s24 + $0xc8] sm:$0xff] }
 0x21f   : > { %v2976_v10 = vsel %vm1679_vm1, %v7047_v62, 0 }
 0x220   : > { %2889 = vmatpush.bf16.xpose.msra.mxu3 %v2877_v8 }
 0x221   : > { %v7835_v14 = vpop.f32.mrf.mxu2 }
 0x223   : > { %v2378_v15 = vpop.f32.mrf.mxu1 }
 0x224   : > { %v2559_v13 = vpack.c.bf16 %v2378_v15, %v2378_v15  ;;  %v7075_v15 = vld [vmem:[%s7562_s24 + $0x1a8] sm:$0xff] }
 0x226   : > { %6657 = vmatmul.msk.bf16.vlgmr.msrb.gmra.mxu0 %vm1679_vm1, %v2559_v13  ;;  %v3389_v13 = vsel %vm1679_vm1, %v7072_v3, 0  ;;  %v7080_v3 = vld [vmem:[%s7562_s24 + $0x1d0] sm:$0xff] }
 0x227   : > { %6585 = vmatmul.msk.bf16.vlgmr.msrb.gmra.mxu3 %vm1679_vm1, %v2551_v18  ;;  %3368 = vmatpush.bf16.xpose.msrb.mxu0 %v3360_v42  ;;  %v3424_v18 = vsel %vm1679_vm1, %v7075_v15, 0  ;;  %v7083_v15 = vld [vmem:[%s7562_s24 + $0x1e8] sm:$0xff] }
 0x228   : > { %2920 = vmatpush.bf16.xpose.msrb.mxu3 %v2912_v22  ;;  %v3552_v23 = vsel %vm1679_vm1, %v7083_v15, 0 }
 0x229   : > { %v7847_v29 = vpop.f32.mrf.mxu2 }
 0x22a   : > { %v7850_v32 = vpop.f32.mrf.mxu3 }
 0x22b   : > { %v2381_v31 = vpop.f32.mrf.mxu1 }
 0x22c   : > { %v2560_v34 = vpack.c.bf16 %v2381_v31, %v2381_v31  ;;  %v3421_v31 = vsel %vm1679_vm1, %v7074_v33, 0 }
 0x22e   : > { %6666 = vmatmul.msk.bf16.vlgmr.msra.gmra.mxu1 %vm1679_vm1, %v2560_v34 }
 0x22f   : > { %3400 = vmatpush.bf16.xpose.msra.mxu1 %v3392_v12  ;;  %3369 = vmatpush.bf16.xpose.msrb.mxu0 %v3357_v61  ;;  %v3520_v61 = vsel %vm1679_vm1, %v7081_v44, 0  ;;  %v7051_v12 = vld [vmem:[%s7562_s24 + $0xe8] sm:$0xff] }
 0x230   : > { %2921 = vmatpush.bf16.xpose.msrb.mxu3 %v2909_v36  ;;  %v7049_v36 = vld [vmem:[%s7562_s24 + $0xd8] sm:$0xff] }
 0x231   : > { %v7856_v39 = vpop.f32.mrf.mxu2 }
 0x232   : > { %v2605_v43 = vpop.f32.mrf.mxu3 }
 0x233   : > { %v2384_v45 = vpop.f32.mrf.mxu1  ;;  %v2554_v43 = vpack.c.bf16 %v7773_v5, %v7773_v5  ;;  %v7078_v5 = vld [vmem:[%s7562_s24 + $0x1c0] sm:$0xff] }
 0x234   : > { %v2561_v46 = vpack.c.bf16 %v2384_v45, %v2384_v45  ;;  %v3008_v45 = vsel %vm1679_vm1, %v7049_v36, 0  ;;  %v7082_v36 = vld [vmem:[%s7562_s24 + $0x1e0] sm:$0xff] }
 0x236   : > { %6675 = vmatmul.msk.bf16.vlgmr.msra.gmra.mxu2 %vm1679_vm1, %v2561_v46  ;;  %v7079_v46 = vld [vmem:[%s7562_s24 + $0x1c8] sm:$0xff] }
 0x237   : > { %6594 = vmatmul.msk.bf16.vlgmr.msra.gmra.mxu3 %vm1679_vm1, %v2552_v47  ;;  %3401 = vmatpush.bf16.xpose.msra.mxu1 %v3389_v13  ;;  %v3488_v47 = vsel %vm1679_vm1, %v7079_v46, 0  ;;  %v3602_v13 = vld [vmem:[%s8889_s8 + $0x18] sm:$0xff]  ;;  %v3599_v46 = vld [vmem:[%s8889_s8] sm:$0xff] }
 0x238   : > { %2952 = vmatpush.bf16.xpose.msra.mxu3 %v2944_v48  ;;  %3432 = vmatpush.bf16.xpose.msra.mxu2 %v3424_v18  ;;  %v7048_v48 = vld [vmem:[%s7562_s24 + $0xd0] sm:$0xff]  ;;  %v3517_v18 = vsel %vm1679_vm1, %v7080_v3, 0  ;;  %v2557_v3 = vpack.c.bf16 %v7813_v58, %v7813_v58  ;;  %v7069_v58 = vld [vmem:[%s7562_s24 + $0x178] sm:$0xff] }
 0x239   : > { %v7866_v54 = vpop.f32.mrf.mxu2  ;;  %v3005_v60 = vsel %vm1679_vm1, %v7048_v48, 0 }
 0x23a   : > { %v7869_v57 = vpop.f32.mrf.mxu3 }
 0x23b   : > { %v7871_v16 = vpop.f32.mrf.mxu1 }
 0x240   : > { %2953 = vmatpush.bf16.xpose.msra.mxu3 %v2941_v52  ;;  %3433 = vmatpush.bf16.xpose.msra.mxu2 %v3421_v31  ;;  %v3485_v52 = vsel %vm1679_vm1, %v7078_v5, 0  ;;  %v2556_v5 = vpack.c.bf16 %v7801_v26, %v7801_v26 }
 0x241   : > { %v7878_v0 = vpop.f32.mrf.mxu2 }
 0x242   : > { %v2637_v4 = vpop.f32.mrf.mxu3 }
 0x243   : > { %v2390_v2 = vpop.f32.mrf.mxu1 }
 0x244   : > { %v2563_v8 = vpack.c.bf16 %v2390_v2, %v2390_v2 }
 0x246   : > { %6693 = vmatmul.msk.bf16.vlgmr.msra.gmra.mxu0 %vm1679_vm1, %v2563_v8  ;;  %v2555_v8 = vpack.c.bf16 %v7785_v21, %v7785_v21  ;;  %v7050_v21 = vld [vmem:[%s7562_s24 + $0xe0] sm:$0xff] }
 0x247   : > { %6603 = vmatmul.msk.bf16.vlgmr.msrb.gmra.mxu3 %vm1679_vm1, %v2553_v9  ;;  %3496 = vmatpush.bf16.xpose.msra.mxu0 %v3488_v47  ;;  %v3037_v31 = vsel %vm1679_vm1, %v7050_v21, 0 }
 0x248   : > { %2984 = vmatpush.bf16.xpose.msrb.mxu3 %v2976_v10  ;;  %v3040_v10 = vsel %vm1679_vm1, %v7051_v12, 0 }
 0x249   : > { %v7890_v22 = vpop.f32.mrf.mxu2 }
 0x24a   : > { %v7893_v56 = vpop.f32.mrf.mxu3 }
 0x24b   : > { %v2393_v24 = vpop.f32.mrf.mxu1 }
 0x24c   : > { %v2564_v25 = vpack.c.bf16 %v2393_v24, %v2393_v24 }
 0x24e   : > { %6702 = vmatmul.msk.bf16.vlgmr.msrb.gmra.mxu1 %vm1679_vm1, %v2564_v25  ;;  %v3601_v25 = vld [vmem:[%s8889_s8 + $0x10] sm:$0xff] }
 0x24f   : > { %3528 = vmatpush.bf16.xpose.msrb.mxu1 %v3520_v61  ;;  %3497 = vmatpush.bf16.xpose.msra.mxu0 %v3485_v52  ;;  %v7052_v52 = vld [vmem:[%s7562_s24 + $0xf0] sm:$0xff] }
 0x250   : > { %2985 = vmatpush.bf16.xpose.msrb.mxu3 %v2973_v28 }
 0x251   : > { %v7899_v34 = vpop.f32.mrf.mxu2 }
 0x252   : > { %v2669_v11 = vpop.f32.mrf.mxu3 }
 0x253   : > { %v2396_v38 = vpop.f32.mrf.mxu1  ;;  %v3600_v11 = vld [vmem:[%s8889_s8 + $0x8] sm:$0xff] }
 0x254   : > { %v2565_v35 = vpack.c.bf16 %v2396_v38, %v2396_v38 }
 0x256   : > { %6711 = vmatmul.msk.bf16.vlgmr.msrb.gmra.mxu2 %vm1679_vm1, %v2565_v35  ;;  %v3549_v35 = vsel %vm1679_vm1, %v7082_v36, 0 }
 0x257   : > { %6612 = vmatmul.msk.bf16.vlgmr.msra.gmra.mxu3 %vm1679_vm1, %v2554_v43  ;;  %3529 = vmatpush.bf16.xpose.msrb.mxu1 %v3517_v18  ;;  %v7053_v43 = vld [vmem:[%s7562_s24 + $0xf8] sm:$0xff] }
 0x258   : > { %3016 = vmatpush.bf16.xpose.msra.mxu3 %v3008_v45  ;;  %3560 = vmatpush.bf16.xpose.msrb.mxu2 %v3552_v23  ;;  %v3072_v44 = vsel %vm1679_vm1, %v7053_v43, 0 }
 0x259   : > { %v7912_v42 = vpop.f32.mrf.mxu2 }
 0x25a   : > { %v7910_v50 = vpop.f32.mrf.mxu3 }
 0x25b   : > { %v7914_v55 = vpop.f32.mrf.mxu1 }
 0x260   : > { %3017 = vmatpush.bf16.xpose.msra.mxu3 %v3005_v60  ;;  %3561 = vmatpush.bf16.xpose.msrb.mxu2 %v3549_v35  ;;  %v3328_v35 = vsel %vm1679_vm1, %v7069_v58, 0 }
 0x261   : > { %v7924_v9 = vpop.f32.mrf.mxu2 }
 0x262   : > { %v2701_v62 = vpop.f32.mrf.mxu3 }
 0x263   : > { %v2402_v4 = vpop.f32.mrf.mxu1  ;;  %v3069_v62 = vsel %vm1679_vm1, %v7052_v52, 0  ;;  %v2562_v52 = vpack.c.bf16 %v7871_v16, %v7871_v16 }
 0x264   : > { %v2567_v2 = vpack.c.bf16 %v2402_v4, %v2402_v4  ;;  %v7061_v4 = vld [vmem:[%s7562_s24 + $0x138] sm:$0xff] }
 0x265   : > { %v3200_v15 = vsel %vm1679_vm1, %v7061_v4, 0  ;;  %v7076_v4 = vld [vmem:[%s7562_s24 + $0x1b0] sm:$0xff] }
 0x266   : > { %6729 = vmatmul.msk.bf16.vlgmr.msrb.gmra.mxu0 %vm1679_vm1, %v2567_v2 }
 0x267   : > { %6621 = vmatmul.msk.bf16.vlgmr.msrb.gmra.mxu3 %vm1679_vm1, %v2555_v8  ;;  %3711 = vmatpush.msrb.mxu0 %v3602_v13  ;;  %v7060_v13 = vld [vmem:[%s7562_s24 + $0x130] sm:$0xff] }
 0x268   : > { %3048 = vmatpush.bf16.xpose.msrb.mxu3 %v3040_v10 }
 0x269   : > { %3712 = vmatpush.msrb.mxu0 %v3601_v25  ;;  %v7948_v38 = vpop.f32.mrf.mxu2 }
 0x26a   : > { %v7937_v24 = vpop.f32.mrf.mxu3 }
 0x26b   : > { %v2405_v28 = vpop.f32.mrf.mxu1  ;;  %3713 = vmatpush.msrb.mxu0 %v3600_v11  ;;  %v2558_v11 = vpack.c.bf16 %v7826_v19, %v7826_v19 }
 0x26c   : > { %v2568_v33 = vpack.c.bf16 %v2405_v28, %v2405_v28  ;;  %v3197_v28 = vsel %vm1679_vm1, %v7060_v13, 0 }
 0x26d   : > { %3714 = vmatpush.msrb.mxu0 %v3599_v46 }
 0x26e   : > { %6738 = vmatmul.msk.bf16.vlgmr.msra.gmra.mxu1 %vm1679_vm1, %v2568_v33 }
 0x270   : > { %3049 = vmatpush.bf16.xpose.msrb.mxu3 %v3037_v31 }
 0x271   : > { %v7960_v60 = vpop.f32.mrf.mxu2 }
 0x272   : > { %v2733_v45 = vpop.f32.mrf.mxu3 }
 0x273   : > { %v2408_v47 = vpop.f32.mrf.mxu1  ;;  %v7068_v45 = vld [vmem:[%s7562_s24 + $0x170] sm:$0xff] }
 0x274   : > { %v2569_v48 = vpack.c.bf16 %v2408_v47, %v2408_v47  ;;  %v3325_v47 = vsel %vm1679_vm1, %v7068_v45, 0 }
 0x276   : > { %6747 = vmatmul.msk.bf16.vlgmr.msra.gmra.mxu2 %vm1679_vm1, %v2569_v48 }
 0x277   : > { %6630 = vmatmul.msk.bf16.vlgmr.msra.gmra.mxu3 %vm1679_vm1, %v2556_v5  ;;  %v7077_v5 = vld [vmem:[%s7562_s24 + $0x1b8] sm:$0xff] }
 0x278   : > { %3080 = vmatpush.bf16.xpose.msra.mxu3 %v3072_v44 }
 0x279   : > { %v7969_v2 = vpop.f32.mrf.mxu2 }
 0x27a   : > { %v7963_v61 = vpop.f32.mrf.mxu3 }
 0x27b   : > { %v7965_v12 = vpop.f32.mrf.mxu1 }
 0x280   : > { %3081 = vmatpush.bf16.xpose.msra.mxu3 %v3069_v62  ;;  %v3456_v62 = vsel %vm1679_vm1, %v7077_v5, 0 }
 0x281   : > { %v7977_v25 = vpop.f32.mrf.mxu2 }
 0x282   : > { %v2765_v26 = vpop.f32.mrf.mxu3 }
 0x283   : > { %v2414_v8 = vpop.f32.mrf.mxu1 }
 0x284   : > { %v2571_v10 = vpack.c.bf16 %v2414_v8, %v2414_v8 }
 0x286   : > { %6765 = vmatmul.msk.bf16.vlgmr.msra.gmra.mxu0 %vm1679_vm1, %v2571_v10 }
 0x287   : > { %6639 = vmatmul.msk.bf16.vlgmr.msrb.gmra.mxu3 %vm1679_vm1, %v2557_v3  ;;  %v3453_v3 = vsel %vm1679_vm1, %v7076_v4, 0 }
 0x288   : > { %3208 = vmatpush.bf16.xpose.msrb.mxu3 %v3200_v15 }
 0x289   : > { %v7988_v43 = vpop.f32.mrf.mxu2 }
 0x28a   : > { %v2795_v18 = vpop.f32.mrf.mxu3 }
 0x28b   : > { %v2417_v23 = vpop.f32.mrf.mxu1 }
 0x28c   : > { %v2572_v21 = vpack.c.bf16 %v2417_v23, %v2417_v23  ;;  %v2566_v23 = vpack.c.bf16 %v7914_v55, %v7914_v55 }
 0x28e   : > { %6774 = vmatmul.msk.bf16.vlgmr.msrb.gmra.mxu1 %vm1679_vm1, %v2572_v21 }
 0x290   : > { %3209 = vmatpush.bf16.xpose.msrb.mxu3 %v3197_v28 }
 0x291   : > { %v7995_v19 = vpop.f32.mrf.mxu2 }
 0x292   : > { %v2797_v33 = vpop.f32.mrf.mxu3 }
 0x293   : > { %v2420_v31 = vpop.f32.mrf.mxu1 }
 0x294   : > { %v2573_v36 = vpack.c.bf16 %v2420_v31, %v2420_v31 }
 0x296   : > { %6783 = vmatmul.msk.bf16.vlgmr.msrb.gmra.mxu2 %vm1679_vm1, %v2573_v36  ;;  %6793 = vmatmul.msk.f32.vlgmr.msrb.gmra.mxu0 %vm1679_vm1, %v7850_v32 }
 0x297   : > { %6648 = vmatmul.msk.bf16.vlgmr.msra.gmra.mxu3 %vm1679_vm1, %v2558_v11 }
 0x298   : > { %3336 = vmatpush.bf16.xpose.msra.mxu3 %v3328_v35 }
 0x29a   : > { %v2827_v46 = vpop.f32.mrf.mxu3 }
 0x29b   : > { %v2423_v48 = vpop.f32.mrf.mxu1 }
 0x29c   : > { %v2574_v5 = vpack.c.bf16 %v2423_v48, %v2423_v48  ;;  %v4043_v48 = vld [vmem:[%s8891_s10 + $0x18] sm:$0xff] }
 0x29d   : > { %4152 = vmatpush.msra.mxu1 %v4043_v48 }
 0x29e   : > { %6794 = vmatmul.msk.f32.gmra.mxu0 %vm1679_vm1, %v7869_v57  ;;  %v8006_v57 = vpop.f32.mrf.mxu2 }
 0x2a0   : > { %3337 = vmatpush.bf16.xpose.msra.mxu3 %v3325_v47 }
 0x2a2   : > { %v2829_v44 = vpop.f32.mrf.mxu3 }
 0x2a3   : > { %v7998_v32 = vpop.f32.mrf.mxu0 }
 0x2a6   : > { %6795 = vmatmul.msk.f32.gmra.mxu0 %vm1679_vm1, %v7893_v56  ;;  %v8014_v16 = vpop.f32.mrf.mxu2  ;;  %v7085_v56 = vld [vmem:[%s7562_s24 + $0x1f8] sm:$0xff] }
 0x2a7   : > { %6684 = vmatmul.msk.bf16.vlgmr.msrb.gmra.mxu3 %vm1679_vm1, %v2562_v52  ;;  %v3584_v21 = vsel %vm1679_vm1, %v7085_v56, 0  ;;  %v4041_v56 = vld [vmem:[%s8891_s10 + $0x8] sm:$0xff] }
 0x2a8   : > { %3464 = vmatpush.bf16.xpose.msrb.mxu3 %v3456_v62 }
 0x2aa   : > { %v2859_v26 = vpop.f32.mrf.mxu3 }
 0x2ab   : > { %v3117_v8 = vpop.f32.mrf.mxu0  ;;  %v8009_v10 = vpop.f32.mrf.mxu1 }
 0x2ae   : > { %6796 = vmatmul.msk.f32.gmra.mxu0 %vm1679_vm1, %v7910_v50  ;;  %v7084_v50 = vld [vmem:[%s7562_s24 + $0x1f0] sm:$0xff]  ;;  %s7126_s24 = smov 6  }
 0x2af   : > { %v3581_v33 = vsel %vm1679_vm1, %v7084_v50, 0  ;;  %v4040_v50 = vld [vmem:[%s8891_s10] sm:$0xff] }
 0x2b0   : > { %3465 = vmatpush.bf16.xpose.msrb.mxu3 %v3453_v3 }
 0x2b2   : > { %v2861_v15 = vpop.f32.mrf.mxu3 }
 0x2b3   : > { %v3149_v13 = vpop.f32.mrf.mxu1 }
 0x2b4   : > { %v4256_v13 = vld [vmem:[%s8892_s11 + $0x18] sm:$0xff] }
 0x2b5   : > { %4269 = vmatpush.msra.mxu2 %v4256_v13 }
 0x2b6   : > { %6797 = vmatmul.msk.f32.gmra.mxu0 %vm1679_vm1, %v7937_v24  ;;  %v2570_v24 = vpack.c.bf16 %v7965_v12, %v7965_v12 }
 0x2b7   : > { %6720 = vmatmul.msk.bf16.vlgmr.msra.gmra.mxu3 %vm1679_vm1, %v2566_v23  ;;  %v4255_v23 = vld [vmem:[%s8892_s11 + $0x10] sm:$0xff] }
 0x2b8   : > { %3592 = vmatpush.bf16.xpose.msra.mxu3 %v3584_v21  ;;  %4270 = vmatpush.msra.mxu2 %v4255_v23  ;;  %v4254_v21 = vld [vmem:[%s8892_s11 + $0x8] sm:$0xff] }
 0x2b9   : > { %v8023_v28 = vpop.f32.mrf.mxu2 }
 0x2ba   : > { %v2891_v58 = vpop.f32.mrf.mxu3  ;;  %4271 = vmatpush.msra.mxu2 %v4254_v21 }
 0x2be   : > { %6798 = vmatmul.msk.f32.gmra.mxu0 %vm1679_vm1, %v7963_v61 }
 0x2c0   : > { %3593 = vmatpush.bf16.xpose.msra.mxu3 %v3581_v33  ;;  %v4253_v33 = vld [vmem:[%s8892_s11] sm:$0xff] }
 0x2c1   : > { %v3181_v31 = vpop.f32.mrf.mxu2  ;;  %4272 = vmatpush.msra.mxu2 %v4253_v33 }
 0x2c2   : > { %v2893_v55 = vpop.f32.mrf.mxu3 }
 0x2c3   : > { %v8029_v36 = vpop.f32.mrf.mxu0 }
 0x2c6   : > { %6799 = vmatmul.msk.f32.gmra.mxu0 %vm1679_vm1, %v2795_v18 }
 0x2c7   : > { %6756 = vmatmul.msk.bf16.vlgmr.msrb.gmra.mxu3 %vm1679_vm1, %v2570_v24 }
 0x2ca   : > { %v2923_v11 = vpop.f32.mrf.mxu3 }
 0x2cb   : > { %v3245_v35 = vpop.f32.mrf.mxu0  ;;  %v8035_v45 = vpop.f32.mrf.mxu1 }
 0x2ce   : > { %6800 = vmatmul.msk.f32.gmra.mxu0 %vm1679_vm1, %v2827_v46 }
 0x2d2   : > { %v2925_v47 = vpop.f32.mrf.mxu3 }
 0x2d3   : > { %v3277_v61 = vpop.f32.mrf.mxu1 }
 0x2d6   : > { %6801 = vmatmul.msk.f32.gmra.mxu0 %vm1679_vm1, %v2859_v26  ;;  %v4042_v26 = vld [vmem:[%s8891_s10 + $0x10] sm:$0xff] }
 0x2d7   : > { %6792 = vmatmul.msk.bf16.vlgmr.msra.gmra.mxu3 %vm1679_vm1, %v2574_v5  ;;  %4153 = vmatpush.msra.mxu1 %v4042_v26  ;;  %v8089_v5 = vld [vmem:[%s8086_s28] sm:$0xff] }
 0x2d8   : > { %v3852_v26 = vrot.slane %v8089_v5, 1 }
 0x2d9   : > { %v8040_v44 = vpop.f32.mrf.mxu2  ;;  %4154 = vmatpush.msra.mxu1 %v4041_v56 }
 0x2da   : > { %v2955_v12 = vpop.f32.mrf.mxu3  ;;  %v3881_v13 = vperm.slane %v3852_v26, 0 }
 0x2db   : > { %4155 = vmatpush.msra.mxu1 %v4040_v50 }
 0x2de   : > { %6802 = vmatmul.msk.f32.gmra.mxu0 %vm1679_vm1, %v2891_v58 }
 0x2e1   : > { %v3309_v18 = vpop.f32.mrf.mxu2 }
 0x2e2   : > { %v2957_v52 = vpop.f32.mrf.mxu3  ;;  %v3880_v18 = vperm.slane %v8089_v5, 0 }
 0x2e3   : > { %v8043_v62 = vpop.f32.mrf.mxu0 }
 0x2e6   : > { %6803 = vmatmul.msk.f32.gmra.mxu0 %vm1679_vm1, %v2923_v11 }
 0x2ea   : > { %v2987_v4 = vpop.f32.mrf.mxu3 }
 0x2eb   : > { %v3373_v46 = vpop.f32.mrf.mxu0  ;;  %v8046_v8 = vpop.f32.mrf.mxu1 }
 0x2ee   : > { %6804 = vmatmul.msk.f32.gmra.mxu0 %vm1679_vm1, %v2955_v12 }
 0x2f2   : > { %v2989_v3 = vpop.f32.mrf.mxu3 }
 0x2f3   : > { %v3405_v15 = vpop.f32.mrf.mxu1 }
 0x2f6   : > { %6805 = vmatmul.msk.f32.gmra.mxu0 %vm1679_vm1, %v2987_v4 }
 0x2f9   : > { %v8071_v58 = vpop.f32.mrf.mxu2 }
 0x2fa   : > { %v3019_v31 = vpop.f32.mrf.mxu3 }
 0x2fe   : > { %6806 = vmatmul.msk.f32.gmra.mxu0 %vm1679_vm1, %v3019_v31 }
 0x301   : > { %v3437_v55 = vpop.f32.mrf.mxu2 }
 0x302   : > { %v3021_v24 = vpop.f32.mrf.mxu3 }
 0x303   : > { %v8077_v11 = vpop.f32.mrf.mxu0 }
 0x30a   : > { %v3051_v35 = vpop.f32.mrf.mxu3 }
 0x30b   : > { %6807 = vmatmul.msk.f32.gmra.mxu0 %vm1679_vm1, %v3051_v35  ;;  %v3501_v47 = vpop.f32.mrf.mxu0  ;;  %v8080_v61 = vpop.f32.mrf.mxu1 }
 0x312   : > { %v3053_v12 = vpop.f32.mrf.mxu3 }
 0x313   : > { %v3533_v52 = vpop.f32.mrf.mxu1  ;;  %v3716_v4 = vpop.f32.mrf.mxu0 }
 0x314   : > { %v3812_v46 = vadd.f32 %v3716_v4, %v7656_v20  ;;  %v3853_v20 = vrot.slane %v8089_v5, 2 }
 0x316   : > { %v3944_v48 = vadd.f32 %v3880_v18, %v3812_v46  ;;  %v3882_v24 = vperm.slane %v3853_v20, 0 }
 0x318   : > { %v3976_v3 = vmax.f32 %v3944_v48, 0.0 }
 0x319   : > { %v8094_v56 = vpop.f32.mrf.mxu2 }
 0x31a   : > { %v3083_v15 = vpop.f32.mrf.mxu3  ;;  %6825 = vmatmul.msk.f32.vlgmr.msra.gmra.mxu1 %vm1679_vm1, %v3976_v3  ;;  %6857 = vmatmul.msk.f32.vlgmr.msra.gmra.mxu2 %vm1679_vm1, %v3976_v3 }
 0x31b   : > { %6808 = vmatmul.msk.f32.gmra.mxu0 %vm1679_vm1, %v3083_v15  ;;  %v3719_v23 = vpop.f32.mrf.mxu0 }
 0x31c   : > { %v3813_v21 = vadd.f32 %v3719_v23, %v7665_v30  ;;  %v3854_v30 = vrot.slane %v8089_v5, 3 }
 0x31e   : > { %v3945_v50 = vadd.f32 %v3881_v13, %v3813_v21  ;;  %v3883_v4 = vperm.slane %v3854_v30, 0  ;;  %v3856_v21 = vrot.slane %v8089_v5, 5 }
 0x320   : > { %v3977_v33 = vmax.f32 %v3945_v50, 0.0  ;;  %v4024_v50 = vld [vmem:[%s8123_s16 + $0x10] sm:$0x1] }
 0x321   : > { %v3565_v31 = vpop.f32.mrf.mxu2  ;;  %v4710_v20 = vsel %vm1679_vm1, %v4024_v50, 0 }
 0x322   : > { %v3085_v55 = vpop.f32.mrf.mxu3  ;;  %6826 = vmatmul.msk.f32.gmra.mxu1 %vm1679_vm1, %v3977_v33  ;;  %6858 = vmatmul.msk.f32.gmra.mxu2 %vm1679_vm1, %v3977_v33 }
 0x323   : > { %6809 = vmatmul.msk.f32.gmra.mxu0 %vm1679_vm1, %v7998_v32  ;;  %v3722_v35 = vpop.f32.mrf.mxu0 }
 0x324   : > { %v3814_v47 = vadd.f32 %v3722_v35, %v7675_v41  ;;  %v3855_v41 = vrot.slane %v8089_v5, 4  ;;  %4719 = vmatpush.bf16.xpose.msra.mxu0 %v4710_v20 }
 0x326   : > { %v3946_v12 = vadd.f32 %v3882_v24, %v3814_v47  ;;  %v3884_v15 = vperm.slane %v3855_v41, 0  ;;  %v3857_v24 = vrot.slane %v8089_v5, 6 }
 0x328   : > { %v3978_v18 = vmax.f32 %v3946_v12, 0.0  ;;  %v3886_v12 = vperm.slane %v3857_v24, 0 }
 0x32a   : > { %v3211_v52 = vpop.f32.mrf.mxu3  ;;  %6827 = vmatmul.msk.f32.gmra.mxu1 %vm1679_vm1, %v3978_v18  ;;  %6859 = vmatmul.msk.f32.gmra.mxu2 %vm1679_vm1, %v3978_v18 }
 0x32b   : > { %6810 = vmatmul.msk.f32.gmra.mxu0 %vm1679_vm1, %v8009_v10  ;;  %v3725_v46 = vpop.f32.mrf.mxu0 }
 0x32c   : > { %v3815_v32 = vadd.f32 %v3725_v46, %v7684_v49 }
 0x32e   : > { %v3947_v48 = vadd.f32 %v3883_v4, %v3815_v32 }
 0x330   : > { %v3979_v26 = vmax.f32 %v3947_v48, 0.0 }
 0x332   : > { %v3213_v3 = vpop.f32.mrf.mxu3  ;;  %6828 = vmatmul.msk.f32.gmra.mxu1 %vm1679_vm1, %v3979_v26  ;;  %6860 = vmatmul.msk.f32.gmra.mxu2 %vm1679_vm1, %v3979_v26  ;;  %v8146_v26 = vld [vmem:[%s8086_s28 + $0x8] sm:$0xff] }
 0x333   : > { %6811 = vmatmul.msk.f32.gmra.mxu0 %vm1679_vm1, %v8023_v28  ;;  %v3728_v13 = vpop.f32.mrf.mxu0  ;;  %v3885_v28 = vperm.slane %v3856_v21, 0  ;;  %v3860_v20 = vrot.slane %v8146_v26, 2 }
 0x334   : > { %v3816_v23 = vadd.f32 %v3728_v13, %v7696_v59 }
 0x336   : > { %v3948_v10 = vadd.f32 %v3884_v15, %v3816_v23 }
 0x338   : > { %v3980_v49 = vmax.f32 %v3948_v10, 0.0 }
 0x33a   : > { %v3339_v33 = vpop.f32.mrf.mxu3  ;;  %6829 = vmatmul.msk.f32.gmra.mxu1 %vm1679_vm1, %v3980_v49  ;;  %6861 = vmatmul.msk.f32.gmra.mxu2 %vm1679_vm1, %v3980_v49 }
 0x33b   : > { %6812 = vmatmul.msk.f32.gmra.mxu0 %vm1679_vm1, %v3211_v52  ;;  %v3731_v59 = vpop.f32.mrf.mxu0 }
 0x33c   : > { %v3817_v31 = vadd.f32 %v3731_v59, %v7707_v6  ;;  %v3858_v6 = vrot.slane %v8089_v5, 7  ;;  %v3888_v5 = vperm.slane %v8146_v26, 0  ;;  %v3890_v59 = vperm.slane %v3860_v20, 0 }
 0x33e   : > { %v3949_v55 = vadd.f32 %v3885_v28, %v3817_v31  ;;  %v3887_v32 = vperm.slane %v3858_v6, 0 }
 0x340   : > { %v3981_v35 = vmax.f32 %v3949_v55, 0.0 }
 0x342   : > { %v3341_v47 = vpop.f32.mrf.mxu3  ;;  %6830 = vmatmul.msk.f32.gmra.mxu1 %vm1679_vm1, %v3981_v35  ;;  %6862 = vmatmul.msk.f32.gmra.mxu2 %vm1679_vm1, %v3981_v35 }
 0x343   : > { %6813 = vmatmul.msk.f32.gmra.mxu0 %vm1679_vm1, %v8029_v36  ;;  %v3734_v30 = vpop.f32.mrf.mxu0 }
 0x344   : > { %v3818_v18 = vadd.f32 %v3734_v30, %v7721_v17  ;;  %v4008_v30 = vld [vmem:[%s8123_s16] sm:$0x1] }
 0x346   : > { %v3950_v52 = vadd.f32 %v3886_v12, %v3818_v18  ;;  %v3862_v18 = vrot.slane %v8146_v26, 4 }
 0x348   : > { %v3982_v4 = vmax.f32 %v3950_v52, 0.0  ;;  %v3892_v6 = vperm.slane %v3862_v18, 0 }
 0x34a   : > { %v8138_v46 = vpop.f32.mrf.mxu3  ;;  %6831 = vmatmul.msk.f32.gmra.mxu1 %vm1679_vm1, %v3982_v4  ;;  %6863 = vmatmul.msk.f32.gmra.mxu2 %vm1679_vm1, %v3982_v4 }
 0x34b   : > { %6814 = vmatmul.msk.f32.gmra.mxu0 %vm1679_vm1, %v8035_v45  ;;  %v3737_v48 = vpop.f32.mrf.mxu0 }
 0x34c   : > { %v3819_v36 = vadd.f32 %v3737_v48, %v7732_v27  ;;  %v3859_v27 = vrot.slane %v8146_v26, 1 }
 0x34e   : > { %v3951_v41 = vadd.f32 %v3887_v32, %v3819_v36  ;;  %v3889_v21 = vperm.slane %v3859_v27, 0  ;;  %v3863_v32 = vrot.slane %v8146_v26, 5 }
 0x350   : > { %v3983_v17 = vmax.f32 %v3951_v41, 0.0  ;;  %v3893_v36 = vperm.slane %v3863_v32, 0 }
 0x352   : > { %v3469_v3 = vpop.f32.mrf.mxu3  ;;  %6832 = vmatmul.msk.f32.gmra.mxu1 %vm1679_vm1, %v3983_v17  ;;  %6864 = vmatmul.msk.f32.gmra.mxu2 %vm1679_vm1, %v3983_v17  ;;  %v4009_v17 = vld [vmem:[%s8123_s16 + $0x1] sm:$0x1] }
 0x353   : > { %6815 = vmatmul.msk.f32.gmra.mxu0 %vm1679_vm1, %v8040_v44  ;;  %v3740_v15 = vpop.f32.mrf.mxu0 }
 0x354   : > { %v3820_v45 = vadd.f32 %v3740_v15, %v7745_v40  ;;  %v3864_v15 = vrot.slane %v8146_v26, 6 }
 0x356   : > { %v3952_v13 = vadd.f32 %v3888_v5, %v3820_v45  ;;  %v4025_v45 = vld [vmem:[%s8123_s16 + $0x11] sm:$0x1]  ;;  %v3894_v27 = vperm.slane %v3864_v15, 0 }
 0x358   : > { %v3984_v23 = vmax.f32 %v3952_v13, 0.0 }
 0x35a   : > { %v8155_v10 = vpop.f32.mrf.mxu3  ;;  %6833 = vmatmul.msk.f32.gmra.mxu1 %vm1679_vm1, %v3984_v23  ;;  %6865 = vmatmul.msk.f32.gmra.mxu2 %vm1679_vm1, %v3984_v23 }
 0x35b   : > { %6816 = vmatmul.msk.f32.gmra.mxu0 %vm1679_vm1, %v3339_v33  ;;  %v3743_v49 = vpop.f32.mrf.mxu0 }
 0x35c   : > { %v3821_v50 = vadd.f32 %v3743_v49, %v7755_v51  ;;  %v3861_v51 = vrot.slane %v8146_v26, 3 }
 0x35e   : > { %v3953_v44 = vadd.f32 %v3889_v21, %v3821_v50  ;;  %v3891_v35 = vperm.slane %v3861_v51, 0  ;;  %v3865_v50 = vrot.slane %v8146_v26, 7 }
 0x360   : > { %v3985_v40 = vmax.f32 %v3953_v44, 0.0  ;;  %v4010_v44 = vld [vmem:[%s8123_s16 + $0x2] sm:$0x1]  ;;  %v3895_v20 = vperm.slane %v3865_v50, 0 }
 0x362   : > { %v3597_v28 = vpop.f32.mrf.mxu3  ;;  %6834 = vmatmul.msk.f32.gmra.mxu1 %vm1679_vm1, %v3985_v40  ;;  %6866 = vmatmul.msk.f32.gmra.mxu2 %vm1679_vm1, %v3985_v40 }
 0x363   : > { %6817 = vmatmul.msk.f32.gmra.mxu0 %vm1679_vm1, %v8043_v62  ;;  %v3746_v31 = vpop.f32.mrf.mxu0 }
 0x364   : > { %v3822_v33 = vadd.f32 %v3746_v31, %v7770_v1  ;;  %v4406_v1 = vsel %vm1679_vm1, %v4008_v30, 0  ;;  %v4011_v30 = vld [vmem:[%s8123_s16 + $0x3] sm:$0x1] }
 0x365   : > { %4415 = vmatpush.bf16.xpose.msrb.mxu3 %v4406_v1 }
 0x366   : > { %v3954_v55 = vadd.f32 %v3890_v59, %v3822_v33  ;;  %v4444_v59 = vsel %vm1679_vm1, %v4010_v44, 0 }
 0x368   : > { %v3986_v24 = vmax.f32 %v3954_v55, 0.0 }
 0x36a   : > { %6835 = vmatmul.msk.f32.gmra.mxu1 %vm1679_vm1, %v3986_v24  ;;  %6867 = vmatmul.msk.f32.gmra.mxu2 %vm1679_vm1, %v3986_v24 }
 0x36b   : > { %6818 = vmatmul.msk.f32.gmra.mxu0 %vm1679_vm1, %v8046_v8  ;;  %v3749_v47 = vpop.f32.mrf.mxu0 }
 0x36c   : > { %v3823_v12 = vadd.f32 %v3749_v47, %v7782_v7 }
 0x36e   : > { %v3955_v62 = vadd.f32 %v3891_v35, %v3823_v12 }
 0x370   : > { %v3987_v52 = vmax.f32 %v3955_v62, 0.0 }
 0x372   : > { %6836 = vmatmul.msk.f32.gmra.mxu1 %vm1679_vm1, %v3987_v52  ;;  %6868 = vmatmul.msk.f32.gmra.mxu2 %vm1679_vm1, %v3987_v52 }
 0x373   : > { %6819 = vmatmul.msk.f32.gmra.mxu0 %vm1679_vm1, %v8071_v58  ;;  %v3752_v8 = vpop.f32.mrf.mxu0 }
 0x374   : > { %v3824_v7 = vadd.f32 %v3752_v8, %v7797_v37  ;;  %v4425_v37 = vsel %vm1679_vm1, %v4009_v17, 0 }
 0x375   : > { %4434 = vmatpush.bf16.xpose.msra.mxu3 %v4425_v37 }
 0x376   : > { %v3956_v4 = vadd.f32 %v3892_v6, %v3824_v7  ;;  %v4463_v6 = vsel %vm1679_vm1, %v4011_v30, 0 }
 0x378   : > { %v3988_v48 = vmax.f32 %v3956_v4, 0.0 }
 0x37a   : > { %6837 = vmatmul.msk.f32.gmra.mxu1 %vm1679_vm1, %v3988_v48  ;;  %6869 = vmatmul.msk.f32.gmra.mxu2 %vm1679_vm1, %v3988_v48 }
 0x37b   : > { %6820 = vmatmul.msk.f32.gmra.mxu0 %vm1679_vm1, %v8138_v46  ;;  %v3755_v41 = vpop.f32.mrf.mxu0  ;;  %v4026_v46 = vld [vmem:[%s8123_s16 + $0x12] sm:$0x1] }
 0x37c   : > { %v3825_v58 = vadd.f32 %v3755_v41, %v7809_v53  ;;  %v4729_v53 = vsel %vm1679_vm1, %v4025_v45, 0  ;;  %v4748_v13 = vsel %vm1679_vm1, %v4026_v46, 0 }
 0x37d   : > { %4738 = vmatpush.bf16.xpose.msrb.mxu1 %v4729_v53  ;;  %4757 = vmatpush.bf16.xpose.msrb.mxu2 %v4748_v13 }
 0x37e   : > { %v3957_v3 = vadd.f32 %v3893_v36, %v3825_v58 }
 0x380   : > { %v3989_v5 = vmax.f32 %v3957_v3, 0.0 }
 0x382   : > { %6838 = vmatmul.msk.f32.gmra.mxu1 %vm1679_vm1, %v3989_v5  ;;  %6870 = vmatmul.msk.f32.gmra.mxu2 %vm1679_vm1, %v3989_v5  ;;  %v4012_v5 = vld [vmem:[%s8123_s16 + $0x4] sm:$0x1] }
 0x383   : > { %6821 = vmatmul.msk.f32.gmra.mxu0 %vm1679_vm1, %v8077_v11  ;;  %v4482_v13 = vsel %vm1679_vm1, %v4012_v5, 0 }
 0x388   : > { %v3758_v23 = vpop.f32.mrf.mxu0 }
 0x389   : > { %v3826_v21 = vadd.f32 %v3758_v23, %v7823_v63 }
 0x38b   : > { %v3958_v49 = vadd.f32 %v3894_v27, %v3826_v21  ;;  %6822 = vmatmul.msk.f32.gmra.mxu0 %vm1679_vm1, %v8080_v61 }
 0x38d   : > { %v3990_v11 = vmax.f32 %v3958_v49, 0.0 }
 0x38f   : > { %6839 = vmatmul.msk.f32.gmra.mxu1 %vm1679_vm1, %v3990_v11  ;;  %6871 = vmatmul.msk.f32.gmra.mxu2 %vm1679_vm1, %v3990_v11 }
 0x393   : > { %6823 = vmatmul.msk.f32.gmra.mxu0 %vm1679_vm1, %v8094_v56  ;;  %v8213_v56 = vld [vmem:[%s8086_s28 + $0x10] sm:$0xff] }
 0x394   : > { %v3896_v55 = vperm.slane %v8213_v56, 0  ;;  %v3866_v47 = vrot.slane %v8213_v56, 1  ;;  %v3867_v7 = vrot.slane %v8213_v56, 2  ;;  %v3868_v17 = vrot.slane %v8213_v56, 3 }
 0x395   : > { %v3869_v23 = vrot.slane %v8213_v56, 4 }
 0x396   : > { %v3897_v62 = vperm.slane %v3866_v47, 0  ;;  %v3898_v48 = vperm.slane %v3867_v7, 0  ;;  %v3899_v15 = vperm.slane %v3868_v17, 0 }
 0x397   : > { %v4157_v40 = vpop.f32.mrf.mxu1  ;;  %v3900_v11 = vperm.slane %v3869_v23, 0 }
 0x398   : > { %v3761_v28 = vpop.f32.mrf.mxu0  ;;  %v4370_v63 = vpack.c.bf16 %v4157_v40, %v4157_v40  ;;  %v3870_v40 = vrot.slane %v8213_v56, 5 }
 0x399   : > { %v3827_v61 = vadd.f32 %v3761_v28, %v7835_v14 }
 0x39a   : > { %6889 = vmatmul.msk.bf16.vlgmr.msrb.gmra.mxu3 %vm1679_vm1, %v4370_v63 }
 0x39b   : > { %v3959_v31 = vadd.f32 %v3895_v20, %v3827_v61  ;;  %6824 = vmatmul.msk.f32.gmra.mxu0 %vm1679_vm1, %v8155_v10  ;;  %4453 = vmatpush.bf16.xpose.msrb.mxu3 %v4444_v59  ;;  %v4013_v59 = vld [vmem:[%s8123_s16 + $0x5] sm:$0x1]  ;;  %v3901_v61 = vperm.slane %v3870_v40, 0 }
 0x39d   : > { %v3991_v26 = vmax.f32 %v3959_v31, 0.0  ;;  %v8215_v33 = vpop.f32.mrf.mxu2 }
 0x39f   : > { %6840 = vmatmul.msk.f32.gmra.mxu1 %vm1679_vm1, %v3991_v26  ;;  %6872 = vmatmul.msk.f32.gmra.mxu2 %vm1679_vm1, %v3991_v26  ;;  %v4160_v14 = vpop.f32.mrf.mxu1 }
 0x3a0   : > { %v3764_v51 = vpop.f32.mrf.mxu0  ;;  %v4371_v1 = vpack.c.bf16 %v4160_v14, %v4160_v14  ;;  %v4501_v14 = vsel %vm1679_vm1, %v4013_v59, 0 }
 0x3a1   : > { %v3828_v24 = vadd.f32 %v3764_v51, %v7847_v29 }
 0x3a3   : > { %v3960_v35 = vadd.f32 %v3896_v55, %v3828_v24  ;;  %v3871_v24 = vrot.slane %v8213_v56, 6 }
 0x3a5   : > { %v3992_v10 = vmax.f32 %v3960_v35, 0.0  ;;  %v8222_v12 = vpop.f32.mrf.mxu2 }
 0x3a7   : > { %6841 = vmatmul.msk.f32.gmra.mxu1 %vm1679_vm1, %v3992_v10  ;;  %6873 = vmatmul.msk.f32.gmra.mxu2 %vm1679_vm1, %v3992_v10  ;;  %v4163_v18 = vpop.f32.mrf.mxu1  ;;  %v3902_v10 = vperm.slane %v3871_v24, 0 }
 0x3a8   : > { %v3767_v52 = vpop.f32.mrf.mxu0  ;;  %v4372_v46 = vpack.c.bf16 %v4163_v18, %v4163_v18 }
 0x3a9   : > { %v3829_v8 = vadd.f32 %v3767_v52, %v7856_v39 }
 0x3aa   : > { %6890 = vmatmul.msk.bf16.vlgmr.msra.gmra.mxu3 %vm1679_vm1, %v4371_v1  ;;  %v3872_v1 = vrot.slane %v8213_v56, 7 }
 0x3ab   : > { %v3961_v29 = vadd.f32 %v3897_v62, %v3829_v8  ;;  %4472 = vmatpush.bf16.xpose.msra.mxu3 %v4463_v6  ;;  %v4014_v6 = vld [vmem:[%s8123_s16 + $0x6] sm:$0x1] }
 0x3ad   : > { %v3993_v4 = vmax.f32 %v3961_v29, 0.0  ;;  %v8231_v32 = vpop.f32.mrf.mxu2  ;;  %v3903_v29 = vperm.slane %v3872_v1, 0 }
 0x3af   : > { %6842 = vmatmul.msk.f32.gmra.mxu1 %vm1679_vm1, %v3993_v4  ;;  %6874 = vmatmul.msk.f32.gmra.mxu2 %vm1679_vm1, %v3993_v4  ;;  %v4166_v36 = vpop.f32.mrf.mxu1 }
 0x3b0   : > { %v3770_v41 = vpop.f32.mrf.mxu0  ;;  %v4373_v26 = vpack.c.bf16 %v4166_v36, %v4166_v36 }
 0x3b1   : > { %v3830_v58 = vadd.f32 %v3770_v41, %v7866_v54  ;;  %v8284_v41 = vld [vmem:[%s8086_s28 + $0x18] sm:$0xff]  ;;  %s7129_s28 = smov 8  }
 0x3b2   : > { %v3875_v59 = vrot.slane %v8284_v41, 3 }
 0x3b3   : > { %v3962_v39 = vadd.f32 %v3898_v48, %v3830_v58  ;;  %v4520_v48 = vsel %vm1679_vm1, %v4014_v6, 0 }
 0x3b5   : > { %v3994_v3 = vmax.f32 %v3962_v39, 0.0  ;;  %v8237_v37 = vpop.f32.mrf.mxu2  ;;  %v3904_v39 = vperm.slane %v8284_v41, 0 }
 0x3b7   : > { %6843 = vmatmul.msk.f32.gmra.mxu1 %vm1679_vm1, %v3994_v3  ;;  %6875 = vmatmul.msk.f32.gmra.mxu2 %vm1679_vm1, %v3994_v3  ;;  %v4169_v45 = vpop.f32.mrf.mxu1 }
 0x3b8   : > { %v3773_v53 = vpop.f32.mrf.mxu0  ;;  %v4374_v7 = vpack.c.bf16 %v4169_v45, %v4169_v45 }
 0x3b9   : > { %v3831_v27 = vadd.f32 %v3773_v53, %v7878_v0  ;;  %v4015_v53 = vld [vmem:[%s8123_s16 + $0x7] sm:$0x1] }
 0x3ba   : > { %6891 = vmatmul.msk.bf16.vlgmr.msrb.gmra.mxu3 %vm1679_vm1, %v4372_v46  ;;  %v4539_v23 = vsel %vm1679_vm1, %v4015_v53, 0 }
 0x3bb   : > { %v3963_v54 = vadd.f32 %v3899_v15, %v3831_v27  ;;  %4491 = vmatpush.bf16.xpose.msrb.mxu3 %v4482_v13  ;;  %v3873_v15 = vrot.slane %v8284_v41, 1 }
 0x3bd   : > { %v3995_v21 = vmax.f32 %v3963_v54, 0.0  ;;  %v8246_v49 = vpop.f32.mrf.mxu2  ;;  %v3905_v13 = vperm.slane %v3873_v15, 0 }
 0x3bf   : > { %6844 = vmatmul.msk.f32.gmra.mxu1 %vm1679_vm1, %v3995_v21  ;;  %6876 = vmatmul.msk.f32.gmra.mxu2 %vm1679_vm1, %v3995_v21  ;;  %v8250_v50 = vpop.f32.mrf.mxu1 }
 0x3c0   : > { %v3776_v44 = vpop.f32.mrf.mxu0  ;;  %v4375_v27 = vpack.c.bf16 %v8250_v50, %v8250_v50 }
 0x3c1   : > { %v3832_v0 = vadd.f32 %v3776_v44, %v7890_v22  ;;  %v3874_v44 = vrot.slane %v8284_v41, 2 }
 0x3c3   : > { %v3964_v20 = vadd.f32 %v3900_v11, %v3832_v0  ;;  %v3906_v50 = vperm.slane %v3874_v44, 0 }
 0x3c5   : > { %v3996_v28 = vmax.f32 %v3964_v20, 0.0  ;;  %v8254_v63 = vpop.f32.mrf.mxu2 }
 0x3c7   : > { %6845 = vmatmul.msk.f32.gmra.mxu1 %vm1679_vm1, %v3996_v28  ;;  %6877 = vmatmul.msk.f32.gmra.mxu2 %vm1679_vm1, %v3996_v28  ;;  %v8259_v31 = vpop.f32.mrf.mxu1 }
 0x3c8   : > { %v3779_v55 = vpop.f32.mrf.mxu0 }
 0x3c9   : > { %v3833_v22 = vadd.f32 %v3779_v55, %v7899_v34  ;;  %v4016_v55 = vld [vmem:[%s8123_s16 + $0x8] sm:$0x1] }
 0x3ca   : > { %6892 = vmatmul.msk.bf16.vlgmr.msra.gmra.mxu3 %vm1679_vm1, %v4373_v26 }
 0x3cb   : > { %v3965_v51 = vadd.f32 %v3901_v61, %v3833_v22  ;;  %4510 = vmatpush.bf16.xpose.msra.mxu3 %v4501_v14  ;;  %v3907_v14 = vperm.slane %v3875_v59, 0  ;;  %v4376_v22 = vpack.c.bf16 %v8259_v31, %v8259_v31 }
 0x3cd   : > { %v3997_v35 = vmax.f32 %v3965_v51, 0.0  ;;  %v8265_v47 = vpop.f32.mrf.mxu2 }
 0x3cf   : > { %6846 = vmatmul.msk.f32.gmra.mxu1 %vm1679_vm1, %v3997_v35  ;;  %6878 = vmatmul.msk.f32.gmra.mxu2 %vm1679_vm1, %v3997_v35  ;;  %v8269_v62 = vpop.f32.mrf.mxu1 }
 0x3d0   : > { %v3782_v30 = vpop.f32.mrf.mxu0 }
 0x3d1   : > { %v3834_v34 = vadd.f32 %v3782_v30, %v7912_v42  ;;  %v3876_v30 = vrot.slane %v8284_v41, 4 }
 0x3d3   : > { %v3966_v18 = vadd.f32 %v3902_v10, %v3834_v34  ;;  %v3908_v31 = vperm.slane %v3876_v30, 0 }
 0x3d5   : > { %v3998_v52 = vmax.f32 %v3966_v18, 0.0  ;;  %v8274_v8 = vpop.f32.mrf.mxu2 }
 0x3d7   : > { %6847 = vmatmul.msk.f32.gmra.mxu1 %vm1679_vm1, %v3998_v52  ;;  %6879 = vmatmul.msk.f32.gmra.mxu2 %vm1679_vm1, %v3998_v52  ;;  %v8280_v42 = vpop.f32.mrf.mxu1 }
 0x3d8   : > { %v3785_v4 = vpop.f32.mrf.mxu0  ;;  %v4378_v44 = vpack.c.bf16 %v8280_v42, %v8280_v42 }
 0x3d9   : > { %v3835_v36 = vadd.f32 %v3785_v4, %v7924_v9  ;;  %v4017_v4 = vld [vmem:[%s8123_s16 + $0x9] sm:$0x1] }
 0x3da   : > { %6893 = vmatmul.msk.bf16.vlgmr.msrb.gmra.mxu3 %vm1679_vm1, %v4374_v7 }
 0x3db   : > { %v3967_v56 = vadd.f32 %v3903_v29, %v3835_v36  ;;  %4529 = vmatpush.bf16.xpose.msrb.mxu3 %v4520_v48  ;;  %v3877_v29 = vrot.slane %v8284_v41, 5  ;;  %v4377_v36 = vpack.c.bf16 %v8269_v62, %v8269_v62 }
 0x3dd   : > { %v3999_v58 = vmax.f32 %v3967_v56, 0.0  ;;  %v8289_v17 = vpop.f32.mrf.mxu2  ;;  %v3909_v48 = vperm.slane %v3877_v29, 0 }
 0x3df   : > { %6848 = vmatmul.msk.f32.gmra.mxu1 %vm1679_vm1, %v3999_v58  ;;  %6880 = vmatmul.msk.f32.gmra.mxu2 %vm1679_vm1, %v3999_v58  ;;  %v8293_v45 = vpop.f32.mrf.mxu1 }
 0x3e0   : > { %v3788_v3 = vpop.f32.mrf.mxu0 }
 0x3e1   : > { %v3836_v9 = vadd.f32 %v3788_v3, %v7948_v38 }
 0x3e3   : > { %v3968_v5 = vadd.f32 %v3904_v39, %v3836_v9  ;;  %v3878_v9 = vrot.slane %v8284_v41, 6 }
 0x3e5   : > { %v4000_v46 = vmax.f32 %v3968_v5, 0.0  ;;  %v8302_v21 = vpop.f32.mrf.mxu2  ;;  %v3910_v62 = vperm.slane %v3878_v9, 0 }
 0x3e7   : > { %6849 = vmatmul.msk.f32.gmra.mxu1 %vm1679_vm1, %v4000_v46  ;;  %6881 = vmatmul.msk.f32.gmra.mxu2 %vm1679_vm1, %v4000_v46  ;;  %v8306_v20 = vpop.f32.mrf.mxu1 }
 0x3e8   : > { %v3791_v54 = vpop.f32.mrf.mxu0 }
 0x3e9   : > { %v3837_v38 = vadd.f32 %v3791_v54, %v7960_v60 }
 0x3ea   : > { %6894 = vmatmul.msk.bf16.vlgmr.msra.gmra.mxu3 %vm1679_vm1, %v4375_v27  ;;  %v3879_v27 = vrot.slane %v8284_v41, 7 }
 0x3eb   : > { %v3969_v11 = vadd.f32 %v3905_v13, %v3837_v38  ;;  %4548 = vmatpush.bf16.xpose.msra.mxu3 %v4539_v23  ;;  %v4018_v38 = vld [vmem:[%s8123_s16 + $0xa] sm:$0x1] }
 0x3ed   : > { %v4001_v0 = vmax.f32 %v3969_v11, 0.0  ;;  %v8312_v61 = vpop.f32.mrf.mxu2  ;;  %v3911_v11 = vperm.slane %v3879_v27, 0  ;;  %v4021_v27 = vld [vmem:[%s8123_s16 + $0xd] sm:$0x1] }
 0x3ef   : > { %6850 = vmatmul.msk.f32.gmra.mxu1 %vm1679_vm1, %v4001_v0  ;;  %6882 = vmatmul.msk.f32.gmra.mxu2 %vm1679_vm1, %v4001_v0  ;;  %v8319_v51 = vpop.f32.mrf.mxu1 }
 0x3f0   : > { %v3794_v40 = vpop.f32.mrf.mxu0 }
 0x3f1   : > { %v3838_v60 = vadd.f32 %v3794_v40, %v7969_v2  ;;  %v4558_v2 = vsel %vm1679_vm1, %v4016_v55, 0 }
 0x3f3   : > { %v3970_v28 = vadd.f32 %v3906_v50, %v3838_v60 }
 0x3f5   : > { %v4002_v26 = vmax.f32 %v3970_v28, 0.0  ;;  %v8325_v18 = vpop.f32.mrf.mxu2 }
 0x3f7   : > { %6851 = vmatmul.msk.f32.gmra.mxu1 %vm1679_vm1, %v4002_v26  ;;  %6883 = vmatmul.msk.f32.gmra.mxu2 %vm1679_vm1, %v4002_v26  ;;  %v8330_v6 = vpop.f32.mrf.mxu1  ;;  %v4028_v26 = vld [vmem:[%s8123_s16 + $0x14] sm:$0x1] }
 0x3f8   : > { %v3797_v24 = vpop.f32.mrf.mxu0  ;;  %v4786_v42 = vsel %vm1679_vm1, %v4028_v26, 0 }
 0x3f9   : > { %v3839_v35 = vadd.f32 %v3797_v24, %v7977_v25  ;;  %4795 = vmatpush.bf16.xpose.msrb.mxu0 %v4786_v42  ;;  %v4019_v24 = vld [vmem:[%s8123_s16 + $0xb] sm:$0x1] }
 0x3fa   : > { %6895 = vmatmul.msk.bf16.vlgmr.msrb.gmra.mxu3 %vm1679_vm1, %v4376_v22  ;;  %v4615_v30 = vsel %vm1679_vm1, %v4019_v24, 0  ;;  %v4036_v24 = vld [vmem:[%s8123_s16 + $0x1c] sm:$0x1] }
 0x3fb   : > { %v3971_v10 = vadd.f32 %v3907_v14, %v3839_v35  ;;  %4567 = vmatpush.bf16.xpose.msrb.mxu3 %v4558_v2  ;;  %v4029_v2 = vld [vmem:[%s8123_s16 + $0x15] sm:$0x1] }
 0x3fc   : > { %v4805_v35 = vsel %vm1679_vm1, %v4029_v2, 0  ;;  %v4382_v2 = vpack.c.bf16 %v8330_v6, %v8330_v6  ;;  %v4023_v6 = vld [vmem:[%s8123_s16 + $0xf] sm:$0x1] }
 0x3fd   : > { %v4003_v34 = vmax.f32 %v3971_v10, 0.0  ;;  %v8338_v56 = vpop.f32.mrf.mxu2  ;;  %v4379_v10 = vpack.c.bf16 %v8293_v45, %v8293_v45  ;;  %4814 = vmatpush.bf16.xpose.msra.mxu1 %v4805_v35 }
 0x3ff   : > { %6852 = vmatmul.msk.f32.gmra.mxu1 %vm1679_vm1, %v4003_v34  ;;  %6884 = vmatmul.msk.f32.gmra.mxu2 %vm1679_vm1, %v4003_v34  ;;  %v8344_v5 = vpop.f32.mrf.mxu1 }
 0x400   : > { %v3800_v1 = vpop.f32.mrf.mxu0 }
 0x401   : > { %v3840_v52 = vadd.f32 %v3800_v1, %v7988_v43  ;;  %v4577_v43 = vsel %vm1679_vm1, %v4017_v4, 0 }
 0x403   : > { %v3972_v25 = vadd.f32 %v3908_v31, %v3840_v52 }
 0x405   : > { %v4004_v7 = vmax.f32 %v3972_v25, 0.0  ;;  %v8349_v13 = vpop.f32.mrf.mxu2  ;;  %v4030_v25 = vld [vmem:[%s8123_s16 + $0x16] sm:$0x1] }
 0x406   : > { %v4824_v29 = vsel %vm1679_vm1, %v4030_v25, 0 }
 0x407   : > { %6853 = vmatmul.msk.f32.gmra.mxu1 %vm1679_vm1, %v4004_v7  ;;  %6885 = vmatmul.msk.f32.gmra.mxu2 %vm1679_vm1, %v4004_v7 }
 0x408   : > { %v3803_v58 = vpop.f32.mrf.mxu0  ;;  %4833 = vmatpush.bf16.xpose.msra.mxu2 %v4824_v29 }
 0x409   : > { %v3841_v39 = vadd.f32 %v3803_v58, %v7995_v19  ;;  %v4380_v58 = vpack.c.bf16 %v8306_v20, %v8306_v20 }
 0x40a   : > { %6896 = vmatmul.msk.bf16.vlgmr.msra.gmra.mxu3 %vm1679_vm1, %v4377_v36  ;;  %v4020_v36 = vld [vmem:[%s8123_s16 + $0xc] sm:$0x1] }
 0x40b   : > { %v3973_v3 = vadd.f32 %v3909_v48, %v3841_v39  ;;  %4586 = vmatpush.bf16.xpose.msra.mxu3 %v4577_v43  ;;  %v4634_v43 = vsel %vm1679_vm1, %v4020_v36, 0  ;;  %v5010_v36 = vld [vmem:[%s8894_s13] sm:$0x3] }
 0x40c   : > { %v8352_v54 = vpop.f32.mrf.mxu1 }
 0x40d   : > { %v4005_v15 = vmax.f32 %v3973_v3, 0.0 }
 0x40f   : > { %6854 = vmatmul.msk.f32.gmra.mxu1 %vm1679_vm1, %v4005_v15  ;;  %6886 = vmatmul.msk.f32.gmra.mxu2 %vm1679_vm1, %v4005_v15  ;;  %v4032_v15 = vld [vmem:[%s8123_s16 + $0x18] sm:$0x1] }
 0x410   : > { %v3806_v46 = vpop.f32.mrf.mxu0 }
 0x411   : > { %v3842_v53 = vadd.f32 %v3806_v46, %v8006_v57  ;;  %v4596_v57 = vsel %vm1679_vm1, %v4018_v38, 0 }
 0x412   : > { %v8361_v40 = vpop.f32.mrf.mxu2 }
 0x413   : > { %v3974_v19 = vadd.f32 %v3910_v62, %v3842_v53  ;;  %v4862_v62 = vsel %vm1679_vm1, %v4032_v15, 0  ;;  %v4691_v15 = vsel %vm1679_vm1, %v4023_v6, 0 }
 0x415   : > { %v4006_v23 = vmax.f32 %v3974_v19, 0.0 }
 0x417   : > { %6855 = vmatmul.msk.f32.gmra.mxu1 %vm1679_vm1, %v4006_v23  ;;  %6887 = vmatmul.msk.f32.gmra.mxu2 %vm1679_vm1, %v4006_v23  ;;  %v4033_v23 = vld [vmem:[%s8123_s16 + $0x19] sm:$0x1] }
 0x418   : > { %v3809_v0 = vpop.f32.mrf.mxu0  ;;  %v4881_v38 = vsel %vm1679_vm1, %v4033_v23, 0 }
 0x419   : > { %v3843_v50 = vadd.f32 %v3809_v0, %v8014_v16 }
 0x41a   : > { %6897 = vmatmul.msk.bf16.vlgmr.msrb.gmra.mxu3 %vm1679_vm1, %v4378_v44  ;;  %v4653_v44 = vsel %vm1679_vm1, %v4021_v27, 0  ;;  %v4038_v27 = vld [vmem:[%s8123_s16 + $0x1e] sm:$0x1] }
 0x41b   : > { %v3975_v41 = vadd.f32 %v3911_v11, %v3843_v50  ;;  %4605 = vmatpush.bf16.xpose.msrb.mxu3 %v4596_v57  ;;  %v4381_v11 = vpack.c.bf16 %v8319_v51, %v8319_v51  ;;  %v4976_v23 = vsel %vm1679_vm1, %v4038_v27, 0 }
 0x41c   : > { %v8364_v60 = vpop.f32.mrf.mxu1 }
 0x41d   : > { %v4007_v28 = vmax.f32 %v3975_v41, 0.0  ;;  %v8366_v59 = vpop.f32.mrf.mxu3 }
 0x41f   : > { %6856 = vmatmul.msk.f32.gmra.mxu1 %vm1679_vm1, %v4007_v28  ;;  %6888 = vmatmul.msk.f32.gmra.mxu2 %vm1679_vm1, %v4007_v28  ;;  %v4034_v28 = vld [vmem:[%s8123_s16 + $0x1a] sm:$0x1] }
 0x420   : > { %v4900_v26 = vsel %vm1679_vm1, %v4034_v28, 0 }
 0x422   : > { %v8372_v16 = vpop.f32.mrf.mxu2 }
 0x424   : > { %v4205_v55 = vpop.f32.mrf.mxu1 }
 0x425   : > { %v4386_v14 = vpack.c.bf16 %v4205_v55, %v4205_v55  ;;  %v4419_v22 = vpop.f32.mrf.mxu3 }
 0x426   : > { %v4022_v22 = vld [vmem:[%s8123_s16 + $0xe] sm:$0x1] }
 0x427   : > { %6905 = vmatmul.msk.bf16.vlgmr.msra.gmra.mxu0 %vm1679_vm1, %v4386_v14  ;;  %v4672_v35 = vsel %vm1679_vm1, %v4022_v22, 0 }
 0x428   : > { %4871 = vmatpush.bf16.xpose.msra.mxu0 %v4862_v62 }
 0x42a   : > { %v8381_v34 = vpop.f32.mrf.mxu2  ;;  %6898 = vmatmul.msk.bf16.vlgmr.msra.gmra.mxu3 %vm1679_vm1, %v4379_v10  ;;  %v4938_v10 = vsel %vm1679_vm1, %v4036_v24, 0 }
 0x42b   : > { %4624 = vmatpush.bf16.xpose.msra.mxu3 %v4615_v30 }
 0x42c   : > { %v4208_v31 = vpop.f32.mrf.mxu1 }
 0x42d   : > { %v4387_v1 = vpack.c.bf16 %v4208_v31, %v4208_v31  ;;  %v8384_v52 = vpop.f32.mrf.mxu3 }
 0x42f   : > { %6906 = vmatmul.msk.bf16.vlgmr.msrb.gmra.mxu1 %vm1679_vm1, %v4387_v1 }
 0x430   : > { %4890 = vmatpush.bf16.xpose.msrb.mxu1 %v4881_v38 }
 0x432   : > { %v8389_v45 = vpop.f32.mrf.mxu2 }
 0x434   : > { %v4211_v7 = vpop.f32.mrf.mxu1 }
 0x435   : > { %v4388_v4 = vpack.c.bf16 %v4211_v7, %v4211_v7  ;;  %v4438_v48 = vpop.f32.mrf.mxu3 }
 0x436   : > { %v4037_v48 = vld [vmem:[%s8123_s16 + $0x1d] sm:$0x1] }
 0x437   : > { %6907 = vmatmul.msk.bf16.vlgmr.msrb.gmra.mxu2 %vm1679_vm1, %v4388_v4 }
 0x438   : > { %4909 = vmatpush.bf16.xpose.msrb.mxu2 %v4900_v26 }
 0x43a   : > { %v8396_v39 = vpop.f32.mrf.mxu2  ;;  %6899 = vmatmul.msk.bf16.vlgmr.msrb.gmra.mxu3 %vm1679_vm1, %v4380_v58  ;;  %v4957_v58 = vsel %vm1679_vm1, %v4037_v48, 0 }
 0x43b   : > { %4643 = vmatpush.bf16.xpose.msrb.mxu3 %v4634_v43  ;;  %v4383_v43 = vpack.c.bf16 %v8344_v5, %v8344_v5 }
 0x43c   : > { %v8399_v3 = vpop.f32.mrf.mxu1 }
 0x43d   : > { %v8401_v9 = vpop.f32.mrf.mxu3 }
 0x442   : > { %v8405_v46 = vpop.f32.mrf.mxu2 }
 0x444   : > { %v4217_v53 = vpop.f32.mrf.mxu1 }
 0x445   : > { %v4390_v20 = vpack.c.bf16 %v4217_v53, %v4217_v53  ;;  %v4457_v19 = vpop.f32.mrf.mxu3 }
 0x447   : > { %6909 = vmatmul.msk.bf16.vlgmr.msrb.gmra.mxu0 %vm1679_vm1, %v4390_v20 }
 0x448   : > { %4947 = vmatpush.bf16.xpose.msrb.mxu0 %v4938_v10 }
 0x44a   : > { %v8414_v0 = vpop.f32.mrf.mxu2  ;;  %6900 = vmatmul.msk.bf16.vlgmr.msra.gmra.mxu3 %vm1679_vm1, %v4381_v11 }
 0x44b   : > { %4662 = vmatpush.bf16.xpose.msra.mxu3 %v4653_v44  ;;  %v4027_v44 = vld [vmem:[%s8123_s16 + $0x13] sm:$0x1] }
 0x44c   : > { %v4220_v57 = vpop.f32.mrf.mxu1  ;;  %v4767_v28 = vsel %vm1679_vm1, %v4027_v44, 0 }
 0x44d   : > { %v4391_v50 = vpack.c.bf16 %v4220_v57, %v4220_v57  ;;  %v8417_v41 = vpop.f32.mrf.mxu3 }
 0x44f   : > { %6910 = vmatmul.msk.bf16.vlgmr.msra.gmra.mxu1 %vm1679_vm1, %v4391_v50  ;;  %v4384_v50 = vpack.c.bf16 %v8352_v54, %v8352_v54 }
 0x450   : > { %4966 = vmatpush.bf16.xpose.msra.mxu1 %v4957_v58 }
 0x452   : > { %v8422_v51 = vpop.f32.mrf.mxu2 }
 0x454   : > { %v4223_v42 = vpop.f32.mrf.mxu1 }
 0x455   : > { %v4392_v55 = vpack.c.bf16 %v4223_v42, %v4223_v42  ;;  %v4476_v14 = vpop.f32.mrf.mxu3 }
 0x457   : > { %6911 = vmatmul.msk.bf16.vlgmr.msra.gmra.mxu2 %vm1679_vm1, %v4392_v55 }
 0x458   : > { %4985 = vmatpush.bf16.xpose.msra.mxu2 %v4976_v23 }
 0x45a   : > { %v8431_v30 = vpop.f32.mrf.mxu2  ;;  %6901 = vmatmul.msk.bf16.vlgmr.msrb.gmra.mxu3 %vm1679_vm1, %v4382_v2  ;;  %v4031_v2 = vld [vmem:[%s8123_s16 + $0x17] sm:$0x1] }
 0x45b   : > { %4681 = vmatpush.bf16.xpose.msrb.mxu3 %v4672_v35  ;;  %v4385_v35 = vpack.c.bf16 %v8364_v60, %v8364_v60  ;;  %v4843_v54 = vsel %vm1679_vm1, %v4031_v2, 0  ;;  %v4035_v60 = vld [vmem:[%s8123_s16 + $0x1b] sm:$0x1] }
 0x45c   : > { %v8434_v31 = vpop.f32.mrf.mxu1 }
 0x45d   : > { %v8436_v1 = vpop.f32.mrf.mxu3 }
 0x462   : > { %v8438_v25 = vpop.f32.mrf.mxu2 }
 0x464   : > { %v4229_v29 = vpop.f32.mrf.mxu1 }
 0x465   : > { %v4394_v7 = vpack.c.bf16 %v4229_v29, %v4229_v29  ;;  %v4495_v4 = vpop.f32.mrf.mxu3 }
 0x467   : > { %6913 = vmatmul.msk.bf16.vlgmr.msra.gmra.mxu0 %vm1679_vm1, %v4394_v7 }
 0x468   : > { %6921 = vmatpush.msk.msra.mxu0 %vm5108_vm2, %v5010_v36 }
 0x46a   : > { %6902 = vmatmul.msk.bf16.vlgmr.msra.gmra.mxu3 %vm1679_vm1, %v4383_v43  ;;  %v8451_v62 = vpop.f32.mrf.mxu2  ;;  %v4389_v43 = vpack.c.bf16 %v8399_v3, %v8399_v3 }
 0x46b   : > { %4700 = vmatpush.bf16.xpose.msra.mxu3 %v4691_v15  ;;  %v4919_v15 = vsel %vm1679_vm1, %v4035_v60, 0 }
 0x46c   : > { %v4232_v53 = vpop.f32.mrf.mxu1 }
 0x46d   : > { %v4395_v20 = vpack.c.bf16 %v4232_v53, %v4232_v53  ;;  %v8453_v19 = vpop.f32.mrf.mxu3 }
 0x46f   : > { %6914 = vmatmul.msk.bf16.vlgmr.msrb.gmra.mxu1 %vm1679_vm1, %v4395_v20 }
 0x472   : > { %v8459_v57 = vpop.f32.mrf.mxu2 }
 0x474   : > { %v4235_v5 = vpop.f32.mrf.mxu1 }
 0x475   : > { %v4396_v38 = vpack.c.bf16 %v4235_v5, %v4235_v5  ;;  %v4514_v11 = vpop.f32.mrf.mxu3 }
 0x477   : > { %6915 = vmatmul.msk.bf16.vlgmr.msrb.gmra.mxu2 %vm1679_vm1, %v4396_v38  ;;  %v4039_v38 = vld [vmem:[%s8123_s16 + $0x1f] sm:$0x1] }
 0x478   : > { %v4995_v11 = vsel %vm1679_vm1, %v4039_v38, 0 }
 0x47a   : > { %6903 = vmatmul.msk.bf16.vlgmr.msrb.gmra.mxu3 %vm1679_vm1, %v4384_v50  ;;  %v8466_v55 = vpop.f32.mrf.mxu2 }
 0x47b   : > { %4776 = vmatpush.bf16.xpose.msrb.mxu3 %v4767_v28 }
 0x47c   : > { %v4238_v26 = vpop.f32.mrf.mxu1 }
 0x47d   : > { %v4531_v42 = vpop.f32.mrf.mxu3 }
 0x482   : > { %v8473_v10 = vpop.f32.mrf.mxu2 }
 0x484   : > { %v4241_v14 = vpop.f32.mrf.mxu1 }
 0x485   : > { %v4398_v22 = vpack.c.bf16 %v4241_v14, %v4241_v14  ;;  %v4533_v24 = vpop.f32.mrf.mxu3 }
 0x487   : > { %6917 = vmatmul.msk.bf16.vlgmr.msrb.gmra.mxu0 %vm1679_vm1, %v4398_v22 }
 0x48a   : > { %6904 = vmatmul.msk.bf16.vlgmr.msra.gmra.mxu3 %vm1679_vm1, %v4385_v35  ;;  %v8477_v6 = vpop.f32.mrf.mxu2 }
 0x48b   : > { %4852 = vmatpush.bf16.xpose.msra.mxu3 %v4843_v54 }
 0x48c   : > { %v4244_v29 = vpop.f32.mrf.mxu1 }
 0x48d   : > { %v4399_v7 = vpack.c.bf16 %v4244_v29, %v4244_v29  ;;  %v4550_v4 = vpop.f32.mrf.mxu3 }
 0x48f   : > { %6918 = vmatmul.msk.bf16.vlgmr.msra.gmra.mxu1 %vm1679_vm1, %v4399_v7 }
 0x492   : > { %v8487_v20 = vpop.f32.mrf.mxu2 }
 0x494   : > { %v4247_v48 = vpop.f32.mrf.mxu1 }
 0x495   : > { %v4400_v36 = vpack.c.bf16 %v4247_v48, %v4247_v48  ;;  %v4552_v58 = vpop.f32.mrf.mxu3 }
 0x497   : > { %6919 = vmatmul.msk.bf16.vlgmr.msra.gmra.mxu2 %vm1679_vm1, %v4400_v36  ;;  %6922 = vmatmul.msk.f32.vlgmr.msra.gmra.mxu0 %vm5011_vm3, %v8366_v59  ;;  %v4393_v59 = vpack.c.bf16 %v8434_v31, %v8434_v31  ;;  %v4397_v31 = vpack.c.bf16 %v4238_v26, %v4238_v26 }
 0x49a   : > { %6908 = vmatmul.msk.bf16.vlgmr.msrb.gmra.mxu3 %vm1679_vm1, %v4389_v43  ;;  %v8498_v3 = vpop.f32.mrf.mxu2 }
 0x49b   : > { %4928 = vmatpush.bf16.xpose.msrb.mxu3 %v4919_v15 }
 0x49c   : > { %v4250_v27 = vpop.f32.mrf.mxu1 }
 0x49d   : > { %v4569_v53 = vpop.f32.mrf.mxu3 }
 0x49f   : > { %6923 = vmatmul.msk.f32.gmra.mxu0 %vm5011_vm3, %v8384_v52 }
 0x4a2   : > { %v8504_v28 = vpop.f32.mrf.mxu2 }
 0x4a3   : > { %8897 = vst [vmem:[#allocation2_spill] sm:$0xff] %v8504_v28 }
 0x4a4   : > { %v8491_v23 = vpop.f32.mrf.mxu0 }
 0x4a5   : > { %v4571_v5 = vpop.f32.mrf.mxu3 }
 0x4a7   : > { %6924 = vmatmul.msk.f32.gmra.mxu0 %vm5011_vm3, %v8401_v9 }
 0x4aa   : > { %6912 = vmatmul.msk.bf16.vlgmr.msra.gmra.mxu3 %vm1679_vm1, %v4393_v59 }
 0x4ab   : > { %5004 = vmatpush.bf16.xpose.msra.mxu3 %v4995_v11 }
 0x4ac   : > { %v4723_v44 = vpop.f32.mrf.mxu0  ;;  %v4740_v52 = vpop.f32.mrf.mxu1 }
 0x4ad   : > { %v4588_v50 = vpop.f32.mrf.mxu3 }
 0x4af   : > { %6925 = vmatmul.msk.f32.gmra.mxu0 %vm5011_vm3, %v8417_v41  ;;  %v4401_v41 = vpack.c.bf16 %v4250_v27, %v4250_v27 }
 0x4b4   : > { %v4742_v14 = vpop.f32.mrf.mxu1 }
 0x4b5   : > { %v4590_v9 = vpop.f32.mrf.mxu3 }
 0x4b7   : > { %6926 = vmatmul.msk.f32.gmra.mxu0 %vm5011_vm3, %v8436_v1 }
 0x4ba   : > { %v4759_v22 = vpop.f32.mrf.mxu2  ;;  %6916 = vmatmul.msk.bf16.vlgmr.msrb.gmra.mxu3 %vm1679_vm1, %v4397_v31 }
 0x4bd   : > { %v4607_v24 = vpop.f32.mrf.mxu3 }
 0x4bf   : > { %6927 = vmatmul.msk.f32.gmra.mxu0 %vm5011_vm3, %v8453_v19 }
 0x4c2   : > { %v4761_v2 = vpop.f32.mrf.mxu2 }
 0x4c4   : > { %v4797_v35 = vpop.f32.mrf.mxu0 }
 0x4c5   : > { %v4609_v54 = vpop.f32.mrf.mxu3 }
 0x4c7   : > { %6928 = vmatmul.msk.f32.gmra.mxu0 %vm5011_vm3, %v4531_v42 }
 0x4ca   : > { %6920 = vmatmul.msk.bf16.vlgmr.msra.gmra.mxu3 %vm1679_vm1, %v4401_v41 }
 0x4cc   : > { %v4799_v29 = vpop.f32.mrf.mxu0  ;;  %v8513_v7 = vpop.f32.mrf.mxu1 }
 0x4cd   : > { %v4626_v1 = vpop.f32.mrf.mxu3 }
 0x4cf   : > { %6929 = vmatmul.msk.f32.gmra.mxu0 %vm5011_vm3, %v4550_v4 }
 0x4d4   : > { %v4818_v26 = vpop.f32.mrf.mxu1 }
 0x4d5   : > { %v4628_v48 = vpop.f32.mrf.mxu3 }
 0x4d7   : > { %6930 = vmatmul.msk.f32.gmra.mxu0 %vm5011_vm3, %v4569_v53 }
 0x4da   : > { %v8517_v36 = vpop.f32.mrf.mxu2 }
 0x4dd   : > { %v4645_v19 = vpop.f32.mrf.mxu3 }
 0x4df   : > { %6931 = vmatmul.msk.f32.gmra.mxu0 %vm5011_vm3, %v4588_v50 }
 0x4e2   : > { %v4837_v58 = vpop.f32.mrf.mxu2 }
 0x4e4   : > { %v8520_v42 = vpop.f32.mrf.mxu0 }
 0x4e5   : > { %v4647_v60 = vpop.f32.mrf.mxu3 }
 0x4e6   : > { %v5257_v60 = vld [vmem:[%s8549_s25] sm:$0xff] }
 0x4e7   : > { %6932 = vmatmul.msk.f32.gmra.mxu0 %vm5011_vm3, %v4607_v24 }
 0x4ec   : > { %v4875_v43 = vpop.f32.mrf.mxu0  ;;  %v8523_v15 = vpop.f32.mrf.mxu1 }
 0x4ed   : > { %v4664_v27 = vpop.f32.mrf.mxu3 }
 0x4ef   : > { %6933 = vmatmul.msk.f32.gmra.mxu0 %vm5011_vm3, %v4626_v1 }
 0x4f4   : > { %v4894_v4 = vpop.f32.mrf.mxu1 }
 0x4f5   : > { %v4666_v5 = vpop.f32.mrf.mxu3  ;;  %v5267_v4 = vrot.slane %v5257_v60, 3 }
 0x4f7   : > { %6934 = vmatmul.msk.f32.gmra.mxu0 %vm5011_vm3, %v4645_v19 }
 0x4fa   : > { %v8527_v53 = vpop.f32.mrf.mxu2 }
 0x4fd   : > { %v4683_v38 = vpop.f32.mrf.mxu3 }
 0x4ff   : > { %6935 = vmatmul.msk.f32.gmra.mxu0 %vm5011_vm3, %v4664_v27  ;;  %v5265_v27 = vrot.slane %v5257_v60, 1 }
 0x502   : > { %v4913_v59 = vpop.f32.mrf.mxu2 }
 0x503   : > { %v5293_v59 = vperm.slane %v5257_v60, 0 }
 0x504   : > { %v8530_v11 = vpop.f32.mrf.mxu0 }
 0x505   : > { %v4685_v44 = vpop.f32.mrf.mxu3 }
 0x507   : > { %6936 = vmatmul.msk.f32.gmra.mxu0 %vm5011_vm3, %v4683_v38 }
 0x50c   : > { %v4951_v50 = vpop.f32.mrf.mxu0  ;;  %v8533_v14 = vpop.f32.mrf.mxu1 }
 0x50d   : > { %v4702_v9 = vpop.f32.mrf.mxu3  ;;  %v5294_v50 = vperm.slane %v5265_v27, 0 }
 0x50f   : > { %6937 = vmatmul.msk.f32.gmra.mxu0 %vm5011_vm3, %v4702_v9 }
 0x514   : > { %v4970_v31 = vpop.f32.mrf.mxu1  ;;  %v5129_v24 = vpop.f32.mrf.mxu0 }
 0x515   : > { %v4704_v2 = vpop.f32.mrf.mxu3  ;;  %v5225_v38 = vadd.f32 %v5129_v24, %v8215_v33 }
 0x516   : > { %v5296_v2 = vperm.slane %v5267_v4, 0 }
 0x517   : > { %6938 = vmatmul.msk.f32.gmra.mxu0 %vm5011_vm3, %v8491_v23 }
 0x51a   : > { %v8538_v54 = vpop.f32.mrf.mxu2 }
 0x51c   : > { %v5132_v41 = vpop.f32.mrf.mxu0 }
 0x51d   : > { %v4778_v29 = vpop.f32.mrf.mxu3  ;;  %v5226_v44 = vadd.f32 %v5132_v41, %v8222_v12 }
 0x51f   : > { %6939 = vmatmul.msk.f32.gmra.mxu0 %vm5011_vm3, %v4740_v52  ;;  %v5266_v52 = vrot.slane %v5257_v60, 2 }
 0x521   : > { %v5295_v5 = vperm.slane %v5266_v52, 0 }
 0x522   : > { %v4989_v1 = vpop.f32.mrf.mxu2 }
 0x524   : > { %v5135_v26 = vpop.f32.mrf.mxu0 }
 0x525   : > { %v4780_v48 = vpop.f32.mrf.mxu3 }
 0x527   : > { %6940 = vmatmul.msk.f32.gmra.mxu0 %vm5011_vm3, %v4759_v22  ;;  %v5227_v22 = vadd.f32 %v5135_v26, %v8231_v32  ;;  %v5270_v32 = vrot.slane %v5257_v60, 6  ;;  %v5358_v26 = vadd.f32 %v5294_v50, %v5226_v44 }
 0x529   : > { %v5359_v48 = vadd.f32 %v5295_v5, %v5227_v22  ;;  %v5299_v27 = vperm.slane %v5270_v32, 0  ;;  %v5404_v4 = vrot.slane %v5358_v26, 4 }
 0x52b   : > { %v5389_v52 = vrot.slane %v5359_v48, 4 }
 0x52c   : > { %v5138_v19 = vpop.f32.mrf.mxu0 }
 0x52d   : > { %v8542_v58 = vpop.f32.mrf.mxu3  ;;  %v5228_v31 = vadd.f32 %v5138_v19, %v8237_v37  ;;  %v5269_v37 = vrot.slane %v5257_v60, 5 }
 0x52f   : > { %6941 = vmatmul.msk.f32.gmra.mxu0 %vm5011_vm3, %v4778_v29  ;;  %v5268_v29 = vrot.slane %v5257_v60, 4  ;;  %v5360_v24 = vadd.f32 %v5296_v2, %v5228_v31 }
 0x531   : > { %v5297_v41 = vperm.slane %v5268_v29, 0  ;;  %v5271_v29 = vrot.slane %v5257_v60, 7 }
 0x534   : > { %v5141_v23 = vpop.f32.mrf.mxu0 }
 0x535   : > { %v4856_v43 = vpop.f32.mrf.mxu3  ;;  %v5229_v12 = vadd.f32 %v5141_v23, %v8246_v49  ;;  %v5298_v49 = vperm.slane %v5269_v37, 0  ;;  %v5405_v23 = vsel %vm5390_vm4, %v5360_v24, %v5404_v4 }
 0x536   : > { %v7123_v43 = vmov 1983009808  }
 0x537   : > { %6942 = vmatmul.msk.f32.gmra.mxu0 %vm5011_vm3, %v4797_v35  ;;  %v5357_v35 = vadd.f32 %v5293_v59, %v5225_v38  ;;  %v5395_v33 = vunpack.c.l.s4 %v7123_v43  ;;  %v5361_v38 = vadd.f32 %v5297_v41, %v5229_v12 }
 0x539   : > { %v5392_v19 = vrot.slane %v5357_v35, 4  ;;  %v8562_v28 = vunpack.c.0.s8 %v5395_v33  ;;  %v5391_v50 = vsel %vm5390_vm4, %v5389_v52, %v5357_v35  ;;  %v5416_v43 = vrot.slane %v5361_v38, 4 }
 0x53b   : > { %v5393_v5 = vsel %vm5390_vm4, %v5359_v48, %v5392_v19  ;;  %v5397_v35 = vperm.slane %v5391_v50, %v8562_v28  ;;  %v5413_v41 = vperm.slane %v5405_v23, %v8562_v28 }
 0x53c   : > { %v5144_v9 = vpop.f32.mrf.mxu0  ;;  %v5401_v32 = vperm.slane %v5393_v5, %v8562_v28 }
 0x53d   : > { %v8557_v1 = vpop.f32.mrf.mxu3  ;;  %v5230_v31 = vadd.f32 %v5144_v9, %v8254_v63  ;;  %v5300_v9 = vperm.slane %v5271_v29, 0  ;;  %v5440_v5 = vrot.slane %v5397_v35, 4 }
 0x53e   : > { %v5452_v52 = vrot.slane %v5401_v32, 4 }
 0x53f   : > { %6943 = vmatmul.msk.f32.gmra.mxu0 %vm5011_vm3, %v8513_v7  ;;  %v5402_v7 = vrot.slane %v5360_v24, 4  ;;  %v5362_v24 = vadd.f32 %v5298_v49, %v5230_v31 }
 0x541   : > { %v5403_v48 = vsel %vm5390_vm4, %v5402_v7, %v5358_v26  ;;  %v5428_v7 = vrot.slane %v5362_v24, 4 }
 0x544   : > { %v5147_v22 = vpop.f32.mrf.mxu0 }
 0x545   : > { %v5231_v59 = vadd.f32 %v5147_v22, %v8265_v47  ;;  %v4932_v44 = vpop.f32.mrf.mxu3  ;;  %v7124_v47 = vmov 1934713408   ;;  %v5453_v22 = vsel %vm5390_vm4, %v5413_v41, %v5452_v52 }
 0x546   : > { %v5443_v12 = vunpack.c.l.s4 %v7124_v47 }
 0x547   : > { %v5363_v2 = vadd.f32 %v5299_v27, %v5231_v59  ;;  %6944 = vmatmul.msk.f32.gmra.mxu0 %vm5011_vm3, %v8517_v36  ;;  %v5409_v36 = vperm.slane %v5403_v48, %v8562_v28 }
 0x548   : > { %v8581_v27 = vunpack.c.0.s8 %v5443_v12 }
 0x549   : > { %v5414_v33 = vrot.slane %v5363_v2, 4  ;;  %v5417_v63 = vsel %vm5390_vm4, %v5363_v2, %v5416_v43  ;;  %v5438_v23 = vrot.slane %v5409_v36, 4  ;;  %v5450_v43 = vrot.slane %v5413_v41, 4 }
 0x54a   : > { %v5425_v4 = vperm.slane %v5417_v63, %v8562_v28  ;;  %v5461_v49 = vperm.slane %v5453_v22, %v8581_v27 }
 0x54b   : > { %v5415_v37 = vsel %vm5390_vm4, %v5414_v33, %v5361_v38  ;;  %v5441_v38 = vsel %vm5390_vm4, %v5409_v36, %v5440_v5 }
 0x54c   : > { %v5150_v60 = vpop.f32.mrf.mxu0  ;;  %v5421_v44 = vperm.slane %v5415_v37, %v8562_v28  ;;  %v5476_v2 = vrot.slane %v5425_v4, 4  ;;  %v5449_v48 = vperm.slane %v5441_v38, %v8581_v27  ;;  %v5500_v52 = vrot.slane %v5461_v49, 4 }
 0x54d   : > { %v5232_v26 = vadd.f32 %v5150_v60, %v8274_v8  ;;  %v8579_v19 = vpop.f32.mrf.mxu3  ;;  %v5439_v37 = vsel %vm5390_vm4, %v5438_v23, %v5397_v35 }
 0x54e   : > { %v5464_v12 = vrot.slane %v5421_v44, 4  ;;  %v5492_v22 = vrot.slane %v5449_v48, 4  ;;  %v5445_v35 = vperm.slane %v5439_v37, %v8581_v27 }
 0x54f   : > { %v5364_v59 = vadd.f32 %v5300_v9, %v5232_v26  ;;  %6945 = vmatmul.msk.f32.gmra.mxu0 %vm5011_vm3, %v8542_v58 }
 0x551   : > { %v5426_v50 = vrot.slane %v5364_v59, 4  ;;  %v5429_v8 = vsel %vm5390_vm4, %v5364_v59, %v5428_v7  ;;  %v5451_v7 = vsel %vm5390_vm4, %v5450_v43, %v5401_v32 }
 0x552   : > { %v5437_v31 = vperm.slane %v5429_v8, %v8562_v28  ;;  %v5457_v8 = vperm.slane %v5451_v7, %v8581_v27 }
 0x553   : > { %v5427_v29 = vsel %vm5390_vm4, %v5426_v50, %v5362_v24 }
 0x554   : > { %v5153_v33 = vpop.f32.mrf.mxu0  ;;  %v5477_v58 = vsel %vm5390_vm4, %v5437_v31, %v5476_v2  ;;  %v5433_v47 = vperm.slane %v5427_v29, %v8562_v28  ;;  %v5474_v60 = vrot.slane %v5437_v31, 4  ;;  %v5488_v31 = vrot.slane %v5445_v35, 4 }
 0x555   : > { %v5008_v63 = vpop.f32.mrf.mxu3  ;;  %v5485_v9 = vperm.slane %v5477_v58, %v8581_v27  ;;  %v5496_v29 = vrot.slane %v5457_v8, 4 }
 0x556   : > { %v5465_v36 = vsel %vm5390_vm4, %v5433_v47, %v5464_v12  ;;  %v5462_v26 = vrot.slane %v5433_v47, 4 }
 0x557   : > { %6946 = vmatmul.msk.f32.gmra.mxu0 %vm5011_vm3, %v8520_v42  ;;  %v5501_v41 = vsel %vm5390_vm4, %v5485_v9, %v5500_v52  ;;  %v5473_v24 = vperm.slane %v5465_v36, %v8581_v27  ;;  %v5475_v42 = vsel %vm5390_vm4, %v5474_v60, %v5425_v4  ;;  %v5498_v47 = vrot.slane %v5485_v9, 4  ;;  %v5258_v60 = vld [vmem:[%s8549_s25 + $0x8] sm:$0xff] }
 0x558   : > { %5938 = vrot.lane.b32.xlu0 %v5501_v41, %s7125_s26  ;;  %v5463_v5 = vsel %vm5390_vm4, %v5462_v26, %v5421_v44  ;;  %v5481_v44 = vperm.slane %v5475_v42, %v8581_v27  ;;  %v5272_v36 = vrot.slane %v5258_v60, 1  ;;  %v5274_v37 = vrot.slane %v5258_v60, 3 }
 0x559   : > { %v5493_v59 = vsel %vm5390_vm4, %v5473_v24, %v5492_v22  ;;  %v5469_v38 = vperm.slane %v5463_v5, %v8581_v27  ;;  %v5499_v12 = vsel %vm5390_vm4, %v5498_v47, %v5461_v49  ;;  %v5490_v52 = vrot.slane %v5473_v24, 4 }
 0x55a   : > { %5874 = vrot.lane.b32.xlu2 %v5493_v59, %s7126_s24  ;;  %v5497_v4 = vsel %vm5390_vm4, %v5481_v44, %v5496_v29  ;;  %v5494_v43 = vrot.slane %v5481_v44, 4  ;;  %v5273_v49 = vrot.slane %v5258_v60, 2  ;;  %v5233_v26 = vadd.f32 %v5153_v33, %v8289_v17 }
 0x55b   : > { %v5486_v50 = vrot.slane %v5469_v38, 4  ;;  %v5489_v2 = vsel %vm5390_vm4, %v5469_v38, %v5488_v31  ;;  %v5491_v9 = vsel %vm5390_vm4, %v5490_v52, %v5449_v48  ;;  %v5301_v41 = vperm.slane %v5258_v60, 0 }
 0x55c   : > { %v5156_v23 = vpop.f32.mrf.mxu0  ;;  %v5302_v22 = vperm.slane %v5272_v36, 0  ;;  %v5304_v59 = vperm.slane %v5274_v37, 0  ;;  %v5276_v31 = vrot.slane %v5258_v60, 5 }
 0x55d   : > { %v8614_v32 = vsel %vm5390_vm4, %v5486_v50, %v5445_v35  ;;  %v5234_v24 = vadd.f32 %v5156_v23, %v8302_v21  ;;  %v5275_v35 = vrot.slane %v5258_v60, 4  ;;  %v5365_v38 = vadd.f32 %v5301_v41, %v5233_v26 }
 0x55f   : > { %6947 = vmatmul.msk.f32.gmra.mxu0 %vm5011_vm3, %v8523_v15  ;;  %v5495_v15 = vsel %vm5390_vm4, %v5494_v43, %v5457_v8  ;;  %v5366_v42 = vadd.f32 %v5302_v22, %v5234_v24  ;;  %v5305_v21 = vperm.slane %v5275_v35, 0  ;;  %v5504_v8 = vrot.slane %v5365_v38, 4 }
 0x560   : > { %5842 = vrot.lane.b32.xlu0 %v5489_v2, %s7127_s21  ;;  %v5306_v43 = vperm.slane %v5276_v31, 0 }
 0x561   : > { %v5516_v23 = vrot.slane %v5366_v42, 4 }
 0x562   : > { %5906 = vrot.lane.b32.xlu2 %v5497_v4, %s7128_s27 }
 0x564   : > { %v5159_v58 = vpop.f32.mrf.mxu0 }
 0x565   : > { %v5235_v48 = vadd.f32 %v5159_v58, %v8312_v61 }
 0x567   : > { %6948 = vmatmul.msk.f32.gmra.mxu0 %vm5011_vm3, %v8527_v53 }
 0x568   : > { %5890 = vrot.lane.b32.xlu0 %v5495_v15, %s7129_s28 }
 0x56a   : > { %5922 = vrot.lane.b32.xlu2 %v5499_v12, %s7130_s29 }
 0x56c   : > { %v5162_v63 = vpop.f32.mrf.mxu0 }
 0x56d   : > { %v5236_v7 = vadd.f32 %v5162_v63, %v8325_v18 }
 0x56f   : > { %6949 = vmatmul.msk.f32.gmra.mxu0 %vm5011_vm3, %v8557_v1  ;;  %v5303_v1 = vperm.slane %v5273_v49, 0  ;;  %v5368_v17 = vadd.f32 %v5304_v59, %v5236_v7 }
 0x571   : > { %v5367_v50 = vadd.f32 %v5303_v1, %v5235_v48  ;;  %v5517_v2 = vsel %vm5390_vm4, %v5368_v17, %v5516_v23 }
 0x572   : > { %5858 = vrot.lane.b32.xlu2 %v5491_v9, %s7131_s19  ;;  %v5525_v12 = vperm.slane %v5517_v2, %v8562_v28  ;;  %v5514_v9 = vrot.slane %v5368_v17, 4 }
 0x573   : > { %v5505_v18 = vsel %vm5390_vm4, %v5367_v50, %v5504_v8  ;;  %v5502_v47 = vrot.slane %v5367_v50, 4 }
 0x574   : > { %v5165_v53 = vpop.f32.mrf.mxu0  ;;  %v5513_v15 = vperm.slane %v5505_v18, %v8562_v28  ;;  %v5562_v37 = vrot.slane %v5525_v12, 4  ;;  %v5515_v41 = vsel %vm5390_vm4, %v5514_v9, %v5366_v42 }
 0x575   : > { %v5237_v33 = vadd.f32 %v5165_v53, %v8338_v56  ;;  %v5278_v56 = vrot.slane %v5258_v60, 7  ;;  %v5521_v35 = vperm.slane %v5515_v41, %v8562_v28 }
 0x576   : > { %v5564_v49 = vrot.slane %v5513_v15, 4  ;;  %v5563_v59 = vsel %vm5390_vm4, %v5562_v37, %v5513_v15 }
 0x577   : > { %6950 = vmatmul.msk.f32.gmra.mxu0 %vm5011_vm3, %v8530_v11  ;;  %v5277_v11 = vrot.slane %v5258_v60, 6  ;;  %v5369_v29 = vadd.f32 %v5305_v21, %v5237_v33  ;;  %v5569_v21 = vperm.slane %v5563_v59, %v8581_v27 }
 0x578   : > { %v5565_v22 = vsel %vm5390_vm4, %v5525_v12, %v5564_v49 }
 0x579   : > { %v5307_v44 = vperm.slane %v5277_v11, 0  ;;  %v5528_v63 = vrot.slane %v5369_v29, 4  ;;  %v5573_v42 = vperm.slane %v5565_v22, %v8581_v27  ;;  %v5608_v15 = vrot.slane %v5569_v21, 4 }
 0x57b   : > { %v5612_v2 = vrot.slane %v5573_v42, 4 }
 0x57c   : > { %v5168_v5 = vpop.f32.mrf.mxu0 }
 0x57f   : > { %6951 = vmatmul.msk.f32.gmra.mxu0 %vm5011_vm3, %v8533_v14  ;;  %v5238_v14 = vadd.f32 %v5168_v5, %v8349_v13  ;;  %v5503_v13 = vsel %vm5390_vm4, %v5502_v47, %v5365_v38 }
 0x580   : > { %v5509_v1 = vperm.slane %v5503_v13, %v8562_v28 }
 0x581   : > { %v5370_v53 = vadd.f32 %v5306_v43, %v5238_v14 }
 0x582   : > { %v5552_v17 = vrot.slane %v5509_v1, 4 }
 0x583   : > { %v5540_v5 = vrot.slane %v5370_v53, 4 }
 0x584   : > { %v5171_v61 = vpop.f32.mrf.mxu0 }
 0x585   : > { %v5239_v4 = vadd.f32 %v5171_v61, %v8361_v40  ;;  %v5308_v40 = vperm.slane %v5278_v56, 0  ;;  %v5550_v61 = vrot.slane %v5521_v35, 4 }
 0x587   : > { %v5371_v58 = vadd.f32 %v5307_v44, %v5239_v4  ;;  %6952 = vmatmul.msk.f32.gmra.mxu0 %vm5011_vm3, %v8538_v54 }
 0x589   : > { %v5526_v52 = vrot.slane %v5371_v58, 4  ;;  %v5529_v36 = vsel %vm5390_vm4, %v5371_v58, %v5528_v63 }
 0x58a   : > { %v5537_v24 = vperm.slane %v5529_v36, %v8562_v28  ;;  %v5551_v36 = vsel %vm5390_vm4, %v5550_v61, %v5509_v1 }
 0x58b   : > { %v5527_v54 = vsel %vm5390_vm4, %v5526_v52, %v5369_v29  ;;  %v5553_v29 = vsel %vm5390_vm4, %v5521_v35, %v5552_v17  ;;  %v5557_v49 = vperm.slane %v5551_v36, %v8581_v27 }
 0x58c   : > { %v5174_v26 = vpop.f32.mrf.mxu0  ;;  %v5533_v7 = vperm.slane %v5527_v54, %v8562_v28  ;;  %v5588_v11 = vrot.slane %v5537_v24, 4  ;;  %v5561_v12 = vperm.slane %v5553_v29, %v8581_v27 }
 0x58d   : > { %v5240_v60 = vadd.f32 %v5174_v26, %v8372_v16 }
 0x58e   : > { %v5576_v44 = vrot.slane %v5533_v7, 4  ;;  %v5604_v26 = vrot.slane %v5561_v12, 4 }
 0x58f   : > { %v5372_v48 = vadd.f32 %v5308_v40, %v5240_v60  ;;  %6953 = vmatmul.msk.f32.gmra.mxu0 %vm5011_vm3, %v8579_v19 }
 0x591   : > { %v5538_v16 = vrot.slane %v5372_v48, 4  ;;  %v5541_v38 = vsel %vm5390_vm4, %v5372_v48, %v5540_v5  ;;  %v5600_v48 = vrot.slane %v5557_v49, 4 }
 0x592   : > { %v5549_v50 = vperm.slane %v5541_v38, %v8562_v28 }
 0x593   : > { %v5539_v33 = vsel %vm5390_vm4, %v5538_v16, %v5370_v53  ;;  %v5259_v16 = vld [vmem:[%s8549_s25 + $0x10] sm:$0xff] }
 0x594   : > { %v5545_v19 = vperm.slane %v5539_v33, %v8562_v28  ;;  %v5586_v8 = vrot.slane %v5549_v50, 4  ;;  %v5177_v23 = vpop.f32.mrf.mxu0  ;;  %v5589_v31 = vsel %vm5390_vm4, %v5549_v50, %v5588_v11  ;;  %v5280_v38 = vrot.slane %v5259_v16, 2 }
 0x595   : > { %v5597_v18 = vperm.slane %v5589_v31, %v8581_v27  ;;  %v5281_v11 = vrot.slane %v5259_v16, 3  ;;  %v5279_v50 = vrot.slane %v5259_v16, 1  ;;  %v5282_v61 = vrot.slane %v5259_v16, 4 }
 0x596   : > { %v5587_v4 = vsel %vm5390_vm4, %v5586_v8, %v5537_v24  ;;  %v5577_v14 = vsel %vm5390_vm4, %v5545_v19, %v5576_v44  ;;  %v5574_v43 = vrot.slane %v5545_v19, 4  ;;  %v5311_v33 = vperm.slane %v5280_v38, 0 }
 0x597   : > { %v5613_v58 = vsel %vm5390_vm4, %v5597_v18, %v5612_v2  ;;  %v5610_v56 = vrot.slane %v5597_v18, 4  ;;  %v5593_v47 = vperm.slane %v5587_v4, %v8581_v27  ;;  %v5585_v53 = vperm.slane %v5577_v14, %v8581_v27 }
 0x598   : > { %5940 = vrot.lane.b32.xlu0 %v5613_v58, %s7125_s26  ;;  %v5575_v63 = vsel %vm5390_vm4, %v5574_v43, %v5533_v7  ;;  %v5309_v19 = vperm.slane %v5259_v16, 0  ;;  %v5312_v44 = vperm.slane %v5281_v11, 0  ;;  %v5310_v2 = vperm.slane %v5279_v50, 0 }
 0x599   : > { %v5611_v52 = vsel %vm5390_vm4, %v5610_v56, %v5573_v42  ;;  %v5609_v9 = vsel %vm5390_vm4, %v5593_v47, %v5608_v15  ;;  %v5581_v40 = vperm.slane %v5575_v63, %v8581_v27  ;;  %v5606_v54 = vrot.slane %v5593_v47, 4 }
 0x59a   : > { %5924 = vrot.lane.b32.xlu2 %v5611_v52, %s7130_s29  ;;  %5908 = vrot.lane.b32.xlu1 %v5609_v9, %s7128_s27  ;;  %v5602_v60 = vrot.slane %v5585_v53, 4  ;;  %v5605_v24 = vsel %vm5390_vm4, %v5585_v53, %v5604_v26  ;;  %v5284_v4 = vrot.slane %v5259_v16, 6  ;;  %v5313_v56 = vperm.slane %v5282_v61, 0 }
 0x59b   : > { %v5598_v37 = vrot.slane %v5581_v40, 4  ;;  %v5607_v22 = vsel %vm5390_vm4, %v5606_v54, %v5569_v21  ;;  %v5601_v7 = vsel %vm5390_vm4, %v5581_v40, %v5600_v48  ;;  %v5241_v21 = vadd.f32 %v5177_v23, %v8381_v34 }
 0x59c   : > { %v5180_v13 = vpop.f32.mrf.mxu0  ;;  %v5603_v1 = vsel %vm5390_vm4, %v5602_v60, %v5561_v12  ;;  %v5283_v34 = vrot.slane %v5259_v16, 5  ;;  %v5315_v15 = vperm.slane %v5284_v4, 0 }
 0x59d   : > { %v8688_v41 = vsel %vm5390_vm4, %v5598_v37, %v5557_v49  ;;  %v5242_v18 = vadd.f32 %v5180_v13, %v8389_v45  ;;  %v5373_v14 = vadd.f32 %v5309_v19, %v5241_v21  ;;  %v5285_v49 = vrot.slane %v5259_v16, 7 }
 0x59e   : > { %v5314_v36 = vperm.slane %v5283_v34, 0 }
 0x59f   : > { %v5616_v12 = vrot.slane %v5373_v14, 4 }
 0x5a0   : > { %5876 = vrot.lane.b32.xlu0 %v5605_v24, %s7126_s24 }
 0x5a2   : > { %5892 = vrot.lane.b32.xlu1 %v5607_v22, %s7129_s28  ;;  %5860 = vrot.lane.b32.xlu2 %v5603_v1, %s7131_s19 }
 0x5a4   : > { %v5183_v5 = vpop.f32.mrf.mxu0 }
 0x5a5   : > { %v5243_v17 = vadd.f32 %v5183_v5, %v8396_v39  ;;  %v5374_v39 = vadd.f32 %v5310_v2, %v5242_v18 }
 0x5a7   : > { %v5375_v29 = vadd.f32 %v5311_v33, %v5243_v17  ;;  %v5628_v9 = vrot.slane %v5374_v39, 4 }
 0x5a8   : > { %5844 = vrot.lane.b32.xlu0 %v5601_v7, %s7127_s21 }
 0x5a9   : > { %v5614_v23 = vrot.slane %v5375_v29, 4  ;;  %v5617_v53 = vsel %vm5390_vm4, %v5375_v29, %v5616_v12 }
 0x5aa   : > { %v5625_v26 = vperm.slane %v5617_v53, %v8562_v28 }
 0x5ab   : > { %v5615_v40 = vsel %vm5390_vm4, %v5614_v23, %v5373_v14 }
 0x5ac   : > { %v5186_v59 = vpop.f32.mrf.mxu0  ;;  %v5676_v38 = vrot.slane %v5625_v26, 4 }
 0x5ad   : > { %v5244_v31 = vadd.f32 %v5186_v59, %v8405_v46 }
 0x5af   : > { %v5376_v43 = vadd.f32 %v5312_v44, %v5244_v31 }
 0x5b1   : > { %v5626_v63 = vrot.slane %v5376_v43, 4  ;;  %v5629_v37 = vsel %vm5390_vm4, %v5376_v43, %v5628_v9 }
 0x5b2   : > { %v5637_v1 = vperm.slane %v5629_v37, %v8562_v28 }
 0x5b3   : > { %v5627_v54 = vsel %vm5390_vm4, %v5626_v63, %v5374_v39 }
 0x5b4   : > { %v5189_v35 = vpop.f32.mrf.mxu0  ;;  %v8699_v42 = vpop.permute.xlu2 %5874  ;;  %v5633_v7 = vperm.slane %v5627_v54, %v8562_v28  ;;  %v5674_v44 = vrot.slane %v5637_v1, 4 }
 0x5b5   : > { %v5245_v58 = vadd.f32 %v5189_v35, %v8414_v0 }
 0x5b6   : > { %v5662_v2 = vrot.slane %v5633_v7, 4  ;;  %v5675_v63 = vsel %vm5390_vm4, %v5674_v44, %v5625_v26 }
 0x5b7   : > { %v5377_v52 = vadd.f32 %v5313_v56, %v5245_v58 }
 0x5b9   : > { %v5640_v60 = vrot.slane %v5377_v52, 4 }
 0x5bc   : > { %v5192_v8 = vpop.f32.mrf.mxu0  ;;  %v8706_v47 = vpop.permute.xlu2 %5906 }
 0x5bd   : > { %v5246_v0 = vadd.f32 %v5192_v8, %v8422_v51  ;;  %v5316_v51 = vperm.slane %v5285_v49, 0  ;;  %v5677_v8 = vsel %vm5390_vm4, %v5637_v1, %v5676_v38 }
 0x5be   : > { %v5685_v14 = vperm.slane %v5677_v8, %v8581_v27 }
 0x5bf   : > { %v5378_v5 = vadd.f32 %v5314_v36, %v5246_v0 }
 0x5c0   : > { %v5724_v36 = vrot.slane %v5685_v14, 4 }
 0x5c1   : > { %v5652_v33 = vrot.slane %v5378_v5, 4 }
 0x5c4   : > { %v5195_v46 = vpop.f32.mrf.mxu0  ;;  %v8721_v59 = vpop.permute.xlu2 %5922 }
 0x5c5   : > { %v5247_v45 = vadd.f32 %v5195_v46, %v8431_v30  ;;  %v5621_v30 = vperm.slane %v5615_v40, %v8562_v28 }
 0x5c7   : > { %v5379_v13 = vadd.f32 %v5315_v15, %v5247_v45  ;;  %v5664_v50 = vrot.slane %v5621_v30, 4  ;;  %v5663_v9 = vsel %vm5390_vm4, %v5662_v2, %v5621_v30 }
 0x5c8   : > { %v5669_v38 = vperm.slane %v5663_v9, %v8581_v27 }
 0x5c9   : > { %v5638_v24 = vrot.slane %v5379_v13, 4  ;;  %v5641_v48 = vsel %vm5390_vm4, %v5379_v13, %v5640_v60  ;;  %v5665_v31 = vsel %vm5390_vm4, %v5633_v7, %v5664_v50 }
 0x5ca   : > { %v8716_v22 = vpop.permute.xlu0 %5938  ;;  %v5649_v17 = vperm.slane %v5641_v48, %v8562_v28  ;;  %v5673_v58 = vperm.slane %v5665_v31, %v8581_v27  ;;  %v5712_v31 = vrot.slane %v5669_v38, 4 }
 0x5cb   : > { %v5639_v35 = vsel %vm5390_vm4, %v5638_v24, %v5377_v52 }
 0x5cc   : > { %v5198_v16 = vpop.f32.mrf.mxu0  ;;  %v5645_v21 = vperm.slane %v5639_v35, %v8562_v28  ;;  %v5700_v29 = vrot.slane %v5649_v17, 4  ;;  %v5859_v52 = vpop.permute.xlu2 %5858  ;;  %v5716_v13 = vrot.slane %v5673_v58, 4 }
 0x5cd   : > { %v5248_v11 = vadd.f32 %v5198_v16, %v8438_v25 }
 0x5ce   : > { %v5688_v56 = vrot.slane %v5645_v21, 4 }
 0x5cf   : > { %v5380_v19 = vadd.f32 %v5316_v51, %v5248_v11 }
 0x5d1   : > { %v5650_v61 = vrot.slane %v5380_v19, 4  ;;  %v5653_v18 = vsel %vm5390_vm4, %v5380_v19, %v5652_v33 }
 0x5d2   : > { %v5661_v4 = vperm.slane %v5653_v18, %v8562_v28  ;;  %v5843_v25 = vpop.permute.xlu0 %5842  ;;  %v5260_v18 = vld [vmem:[%s8549_s25 + $0x18] sm:$0xff] }
 0x5d3   : > { %v5651_v43 = vsel %vm5390_vm4, %v5650_v61, %v5378_v5  ;;  %v5950_v23 = vsel %vm5011_vm3, %v8614_v32, %v5843_v25  ;;  %v5681_v5 = vperm.slane %v5675_v63, %v8581_v27  ;;  %v5287_v2 = vrot.slane %v5260_v18, 2 }
 0x5d4   : > { %v5657_v39 = vperm.slane %v5651_v43, %v8562_v28  ;;  %v5698_v34 = vrot.slane %v5661_v4, 4  ;;  %v8737_v15 = vpop.f32.mrf.mxu0  ;;  %v5701_v12 = vsel %vm5390_vm4, %v5661_v4, %v5700_v29  ;;  %v5955_v40 = vsel %vm5954_vm5, %v5950_v23, %v5859_v52 }
 0x5d5   : > { %v5709_v46 = vperm.slane %v5701_v12, %v8581_v27  ;;  %v5960_v1 = vsel %vm5959_vm6, %v5955_v40, %v8699_v42  ;;  %v5720_v33 = vrot.slane %v5681_v5, 4  ;;  %v5286_v29 = vrot.slane %v5260_v18, 1 }
 0x5d6   : > { %v5689_v45 = vsel %vm5390_vm4, %v5657_v39, %v5688_v56  ;;  %v5686_v53 = vrot.slane %v5657_v39, 4  ;;  %v5699_v49 = vsel %vm5390_vm4, %v5698_v34, %v5649_v17  ;;  %v5288_v4 = vrot.slane %v5260_v18, 3 }
 0x5d7   : > { %v5722_v0 = vrot.slane %v5709_v46, 4  ;;  %v5697_v32 = vperm.slane %v5689_v45, %v8581_v27  ;;  %v8749_v26 = vsel %vm5390_vm4, %v5709_v46, %v5724_v36  ;;  %v5705_v35 = vperm.slane %v5699_v49, %v8581_v27 }
 0x5d8   : > { %v5687_v37 = vsel %vm5390_vm4, %v5686_v53, %v5645_v21  ;;  %v5320_v34 = vperm.slane %v5288_v4, 0  ;;  %v5291_v46 = vrot.slane %v5260_v18, 6  ;;  %v5249_v63 = vadd.f32 %v8737_v15, %v8451_v62 }
 0x5d9   : > { %v5723_v54 = vsel %vm5390_vm4, %v5722_v0, %v5685_v14  ;;  %v5717_v60 = vsel %vm5390_vm4, %v5697_v32, %v5716_v13  ;;  %v5714_v24 = vrot.slane %v5697_v32, 4  ;;  %v5693_v48 = vperm.slane %v5687_v37, %v8581_v27 }
 0x5da   : > { %v5891_v30 = vpop.permute.xlu0 %5890  ;;  %5926 = vrot.lane.b32.xlu2 %v5723_v54, %s7130_s29  ;;  %5878 = vrot.lane.b32.xlu1 %v5717_v60, %s7126_s24  ;;  %v5718_v21 = vrot.slane %v5705_v35, 4  ;;  %v5721_v19 = vsel %vm5390_vm4, %v5705_v35, %v5720_v33  ;;  %v5319_v14 = vperm.slane %v5287_v2, 0  ;;  %v5317_v52 = vperm.slane %v5260_v18, 0 }
 0x5db   : > { %v5965_v51 = vsel %vm5964_vm7, %v5960_v1, %v5891_v30  ;;  %v5715_v7 = vsel %vm5390_vm4, %v5714_v24, %v5673_v58  ;;  %v5710_v11 = vrot.slane %v5693_v48, 4  ;;  %v5713_v44 = vsel %vm5390_vm4, %v5693_v48, %v5712_v31 }
 0x5dc   : > { %v5970_v16 = vsel %vm5969_vm8, %v5965_v51, %v8706_v47  ;;  %5862 = vrot.lane.b32.xlu0 %v5715_v7, %s7131_s19  ;;  %v5204_v42 = vpop.f32.mrf.mxu0  ;;  %v5719_v8 = vsel %vm5390_vm4, %v5718_v21, %v5681_v5  ;;  %v5318_v58 = vperm.slane %v5286_v29, 0  ;;  %v5289_v53 = vrot.slane %v5260_v18, 4 }
 0x5dd   : > { %v5975_v50 = vsel %vm5974_vm9, %v5970_v16, %v8721_v59  ;;  %v8775_v17 = vsel %vm5390_vm4, %v5710_v11, %v5669_v38  ;;  %v5250_v43 = vadd.f32 %v5204_v42, %v8459_v57  ;;  %v5290_v36 = vrot.slane %v5260_v18, 5 }
 0x5de   : > { %v5980_v47 = vsel %vm5979_vm10, %v5975_v50, %v8716_v22  ;;  %v5323_v40 = vperm.slane %v5291_v46, 0  ;;  %v5381_v0 = vadd.f32 %v5317_v52, %v5249_v63  ;;  %v5321_v37 = vperm.slane %v5289_v53, 0  ;;  %v8898_v50 = vld [vmem:[#allocation2_spill] sm:$0xff] }
 0x5df   : > { %5984 = vst.msk [vmem:[%s8770_s17] sm:$0xff] %vm753_vm0, %v5980_v47  ;;  %v5382_v12 = vadd.f32 %v5318_v58, %v5250_v43  ;;  %v5322_v54 = vperm.slane %v5290_v36, 0  ;;  %v5292_v24 = vrot.slane %v5260_v18, 7 }
 0x5e0   : > { %v5728_v1 = vrot.slane %v5381_v0, 4 }
 0x5e1   : > { %v5324_v42 = vperm.slane %v5292_v24, 0 }
 0x5e2   : > { %5910 = vrot.lane.b32.xlu1 %v5721_v19, %s7128_s27 }
 0x5e4   : > { %5894 = vrot.lane.b32.xlu0 %v5719_v8, %s7129_s28  ;;  %v5207_v59 = vpop.f32.mrf.mxu0 }
 0x5e5   : > { %v5251_v25 = vadd.f32 %v5207_v59, %v8466_v55  ;;  %v5740_v55 = vrot.slane %v5382_v12, 4 }
 0x5e7   : > { %v5383_v23 = vadd.f32 %v5319_v14, %v5251_v25 }
 0x5e9   : > { %v5726_v9 = vrot.slane %v5383_v23, 4 }
 0x5ea   : > { %5846 = vrot.lane.b32.xlu1 %v5713_v44, %s7127_s21 }
 0x5eb   : > { %v5727_v49 = vsel %vm5390_vm4, %v5726_v9, %v5381_v0 }
 0x5ec   : > { %v5210_v61 = vpop.f32.mrf.mxu0  ;;  %v5733_v51 = vperm.slane %v5727_v49, %v8562_v28 }
 0x5ed   : > { %v5252_v39 = vadd.f32 %v5210_v61, %v8473_v10 }
 0x5ee   : > { %v5776_v21 = vrot.slane %v5733_v51, 4 }
 0x5ef   : > { %v5384_v45 = vadd.f32 %v5320_v34, %v5252_v39 }
 0x5f1   : > { %v5738_v32 = vrot.slane %v5384_v45, 4  ;;  %v5741_v13 = vsel %vm5390_vm4, %v5384_v45, %v5740_v55 }
 0x5f2   : > { %v5749_v30 = vperm.slane %v5741_v13, %v8562_v28 }
 0x5f3   : > { %v5739_v5 = vsel %vm5390_vm4, %v5738_v32, %v5382_v12 }
 0x5f4   : > { %v5213_v22 = vpop.f32.mrf.mxu0 }
 0x5f5   : > { %v5253_v62 = vadd.f32 %v5213_v22, %v8477_v6  ;;  %v5745_v6 = vperm.slane %v5739_v5, %v8562_v28  ;;  %v5925_v22 = vpop.permute.xlu2 %5924 }
 0x5f7   : > { %v5385_v35 = vadd.f32 %v5321_v37, %v5253_v62  ;;  %v5777_v61 = vsel %vm5390_vm4, %v5745_v6, %v5776_v21  ;;  %v5774_v14 = vrot.slane %v5745_v6, 4 }
 0x5f8   : > { %v5785_v39 = vperm.slane %v5777_v61, %v8581_v27 }
 0x5f9   : > { %v5752_v19 = vrot.slane %v5385_v35, 4  ;;  %v5775_v0 = vsel %vm5390_vm4, %v5774_v14, %v5733_v51 }
 0x5fa   : > { %v5828_v55 = vrot.slane %v5785_v39, 4  ;;  %v5781_v24 = vperm.slane %v5775_v0, %v8581_v27 }
 0x5fc   : > { %v5216_v56 = vpop.f32.mrf.mxu0 }
 0x5fd   : > { %v5254_v15 = vadd.f32 %v5216_v56, %v8487_v20  ;;  %v5786_v20 = vrot.slane %v5749_v30, 4  ;;  %v5861_v62 = vpop.permute.xlu2 %5860 }
 0x5ff   : > { %v5386_v16 = vadd.f32 %v5322_v54, %v5254_v15 }
 0x601   : > { %v5764_v8 = vrot.slane %v5386_v16, 4 }
 0x604   : > { %v5219_v57 = vpop.f32.mrf.mxu0 }
 0x605   : > { %v5255_v10 = vadd.f32 %v5219_v57, %v8498_v3  ;;  %v5729_v3 = vsel %vm5390_vm4, %v5383_v23, %v5728_v1 }
 0x606   : > { %v5737_v33 = vperm.slane %v5729_v3, %v8562_v28 }
 0x607   : > { %v5387_v60 = vadd.f32 %v5323_v40, %v5255_v10 }
 0x608   : > { %v5787_v44 = vsel %vm5390_vm4, %v5786_v20, %v5737_v33  ;;  %v5788_v40 = vrot.slane %v5737_v33, 4 }
 0x609   : > { %v5750_v48 = vrot.slane %v5387_v60, 4  ;;  %v5753_v18 = vsel %vm5390_vm4, %v5387_v60, %v5752_v19  ;;  %v5793_v56 = vperm.slane %v5787_v44, %v8581_v27 }
 0x60a   : > { %v8801_v7 = vpop.permute.xlu0 %5940  ;;  %v5761_v34 = vperm.slane %v5753_v18, %v8562_v28  ;;  %v5789_v54 = vsel %vm5390_vm4, %v5749_v30, %v5788_v40 }
 0x60b   : > { %v5751_v11 = vsel %vm5390_vm4, %v5750_v48, %v5385_v35  ;;  %v5832_v53 = vrot.slane %v5793_v56, 4  ;;  %v5797_v30 = vperm.slane %v5789_v54, %v8581_v27 }
 0x60c   : > { %v5222_v38 = vpop.f32.mrf.mxu0  ;;  %v5757_v31 = vperm.slane %v5751_v11, %v8562_v28  ;;  %v5909_v43 = vpop.permute.xlu1 %5908  ;;  %v5812_v49 = vrot.slane %v5761_v34, 4 }
 0x60d   : > { %v5256_v47 = vadd.f32 %v5222_v38, %v8898_v50  ;;  %v5836_v11 = vrot.slane %v5797_v30, 4 }
 0x60e   : > { %v5800_v46 = vrot.slane %v5757_v31, 4 }
 0x60f   : > { %v5388_v59 = vadd.f32 %v5324_v42, %v5256_v47  ;;  %v5824_v42 = vrot.slane %v5781_v24, 4 }
 0x611   : > { %v5762_v2 = vrot.slane %v5388_v59, 4  ;;  %v5765_v29 = vsel %vm5390_vm4, %v5388_v59, %v5764_v8 }
 0x612   : > { %v5773_v4 = vperm.slane %v5765_v29, %v8562_v28  ;;  %v5877_v25 = vpop.permute.xlu0 %5876 }
 0x613   : > { %v5763_v58 = vsel %vm5390_vm4, %v5762_v2, %v5386_v16 }
 0x614   : > { %v5769_v23 = vperm.slane %v5763_v58, %v8562_v28  ;;  %v5810_v12 = vrot.slane %v5773_v4, 4  ;;  %v5813_v48 = vsel %vm5390_vm4, %v5773_v4, %v5812_v49  ;;  %v5893_v51 = vpop.permute.xlu1 %5892 }
 0x615   : > { %v5821_v6 = vperm.slane %v5813_v48, %v8581_v27 }
 0x616   : > { %v5811_v63 = vsel %vm5390_vm4, %v5810_v12, %v5761_v34  ;;  %v5801_v52 = vsel %vm5390_vm4, %v5769_v23, %v5800_v46  ;;  %v5798_v45 = vrot.slane %v5769_v23, 4 }
 0x617   : > { %v5817_v9 = vperm.slane %v5811_v63, %v8581_v27  ;;  %v5809_v36 = vperm.slane %v5801_v52, %v8581_v27  ;;  %v5837_v47 = vsel %vm5390_vm4, %v5821_v6, %v5836_v11  ;;  %v5834_v21 = vrot.slane %v5821_v6, 4 }
 0x618   : > { %v5799_v57 = vsel %vm5390_vm4, %v5798_v45, %v5757_v31 }
 0x619   : > { %v5833_v28 = vsel %vm5390_vm4, %v5817_v9, %v5832_v53  ;;  %v5829_v32 = vsel %vm5390_vm4, %v5809_v36, %v5828_v55  ;;  %v5830_v13 = vrot.slane %v5817_v9, 4  ;;  %v5805_v10 = vperm.slane %v5799_v57, %v8581_v27 }
 0x61a   : > { %v5845_v37 = vpop.permute.xlu0 %5844  ;;  %5912 = vrot.lane.b32.xlu1 %v5833_v28, %s7128_s27  ;;  %5880 = vrot.lane.b32.xlu2 %v5829_v32, %s7126_s24  ;;  %v5826_v27 = vrot.slane %v5809_v36, 4  ;;  %v5835_v19 = vsel %vm5390_vm4, %v5834_v21, %v5797_v30 }
 0x61b   : > { %v5951_v15 = vsel %vm5011_vm3, %v8688_v41, %v5845_v37  ;;  %v5831_v60 = vsel %vm5390_vm4, %v5830_v13, %v5793_v56  ;;  %v5822_v1 = vrot.slane %v5805_v10, 4  ;;  %v5825_v38 = vsel %vm5390_vm4, %v5805_v10, %v5824_v42 }
 0x61c   : > { %v5956_v5 = vsel %vm5954_vm5, %v5951_v15, %v5861_v62  ;;  %5896 = vrot.lane.b32.xlu0 %v5831_v60, %s7129_s28  ;;  %v5827_v33 = vsel %vm5390_vm4, %v5826_v27, %v5785_v39 }
 0x61d   : > { %v5961_v3 = vsel %vm5959_vm6, %v5956_v5, %v5877_v25  ;;  %v5823_v35 = vsel %vm5390_vm4, %v5822_v1, %v5781_v24 }
 0x61e   : > { %v5966_v41 = vsel %vm5964_vm7, %v5961_v3, %v5893_v51 }
 0x61f   : > { %v5971_v16 = vsel %vm5969_vm8, %v5966_v41, %v5909_v43 }
 0x620   : > { %v5976_v20 = vsel %vm5974_vm9, %v5971_v16, %v5925_v22 }
 0x621   : > { %v5981_v50 = vsel %vm5979_vm10, %v5976_v20, %v8801_v7 }
 0x622   : > { %5942 = vrot.lane.b32.xlu2 %v8749_v26, %s7125_s26  ;;  %5848 = vrot.lane.b32.xlu1 %v5825_v38, %s7127_s21  ;;  %5985 = vst.msk [vmem:[%s8770_s17 + $0x8] sm:$0xff] %vm753_vm0, %v5981_v50 }
 0x624   : > { %5944 = vrot.lane.b32.xlu0 %v5837_v47, %s7125_s26 }
 0x62a   : > { %5864 = vrot.lane.b32.xlu1 %v5827_v33, %s7131_s19 }
 0x632   : > { %5928 = vrot.lane.b32.xlu1 %v5835_v19, %s7130_s29 }
 0x634   : > { %v5927_v31 = vpop.permute.xlu2 %5926 }
 0x64c   : > { %v5879_v26 = vpop.permute.xlu1 %5878 }
 0x64e   : > { %v5863_v59 = vpop.permute.xlu0 %5862 }
 0x654   : > { %v5911_v7 = vpop.permute.xlu1 %5910 }
 0x656   : > { %v5895_v2 = vpop.permute.xlu0 %5894 }
 0x65c   : > { %v5847_v8 = vpop.permute.xlu1 %5846 }
 0x65d   : > { %v5952_v44 = vsel %vm5011_vm3, %v8775_v17, %v5847_v8 }
 0x65e   : > { %v5957_v61 = vsel %vm5954_vm5, %v5952_v44, %v5863_v59 }
 0x65f   : > { %v5962_v22 = vsel %vm5959_vm6, %v5957_v61, %v5879_v26 }
 0x660   : > { %v5967_v29 = vsel %vm5964_vm7, %v5962_v22, %v5895_v2 }
 0x661   : > { %v5972_v4 = vsel %vm5969_vm8, %v5967_v29, %v5911_v7 }
 0x662   : > { %v5977_v25 = vsel %vm5974_vm9, %v5972_v4, %v5927_v31 }
 0x674   : > { %v5881_v18 = vpop.permute.xlu2 %5880 }
 0x67c   : > { %v5943_v14 = vpop.permute.xlu2 %5942 }
 0x67d   : > { %v5982_v43 = vsel %vm5979_vm10, %v5977_v25, %v5943_v14 }
 0x67e   : > { %5986 = vst.msk [vmem:[%s8770_s17 + $0x10] sm:$0xff] %vm753_vm0, %v5982_v43 }
 0x68c   : > { %v5913_v58 = vpop.permute.xlu1 %5912 }
 0x68e   : > { %v5897_v56 = vpop.permute.xlu0 %5896 }
 0x694   : > { %v5849_v17 = vpop.permute.xlu1 %5848 }
 0x695   : > { %v5953_v39 = vsel %vm5011_vm3, %v5823_v35, %v5849_v17 }
 0x696   : > { %v5945_v45 = vpop.permute.xlu0 %5944 }
 0x69c   : > { %v5865_v34 = vpop.permute.xlu1 %5864 }
 0x69d   : > { %v5958_v23 = vsel %vm5954_vm5, %v5953_v39, %v5865_v34 }
 0x69e   : > { %v5963_v12 = vsel %vm5959_vm6, %v5958_v23, %v5881_v18 }
 0x69f   : > { %v5968_v46 = vsel %vm5964_vm7, %v5963_v12, %v5897_v56 }
 0x6a0   : > { %v5973_v52 = vsel %vm5969_vm8, %v5968_v46, %v5913_v58 }
 0x6a4   : > { %v5929_v63 = vpop.permute.xlu1 %5928 }
 0x6a5   : > { %v5978_v9 = vsel %vm5974_vm9, %v5973_v52, %v5929_v63 }
 0x6a6   : > { %v5983_v53 = vsel %vm5979_vm10, %v5978_v9, %v5945_v45 }
 0x6a7   : > { %5987 = vst.msk [vmem:[%s8770_s17 + $0x18] sm:$0xff] %vm753_vm0, %v5983_v53 }
 0x6a8 PF: > { %s25_s18 = sadd.s32 1, %s7121_s18  }
 0x6a9   : > { %p22_p5 = scmp.ge.s32.totalorder %s25_s18, 4  }
 0x6ab   :  { %24 = sbr.rel (!%p22_p5) target bundleno = 1 (0x1), region = 125 }

// kernel: tpu_custom_call.1
= control target key start
LH: loop header
LB: loop body
LE: loop exit
PB: predicated region body
PF: predicated region fallthrough
CT: control target
= control target key end

     0   :  { %s7212_s18 = smov 0   ;;  %s8881_s0 = inlined_call_operand.vmem [shape: f32[8,16], index: 0, kind: input, shape index: {}]   ;;  %s8882_s1 = inlined_call_operand.vmem [shape: f32[8,32], index: 1, kind: input, shape index: {}]   ;;  %s8883_s2 = inlined_call_operand.vmem [shape: bf16[64,32,16], index: 2, kind: input, shape index: {}]   ;;  %s8884_s3 = inlined_call_operand.vmem [shape: f32[32,32], index: 3, kind: input, shape index: {}]   ;;  %s8885_s4 = inlined_call_operand.vmem [shape: f32[64,32], index: 4, kind: input, shape index: {}]   ;;  %s8886_s5 = inlined_call_operand.vmem [shape: f32[32,32], index: 5, kind: input, shape index: {}]   ;;  %s8887_s6 = inlined_call_operand.vmem [shape: f32[32,32], index: 6, kind: input, shape index: {}]   ;;  %s8888_s7 = inlined_call_operand.vmem [shape: bf16[64,32,32], index: 7, kind: input, shape index: {}]   ;;  %s8889_s8 = inlined_call_operand.vmem [shape: f32[32,32], index: 8, kind: input, shape index: {}]   ;;  %s8890_s9 = inlined_call_operand.vmem [shape: f32[64,32], index: 9, kind: input, shape index: {}]   ;;  %s8891_s10 = inlined_call_operand.vmem [shape: f32[32,32], index: 10, kind: input, shape index: {}]   ;;  %s8892_s11 = inlined_call_operand.vmem [shape: f32[32,2], index: 11, kind: input, shape index: {}]   ;;  %s8893_s12 = inlined_call_operand.vmem [shape: bf16[64,2,32], index: 12, kind: input, shape index: {}]   ;;  %s8894_s13 = inlined_call_operand.vmem [shape: f32[2,2], index: 13, kind: input, shape index: {}]   ;;  %s8895_s14 = inlined_call_operand.vmem [shape: f32[64,2], index: 14, kind: input, shape index: {}]   ;;  %s8896_s15 = inlined_call_operand.vmem [shape: f32[64,16], index: 15, kind: output, shape index: {}]  }
   0x1 LB: > { %s6101_s19 = sadd.s32 4294967295, %s7121_s18   ;;  %p6105_p0 = scmp.ge.s32.totalorder %s7121_s18, 1  ;;  %s7121_s18 = sphi %s7212_s18, %s25_s18  }
   0x2   : > { %p494_p1 = scmp.lt.s32.totalorder %s7121_s18, 3 }
   0x4   : > { %p495_p2 = pnand %p6105_p0, %p494_p1 }
   0x6   : > { %498 = sbr.rel (%p495_p2) target bundleno = 1704 (0x6a8), region = 80 }
   0xb   : > { %s6106_s20 = sshll.u32 %s6101_s19, 5  ;;  %vm753_vm0 = vcmask 130048   ;;  %v740_v22 = vld [vmem:[%s8881_s0] sm:$0xff]  ;;  %vm1679_vm1 = vcmask 261120   ;;  %s6109_s29 = sshll.u32 %s6101_s19, 2  ;;  %vm5108_vm2 = vcmask 1041408  }
   0xc   : > { %p569_p3 = scmp.lt.s32.totalorder %s6106_s20, 63  ;;  %v7260_v26 = vpack.c.bf16 %v740_v22, %v740_v22  ;;  %p576_p4 = scmp.lt.s32.totalorder %s6109_s29, 7  ;;  %vm5011_vm3 = vcmask 15360   ;;  %vm5390_vm4 = vcmask 1047556   ;;  %vm5954_vm5 = vcmask 31744  }
   0xd   : > { %s7125_s26 = smov 14   ;;  %s7128_s27 = smov 10   ;;  %vm5959_vm6 = vcmask 48128   ;;  %vm5964_vm7 = vcmask 64512   ;;  %vm5969_vm8 = vcmask 80896   ;;  %vm5974_vm9 = vcmask 97280  }
   0xe   : > { %s8900_s20 = smov (!%p569_p3, %s6106_s20), 63  ;;  %s8902_s29 = smov (!%p576_p4, %s6109_s29), 7  ;;  %vm5979_vm10 = vcmask 113664  }
   0xf   : > { %s6956_s21 = sshll.u32 %s8900_s20, 4  ;;  %s7517_s30 = sshll.u32 %s8902_s29, 3 }
  0x10   : > { %s7230_s24 = scalar_lea.vmem %s8883_s2, %s6956_s21  ;;  %s7525_s17 = scalar_lea.vmem %s8885_s4, %s7517_s30 }
  0x11   : > { %v6959_v0 = vld [vmem:[%s7230_s24 + $0x8] sm:$0xff]  ;;  %v6961_v1 = vld [vmem:[%s7230_s24 + $0x18] sm:$0xff]  ;;  %v6958_v7 = vld [vmem:[%s7230_s24] sm:$0xff]  ;;  %s8086_s28 = scalar_lea.vmem %s8890_s9, %s7517_s30  ;;  %s8123_s16 = scalar_lea.vmem %s8893_s12, %s8900_s20 }
  0x12   : > { %v6963_v2 = vld [vmem:[%s7230_s24 + $0x28] sm:$0xff]  ;;  %v761_v3 = vsel %vm753_vm0, %v6959_v0, 0  ;;  %v790_v4 = vsel %vm753_vm0, %v6961_v1, 0  ;;  %v6965_v6 = vld [vmem:[%s7230_s24 + $0x38] sm:$0xff]  ;;  %v6960_v8 = vld [vmem:[%s7230_s24 + $0x10] sm:$0xff]  ;;  %v758_v16 = vsel %vm753_vm0, %v6958_v7, 0  ;;  %s8549_s25 = scalar_lea.vmem %s8895_s14, %s7517_s30 }
  0x13   : > { %v819_v5 = vsel %vm753_vm0, %v6963_v2, 0  ;;  %769 = vmatpush.bf16.xpose.msra.mxu0 %v761_v3  ;;  %798 = vmatpush.bf16.xpose.msra.mxu1 %v790_v4  ;;  %v848_v9 = vsel %vm753_vm0, %v6965_v6, 0  ;;  %v6962_v10 = vld [vmem:[%s7230_s24 + $0x20] sm:$0xff]  ;;  %v6967_v11 = vld [vmem:[%s7230_s24 + $0x48] sm:$0xff]  ;;  %v6964_v12 = vld [vmem:[%s7230_s24 + $0x30] sm:$0xff]  ;;  %v787_v17 = vsel %vm753_vm0, %v6960_v8, 0 }
  0x14   : > { %827 = vmatpush.bf16.xpose.msra.mxu2 %v819_v5  ;;  %856 = vmatpush.bf16.xpose.msra.mxu3 %v848_v9  ;;  %v6969_v13 = vld [vmem:[%s7230_s24 + $0x58] sm:$0xff]  ;;  %v6971_v14 = vld [vmem:[%s7230_s24 + $0x68] sm:$0xff]  ;;  %v816_v18 = vsel %vm753_vm0, %v6962_v10, 0  ;;  %v877_v19 = vsel %vm753_vm0, %v6967_v11, 0  ;;  %v845_v20 = vsel %vm753_vm0, %v6964_v12, 0  ;;  %v6966_v25 = vld [vmem:[%s7230_s24 + $0x40] sm:$0xff] }
  0x15   : > { %v6973_v15 = vld [vmem:[%s7230_s24 + $0x78] sm:$0xff]  ;;  %v906_v21 = vsel %vm753_vm0, %v6969_v13, 0  ;;  %v935_v23 = vsel %vm753_vm0, %v6971_v14, 0  ;;  %v6975_v27 = vld [vmem:[%s7230_s24 + $0x88] sm:$0xff]  ;;  %v6968_v28 = vld [vmem:[%s7230_s24 + $0x50] sm:$0xff]  ;;  %v874_v33 = vsel %vm753_vm0, %v6966_v25, 0 }
  0x16   : > { %v964_v24 = vsel %vm753_vm0, %v6973_v15, 0  ;;  %v6970_v29 = vld [vmem:[%s7230_s24 + $0x60] sm:$0xff]  ;;  %v6977_v30 = vld [vmem:[%s7230_s24 + $0x98] sm:$0xff]  ;;  %v6972_v31 = vld [vmem:[%s7230_s24 + $0x70] sm:$0xff]  ;;  %v993_v34 = vsel %vm753_vm0, %v6975_v27, 0  ;;  %v903_v35 = vsel %vm753_vm0, %v6968_v28, 0 }
  0x17   : > { %v6979_v32 = vld [vmem:[%s7230_s24 + $0xa8] sm:$0xff]  ;;  %v6981_v36 = vld [vmem:[%s7230_s24 + $0xb8] sm:$0xff]  ;;  %v932_v37 = vsel %vm753_vm0, %v6970_v29, 0  ;;  %v1022_v38 = vsel %vm753_vm0, %v6977_v30, 0  ;;  %v961_v39 = vsel %vm753_vm0, %v6972_v31, 0  ;;  %v6974_v42 = vld [vmem:[%s7230_s24 + $0x80] sm:$0xff] }
  0x18   : > { %v1051_v40 = vsel %vm753_vm0, %v6979_v32, 0  ;;  %v1080_v41 = vsel %vm753_vm0, %v6981_v36, 0  ;;  %v6976_v43 = vld [vmem:[%s7230_s24 + $0x90] sm:$0xff]  ;;  %v6978_v44 = vld [vmem:[%s7230_s24 + $0xa0] sm:$0xff]  ;;  %v990_v46 = vsel %vm753_vm0, %v6974_v42, 0  ;;  %v6983_v48 = vld [vmem:[%s7230_s24 + $0xc8] sm:$0xff] }
  0x19   : > { %v6980_v45 = vld [vmem:[%s7230_s24 + $0xb0] sm:$0xff]  ;;  %v1019_v47 = vsel %vm753_vm0, %v6976_v43, 0  ;;  %v1048_v49 = vsel %vm753_vm0, %v6978_v44, 0  ;;  %v6985_v50 = vld [vmem:[%s7230_s24 + $0xd8] sm:$0xff]  ;;  %v6987_v52 = vld [vmem:[%s7230_s24 + $0xe8] sm:$0xff]  ;;  %v1109_v53 = vsel %vm753_vm0, %v6983_v48, 0 }
  0x1a   : > { %v1077_v51 = vsel %vm753_vm0, %v6980_v45, 0  ;;  %v1138_v54 = vsel %vm753_vm0, %v6985_v50, 0  ;;  %v1167_v55 = vsel %vm753_vm0, %v6987_v52, 0  ;;  %v6989_v56 = vld [vmem:[%s7230_s24 + $0xf8] sm:$0xff]  ;;  %v6982_v57 = vld [vmem:[%s7230_s24 + $0xc0] sm:$0xff]  ;;  %v6984_v59 = vld [vmem:[%s7230_s24 + $0xd0] sm:$0xff] }
  0x1b   : > { %770 = vmatpush.bf16.xpose.msra.mxu0 %v758_v16  ;;  %799 = vmatpush.bf16.xpose.msra.mxu1 %v787_v17  ;;  %v1196_v58 = vsel %vm753_vm0, %v6989_v56, 0  ;;  %v6986_v60 = vld [vmem:[%s7230_s24 + $0xe0] sm:$0xff]  ;;  %v6988_v61 = vld [vmem:[%s7230_s24 + $0xf0] sm:$0xff]  ;;  %v1106_v62 = vsel %vm753_vm0, %v6982_v57, 0  ;;  %v1135_v63 = vsel %vm753_vm0, %v6984_v59, 0  ;;  %v6991_v2 = vld [vmem:[%s7230_s24 + $0x108] sm:$0xff] }
  0x1c   : > { %828 = vmatpush.bf16.xpose.msra.mxu2 %v816_v18  ;;  %857 = vmatpush.bf16.xpose.msra.mxu3 %v845_v20  ;;  %v1164_v0 = vsel %vm753_vm0, %v6986_v60, 0  ;;  %v1193_v1 = vsel %vm753_vm0, %v6988_v61, 0  ;;  %v6993_v3 = vld [vmem:[%s7230_s24 + $0x118] sm:$0xff]  ;;  %v6995_v4 = vld [vmem:[%s7230_s24 + $0x128] sm:$0xff]  ;;  %v1225_v5 = vsel %vm753_vm0, %v6991_v2, 0  ;;  %v6990_v9 = vld [vmem:[%s7230_s24 + $0x100] sm:$0xff] }
  0x1d   : > { %v1254_v6 = vsel %vm753_vm0, %v6993_v3, 0  ;;  %v1283_v7 = vsel %vm753_vm0, %v6995_v4, 0  ;;  %v6997_v8 = vld [vmem:[%s7230_s24 + $0x138] sm:$0xff]  ;;  %v6992_v11 = vld [vmem:[%s7230_s24 + $0x110] sm:$0xff]  ;;  %v6994_v12 = vld [vmem:[%s7230_s24 + $0x120] sm:$0xff]  ;;  %v1222_v14 = vsel %vm753_vm0, %v6990_v9, 0 }
  0x1e   : > { %v1312_v10 = vsel %vm753_vm0, %v6997_v8, 0  ;;  %v6996_v13 = vld [vmem:[%s7230_s24 + $0x130] sm:$0xff]  ;;  %v1251_v15 = vsel %vm753_vm0, %v6992_v11, 0  ;;  %v1280_v16 = vsel %vm753_vm0, %v6994_v12, 0  ;;  %v6999_v18 = vld [vmem:[%s7230_s24 + $0x148] sm:$0xff]  ;;  %v6998_v25 = vld [vmem:[%s7230_s24 + $0x140] sm:$0xff] }
  0x1f   : > { %v1309_v17 = vsel %vm753_vm0, %v6996_v13, 0  ;;  %v7003_v20 = vld [vmem:[%s7230_s24 + $0x168] sm:$0xff]  ;;  %v7000_v28 = vld [vmem:[%s7230_s24 + $0x150] sm:$0xff]  ;;  %v7002_v29 = vld [vmem:[%s7230_s24 + $0x160] sm:$0xff]  ;;  %v1338_v31 = vsel %vm753_vm0, %v6998_v25, 0  ;;  %s7130_s29 = smov 12  }
  0x20   : > { %v7004_v30 = vld [vmem:[%s7230_s24 + $0x170] sm:$0xff]  ;;  %v1367_v32 = vsel %vm753_vm0, %v7000_v28, 0  ;;  %v7009_v36 = vld [vmem:[%s7230_s24 + $0x198] sm:$0xff]  ;;  %v7006_v42 = vld [vmem:[%s7230_s24 + $0x180] sm:$0xff]  ;;  %s7131_s19 = smov 4  }
  0x21   : > { %v7008_v44 = vld [vmem:[%s7230_s24 + $0x190] sm:$0xff]  ;;  %v7010_v45 = vld [vmem:[%s7230_s24 + $0x1a0] sm:$0xff]  ;;  %v7405_v56 = vld [vmem:[%s8884_s3 + $0x18] sm:$0xff] }
  0x22   : > { %6129 = vmatmul.msk.bf16.vlgmr.msra.gmra.mxu0 %vm753_vm0, %v7260_v26  ;;  %6138 = vmatmul.msk.bf16.vlgmr.msra.gmra.mxu1 %vm753_vm0, %v7260_v26  ;;  %v1483_v48 = vsel %vm753_vm0, %v7008_v44, 0  ;;  %v7425_v59 = vld [vmem:[%s8884_s3 + $0x8] sm:$0xff]  ;;  %v7431_v60 = vld [vmem:[%s8884_s3] sm:$0xff]  ;;  %v7016_v61 = vld [vmem:[%s7230_s24 + $0x1d0] sm:$0xff] }
  0x23   : > { %885 = vmatpush.bf16.xpose.msrb.mxu0 %v877_v19  ;;  %914 = vmatpush.bf16.xpose.msrb.mxu1 %v906_v21  ;;  %v7001_v19 = vld [vmem:[%s7230_s24 + $0x158] sm:$0xff]  ;;  %v1341_v21 = vsel %vm753_vm0, %v6999_v18, 0  ;;  %v7018_v4 = vld [vmem:[%s7230_s24 + $0x1e0] sm:$0xff]  ;;  %v7020_v25 = vld [vmem:[%s7230_s24 + $0x1f0] sm:$0xff] }
  0x24   : > { %943 = vmatpush.bf16.xpose.msrb.mxu2 %v935_v23  ;;  %972 = vmatpush.bf16.xpose.msrb.mxu3 %v964_v24  ;;  %v1370_v22 = vsel %vm753_vm0, %v7001_v19, 0  ;;  %v1399_v23 = vsel %vm753_vm0, %v7003_v20, 0  ;;  %v7005_v24 = vld [vmem:[%s7230_s24 + $0x178] sm:$0xff]  ;;  %v1628_v8 = vsel %vm753_vm0, %v7018_v4, 0 }
  0x25   : > { %6147 = vmatmul.msk.bf16.vlgmr.msra.gmra.mxu2 %vm753_vm0, %v7260_v26  ;;  %6156 = vmatmul.msk.bf16.vlgmr.msra.gmra.mxu3 %vm753_vm0, %v7260_v26  ;;  %v1428_v27 = vsel %vm753_vm0, %v7005_v24, 0  ;;  %v7021_v18 = vld [vmem:[%s7230_s24 + $0x1f8] sm:$0xff] }
  0x2b   : > { %886 = vmatpush.bf16.xpose.msrb.mxu0 %v874_v33  ;;  %915 = vmatpush.bf16.xpose.msrb.mxu1 %v903_v35  ;;  %v1396_v33 = vsel %vm753_vm0, %v7002_v29, 0  ;;  %v7007_v35 = vld [vmem:[%s7230_s24 + $0x188] sm:$0xff] }
  0x2c   : > { %944 = vmatpush.bf16.xpose.msrb.mxu2 %v932_v37  ;;  %973 = vmatpush.bf16.xpose.msrb.mxu3 %v961_v39  ;;  %v7011_v37 = vld [vmem:[%s7230_s24 + $0x1a8] sm:$0xff]  ;;  %v1486_v39 = vsel %vm753_vm0, %v7009_v36, 0 }
  0x32   : > { %6165 = vmatmul.msk.bf16.vlgmr.msrb.gmra.mxu0 %vm753_vm0, %v7260_v26  ;;  %6174 = vmatmul.msk.bf16.vlgmr.msrb.gmra.mxu1 %vm753_vm0, %v7260_v26 }
  0x33   : > { %1001 = vmatpush.bf16.xpose.msra.mxu0 %v993_v34  ;;  %1030 = vmatpush.bf16.xpose.msra.mxu1 %v1022_v38  ;;  %v1425_v34 = vsel %vm753_vm0, %v7004_v30, 0  ;;  %v1457_v38 = vsel %vm753_vm0, %v7007_v35, 0  ;;  %v1657_v30 = vsel %vm753_vm0, %v7020_v25, 0  ;;  %v2215_v35 = vld [vmem:[%s8886_s5 + $0x10] sm:$0xff] }
  0x34   : > { %1059 = vmatpush.bf16.xpose.msra.mxu2 %v1051_v40  ;;  %1088 = vmatpush.bf16.xpose.msra.mxu3 %v1080_v41  ;;  %v1515_v40 = vsel %vm753_vm0, %v7011_v37, 0  ;;  %v7013_v41 = vld [vmem:[%s7230_s24 + $0x1b8] sm:$0xff] }
  0x35   : > { %6183 = vmatmul.msk.bf16.vlgmr.msrb.gmra.mxu2 %vm753_vm0, %v7260_v26  ;;  %6192 = vmatmul.msk.bf16.vlgmr.msrb.gmra.mxu3 %vm753_vm0, %v7260_v26  ;;  %v1544_v43 = vsel %vm753_vm0, %v7013_v41, 0 }
  0x3b   : > { %1002 = vmatpush.bf16.xpose.msra.mxu0 %v990_v46  ;;  %1031 = vmatpush.bf16.xpose.msra.mxu1 %v1019_v47  ;;  %v7012_v46 = vld [vmem:[%s7230_s24 + $0x1b0] sm:$0xff]  ;;  %v1454_v47 = vsel %vm753_vm0, %v7006_v42, 0 }
  0x3c   : > { %1060 = vmatpush.bf16.xpose.msra.mxu2 %v1048_v49  ;;  %1089 = vmatpush.bf16.xpose.msra.mxu3 %v1077_v51  ;;  %v1512_v49 = vsel %vm753_vm0, %v7010_v45, 0  ;;  %v1541_v50 = vsel %vm753_vm0, %v7012_v46, 0  ;;  %v7015_v51 = vld [vmem:[%s7230_s24 + $0x1c8] sm:$0xff] }
  0x3d   : > { %v1573_v52 = vsel %vm753_vm0, %v7015_v51, 0 }
  0x42   : > { %6201 = vmatmul.msk.bf16.vlgmr.msra.gmra.mxu0 %vm753_vm0, %v7260_v26  ;;  %6210 = vmatmul.msk.bf16.vlgmr.msra.gmra.mxu1 %vm753_vm0, %v7260_v26 }
  0x43   : > { %1117 = vmatpush.bf16.xpose.msrb.mxu0 %v1109_v53  ;;  %1146 = vmatpush.bf16.xpose.msrb.mxu1 %v1138_v54  ;;  %v7014_v53 = vld [vmem:[%s7230_s24 + $0x1c0] sm:$0xff] }
  0x44   : > { %1175 = vmatpush.bf16.xpose.msrb.mxu2 %v1167_v55  ;;  %1204 = vmatpush.bf16.xpose.msrb.mxu3 %v1196_v58  ;;  %v1570_v54 = vsel %vm753_vm0, %v7014_v53, 0  ;;  %v7017_v55 = vld [vmem:[%s7230_s24 + $0x1d8] sm:$0xff]  ;;  %v7415_v58 = vld [vmem:[%s8884_s3 + $0x10] sm:$0xff] }
  0x45   : > { %6219 = vmatmul.msk.bf16.vlgmr.msra.gmra.mxu2 %vm753_vm0, %v7260_v26  ;;  %6228 = vmatmul.msk.bf16.vlgmr.msra.gmra.mxu3 %vm753_vm0, %v7260_v26  ;;  %v1602_v57 = vsel %vm753_vm0, %v7017_v55, 0 }
  0x4b   : > { %1118 = vmatpush.bf16.xpose.msrb.mxu0 %v1106_v62  ;;  %1147 = vmatpush.bf16.xpose.msrb.mxu1 %v1135_v63  ;;  %v1599_v62 = vsel %vm753_vm0, %v7016_v61, 0  ;;  %v7019_v63 = vld [vmem:[%s7230_s24 + $0x1e8] sm:$0xff]  ;;  %s7562_s24 = scalar_lea.vmem %s8888_s7, %s6956_s21  ;;  %s7127_s21 = smov 2  }
  0x4c   : > { %1176 = vmatpush.bf16.xpose.msrb.mxu2 %v1164_v0  ;;  %1205 = vmatpush.bf16.xpose.msrb.mxu3 %v1193_v1  ;;  %v1631_v2 = vsel %vm753_vm0, %v7019_v63, 0  ;;  %v2427_v63 = vld [vmem:[%s8887_s6 + $0x8] sm:$0xff] }
  0x52   : > { %6237 = vmatmul.msk.bf16.vlgmr.msrb.gmra.mxu0 %vm753_vm0, %v7260_v26  ;;  %6246 = vmatmul.msk.bf16.vlgmr.msrb.gmra.mxu1 %vm753_vm0, %v7260_v26 }
  0x53   : > { %1233 = vmatpush.bf16.xpose.msra.mxu0 %v1225_v5  ;;  %1262 = vmatpush.bf16.xpose.msra.mxu1 %v1254_v6 }
  0x54   : > { %1291 = vmatpush.bf16.xpose.msra.mxu2 %v1283_v7  ;;  %1320 = vmatpush.bf16.xpose.msra.mxu3 %v1312_v10 }
  0x55   : > { %6255 = vmatmul.msk.bf16.vlgmr.msrb.gmra.mxu2 %vm753_vm0, %v7260_v26  ;;  %6264 = vmatmul.msk.bf16.vlgmr.msrb.gmra.mxu3 %vm753_vm0, %v7260_v26 }
  0x5b   : > { %1234 = vmatpush.bf16.xpose.msra.mxu0 %v1222_v14  ;;  %1263 = vmatpush.bf16.xpose.msra.mxu1 %v1251_v15 }
  0x5c   : > { %1292 = vmatpush.bf16.xpose.msra.mxu2 %v1280_v16  ;;  %1321 = vmatpush.bf16.xpose.msra.mxu3 %v1309_v17 }
  0x62   : > { %6273 = vmatmul.msk.bf16.vlgmr.msra.gmra.mxu0 %vm753_vm0, %v7260_v26  ;;  %6282 = vmatmul.msk.bf16.vlgmr.msra.gmra.mxu1 %vm753_vm0, %v7260_v26 }
  0x63   : > { %1349 = vmatpush.bf16.xpose.msrb.mxu0 %v1341_v21  ;;  %1378 = vmatpush.bf16.xpose.msrb.mxu1 %v1370_v22  ;;  %v1660_v22 = vsel %vm753_vm0, %v7021_v18, 0 }
  0x64   : > { %1407 = vmatpush.bf16.xpose.msrb.mxu2 %v1399_v23  ;;  %1436 = vmatpush.bf16.xpose.msrb.mxu3 %v1428_v27  ;;  %v2216_v23 = vld [vmem:[%s8886_s5 + $0x18] sm:$0xff] }
  0x65   : > { %6291 = vmatmul.msk.bf16.vlgmr.msra.gmra.mxu2 %vm753_vm0, %v7260_v26  ;;  %6300 = vmatmul.msk.bf16.vlgmr.msra.gmra.mxu3 %vm753_vm0, %v7260_v26 }
  0x6b   : > { %1350 = vmatpush.bf16.xpose.msrb.mxu0 %v1338_v31  ;;  %1379 = vmatpush.bf16.xpose.msrb.mxu1 %v1367_v32 }
  0x6c   : > { %1408 = vmatpush.bf16.xpose.msrb.mxu2 %v1396_v33  ;;  %1437 = vmatpush.bf16.xpose.msrb.mxu3 %v1425_v34 }
  0x72   : > { %6309 = vmatmul.msk.bf16.vlgmr.msrb.gmra.mxu0 %vm753_vm0, %v7260_v26  ;;  %6318 = vmatmul.msk.bf16.vlgmr.msrb.gmra.mxu1 %vm753_vm0, %v7260_v26 }
  0x73   : > { %1465 = vmatpush.bf16.xpose.msra.mxu0 %v1457_v38  ;;  %1494 = vmatpush.bf16.xpose.msra.mxu1 %v1486_v39 }
  0x74   : > { %1523 = vmatpush.bf16.xpose.msra.mxu2 %v1515_v40  ;;  %1552 = vmatpush.bf16.xpose.msra.mxu3 %v1544_v43  ;;  %v2214_v43 = vld [vmem:[%s8886_s5 + $0x8] sm:$0xff] }
  0x75   : > { %6327 = vmatmul.msk.bf16.vlgmr.msrb.gmra.mxu2 %vm753_vm0, %v7260_v26  ;;  %6336 = vmatmul.msk.bf16.vlgmr.msrb.gmra.mxu3 %vm753_vm0, %v7260_v26 }
  0x7b   : > { %1466 = vmatpush.bf16.xpose.msra.mxu0 %v1454_v47  ;;  %1495 = vmatpush.bf16.xpose.msra.mxu1 %v1483_v48 }
  0x7c   : > { %1524 = vmatpush.bf16.xpose.msra.mxu2 %v1512_v49  ;;  %1553 = vmatpush.bf16.xpose.msra.mxu3 %v1541_v50 }
  0x82   : > { %6345 = vmatmul.msk.bf16.vlgmr.msra.gmra.mxu0 %vm753_vm0, %v7260_v26  ;;  %6354 = vmatmul.msk.bf16.vlgmr.msra.gmra.mxu1 %vm753_vm0, %v7260_v26 }
  0x83   : > { %1581 = vmatpush.bf16.xpose.msrb.mxu0 %v1573_v52  ;;  %1610 = vmatpush.bf16.xpose.msrb.mxu1 %v1602_v57  ;;  %v2213_v52 = vld [vmem:[%s8886_s5] sm:$0xff] }
  0x84   : > { %1639 = vmatpush.bf16.xpose.msrb.mxu2 %v1631_v2  ;;  %1668 = vmatpush.bf16.xpose.msrb.mxu3 %v1660_v22 }
  0x85   : > { %6363 = vmatmul.msk.bf16.vlgmr.msra.gmra.mxu2 %vm753_vm0, %v7260_v26  ;;  %6372 = vmatmul.msk.bf16.vlgmr.msra.gmra.mxu3 %vm753_vm0, %v7260_v26 }
  0x8b   : > { %1582 = vmatpush.bf16.xpose.msrb.mxu0 %v1570_v54  ;;  %1611 = vmatpush.bf16.xpose.msrb.mxu1 %v1599_v62  ;;  %v2428_v62 = vld [vmem:[%s8887_s6 + $0x10] sm:$0xff] }
  0x8c   : > { %1640 = vmatpush.bf16.xpose.msrb.mxu2 %v1628_v8  ;;  %1669 = vmatpush.bf16.xpose.msrb.mxu3 %v1657_v30 }
  0x92   : > { %6381 = vmatmul.msk.bf16.vlgmr.msrb.gmra.mxu0 %vm753_vm0, %v7260_v26  ;;  %6390 = vmatmul.msk.bf16.vlgmr.msrb.gmra.mxu1 %vm753_vm0, %v7260_v26 }
  0x93   : > { %1788 = vmatpush.msra.mxu0 %v7405_v56  ;;  %7086 = vmatpush.msra.mxu1 %v7405_v56 }
  0x94   : > { %7087 = vmatpush.msra.mxu2 %v7405_v56  ;;  %7088 = vmatpush.msra.mxu3 %v7405_v56 }
  0x95   : > { %1789 = vmatpush.msra.mxu0 %v7415_v58  ;;  %7089 = vmatpush.msra.mxu1 %v7415_v58 }
  0x96   : > { %7090 = vmatpush.msra.mxu2 %v7415_v58  ;;  %7091 = vmatpush.msra.mxu3 %v7415_v58  ;;  %v2429_v58 = vld [vmem:[%s8887_s6 + $0x18] sm:$0xff] }
  0x97   : > { %1790 = vmatpush.msra.mxu0 %v7425_v59  ;;  %7092 = vmatpush.msra.mxu1 %v7425_v59 }
  0x98   : > { %7093 = vmatpush.msra.mxu2 %v7425_v59  ;;  %7094 = vmatpush.msra.mxu3 %v7425_v59 }
  0x99   : > { %1791 = vmatpush.msra.mxu0 %v7431_v60  ;;  %7095 = vmatpush.msra.mxu1 %v7431_v60 }
  0x9a   : > { %6399 = vmatmul.msk.bf16.vlgmr.msrb.gmra.mxu2 %vm753_vm0, %v7260_v26  ;;  %6408 = vmatmul.msk.bf16.vlgmr.msrb.gmra.mxu3 %vm753_vm0, %v7260_v26 }
  0x9b   : > { %7096 = vmatpush.msra.mxu2 %v7431_v60  ;;  %2325 = vmatpush.msrb.mxu1 %v2216_v23 }
  0x9c   : > { %7097 = vmatpush.msra.mxu3 %v7431_v60 }
  0x9d   : > { %2326 = vmatpush.msrb.mxu1 %v2215_v35  ;;  %2442 = vmatpush.msrb.mxu2 %v2429_v58 }
  0x9f   : > { %v772_v0 = vpop.f32.mrf.mxu0  ;;  %v801_v1 = vpop.f32.mrf.mxu1  ;;  %2327 = vmatpush.msrb.mxu1 %v2214_v43  ;;  %2443 = vmatpush.msrb.mxu2 %v2428_v62 }
  0xa1   : > { %2328 = vmatpush.msrb.mxu1 %v2213_v52  ;;  %2444 = vmatpush.msrb.mxu2 %v2427_v63 }
  0xa2   : > { %6409 = vmatmul.msk.f32.vlgmr.msra.gmra.mxu0 %vm1679_vm1, %v772_v0  ;;  %v2426_v0 = vld [vmem:[%s8887_s6] sm:$0xff] }
  0xa3   : > { %2445 = vmatpush.msrb.mxu2 %v2426_v0 }
  0xa7   : > { %v774_v5 = vpop.f32.mrf.mxu0  ;;  %v803_v6 = vpop.f32.mrf.mxu1 }
  0xa8   : > { %v830_v3 = vpop.f32.mrf.mxu2  ;;  %v859_v7 = vpop.f32.mrf.mxu3 }
  0xaa   : > { %6410 = vmatmul.msk.f32.gmra.mxu0 %vm1679_vm1, %v801_v1 }
  0xaf   : > { %v888_v10 = vpop.f32.mrf.mxu0  ;;  %v917_v11 = vpop.f32.mrf.mxu1 }
  0xb0   : > { %v832_v9 = vpop.f32.mrf.mxu2  ;;  %v861_v12 = vpop.f32.mrf.mxu3 }
  0xb1   : > { %v7533_v12 = vld [vmem:[%s8882_s1] sm:$0xff] }
  0xb2   : > { %6411 = vmatmul.msk.f32.gmra.mxu0 %vm1679_vm1, %v830_v3 }
  0xb7   : > { %v890_v14 = vpop.f32.mrf.mxu0  ;;  %v919_v15 = vpop.f32.mrf.mxu1 }
  0xb8   : > { %v946_v13 = vpop.f32.mrf.mxu2  ;;  %v975_v16 = vpop.f32.mrf.mxu3 }
  0xba   : > { %6412 = vmatmul.msk.f32.gmra.mxu0 %vm1679_vm1, %v859_v7 }
  0xbf   : > { %v1004_v19 = vpop.f32.mrf.mxu0  ;;  %v1033_v20 = vpop.f32.mrf.mxu1 }
  0xc0   : > { %v948_v17 = vpop.f32.mrf.mxu2  ;;  %6417 = vmatmul.msk.f32.vlgmr.msra.gmra.mxu1 %vm1679_vm1, %v1004_v19  ;;  %v977_v21 = vpop.f32.mrf.mxu3 }
  0xc2   : > { %6413 = vmatmul.msk.f32.gmra.mxu0 %vm1679_vm1, %v888_v10 }
  0xc7   : > { %v1006_v27 = vpop.f32.mrf.mxu0  ;;  %v1035_v28 = vpop.f32.mrf.mxu1 }
  0xc8   : > { %v1062_v24 = vpop.f32.mrf.mxu2  ;;  %6418 = vmatmul.msk.f32.gmra.mxu1 %vm1679_vm1, %v1033_v20  ;;  %v1091_v29 = vpop.f32.mrf.mxu3 }
  0xca   : > { %6414 = vmatmul.msk.f32.gmra.mxu0 %vm1679_vm1, %v917_v11  ;;  %v7528_v11 = vld [vmem:[%s7525_s17] sm:$0xff] }
  0xcb   : > { %v1929_v17 = vrot.slane %v7528_v11, 1  ;;  %v1930_v23 = vrot.slane %v7528_v11, 2  ;;  %v1931_v30 = vrot.slane %v7528_v11, 3  ;;  %v1933_v43 = vrot.slane %v7528_v11, 5 }
  0xcc   : > { %v1935_v58 = vrot.slane %v7528_v11, 7 }
  0xcd   : > { %v1958_v19 = vperm.slane %v1929_v17, 0  ;;  %v1959_v25 = vperm.slane %v1930_v23, 0  ;;  %v7022_v17 = vld [vmem:[%s7562_s24] sm:$0xff] }
  0xce   : > { %v1964_v62 = vperm.slane %v1935_v58, 0  ;;  %v7059_v58 = vld [vmem:[%s7562_s24 + $0x128] sm:$0xff] }
  0xcf   : > { %v1120_v32 = vpop.f32.mrf.mxu0  ;;  %v1149_v33 = vpop.f32.mrf.mxu1 }
  0xd0   : > { %v1064_v31 = vpop.f32.mrf.mxu2  ;;  %6419 = vmatmul.msk.f32.gmra.mxu1 %vm1679_vm1, %v1062_v24  ;;  %v1093_v34 = vpop.f32.mrf.mxu3 }
  0xd2   : > { %6415 = vmatmul.msk.f32.gmra.mxu0 %vm1679_vm1, %v946_v13  ;;  %v1957_v13 = vperm.slane %v7528_v11, 0 }
  0xd7   : > { %v1122_v37 = vpop.f32.mrf.mxu0  ;;  %v1151_v38 = vpop.f32.mrf.mxu1 }
  0xd8   : > { %v1178_v36 = vpop.f32.mrf.mxu2  ;;  %6420 = vmatmul.msk.f32.gmra.mxu1 %vm1679_vm1, %v1091_v29  ;;  %v1207_v39 = vpop.f32.mrf.mxu3  ;;  %v1932_v37 = vrot.slane %v7528_v11, 4 }
  0xda   : > { %6416 = vmatmul.msk.f32.gmra.mxu0 %vm1679_vm1, %v975_v16 }
  0xdf   : > { %v1236_v41 = vpop.f32.mrf.mxu0  ;;  %v1265_v26 = vpop.f32.mrf.mxu1 }
  0xe0   : > { %v1180_v40 = vpop.f32.mrf.mxu2  ;;  %6421 = vmatmul.msk.f32.gmra.mxu1 %vm1679_vm1, %v1120_v32  ;;  %6425 = vmatmul.msk.f32.vlgmr.msra.gmra.mxu2 %vm1679_vm1, %v1236_v41  ;;  %v1209_v42 = vpop.f32.mrf.mxu3 }
  0xe1   : > { %v1961_v40 = vperm.slane %v1932_v37, 0 }
  0xe7   : > { %v1238_v45 = vpop.f32.mrf.mxu0  ;;  %v1267_v46 = vpop.f32.mrf.mxu1 }
  0xe8   : > { %v1294_v44 = vpop.f32.mrf.mxu2  ;;  %6426 = vmatmul.msk.f32.gmra.mxu2 %vm1679_vm1, %v1265_v26  ;;  %v1323_v47 = vpop.f32.mrf.mxu3  ;;  %6422 = vmatmul.msk.f32.gmra.mxu1 %vm1679_vm1, %v1149_v33  ;;  %v1960_v33 = vperm.slane %v1931_v30, 0  ;;  %v1962_v45 = vperm.slane %v1933_v43, 0 }
  0xef   : > { %v1352_v49 = vpop.f32.mrf.mxu0  ;;  %v1381_v50 = vpop.f32.mrf.mxu1 }
  0xf0   : > { %v1296_v48 = vpop.f32.mrf.mxu2  ;;  %6427 = vmatmul.msk.f32.gmra.mxu2 %vm1679_vm1, %v1294_v44  ;;  %v1325_v51 = vpop.f32.mrf.mxu3  ;;  %6423 = vmatmul.msk.f32.gmra.mxu1 %vm1679_vm1, %v1178_v36 }
  0xf1   : > { %v7023_v48 = vld [vmem:[%s7562_s24 + $0x8] sm:$0xff] }
  0xf2   : > { %v2592_v51 = vsel %vm1679_vm1, %v7023_v48, 0 }
  0xf3   : > { %2600 = vmatpush.bf16.xpose.msrb.mxu3 %v2592_v51 }
  0xf7   : > { %v1354_v54 = vpop.f32.mrf.mxu0  ;;  %v1383_v55 = vpop.f32.mrf.mxu1 }
  0xf8   : > { %v1410_v53 = vpop.f32.mrf.mxu2  ;;  %6428 = vmatmul.msk.f32.gmra.mxu2 %vm1679_vm1, %v1323_v47  ;;  %v1439_v56 = vpop.f32.mrf.mxu3  ;;  %6424 = vmatmul.msk.f32.gmra.mxu1 %vm1679_vm1, %v1207_v39 }
  0xff   : > { %v1468_v59 = vpop.f32.mrf.mxu0  ;;  %v1497_v60 = vpop.f32.mrf.mxu1 }
 0x100   : > { %v1412_v57 = vpop.f32.mrf.mxu2  ;;  %6429 = vmatmul.msk.f32.gmra.mxu2 %vm1679_vm1, %v1352_v49  ;;  %6433 = vmatmul.msk.f32.vlgmr.msra.gmra.mxu3 %vm1679_vm1, %v1468_v59  ;;  %v1441_v61 = vpop.f32.mrf.mxu3 }
 0x107   : > { %v1470_v2 = vpop.f32.mrf.mxu0  ;;  %v1499_v3 = vpop.f32.mrf.mxu1 }
 0x108   : > { %v1526_v1 = vpop.f32.mrf.mxu2  ;;  %6434 = vmatmul.msk.f32.gmra.mxu3 %vm1679_vm1, %v1497_v60  ;;  %6430 = vmatmul.msk.f32.gmra.mxu2 %vm1679_vm1, %v1381_v50  ;;  %v1555_v4 = vpop.f32.mrf.mxu3  ;;  %v1934_v50 = vrot.slane %v7528_v11, 6 }
 0x10a   : > { %v1963_v54 = vperm.slane %v1934_v50, 0 }
 0x10f   : > { %v1584_v6 = vpop.f32.mrf.mxu0  ;;  %v1613_v7 = vpop.f32.mrf.mxu1 }
 0x110   : > { %v1528_v5 = vpop.f32.mrf.mxu2  ;;  %6435 = vmatmul.msk.f32.gmra.mxu3 %vm1679_vm1, %v1526_v1  ;;  %6431 = vmatmul.msk.f32.gmra.mxu2 %vm1679_vm1, %v1410_v53  ;;  %v1557_v8 = vpop.f32.mrf.mxu3  ;;  %v7579_v1 = vld [vmem:[%s7525_s17 + $0x8] sm:$0xff] }
 0x111   : > { %v1965_v5 = vperm.slane %v7579_v1, 0 }
 0x117   : > { %v1586_v9 = vpop.f32.mrf.mxu0  ;;  %v1615_v10 = vpop.f32.mrf.mxu1 }
 0x118   : > { %6436 = vmatmul.msk.f32.gmra.mxu3 %vm1679_vm1, %v1555_v4  ;;  %6432 = vmatmul.msk.f32.gmra.mxu2 %vm1679_vm1, %v1439_v56 }
 0x11d   : > { %v1642_v31 = vpop.f32.mrf.mxu2  ;;  %v1671_v59 = vpop.f32.mrf.mxu3 }
 0x11f   : > { %v1793_v14 = vpop.f32.mrf.mxu0 }
 0x120   : > { %v1889_v15 = vadd.f32 %v1793_v14, %v7533_v12  ;;  %6437 = vmatmul.msk.f32.gmra.mxu3 %vm1679_vm1, %v1584_v6 }
 0x122   : > { %v2021_v16 = vadd.f32 %v1957_v13, %v1889_v15 }
 0x124   : > { %v2053_v18 = vmax.f32 %v2021_v16, 0.0  ;;  %v1937_v16 = vrot.slane %v7579_v1, 2 }
 0x125   : > { %v1644_v38 = vpop.f32.mrf.mxu2  ;;  %v1673_v3 = vpop.f32.mrf.mxu3 }
 0x126   : > { %6441 = vmatmul.msk.f32.vlgmr.msrb.gmra.mxu1 %vm1679_vm1, %v2053_v18  ;;  %6473 = vmatmul.msk.f32.vlgmr.msrb.gmra.mxu2 %vm1679_vm1, %v2053_v18  ;;  %v7638_v3 = vld [vmem:[%s7525_s17 + $0x10] sm:$0xff] }
 0x127   : > { %v1796_v20 = vpop.f32.mrf.mxu0 }
 0x128   : > { %v1890_v21 = vadd.f32 %v1796_v20, %v7533_v12  ;;  %6438 = vmatmul.msk.f32.gmra.mxu3 %vm1679_vm1, %v1613_v7  ;;  %v1936_v7 = vrot.slane %v7579_v1, 1 }
 0x12a   : > { %v2022_v22 = vadd.f32 %v1958_v19, %v1890_v21  ;;  %v1966_v11 = vperm.slane %v1936_v7, 0  ;;  %v1967_v21 = vperm.slane %v1937_v16, 0 }
 0x12c   : > { %v2054_v24 = vmax.f32 %v2022_v22, 0.0  ;;  %v2589_v22 = vsel %vm1679_vm1, %v7022_v17, 0 }
 0x12d   : > { %2601 = vmatpush.bf16.xpose.msrb.mxu3 %v2589_v22 }
 0x12e   : > { %6442 = vmatmul.msk.f32.gmra.mxu1 %vm1679_vm1, %v2054_v24  ;;  %6474 = vmatmul.msk.f32.gmra.mxu2 %vm1679_vm1, %v2054_v24 }
 0x12f   : > { %v1799_v27 = vpop.f32.mrf.mxu0 }
 0x130   : > { %v1891_v28 = vadd.f32 %v1799_v27, %v7533_v12  ;;  %6439 = vmatmul.msk.f32.gmra.mxu3 %vm1679_vm1, %v1642_v31 }
 0x132   : > { %v2023_v29 = vadd.f32 %v1959_v25, %v1891_v28  ;;  %v1938_v25 = vrot.slane %v7579_v1, 3 }
 0x134   : > { %v2055_v32 = vmax.f32 %v2023_v29, 0.0  ;;  %v1968_v29 = vperm.slane %v1938_v25, 0 }
 0x136   : > { %6443 = vmatmul.msk.f32.gmra.mxu1 %vm1679_vm1, %v2055_v32  ;;  %6475 = vmatmul.msk.f32.gmra.mxu2 %vm1679_vm1, %v2055_v32 }
 0x137   : > { %v1802_v34 = vpop.f32.mrf.mxu0 }
 0x138   : > { %v1892_v35 = vadd.f32 %v1802_v34, %v7533_v12  ;;  %6440 = vmatmul.msk.f32.gmra.mxu3 %vm1679_vm1, %v1671_v59 }
 0x13a   : > { %v2024_v36 = vadd.f32 %v1960_v33, %v1892_v35  ;;  %v1939_v33 = vrot.slane %v7579_v1, 4 }
 0x13c   : > { %v2056_v39 = vmax.f32 %v2024_v36, 0.0  ;;  %v1969_v38 = vperm.slane %v1939_v33, 0 }
 0x13d   : > { %v1817_v52 = vpop.f32.mrf.mxu1 }
 0x13e   : > { %6444 = vmatmul.msk.f32.gmra.mxu1 %vm1679_vm1, %v2056_v39  ;;  %6476 = vmatmul.msk.f32.gmra.mxu2 %vm1679_vm1, %v2056_v39  ;;  %v1897_v4 = vadd.f32 %v1817_v52, %v7533_v12  ;;  %v1940_v39 = vrot.slane %v7579_v1, 5 }
 0x13f   : > { %v1805_v41 = vpop.f32.mrf.mxu0 }
 0x140   : > { %v1893_v26 = vadd.f32 %v1805_v41, %v7533_v12  ;;  %v2029_v9 = vadd.f32 %v1965_v5, %v1897_v4 }
 0x142   : > { %v2025_v42 = vadd.f32 %v1961_v40, %v1893_v26  ;;  %v2061_v14 = vmax.f32 %v2029_v9, 0.0  ;;  %v1970_v26 = vperm.slane %v1940_v39, 0  ;;  %v1943_v9 = vrot.slane %v7638_v3, 1 }
 0x144   : > { %v2057_v44 = vmax.f32 %v2025_v42, 0.0  ;;  %v1974_v16 = vperm.slane %v1943_v9, 0 }
 0x145   : > { %v1820_v61 = vpop.f32.mrf.mxu1 }
 0x146   : > { %6445 = vmatmul.msk.f32.gmra.mxu1 %vm1679_vm1, %v2057_v44  ;;  %6477 = vmatmul.msk.f32.gmra.mxu2 %vm1679_vm1, %v2057_v44  ;;  %v1898_v10 = vadd.f32 %v1820_v61, %v7533_v12  ;;  %v3168_v61 = vsel %vm1679_vm1, %v7059_v58, 0 }
 0x147   : > { %v1808_v46 = vpop.f32.mrf.mxu0  ;;  %3176 = vmatpush.bf16.xpose.msra.mxu2 %v3168_v61 }
 0x148   : > { %v1894_v47 = vadd.f32 %v1808_v46, %v7533_v12  ;;  %v2030_v15 = vadd.f32 %v1966_v11, %v1898_v10  ;;  %v7027_v10 = vld [vmem:[%s7562_s24 + $0x28] sm:$0xff] }
 0x149   : > { %v2656_v17 = vsel %vm1679_vm1, %v7027_v10, 0 }
 0x14a   : > { %v2026_v49 = vadd.f32 %v1962_v45, %v1894_v47  ;;  %v2062_v19 = vmax.f32 %v2030_v15, 0.0  ;;  %v7025_v45 = vld [vmem:[%s7562_s24 + $0x18] sm:$0xff]  ;;  %v1941_v47 = vrot.slane %v7579_v1, 6 }
 0x14b   : > { %v2624_v48 = vsel %vm1679_vm1, %v7025_v45, 0 }
 0x14c   : > { %v2058_v53 = vmax.f32 %v2026_v49, 0.0  ;;  %2632 = vmatpush.bf16.xpose.msra.mxu3 %v2624_v48  ;;  %v1971_v51 = vperm.slane %v1941_v47, 0  ;;  %v1947_v48 = vrot.slane %v7638_v3, 5 }
 0x14d   : > { %v1823_v8 = vpop.f32.mrf.mxu1 }
 0x14e   : > { %6446 = vmatmul.msk.f32.gmra.mxu1 %vm1679_vm1, %v2058_v53  ;;  %6478 = vmatmul.msk.f32.gmra.mxu2 %vm1679_vm1, %v2058_v53  ;;  %v1899_v20 = vadd.f32 %v1823_v8, %v7533_v12  ;;  %v7057_v53 = vld [vmem:[%s7562_s24 + $0x118] sm:$0xff] }
 0x14f   : > { %v1811_v55 = vpop.f32.mrf.mxu0 }
 0x150   : > { %v1895_v56 = vadd.f32 %v1811_v55, %v7533_v12  ;;  %v2031_v24 = vadd.f32 %v1967_v21, %v1899_v20  ;;  %v7026_v21 = vld [vmem:[%s7562_s24 + $0x20] sm:$0xff] }
 0x152   : > { %v2027_v57 = vadd.f32 %v1963_v54, %v1895_v56  ;;  %v2063_v27 = vmax.f32 %v2031_v24, 0.0  ;;  %v7024_v54 = vld [vmem:[%s7562_s24 + $0x10] sm:$0xff]  ;;  %v1942_v56 = vrot.slane %v7579_v1, 7 }
 0x154   : > { %v2059_v60 = vmax.f32 %v2027_v57, 0.0  ;;  %v3136_v57 = vsel %vm1679_vm1, %v7057_v53, 0 }
 0x155   : > { %v1826_v18 = vpop.f32.mrf.mxu1  ;;  %3144 = vmatpush.bf16.xpose.msra.mxu1 %v3136_v57  ;;  %v1948_v57 = vrot.slane %v7638_v3, 6 }
 0x156   : > { %6447 = vmatmul.msk.f32.gmra.mxu1 %vm1679_vm1, %v2059_v60  ;;  %6479 = vmatmul.msk.f32.gmra.mxu2 %vm1679_vm1, %v2059_v60  ;;  %v1900_v28 = vadd.f32 %v1826_v18, %v7533_v12  ;;  %v2621_v60 = vsel %vm1679_vm1, %v7024_v54, 0  ;;  %v1944_v18 = vrot.slane %v7638_v3, 2  ;;  %v1978_v54 = vperm.slane %v1947_v48, 0 }
 0x157   : > { %v1814_v63 = vpop.f32.mrf.mxu0  ;;  %2633 = vmatpush.bf16.xpose.msra.mxu3 %v2621_v60  ;;  %v7030_v60 = vld [vmem:[%s7562_s24 + $0x40] sm:$0xff]  ;;  %v1979_v61 = vperm.slane %v1948_v57, 0 }
 0x158   : > { %v1896_v0 = vadd.f32 %v1814_v63, %v7533_v12  ;;  %v2032_v32 = vadd.f32 %v1968_v29, %v1900_v28  ;;  %v1945_v29 = vrot.slane %v7638_v3, 3 }
 0x15a   : > { %v2028_v2 = vadd.f32 %v1964_v62, %v1896_v0  ;;  %v2064_v34 = vmax.f32 %v2032_v32, 0.0  ;;  %v1972_v0 = vperm.slane %v1942_v56, 0  ;;  %v7029_v32 = vld [vmem:[%s7562_s24 + $0x38] sm:$0xff] }
 0x15c   : > { %v2060_v6 = vmax.f32 %v2028_v2, 0.0 }
 0x15d   : > { %v1829_v30 = vpop.f32.mrf.mxu1 }
 0x15e   : > { %6448 = vmatmul.msk.f32.gmra.mxu1 %vm1679_vm1, %v2060_v6  ;;  %6480 = vmatmul.msk.f32.gmra.mxu2 %vm1679_vm1, %v2060_v6  ;;  %v1901_v37 = vadd.f32 %v1829_v30, %v7533_v12  ;;  %v1973_v6 = vperm.slane %v7638_v3, 0 }
 0x160   : > { %v2033_v40 = vadd.f32 %v1969_v38, %v1901_v37  ;;  %v2688_v38 = vsel %vm1679_vm1, %v7029_v32, 0 }
 0x162   : > { %v2065_v43 = vmax.f32 %v2033_v40, 0.0  ;;  %v1946_v40 = vrot.slane %v7638_v3, 4 }
 0x163   : > { %v7587_v13 = vpop.f32.mrf.mxu2 }
 0x164   : > { %v1905_v5 = vadd.f32 %v7587_v13, %v7533_v12  ;;  %v1977_v45 = vperm.slane %v1946_v40, 0 }
 0x165   : > { %v1832_v36 = vpop.f32.mrf.mxu1 }
 0x166   : > { %6449 = vmatmul.msk.f32.gmra.mxu1 %vm1679_vm1, %v2061_v14  ;;  %6481 = vmatmul.msk.f32.gmra.mxu2 %vm1679_vm1, %v2061_v14  ;;  %v1902_v41 = vadd.f32 %v1832_v36, %v7533_v12  ;;  %v2037_v8 = vadd.f32 %v1973_v6, %v1905_v5 }
 0x168   : > { %v2034_v46 = vadd.f32 %v1970_v26, %v1902_v41  ;;  %v2069_v14 = vmax.f32 %v2037_v8, 0.0  ;;  %v7028_v26 = vld [vmem:[%s7562_s24 + $0x30] sm:$0xff] }
 0x16a   : > { %v2066_v49 = vmax.f32 %v2034_v46, 0.0  ;;  %v2685_v46 = vsel %vm1679_vm1, %v7028_v26, 0  ;;  %v7034_v26 = vld [vmem:[%s7562_s24 + $0x60] sm:$0xff] }
 0x16b   : > { %v7595_v23 = vpop.f32.mrf.mxu2 }
 0x16c   : > { %v1906_v15 = vadd.f32 %v7595_v23, %v7533_v12  ;;  %v1975_v23 = vperm.slane %v1944_v18, 0 }
 0x16d   : > { %v1835_v44 = vpop.f32.mrf.mxu1 }
 0x16e   : > { %6450 = vmatmul.msk.f32.gmra.mxu1 %vm1679_vm1, %v2062_v19  ;;  %6482 = vmatmul.msk.f32.gmra.mxu2 %vm1679_vm1, %v2062_v19  ;;  %v1903_v50 = vadd.f32 %v1835_v44, %v7533_v12  ;;  %v2038_v19 = vadd.f32 %v1974_v16, %v1906_v15  ;;  %v7719_v16 = vld [vmem:[%s7525_s17 + $0x18] sm:$0xff]  ;;  %s8770_s17 = scalar_lea.vmem %s8896_s15, %s7517_s30 }
 0x170   : > { %v2035_v55 = vadd.f32 %v1971_v51, %v1903_v50  ;;  %v2070_v25 = vmax.f32 %v2038_v19, 0.0  ;;  %v7031_v50 = vld [vmem:[%s7562_s24 + $0x48] sm:$0xff] }
 0x171   : > { %v2720_v56 = vsel %vm1679_vm1, %v7031_v50, 0  ;;  %v1952_v50 = vrot.slane %v7719_v16, 3 }
 0x172   : > { %v2067_v62 = vmax.f32 %v2035_v55, 0.0 }
 0x173   : > { %v7601_v31 = vpop.f32.mrf.mxu2 }
 0x174   : > { %v1907_v22 = vadd.f32 %v7601_v31, %v7533_v12 }
 0x175   : > { %v1838_v59 = vpop.f32.mrf.mxu1 }
 0x176   : > { %6451 = vmatmul.msk.f32.gmra.mxu1 %vm1679_vm1, %v2063_v27  ;;  %6483 = vmatmul.msk.f32.gmra.mxu2 %vm1679_vm1, %v2063_v27  ;;  %v1904_v63 = vadd.f32 %v1838_v59, %v7533_v12  ;;  %v2653_v27 = vsel %vm1679_vm1, %v7026_v21, 0  ;;  %v2039_v28 = vadd.f32 %v1975_v23, %v1907_v22  ;;  %v1981_v22 = vperm.slane %v7719_v16, 0 }
 0x178   : > { %v2036_v1 = vadd.f32 %v1972_v0, %v1904_v63  ;;  %v2071_v33 = vmax.f32 %v2039_v28, 0.0  ;;  %v2717_v0 = vsel %vm1679_vm1, %v7030_v60, 0  ;;  %v7035_v28 = vld [vmem:[%s7562_s24 + $0x68] sm:$0xff] }
 0x179   : > { %v7055_v60 = vld [vmem:[%s7562_s24 + $0x108] sm:$0xff] }
 0x17a   : > { %v2068_v4 = vmax.f32 %v2036_v1, 0.0 }
 0x17b   : > { %v7606_v35 = vpop.f32.mrf.mxu2 }
 0x17c   : > { %v1908_v31 = vadd.f32 %v7606_v35, %v7533_v12 }
 0x17e   : > { %6452 = vmatmul.msk.f32.gmra.mxu1 %vm1679_vm1, %v2064_v34  ;;  %6484 = vmatmul.msk.f32.gmra.mxu2 %vm1679_vm1, %v2064_v34  ;;  %v1976_v34 = vperm.slane %v1945_v29, 0 }
 0x180   : > { %v2040_v39 = vadd.f32 %v1976_v34, %v1908_v31 }
 0x182   : > { %v2072_v35 = vmax.f32 %v2040_v39, 0.0 }
 0x183   : > { %v7613_v42 = vpop.f32.mrf.mxu2  ;;  %v1865_v5 = vpop.f32.mrf.mxu3 }
 0x184   : > { %v1909_v44 = vadd.f32 %v7613_v42, %v7533_v12  ;;  %v1913_v21 = vadd.f32 %v1865_v5, %v7533_v12 }
 0x186   : > { %6453 = vmatmul.msk.f32.gmra.mxu1 %vm1679_vm1, %v2065_v43  ;;  %6485 = vmatmul.msk.f32.gmra.mxu2 %vm1679_vm1, %v2065_v43  ;;  %v2041_v47 = vadd.f32 %v1977_v45, %v1909_v44 }
 0x188   : > { %v2073_v53 = vmax.f32 %v2041_v47, 0.0  ;;  %v2781_v47 = vsel %vm1679_vm1, %v7034_v26, 0 }
 0x18b   : > { %v7621_v52 = vpop.f32.mrf.mxu2 }
 0x18c   : > { %v1910_v42 = vadd.f32 %v7621_v52, %v7533_v12 }
 0x18e   : > { %6454 = vmatmul.msk.f32.gmra.mxu1 %vm1679_vm1, %v2066_v49  ;;  %6486 = vmatmul.msk.f32.gmra.mxu2 %vm1679_vm1, %v2066_v49  ;;  %v2042_v58 = vadd.f32 %v1978_v54, %v1910_v42 }
 0x190   : > { %v2074_v63 = vmax.f32 %v2042_v58, 0.0 }
 0x193   : > { %v7633_v2 = vpop.f32.mrf.mxu2 }
 0x194   : > { %v1911_v52 = vadd.f32 %v7633_v2, %v7533_v12  ;;  %v7033_v2 = vld [vmem:[%s7562_s24 + $0x58] sm:$0xff] }
 0x196   : > { %6455 = vmatmul.msk.f32.gmra.mxu1 %vm1679_vm1, %v2067_v62  ;;  %6487 = vmatmul.msk.f32.gmra.mxu2 %vm1679_vm1, %v2067_v62  ;;  %v2043_v1 = vadd.f32 %v1979_v61, %v1911_v52 }
 0x198   : > { %v2075_v8 = vmax.f32 %v2043_v1, 0.0 }
 0x19b   : > { %v7645_v7 = vpop.f32.mrf.mxu2 }
 0x19c   : > { %v1912_v9 = vadd.f32 %v7645_v7, %v7533_v12  ;;  %v7032_v7 = vld [vmem:[%s7562_s24 + $0x50] sm:$0xff] }
 0x19d   : > { %v2749_v23 = vsel %vm1679_vm1, %v7032_v7, 0 }
 0x19e   : > { %6456 = vmatmul.msk.f32.gmra.mxu1 %vm1679_vm1, %v2068_v4  ;;  %6488 = vmatmul.msk.f32.gmra.mxu2 %vm1679_vm1, %v2068_v4  ;;  %v1949_v4 = vrot.slane %v7638_v3, 7  ;;  %v2752_v3 = vsel %vm1679_vm1, %v7033_v2, 0 }
 0x1a0   : > { %v1980_v10 = vperm.slane %v1949_v4, 0 }
 0x1a2   : > { %v2044_v15 = vadd.f32 %v1980_v10, %v1912_v9  ;;  %v7054_v9 = vld [vmem:[%s7562_s24 + $0x100] sm:$0xff] }
 0x1a3   : > { %v2330_v11 = vpop.f32.mrf.mxu1 }
 0x1a4   : > { %v2543_v13 = vpack.c.bf16 %v2330_v11, %v2330_v11  ;;  %v2076_v18 = vmax.f32 %v2044_v15, 0.0 }
 0x1a6   : > { %6457 = vmatmul.msk.f32.gmra.mxu1 %vm1679_vm1, %v2069_v14  ;;  %6489 = vmatmul.msk.f32.gmra.mxu2 %vm1679_vm1, %v2069_v14 }
 0x1a7   : > { %6513 = vmatmul.msk.bf16.vlgmr.msrb.gmra.mxu3 %vm1679_vm1, %v2543_v13  ;;  %v1868_v13 = vpop.f32.mrf.mxu3 }
 0x1a8   : > { %2664 = vmatpush.bf16.xpose.msrb.mxu3 %v2656_v17  ;;  %v1914_v31 = vadd.f32 %v1868_v13, %v7533_v12  ;;  %v1954_v13 = vrot.slane %v7719_v16, 5 }
 0x1a9   : > { %v7656_v20 = vpop.f32.mrf.mxu2 }
 0x1ab   : > { %v2333_v24 = vpop.f32.mrf.mxu1 }
 0x1ac   : > { %v2544_v37 = vpack.c.bf16 %v2333_v24, %v2333_v24  ;;  %v2045_v24 = vadd.f32 %v1981_v22, %v1913_v21 }
 0x1ae   : > { %6458 = vmatmul.msk.f32.gmra.mxu1 %vm1679_vm1, %v2070_v25  ;;  %6490 = vmatmul.msk.f32.gmra.mxu2 %vm1679_vm1, %v2070_v25  ;;  %v1950_v25 = vrot.slane %v7719_v16, 1 }
 0x1af   : > { %v1871_v29 = vpop.f32.mrf.mxu3 }
 0x1b0   : > { %2665 = vmatpush.bf16.xpose.msrb.mxu3 %v2653_v27  ;;  %v1982_v34 = vperm.slane %v1950_v25, 0 }
 0x1b1   : > { %v7665_v30 = vpop.f32.mrf.mxu2 }
 0x1b2   : > { %v2046_v39 = vadd.f32 %v1982_v34, %v1914_v31 }
 0x1b3   : > { %v2336_v36 = vpop.f32.mrf.mxu1 }
 0x1b4   : > { %v2545_v55 = vpack.c.bf16 %v2336_v36, %v2336_v36  ;;  %v2078_v45 = vmax.f32 %v2046_v39, 0.0 }
 0x1b6   : > { %6459 = vmatmul.msk.f32.gmra.mxu1 %vm1679_vm1, %v2071_v33  ;;  %6491 = vmatmul.msk.f32.gmra.mxu2 %vm1679_vm1, %v2071_v33  ;;  %v2077_v33 = vmax.f32 %v2045_v24, 0.0  ;;  %v1986_v24 = vperm.slane %v1954_v13, 0 }
 0x1b7   : > { %6522 = vmatmul.msk.bf16.vlgmr.msra.gmra.mxu3 %vm1679_vm1, %v2544_v37  ;;  %v2784_v37 = vsel %vm1679_vm1, %v7035_v28, 0 }
 0x1b8   : > { %2696 = vmatpush.bf16.xpose.msra.mxu3 %v2688_v38  ;;  %v1951_v38 = vrot.slane %v7719_v16, 2 }
 0x1b9   : > { %v7675_v41 = vpop.f32.mrf.mxu2 }
 0x1bb   : > { %v2339_v43 = vpop.f32.mrf.mxu1 }
 0x1bc   : > { %v2546_v14 = vpack.c.bf16 %v2339_v43, %v2339_v43  ;;  %v1983_v43 = vperm.slane %v1951_v38, 0 }
 0x1be   : > { %6460 = vmatmul.msk.f32.gmra.mxu1 %vm1679_vm1, %v2072_v35  ;;  %6492 = vmatmul.msk.f32.gmra.mxu2 %vm1679_vm1, %v2072_v35  ;;  %v1915_v35 = vadd.f32 %v1871_v29, %v7533_v12  ;;  %v7056_v29 = vld [vmem:[%s7562_s24 + $0x110] sm:$0xff] }
 0x1bf   : > { %v3133_v34 = vsel %vm1679_vm1, %v7056_v29, 0 }
 0x1c0   : > { %2697 = vmatpush.bf16.xpose.msra.mxu3 %v2685_v46  ;;  %v1874_v46 = vpop.f32.mrf.mxu3  ;;  %v2047_v48 = vadd.f32 %v1983_v43, %v1915_v35  ;;  %3145 = vmatpush.bf16.xpose.msra.mxu1 %v3133_v34 }
 0x1c1   : > { %v7684_v49 = vpop.f32.mrf.mxu2  ;;  %v1916_v54 = vadd.f32 %v1874_v46, %v7533_v12 }
 0x1c2   : > { %v2079_v42 = vmax.f32 %v2047_v48, 0.0 }
 0x1c3   : > { %v7687_v51 = vpop.f32.mrf.mxu1 }
 0x1c4   : > { %v2547_v36 = vpack.c.bf16 %v7687_v51, %v7687_v51 }
 0x1c6   : > { %6461 = vmatmul.msk.f32.gmra.mxu1 %vm1679_vm1, %v2073_v53  ;;  %6493 = vmatmul.msk.f32.gmra.mxu2 %vm1679_vm1, %v2073_v53  ;;  %v7037_v53 = vld [vmem:[%s7562_s24 + $0x78] sm:$0xff] }
 0x1c7   : > { %6531 = vmatmul.msk.bf16.vlgmr.msrb.gmra.mxu3 %vm1679_vm1, %v2545_v55  ;;  %v1984_v55 = vperm.slane %v1952_v50, 0  ;;  %v2816_v58 = vsel %vm1679_vm1, %v7037_v53, 0 }
 0x1c8   : > { %2728 = vmatpush.bf16.xpose.msrb.mxu3 %v2720_v56  ;;  %v1877_v61 = vpop.f32.mrf.mxu3 }
 0x1c9   : > { %v7696_v59 = vpop.f32.mrf.mxu2  ;;  %v2048_v52 = vadd.f32 %v1984_v55, %v1916_v54  ;;  %v1917_v2 = vadd.f32 %v1877_v61, %v7533_v12 }
 0x1cb   : > { %v7701_v62 = vpop.f32.mrf.mxu1  ;;  %v2080_v4 = vmax.f32 %v2048_v52, 0.0  ;;  %v7063_v52 = vld [vmem:[%s7562_s24 + $0x148] sm:$0xff] }
 0x1cc   : > { %v2548_v57 = vpack.c.bf16 %v7701_v62, %v7701_v62  ;;  %v7036_v62 = vld [vmem:[%s7562_s24 + $0x70] sm:$0xff] }
 0x1cd   : > { %v2813_v10 = vsel %vm1679_vm1, %v7036_v62, 0 }
 0x1ce   : > { %6462 = vmatmul.msk.f32.gmra.mxu1 %vm1679_vm1, %v2074_v63  ;;  %6494 = vmatmul.msk.f32.gmra.mxu2 %vm1679_vm1, %v2074_v63  ;;  %v3104_v63 = vsel %vm1679_vm1, %v7055_v60, 0 }
 0x1cf   : > { %3112 = vmatpush.bf16.xpose.msrb.mxu0 %v3104_v63 }
 0x1d0   : > { %2729 = vmatpush.bf16.xpose.msrb.mxu3 %v2717_v0  ;;  %v1953_v0 = vrot.slane %v7719_v16, 4 }
 0x1d1   : > { %v7707_v6 = vpop.f32.mrf.mxu2 }
 0x1d3   : > { %v7712_v11 = vpop.f32.mrf.mxu1 }
 0x1d4   : > { %v2549_v25 = vpack.c.bf16 %v7712_v11, %v7712_v11  ;;  %v7038_v11 = vld [vmem:[%s7562_s24 + $0x80] sm:$0xff] }
 0x1d5   : > { %v2845_v43 = vsel %vm1679_vm1, %v7038_v11, 0  ;;  %v7066_v11 = vld [vmem:[%s7562_s24 + $0x160] sm:$0xff] }
 0x1d6   : > { %6463 = vmatmul.msk.f32.gmra.mxu1 %vm1679_vm1, %v2075_v8  ;;  %6495 = vmatmul.msk.f32.gmra.mxu2 %vm1679_vm1, %v2075_v8  ;;  %v1985_v8 = vperm.slane %v1953_v0, 0  ;;  %v7040_v0 = vld [vmem:[%s7562_s24 + $0x90] sm:$0xff] }
 0x1d7   : > { %6540 = vmatmul.msk.bf16.vlgmr.msra.gmra.mxu3 %vm1679_vm1, %v2546_v14  ;;  %v3101_v14 = vsel %vm1679_vm1, %v7054_v9, 0 }
 0x1d8   : > { %2760 = vmatpush.bf16.xpose.msra.mxu3 %v2752_v3  ;;  %v1880_v3 = vpop.f32.mrf.mxu3  ;;  %v2049_v15 = vadd.f32 %v1985_v8, %v1917_v2  ;;  %3113 = vmatpush.bf16.xpose.msrb.mxu0 %v3101_v14  ;;  %v7065_v2 = vld [vmem:[%s7562_s24 + $0x158] sm:$0xff]  ;;  %v2877_v8 = vsel %vm1679_vm1, %v7040_v0, 0 }
 0x1d9   : > { %v7721_v17 = vpop.f32.mrf.mxu2 }
 0x1da   : > { %v2081_v22 = vmax.f32 %v2049_v15, 0.0 }
 0x1db   : > { %v7724_v19 = vpop.f32.mrf.mxu1 }
 0x1de   : > { %6464 = vmatmul.msk.f32.gmra.mxu1 %vm1679_vm1, %v2076_v18  ;;  %6496 = vmatmul.msk.f32.gmra.mxu2 %vm1679_vm1, %v2076_v18  ;;  %v7039_v18 = vld [vmem:[%s7562_s24 + $0x88] sm:$0xff] }
 0x1df   : > { %v2848_v28 = vsel %vm1679_vm1, %v7039_v18, 0 }
 0x1e0   : > { %2761 = vmatpush.bf16.xpose.msra.mxu3 %v2749_v23  ;;  %v1918_v23 = vadd.f32 %v1880_v3, %v7533_v12  ;;  %v1883_v31 = vpop.f32.mrf.mxu3  ;;  %v7043_v3 = vld [vmem:[%s7562_s24 + $0xa8] sm:$0xff] }
 0x1e1   : > { %v7732_v27 = vpop.f32.mrf.mxu2  ;;  %v1919_v38 = vadd.f32 %v1883_v31, %v7533_v12 }
 0x1e3   : > { %v7735_v32 = vpop.f32.mrf.mxu1 }
 0x1e4   : > { %v2551_v18 = vpack.c.bf16 %v7735_v32, %v7735_v32 }
 0x1e6   : > { %6465 = vmatmul.msk.f32.gmra.mxu1 %vm1679_vm1, %v2077_v33  ;;  %6497 = vmatmul.msk.f32.gmra.mxu2 %vm1679_vm1, %v2077_v33  ;;  %v1955_v33 = vrot.slane %v7719_v16, 6 }
 0x1e7   : > { %6549 = vmatmul.msk.bf16.vlgmr.msrb.gmra.mxu3 %vm1679_vm1, %v2547_v36  ;;  %v2050_v36 = vadd.f32 %v1986_v24, %v1918_v23  ;;  %v7064_v23 = vld [vmem:[%s7562_s24 + $0x150] sm:$0xff]  ;;  %v7067_v24 = vld [vmem:[%s7562_s24 + $0x168] sm:$0xff] }
 0x1e8   : > { %2792 = vmatpush.bf16.xpose.msrb.mxu3 %v2784_v37  ;;  %v1987_v39 = vperm.slane %v1955_v33, 0  ;;  %v1886_v48 = vpop.f32.mrf.mxu3  ;;  %v7042_v33 = vld [vmem:[%s7562_s24 + $0xa0] sm:$0xff] }
 0x1e9   : > { %v7745_v40 = vpop.f32.mrf.mxu2  ;;  %v2082_v35 = vmax.f32 %v2050_v36, 0.0  ;;  %v1920_v55 = vadd.f32 %v1886_v48, %v7533_v12  ;;  %v3232_v12 = vsel %vm1679_vm1, %v7063_v52, 0  ;;  %v2909_v36 = vsel %vm1679_vm1, %v7042_v33, 0  ;;  %v7074_v33 = vld [vmem:[%s7562_s24 + $0x1a0] sm:$0xff] }
 0x1ea   : > { %v2051_v46 = vadd.f32 %v1987_v39, %v1919_v38  ;;  %3240 = vmatpush.bf16.xpose.msra.mxu0 %v3232_v12  ;;  %v3293_v38 = vsel %vm1679_vm1, %v7066_v11, 0 }
 0x1eb   : > { %v7749_v44 = vpop.f32.mrf.mxu1 }
 0x1ec   : > { %v2083_v54 = vmax.f32 %v2051_v46, 0.0 }
 0x1ee   : > { %6466 = vmatmul.msk.f32.gmra.mxu1 %vm1679_vm1, %v2078_v45  ;;  %6498 = vmatmul.msk.f32.gmra.mxu2 %vm1679_vm1, %v2078_v45  ;;  %v7058_v45 = vld [vmem:[%s7562_s24 + $0x120] sm:$0xff] }
 0x1ef   : > { %v3165_v50 = vsel %vm1679_vm1, %v7058_v45, 0 }
 0x1f0   : > { %2793 = vmatpush.bf16.xpose.msrb.mxu3 %v2781_v47  ;;  %v1956_v47 = vrot.slane %v7719_v16, 7  ;;  %3177 = vmatpush.bf16.xpose.msra.mxu2 %v3165_v50  ;;  %v2550_v16 = vpack.c.bf16 %v7724_v19, %v7724_v19  ;;  %v7071_v50 = vld [vmem:[%s7562_s24 + $0x188] sm:$0xff] }
 0x1f1   : > { %v7755_v51 = vpop.f32.mrf.mxu2 }
 0x1f3   : > { %v7759_v56 = vpop.f32.mrf.mxu1 }
 0x1f6   : > { %6467 = vmatmul.msk.f32.gmra.mxu1 %vm1679_vm1, %v2079_v42  ;;  %6499 = vmatmul.msk.f32.gmra.mxu2 %vm1679_vm1, %v2079_v42  ;;  %v7041_v42 = vld [vmem:[%s7562_s24 + $0x98] sm:$0xff] }
 0x1f7   : > { %6558 = vmatmul.msk.bf16.vlgmr.msra.gmra.mxu3 %vm1679_vm1, %v2548_v57  ;;  %v1988_v57 = vperm.slane %v1956_v47, 0  ;;  %v2880_v60 = vsel %vm1679_vm1, %v7041_v42, 0  ;;  %v2552_v47 = vpack.c.bf16 %v7749_v44, %v7749_v44  ;;  %v3360_v42 = vsel %vm1679_vm1, %v7071_v50, 0  ;;  %v7070_v44 = vld [vmem:[%s7562_s24 + $0x180] sm:$0xff] }
 0x1f8   : > { %2824 = vmatpush.bf16.xpose.msra.mxu3 %v2816_v58 }
 0x1f9   : > { %v7770_v1 = vpop.f32.mrf.mxu2  ;;  %v2052_v61 = vadd.f32 %v1988_v57, %v1920_v55  ;;  %v7044_v55 = vld [vmem:[%s7562_s24 + $0xb0] sm:$0xff] }
 0x1fa   : > { %v2941_v52 = vsel %vm1679_vm1, %v7044_v55, 0 }
 0x1fb   : > { %v7773_v5 = vpop.f32.mrf.mxu1  ;;  %v2084_v62 = vmax.f32 %v2052_v61, 0.0  ;;  %v3357_v61 = vsel %vm1679_vm1, %v7070_v44, 0  ;;  %v7081_v44 = vld [vmem:[%s7562_s24 + $0x1d8] sm:$0xff] }
 0x1fe   : > { %6468 = vmatmul.msk.f32.gmra.mxu1 %vm1679_vm1, %v2080_v4  ;;  %6500 = vmatmul.msk.f32.gmra.mxu2 %vm1679_vm1, %v2080_v4  ;;  %v7062_v4 = vld [vmem:[%s7562_s24 + $0x140] sm:$0xff] }
 0x1ff   : > { %v3229_v9 = vsel %vm1679_vm1, %v7062_v4, 0 }
 0x200   : > { %2825 = vmatpush.bf16.xpose.msra.mxu3 %v2813_v10  ;;  %v3264_v10 = vsel %vm1679_vm1, %v7065_v2, 0  ;;  %3241 = vmatpush.bf16.xpose.msra.mxu0 %v3229_v9  ;;  %v2553_v9 = vpack.c.bf16 %v7759_v56, %v7759_v56 }
 0x201   : > { %v7782_v7 = vpop.f32.mrf.mxu2  ;;  %3272 = vmatpush.bf16.xpose.msrb.mxu1 %v3264_v10 }
 0x203   : > { %v7785_v21 = vpop.f32.mrf.mxu1 }
 0x206   : > { %6469 = vmatmul.msk.f32.gmra.mxu1 %vm1679_vm1, %v2081_v22  ;;  %6501 = vmatmul.msk.f32.gmra.mxu2 %vm1679_vm1, %v2081_v22  ;;  %v2912_v22 = vsel %vm1679_vm1, %v7043_v3, 0  ;;  %v7072_v3 = vld [vmem:[%s7562_s24 + $0x190] sm:$0xff] }
 0x207   : > { %6567 = vmatmul.msk.bf16.vlgmr.msrb.gmra.mxu3 %vm1679_vm1, %v2549_v25  ;;  %v3261_v25 = vsel %vm1679_vm1, %v7064_v23, 0  ;;  %v7046_v23 = vld [vmem:[%s7562_s24 + $0xc0] sm:$0xff] }
 0x208   : > { %2856 = vmatpush.bf16.xpose.msrb.mxu3 %v2848_v28  ;;  %v3296_v28 = vsel %vm1679_vm1, %v7067_v24, 0 }
 0x209   : > { %v7797_v37 = vpop.f32.mrf.mxu2  ;;  %3273 = vmatpush.bf16.xpose.msrb.mxu1 %v3261_v25  ;;  %3304 = vmatpush.bf16.xpose.msrb.mxu2 %v3296_v28  ;;  %v2973_v28 = vsel %vm1679_vm1, %v7046_v23, 0 }
 0x20b   : > { %v7801_v26 = vpop.f32.mrf.mxu1 }
 0x20e   : > { %6470 = vmatmul.msk.f32.gmra.mxu1 %vm1679_vm1, %v2082_v35  ;;  %6502 = vmatmul.msk.f32.gmra.mxu2 %vm1679_vm1, %v2082_v35  ;;  %v7045_v35 = vld [vmem:[%s7562_s24 + $0xb8] sm:$0xff] }
 0x20f   : > { %v2944_v48 = vsel %vm1679_vm1, %v7045_v35, 0 }
 0x210   : > { %2857 = vmatpush.bf16.xpose.msrb.mxu3 %v2845_v43 }
 0x211   : > { %v7809_v53 = vpop.f32.mrf.mxu2  ;;  %3305 = vmatpush.bf16.xpose.msrb.mxu2 %v3293_v38 }
 0x213   : > { %v7813_v58 = vpop.f32.mrf.mxu1 }
 0x216   : > { %6471 = vmatmul.msk.f32.gmra.mxu1 %vm1679_vm1, %v2083_v54  ;;  %6503 = vmatmul.msk.f32.gmra.mxu2 %vm1679_vm1, %v2083_v54 }
 0x217   : > { %6576 = vmatmul.msk.bf16.vlgmr.msra.gmra.mxu3 %vm1679_vm1, %v2550_v16 }
 0x218   : > { %2888 = vmatpush.bf16.xpose.msra.mxu3 %v2880_v60  ;;  %v7073_v60 = vld [vmem:[%s7562_s24 + $0x198] sm:$0xff] }
 0x219   : > { %v7823_v63 = vpop.f32.mrf.mxu2  ;;  %v3392_v12 = vsel %vm1679_vm1, %v7073_v60, 0 }
 0x21b   : > { %v7826_v19 = vpop.f32.mrf.mxu1 }
 0x21e   : > { %6472 = vmatmul.msk.f32.gmra.mxu1 %vm1679_vm1, %v2084_v62  ;;  %6504 = vmatmul.msk.f32.gmra.mxu2 %vm1679_vm1, %v2084_v62  ;;  %v7047_v62 = vld [vmem:[%s7562_s24 + $0xc8] sm:$0xff] }
 0x21f   : > { %v2976_v10 = vsel %vm1679_vm1, %v7047_v62, 0 }
 0x220   : > { %2889 = vmatpush.bf16.xpose.msra.mxu3 %v2877_v8 }
 0x221   : > { %v7835_v14 = vpop.f32.mrf.mxu2 }
 0x223   : > { %v2378_v15 = vpop.f32.mrf.mxu1 }
 0x224   : > { %v2559_v13 = vpack.c.bf16 %v2378_v15, %v2378_v15  ;;  %v7075_v15 = vld [vmem:[%s7562_s24 + $0x1a8] sm:$0xff] }
 0x226   : > { %6657 = vmatmul.msk.bf16.vlgmr.msrb.gmra.mxu0 %vm1679_vm1, %v2559_v13  ;;  %v3389_v13 = vsel %vm1679_vm1, %v7072_v3, 0  ;;  %v7080_v3 = vld [vmem:[%s7562_s24 + $0x1d0] sm:$0xff] }
 0x227   : > { %6585 = vmatmul.msk.bf16.vlgmr.msrb.gmra.mxu3 %vm1679_vm1, %v2551_v18  ;;  %3368 = vmatpush.bf16.xpose.msrb.mxu0 %v3360_v42  ;;  %v3424_v18 = vsel %vm1679_vm1, %v7075_v15, 0  ;;  %v7083_v15 = vld [vmem:[%s7562_s24 + $0x1e8] sm:$0xff] }
 0x228   : > { %2920 = vmatpush.bf16.xpose.msrb.mxu3 %v2912_v22  ;;  %v3552_v23 = vsel %vm1679_vm1, %v7083_v15, 0 }
 0x229   : > { %v7847_v29 = vpop.f32.mrf.mxu2 }
 0x22a   : > { %v7850_v32 = vpop.f32.mrf.mxu3 }
 0x22b   : > { %v2381_v31 = vpop.f32.mrf.mxu1 }
 0x22c   : > { %v2560_v34 = vpack.c.bf16 %v2381_v31, %v2381_v31  ;;  %v3421_v31 = vsel %vm1679_vm1, %v7074_v33, 0 }
 0x22e   : > { %6666 = vmatmul.msk.bf16.vlgmr.msra.gmra.mxu1 %vm1679_vm1, %v2560_v34 }
 0x22f   : > { %3400 = vmatpush.bf16.xpose.msra.mxu1 %v3392_v12  ;;  %3369 = vmatpush.bf16.xpose.msrb.mxu0 %v3357_v61  ;;  %v3520_v61 = vsel %vm1679_vm1, %v7081_v44, 0  ;;  %v7051_v12 = vld [vmem:[%s7562_s24 + $0xe8] sm:$0xff] }
 0x230   : > { %2921 = vmatpush.bf16.xpose.msrb.mxu3 %v2909_v36  ;;  %v7049_v36 = vld [vmem:[%s7562_s24 + $0xd8] sm:$0xff] }
 0x231   : > { %v7856_v39 = vpop.f32.mrf.mxu2 }
 0x232   : > { %v2605_v43 = vpop.f32.mrf.mxu3 }
 0x233   : > { %v2384_v45 = vpop.f32.mrf.mxu1  ;;  %v2554_v43 = vpack.c.bf16 %v7773_v5, %v7773_v5  ;;  %v7078_v5 = vld [vmem:[%s7562_s24 + $0x1c0] sm:$0xff] }
 0x234   : > { %v2561_v46 = vpack.c.bf16 %v2384_v45, %v2384_v45  ;;  %v3008_v45 = vsel %vm1679_vm1, %v7049_v36, 0  ;;  %v7082_v36 = vld [vmem:[%s7562_s24 + $0x1e0] sm:$0xff] }
 0x236   : > { %6675 = vmatmul.msk.bf16.vlgmr.msra.gmra.mxu2 %vm1679_vm1, %v2561_v46  ;;  %v7079_v46 = vld [vmem:[%s7562_s24 + $0x1c8] sm:$0xff] }
 0x237   : > { %6594 = vmatmul.msk.bf16.vlgmr.msra.gmra.mxu3 %vm1679_vm1, %v2552_v47  ;;  %3401 = vmatpush.bf16.xpose.msra.mxu1 %v3389_v13  ;;  %v3488_v47 = vsel %vm1679_vm1, %v7079_v46, 0  ;;  %v3602_v13 = vld [vmem:[%s8889_s8 + $0x18] sm:$0xff]  ;;  %v3599_v46 = vld [vmem:[%s8889_s8] sm:$0xff] }
 0x238   : > { %2952 = vmatpush.bf16.xpose.msra.mxu3 %v2944_v48  ;;  %3432 = vmatpush.bf16.xpose.msra.mxu2 %v3424_v18  ;;  %v7048_v48 = vld [vmem:[%s7562_s24 + $0xd0] sm:$0xff]  ;;  %v3517_v18 = vsel %vm1679_vm1, %v7080_v3, 0  ;;  %v2557_v3 = vpack.c.bf16 %v7813_v58, %v7813_v58  ;;  %v7069_v58 = vld [vmem:[%s7562_s24 + $0x178] sm:$0xff] }
 0x239   : > { %v7866_v54 = vpop.f32.mrf.mxu2  ;;  %v3005_v60 = vsel %vm1679_vm1, %v7048_v48, 0 }
 0x23a   : > { %v7869_v57 = vpop.f32.mrf.mxu3 }
 0x23b   : > { %v7871_v16 = vpop.f32.mrf.mxu1 }
 0x240   : > { %2953 = vmatpush.bf16.xpose.msra.mxu3 %v2941_v52  ;;  %3433 = vmatpush.bf16.xpose.msra.mxu2 %v3421_v31  ;;  %v3485_v52 = vsel %vm1679_vm1, %v7078_v5, 0  ;;  %v2556_v5 = vpack.c.bf16 %v7801_v26, %v7801_v26 }
 0x241   : > { %v7878_v0 = vpop.f32.mrf.mxu2 }
 0x242   : > { %v2637_v4 = vpop.f32.mrf.mxu3 }
 0x243   : > { %v2390_v2 = vpop.f32.mrf.mxu1 }
 0x244   : > { %v2563_v8 = vpack.c.bf16 %v2390_v2, %v2390_v2 }
 0x246   : > { %6693 = vmatmul.msk.bf16.vlgmr.msra.gmra.mxu0 %vm1679_vm1, %v2563_v8  ;;  %v2555_v8 = vpack.c.bf16 %v7785_v21, %v7785_v21  ;;  %v7050_v21 = vld [vmem:[%s7562_s24 + $0xe0] sm:$0xff] }
 0x247   : > { %6603 = vmatmul.msk.bf16.vlgmr.msrb.gmra.mxu3 %vm1679_vm1, %v2553_v9  ;;  %3496 = vmatpush.bf16.xpose.msra.mxu0 %v3488_v47  ;;  %v3037_v31 = vsel %vm1679_vm1, %v7050_v21, 0 }
 0x248   : > { %2984 = vmatpush.bf16.xpose.msrb.mxu3 %v2976_v10  ;;  %v3040_v10 = vsel %vm1679_vm1, %v7051_v12, 0 }
 0x249   : > { %v7890_v22 = vpop.f32.mrf.mxu2 }
 0x24a   : > { %v7893_v56 = vpop.f32.mrf.mxu3 }
 0x24b   : > { %v2393_v24 = vpop.f32.mrf.mxu1 }
 0x24c   : > { %v2564_v25 = vpack.c.bf16 %v2393_v24, %v2393_v24 }
 0x24e   : > { %6702 = vmatmul.msk.bf16.vlgmr.msrb.gmra.mxu1 %vm1679_vm1, %v2564_v25  ;;  %v3601_v25 = vld [vmem:[%s8889_s8 + $0x10] sm:$0xff] }
 0x24f   : > { %3528 = vmatpush.bf16.xpose.msrb.mxu1 %v3520_v61  ;;  %3497 = vmatpush.bf16.xpose.msra.mxu0 %v3485_v52  ;;  %v7052_v52 = vld [vmem:[%s7562_s24 + $0xf0] sm:$0xff] }
 0x250   : > { %2985 = vmatpush.bf16.xpose.msrb.mxu3 %v2973_v28 }
 0x251   : > { %v7899_v34 = vpop.f32.mrf.mxu2 }
 0x252   : > { %v2669_v11 = vpop.f32.mrf.mxu3 }
 0x253   : > { %v2396_v38 = vpop.f32.mrf.mxu1  ;;  %v3600_v11 = vld [vmem:[%s8889_s8 + $0x8] sm:$0xff] }
 0x254   : > { %v2565_v35 = vpack.c.bf16 %v2396_v38, %v2396_v38 }
 0x256   : > { %6711 = vmatmul.msk.bf16.vlgmr.msrb.gmra.mxu2 %vm1679_vm1, %v2565_v35  ;;  %v3549_v35 = vsel %vm1679_vm1, %v7082_v36, 0 }
 0x257   : > { %6612 = vmatmul.msk.bf16.vlgmr.msra.gmra.mxu3 %vm1679_vm1, %v2554_v43  ;;  %3529 = vmatpush.bf16.xpose.msrb.mxu1 %v3517_v18  ;;  %v7053_v43 = vld [vmem:[%s7562_s24 + $0xf8] sm:$0xff] }
 0x258   : > { %3016 = vmatpush.bf16.xpose.msra.mxu3 %v3008_v45  ;;  %3560 = vmatpush.bf16.xpose.msrb.mxu2 %v3552_v23  ;;  %v3072_v44 = vsel %vm1679_vm1, %v7053_v43, 0 }
 0x259   : > { %v7912_v42 = vpop.f32.mrf.mxu2 }
 0x25a   : > { %v7910_v50 = vpop.f32.mrf.mxu3 }
 0x25b   : > { %v7914_v55 = vpop.f32.mrf.mxu1 }
 0x260   : > { %3017 = vmatpush.bf16.xpose.msra.mxu3 %v3005_v60  ;;  %3561 = vmatpush.bf16.xpose.msrb.mxu2 %v3549_v35  ;;  %v3328_v35 = vsel %vm1679_vm1, %v7069_v58, 0 }
 0x261   : > { %v7924_v9 = vpop.f32.mrf.mxu2 }
 0x262   : > { %v2701_v62 = vpop.f32.mrf.mxu3 }
 0x263   : > { %v2402_v4 = vpop.f32.mrf.mxu1  ;;  %v3069_v62 = vsel %vm1679_vm1, %v7052_v52, 0  ;;  %v2562_v52 = vpack.c.bf16 %v7871_v16, %v7871_v16 }
 0x264   : > { %v2567_v2 = vpack.c.bf16 %v2402_v4, %v2402_v4  ;;  %v7061_v4 = vld [vmem:[%s7562_s24 + $0x138] sm:$0xff] }
 0x265   : > { %v3200_v15 = vsel %vm1679_vm1, %v7061_v4, 0  ;;  %v7076_v4 = vld [vmem:[%s7562_s24 + $0x1b0] sm:$0xff] }
 0x266   : > { %6729 = vmatmul.msk.bf16.vlgmr.msrb.gmra.mxu0 %vm1679_vm1, %v2567_v2 }
 0x267   : > { %6621 = vmatmul.msk.bf16.vlgmr.msrb.gmra.mxu3 %vm1679_vm1, %v2555_v8  ;;  %3711 = vmatpush.msrb.mxu0 %v3602_v13  ;;  %v7060_v13 = vld [vmem:[%s7562_s24 + $0x130] sm:$0xff] }
 0x268   : > { %3048 = vmatpush.bf16.xpose.msrb.mxu3 %v3040_v10 }
 0x269   : > { %3712 = vmatpush.msrb.mxu0 %v3601_v25  ;;  %v7948_v38 = vpop.f32.mrf.mxu2 }
 0x26a   : > { %v7937_v24 = vpop.f32.mrf.mxu3 }
 0x26b   : > { %v2405_v28 = vpop.f32.mrf.mxu1  ;;  %3713 = vmatpush.msrb.mxu0 %v3600_v11  ;;  %v2558_v11 = vpack.c.bf16 %v7826_v19, %v7826_v19 }
 0x26c   : > { %v2568_v33 = vpack.c.bf16 %v2405_v28, %v2405_v28  ;;  %v3197_v28 = vsel %vm1679_vm1, %v7060_v13, 0 }
 0x26d   : > { %3714 = vmatpush.msrb.mxu0 %v3599_v46 }
 0x26e   : > { %6738 = vmatmul.msk.bf16.vlgmr.msra.gmra.mxu1 %vm1679_vm1, %v2568_v33 }
 0x270   : > { %3049 = vmatpush.bf16.xpose.msrb.mxu3 %v3037_v31 }
 0x271   : > { %v7960_v60 = vpop.f32.mrf.mxu2 }
 0x272   : > { %v2733_v45 = vpop.f32.mrf.mxu3 }
 0x273   : > { %v2408_v47 = vpop.f32.mrf.mxu1  ;;  %v7068_v45 = vld [vmem:[%s7562_s24 + $0x170] sm:$0xff] }
 0x274   : > { %v2569_v48 = vpack.c.bf16 %v2408_v47, %v2408_v47  ;;  %v3325_v47 = vsel %vm1679_vm1, %v7068_v45, 0 }
 0x276   : > { %6747 = vmatmul.msk.bf16.vlgmr.msra.gmra.mxu2 %vm1679_vm1, %v2569_v48 }
 0x277   : > { %6630 = vmatmul.msk.bf16.vlgmr.msra.gmra.mxu3 %vm1679_vm1, %v2556_v5  ;;  %v7077_v5 = vld [vmem:[%s7562_s24 + $0x1b8] sm:$0xff] }
 0x278   : > { %3080 = vmatpush.bf16.xpose.msra.mxu3 %v3072_v44 }
 0x279   : > { %v7969_v2 = vpop.f32.mrf.mxu2 }
 0x27a   : > { %v7963_v61 = vpop.f32.mrf.mxu3 }
 0x27b   : > { %v7965_v12 = vpop.f32.mrf.mxu1 }
 0x280   : > { %3081 = vmatpush.bf16.xpose.msra.mxu3 %v3069_v62  ;;  %v3456_v62 = vsel %vm1679_vm1, %v7077_v5, 0 }
 0x281   : > { %v7977_v25 = vpop.f32.mrf.mxu2 }
 0x282   : > { %v2765_v26 = vpop.f32.mrf.mxu3 }
 0x283   : > { %v2414_v8 = vpop.f32.mrf.mxu1 }
 0x284   : > { %v2571_v10 = vpack.c.bf16 %v2414_v8, %v2414_v8 }
 0x286   : > { %6765 = vmatmul.msk.bf16.vlgmr.msra.gmra.mxu0 %vm1679_vm1, %v2571_v10 }
 0x287   : > { %6639 = vmatmul.msk.bf16.vlgmr.msrb.gmra.mxu3 %vm1679_vm1, %v2557_v3  ;;  %v3453_v3 = vsel %vm1679_vm1, %v7076_v4, 0 }
 0x288   : > { %3208 = vmatpush.bf16.xpose.msrb.mxu3 %v3200_v15 }
 0x289   : > { %v7988_v43 = vpop.f32.mrf.mxu2 }
 0x28a   : > { %v2795_v18 = vpop.f32.mrf.mxu3 }
 0x28b   : > { %v2417_v23 = vpop.f32.mrf.mxu1 }
 0x28c   : > { %v2572_v21 = vpack.c.bf16 %v2417_v23, %v2417_v23  ;;  %v2566_v23 = vpack.c.bf16 %v7914_v55, %v7914_v55 }
 0x28e   : > { %6774 = vmatmul.msk.bf16.vlgmr.msrb.gmra.mxu1 %vm1679_vm1, %v2572_v21 }
 0x290   : > { %3209 = vmatpush.bf16.xpose.msrb.mxu3 %v3197_v28 }
 0x291   : > { %v7995_v19 = vpop.f32.mrf.mxu2 }
 0x292   : > { %v2797_v33 = vpop.f32.mrf.mxu3 }
 0x293   : > { %v2420_v31 = vpop.f32.mrf.mxu1 }
 0x294   : > { %v2573_v36 = vpack.c.bf16 %v2420_v31, %v2420_v31 }
 0x296   : > { %6783 = vmatmul.msk.bf16.vlgmr.msrb.gmra.mxu2 %vm1679_vm1, %v2573_v36  ;;  %6793 = vmatmul.msk.f32.vlgmr.msrb.gmra.mxu0 %vm1679_vm1, %v7850_v32 }
 0x297   : > { %6648 = vmatmul.msk.bf16.vlgmr.msra.gmra.mxu3 %vm1679_vm1, %v2558_v11 }
 0x298   : > { %3336 = vmatpush.bf16.xpose.msra.mxu3 %v3328_v35 }
 0x29a   : > { %v2827_v46 = vpop.f32.mrf.mxu3 }
 0x29b   : > { %v2423_v48 = vpop.f32.mrf.mxu1 }
 0x29c   : > { %v2574_v5 = vpack.c.bf16 %v2423_v48, %v2423_v48  ;;  %v4043_v48 = vld [vmem:[%s8891_s10 + $0x18] sm:$0xff] }
 0x29d   : > { %4152 = vmatpush.msra.mxu1 %v4043_v48 }
 0x29e   : > { %6794 = vmatmul.msk.f32.gmra.mxu0 %vm1679_vm1, %v7869_v57  ;;  %v8006_v57 = vpop.f32.mrf.mxu2 }
 0x2a0   : > { %3337 = vmatpush.bf16.xpose.msra.mxu3 %v3325_v47 }
 0x2a2   : > { %v2829_v44 = vpop.f32.mrf.mxu3 }
 0x2a3   : > { %v7998_v32 = vpop.f32.mrf.mxu0 }
 0x2a6   : > { %6795 = vmatmul.msk.f32.gmra.mxu0 %vm1679_vm1, %v7893_v56  ;;  %v8014_v16 = vpop.f32.mrf.mxu2  ;;  %v7085_v56 = vld [vmem:[%s7562_s24 + $0x1f8] sm:$0xff] }
 0x2a7   : > { %6684 = vmatmul.msk.bf16.vlgmr.msrb.gmra.mxu3 %vm1679_vm1, %v2562_v52  ;;  %v3584_v21 = vsel %vm1679_vm1, %v7085_v56, 0  ;;  %v4041_v56 = vld [vmem:[%s8891_s10 + $0x8] sm:$0xff] }
 0x2a8   : > { %3464 = vmatpush.bf16.xpose.msrb.mxu3 %v3456_v62 }
 0x2aa   : > { %v2859_v26 = vpop.f32.mrf.mxu3 }
 0x2ab   : > { %v3117_v8 = vpop.f32.mrf.mxu0  ;;  %v8009_v10 = vpop.f32.mrf.mxu1 }
 0x2ae   : > { %6796 = vmatmul.msk.f32.gmra.mxu0 %vm1679_vm1, %v7910_v50  ;;  %v7084_v50 = vld [vmem:[%s7562_s24 + $0x1f0] sm:$0xff]  ;;  %s7126_s24 = smov 6  }
 0x2af   : > { %v3581_v33 = vsel %vm1679_vm1, %v7084_v50, 0  ;;  %v4040_v50 = vld [vmem:[%s8891_s10] sm:$0xff] }
 0x2b0   : > { %3465 = vmatpush.bf16.xpose.msrb.mxu3 %v3453_v3 }
 0x2b2   : > { %v2861_v15 = vpop.f32.mrf.mxu3 }
 0x2b3   : > { %v3149_v13 = vpop.f32.mrf.mxu1 }
 0x2b4   : > { %v4256_v13 = vld [vmem:[%s8892_s11 + $0x18] sm:$0xff] }
 0x2b5   : > { %4269 = vmatpush.msra.mxu2 %v4256_v13 }
 0x2b6   : > { %6797 = vmatmul.msk.f32.gmra.mxu0 %vm1679_vm1, %v7937_v24  ;;  %v2570_v24 = vpack.c.bf16 %v7965_v12, %v7965_v12 }
 0x2b7   : > { %6720 = vmatmul.msk.bf16.vlgmr.msra.gmra.mxu3 %vm1679_vm1, %v2566_v23  ;;  %v4255_v23 = vld [vmem:[%s8892_s11 + $0x10] sm:$0xff] }
 0x2b8   : > { %3592 = vmatpush.bf16.xpose.msra.mxu3 %v3584_v21  ;;  %4270 = vmatpush.msra.mxu2 %v4255_v23  ;;  %v4254_v21 = vld [vmem:[%s8892_s11 + $0x8] sm:$0xff] }
 0x2b9   : > { %v8023_v28 = vpop.f32.mrf.mxu2 }
 0x2ba   : > { %v2891_v58 = vpop.f32.mrf.mxu3  ;;  %4271 = vmatpush.msra.mxu2 %v4254_v21 }
 0x2be   : > { %6798 = vmatmul.msk.f32.gmra.mxu0 %vm1679_vm1, %v7963_v61 }
 0x2c0   : > { %3593 = vmatpush.bf16.xpose.msra.mxu3 %v3581_v33  ;;  %v4253_v33 = vld [vmem:[%s8892_s11] sm:$0xff] }
 0x2c1   : > { %v3181_v31 = vpop.f32.mrf.mxu2  ;;  %4272 = vmatpush.msra.mxu2 %v4253_v33 }
 0x2c2   : > { %v2893_v55 = vpop.f32.mrf.mxu3 }
 0x2c3   : > { %v8029_v36 = vpop.f32.mrf.mxu0 }
 0x2c6   : > { %6799 = vmatmul.msk.f32.gmra.mxu0 %vm1679_vm1, %v2795_v18 }
 0x2c7   : > { %6756 = vmatmul.msk.bf16.vlgmr.msrb.gmra.mxu3 %vm1679_vm1, %v2570_v24 }
 0x2ca   : > { %v2923_v11 = vpop.f32.mrf.mxu3 }
 0x2cb   : > { %v3245_v35 = vpop.f32.mrf.mxu0  ;;  %v8035_v45 = vpop.f32.mrf.mxu1 }
 0x2ce   : > { %6800 = vmatmul.msk.f32.gmra.mxu0 %vm1679_vm1, %v2827_v46 }
 0x2d2   : > { %v2925_v47 = vpop.f32.mrf.mxu3 }
 0x2d3   : > { %v3277_v61 = vpop.f32.mrf.mxu1 }
 0x2d6   : > { %6801 = vmatmul.msk.f32.gmra.mxu0 %vm1679_vm1, %v2859_v26  ;;  %v4042_v26 = vld [vmem:[%s8891_s10 + $0x10] sm:$0xff] }
 0x2d7   : > { %6792 = vmatmul.msk.bf16.vlgmr.msra.gmra.mxu3 %vm1679_vm1, %v2574_v5  ;;  %4153 = vmatpush.msra.mxu1 %v4042_v26  ;;  %v8089_v5 = vld [vmem:[%s8086_s28] sm:$0xff] }
 0x2d8   : > { %v3852_v26 = vrot.slane %v8089_v5, 1 }
 0x2d9   : > { %v8040_v44 = vpop.f32.mrf.mxu2  ;;  %4154 = vmatpush.msra.mxu1 %v4041_v56 }
 0x2da   : > { %v2955_v12 = vpop.f32.mrf.mxu3  ;;  %v3881_v13 = vperm.slane %v3852_v26, 0 }
 0x2db   : > { %4155 = vmatpush.msra.mxu1 %v4040_v50 }
 0x2de   : > { %6802 = vmatmul.msk.f32.gmra.mxu0 %vm1679_vm1, %v2891_v58 }
 0x2e1   : > { %v3309_v18 = vpop.f32.mrf.mxu2 }
 0x2e2   : > { %v2957_v52 = vpop.f32.mrf.mxu3  ;;  %v3880_v18 = vperm.slane %v8089_v5, 0 }
 0x2e3   : > { %v8043_v62 = vpop.f32.mrf.mxu0 }
 0x2e6   : > { %6803 = vmatmul.msk.f32.gmra.mxu0 %vm1679_vm1, %v2923_v11 }
 0x2ea   : > { %v2987_v4 = vpop.f32.mrf.mxu3 }
 0x2eb   : > { %v3373_v46 = vpop.f32.mrf.mxu0  ;;  %v8046_v8 = vpop.f32.mrf.mxu1 }
 0x2ee   : > { %6804 = vmatmul.msk.f32.gmra.mxu0 %vm1679_vm1, %v2955_v12 }
 0x2f2   : > { %v2989_v3 = vpop.f32.mrf.mxu3 }
 0x2f3   : > { %v3405_v15 = vpop.f32.mrf.mxu1 }
 0x2f6   : > { %6805 = vmatmul.msk.f32.gmra.mxu0 %vm1679_vm1, %v2987_v4 }
 0x2f9   : > { %v8071_v58 = vpop.f32.mrf.mxu2 }
 0x2fa   : > { %v3019_v31 = vpop.f32.mrf.mxu3 }
 0x2fe   : > { %6806 = vmatmul.msk.f32.gmra.mxu0 %vm1679_vm1, %v3019_v31 }
 0x301   : > { %v3437_v55 = vpop.f32.mrf.mxu2 }
 0x302   : > { %v3021_v24 = vpop.f32.mrf.mxu3 }
 0x303   : > { %v8077_v11 = vpop.f32.mrf.mxu0 }
 0x30a   : > { %v3051_v35 = vpop.f32.mrf.mxu3 }
 0x30b   : > { %6807 = vmatmul.msk.f32.gmra.mxu0 %vm1679_vm1, %v3051_v35  ;;  %v3501_v47 = vpop.f32.mrf.mxu0  ;;  %v8080_v61 = vpop.f32.mrf.mxu1 }
 0x312   : > { %v3053_v12 = vpop.f32.mrf.mxu3 }
 0x313   : > { %v3533_v52 = vpop.f32.mrf.mxu1  ;;  %v3716_v4 = vpop.f32.mrf.mxu0 }
 0x314   : > { %v3812_v46 = vadd.f32 %v3716_v4, %v7656_v20  ;;  %v3853_v20 = vrot.slane %v8089_v5, 2 }
 0x316   : > { %v3944_v48 = vadd.f32 %v3880_v18, %v3812_v46  ;;  %v3882_v24 = vperm.slane %v3853_v20, 0 }
 0x318   : > { %v3976_v3 = vmax.f32 %v3944_v48, 0.0 }
 0x319   : > { %v8094_v56 = vpop.f32.mrf.mxu2 }
 0x31a   : > { %v3083_v15 = vpop.f32.mrf.mxu3  ;;  %6825 = vmatmul.msk.f32.vlgmr.msra.gmra.mxu1 %vm1679_vm1, %v3976_v3  ;;  %6857 = vmatmul.msk.f32.vlgmr.msra.gmra.mxu2 %vm1679_vm1, %v3976_v3 }
 0x31b   : > { %6808 = vmatmul.msk.f32.gmra.mxu0 %vm1679_vm1, %v3083_v15  ;;  %v3719_v23 = vpop.f32.mrf.mxu0 }
 0x31c   : > { %v3813_v21 = vadd.f32 %v3719_v23, %v7665_v30  ;;  %v3854_v30 = vrot.slane %v8089_v5, 3 }
 0x31e   : > { %v3945_v50 = vadd.f32 %v3881_v13, %v3813_v21  ;;  %v3883_v4 = vperm.slane %v3854_v30, 0  ;;  %v3856_v21 = vrot.slane %v8089_v5, 5 }
 0x320   : > { %v3977_v33 = vmax.f32 %v3945_v50, 0.0  ;;  %v4024_v50 = vld [vmem:[%s8123_s16 + $0x10] sm:$0x1] }
 0x321   : > { %v3565_v31 = vpop.f32.mrf.mxu2  ;;  %v4710_v20 = vsel %vm1679_vm1, %v4024_v50, 0 }
 0x322   : > { %v3085_v55 = vpop.f32.mrf.mxu3  ;;  %6826 = vmatmul.msk.f32.gmra.mxu1 %vm1679_vm1, %v3977_v33  ;;  %6858 = vmatmul.msk.f32.gmra.mxu2 %vm1679_vm1, %v3977_v33 }
 0x323   : > { %6809 = vmatmul.msk.f32.gmra.mxu0 %vm1679_vm1, %v7998_v32  ;;  %v3722_v35 = vpop.f32.mrf.mxu0 }
 0x324   : > { %v3814_v47 = vadd.f32 %v3722_v35, %v7675_v41  ;;  %v3855_v41 = vrot.slane %v8089_v5, 4  ;;  %4719 = vmatpush.bf16.xpose.msra.mxu0 %v4710_v20 }
 0x326   : > { %v3946_v12 = vadd.f32 %v3882_v24, %v3814_v47  ;;  %v3884_v15 = vperm.slane %v3855_v41, 0  ;;  %v3857_v24 = vrot.slane %v8089_v5, 6 }
 0x328   : > { %v3978_v18 = vmax.f32 %v3946_v12, 0.0  ;;  %v3886_v12 = vperm.slane %v3857_v24, 0 }
 0x32a   : > { %v3211_v52 = vpop.f32.mrf.mxu3  ;;  %6827 = vmatmul.msk.f32.gmra.mxu1 %vm1679_vm1, %v3978_v18  ;;  %6859 = vmatmul.msk.f32.gmra.mxu2 %vm1679_vm1, %v3978_v18 }
 0x32b   : > { %6810 = vmatmul.msk.f32.gmra.mxu0 %vm1679_vm1, %v8009_v10  ;;  %v3725_v46 = vpop.f32.mrf.mxu0 }
 0x32c   : > { %v3815_v32 = vadd.f32 %v3725_v46, %v7684_v49 }
 0x32e   : > { %v3947_v48 = vadd.f32 %v3883_v4, %v3815_v32 }
 0x330   : > { %v3979_v26 = vmax.f32 %v3947_v48, 0.0 }
 0x332   : > { %v3213_v3 = vpop.f32.mrf.mxu3  ;;  %6828 = vmatmul.msk.f32.gmra.mxu1 %vm1679_vm1, %v3979_v26  ;;  %6860 = vmatmul.msk.f32.gmra.mxu2 %vm1679_vm1, %v3979_v26  ;;  %v8146_v26 = vld [vmem:[%s8086_s28 + $0x8] sm:$0xff] }
 0x333   : > { %6811 = vmatmul.msk.f32.gmra.mxu0 %vm1679_vm1, %v8023_v28  ;;  %v3728_v13 = vpop.f32.mrf.mxu0  ;;  %v3885_v28 = vperm.slane %v3856_v21, 0  ;;  %v3860_v20 = vrot.slane %v8146_v26, 2 }
 0x334   : > { %v3816_v23 = vadd.f32 %v3728_v13, %v7696_v59 }
 0x336   : > { %v3948_v10 = vadd.f32 %v3884_v15, %v3816_v23 }
 0x338   : > { %v3980_v49 = vmax.f32 %v3948_v10, 0.0 }
 0x33a   : > { %v3339_v33 = vpop.f32.mrf.mxu3  ;;  %6829 = vmatmul.msk.f32.gmra.mxu1 %vm1679_vm1, %v3980_v49  ;;  %6861 = vmatmul.msk.f32.gmra.mxu2 %vm1679_vm1, %v3980_v49 }
 0x33b   : > { %6812 = vmatmul.msk.f32.gmra.mxu0 %vm1679_vm1, %v3211_v52  ;;  %v3731_v59 = vpop.f32.mrf.mxu0 }
 0x33c   : > { %v3817_v31 = vadd.f32 %v3731_v59, %v7707_v6  ;;  %v3858_v6 = vrot.slane %v8089_v5, 7  ;;  %v3888_v5 = vperm.slane %v8146_v26, 0  ;;  %v3890_v59 = vperm.slane %v3860_v20, 0 }
 0x33e   : > { %v3949_v55 = vadd.f32 %v3885_v28, %v3817_v31  ;;  %v3887_v32 = vperm.slane %v3858_v6, 0 }
 0x340   : > { %v3981_v35 = vmax.f32 %v3949_v55, 0.0 }
 0x342   : > { %v3341_v47 = vpop.f32.mrf.mxu3  ;;  %6830 = vmatmul.msk.f32.gmra.mxu1 %vm1679_vm1, %v3981_v35  ;;  %6862 = vmatmul.msk.f32.gmra.mxu2 %vm1679_vm1, %v3981_v35 }
 0x343   : > { %6813 = vmatmul.msk.f32.gmra.mxu0 %vm1679_vm1, %v8029_v36  ;;  %v3734_v30 = vpop.f32.mrf.mxu0 }
 0x344   : > { %v3818_v18 = vadd.f32 %v3734_v30, %v7721_v17  ;;  %v4008_v30 = vld [vmem:[%s8123_s16] sm:$0x1] }
 0x346   : > { %v3950_v52 = vadd.f32 %v3886_v12, %v3818_v18  ;;  %v3862_v18 = vrot.slane %v8146_v26, 4 }
 0x348   : > { %v3982_v4 = vmax.f32 %v3950_v52, 0.0  ;;  %v3892_v6 = vperm.slane %v3862_v18, 0 }
 0x34a   : > { %v8138_v46 = vpop.f32.mrf.mxu3  ;;  %6831 = vmatmul.msk.f32.gmra.mxu1 %vm1679_vm1, %v3982_v4  ;;  %6863 = vmatmul.msk.f32.gmra.mxu2 %vm1679_vm1, %v3982_v4 }
 0x34b   : > { %6814 = vmatmul.msk.f32.gmra.mxu0 %vm1679_vm1, %v8035_v45  ;;  %v3737_v48 = vpop.f32.mrf.mxu0 }
 0x34c   : > { %v3819_v36 = vadd.f32 %v3737_v48, %v7732_v27  ;;  %v3859_v27 = vrot.slane %v8146_v26, 1 }
 0x34e   : > { %v3951_v41 = vadd.f32 %v3887_v32, %v3819_v36  ;;  %v3889_v21 = vperm.slane %v3859_v27, 0  ;;  %v3863_v32 = vrot.slane %v8146_v26, 5 }
 0x350   : > { %v3983_v17 = vmax.f32 %v3951_v41, 0.0  ;;  %v3893_v36 = vperm.slane %v3863_v32, 0 }
 0x352   : > { %v3469_v3 = vpop.f32.mrf.mxu3  ;;  %6832 = vmatmul.msk.f32.gmra.mxu1 %vm1679_vm1, %v3983_v17  ;;  %6864 = vmatmul.msk.f32.gmra.mxu2 %vm1679_vm1, %v3983_v17  ;;  %v4009_v17 = vld [vmem:[%s8123_s16 + $0x1] sm:$0x1] }
 0x353   : > { %6815 = vmatmul.msk.f32.gmra.mxu0 %vm1679_vm1, %v8040_v44  ;;  %v3740_v15 = vpop.f32.mrf.mxu0 }
 0x354   : > { %v3820_v45 = vadd.f32 %v3740_v15, %v7745_v40  ;;  %v3864_v15 = vrot.slane %v8146_v26, 6 }
 0x356   : > { %v3952_v13 = vadd.f32 %v3888_v5, %v3820_v45  ;;  %v4025_v45 = vld [vmem:[%s8123_s16 + $0x11] sm:$0x1]  ;;  %v3894_v27 = vperm.slane %v3864_v15, 0 }
 0x358   : > { %v3984_v23 = vmax.f32 %v3952_v13, 0.0 }
 0x35a   : > { %v8155_v10 = vpop.f32.mrf.mxu3  ;;  %6833 = vmatmul.msk.f32.gmra.mxu1 %vm1679_vm1, %v3984_v23  ;;  %6865 = vmatmul.msk.f32.gmra.mxu2 %vm1679_vm1, %v3984_v23 }
 0x35b   : > { %6816 = vmatmul.msk.f32.gmra.mxu0 %vm1679_vm1, %v3339_v33  ;;  %v3743_v49 = vpop.f32.mrf.mxu0 }
 0x35c   : > { %v3821_v50 = vadd.f32 %v3743_v49, %v7755_v51  ;;  %v3861_v51 = vrot.slane %v8146_v26, 3 }
 0x35e   : > { %v3953_v44 = vadd.f32 %v3889_v21, %v3821_v50  ;;  %v3891_v35 = vperm.slane %v3861_v51, 0  ;;  %v3865_v50 = vrot.slane %v8146_v26, 7 }
 0x360   : > { %v3985_v40 = vmax.f32 %v3953_v44, 0.0  ;;  %v4010_v44 = vld [vmem:[%s8123_s16 + $0x2] sm:$0x1]  ;;  %v3895_v20 = vperm.slane %v3865_v50, 0 }
 0x362   : > { %v3597_v28 = vpop.f32.mrf.mxu3  ;;  %6834 = vmatmul.msk.f32.gmra.mxu1 %vm1679_vm1, %v3985_v40  ;;  %6866 = vmatmul.msk.f32.gmra.mxu2 %vm1679_vm1, %v3985_v40 }
 0x363   : > { %6817 = vmatmul.msk.f32.gmra.mxu0 %vm1679_vm1, %v8043_v62  ;;  %v3746_v31 = vpop.f32.mrf.mxu0 }
 0x364   : > { %v3822_v33 = vadd.f32 %v3746_v31, %v7770_v1  ;;  %v4406_v1 = vsel %vm1679_vm1, %v4008_v30, 0  ;;  %v4011_v30 = vld [vmem:[%s8123_s16 + $0x3] sm:$0x1] }
 0x365   : > { %4415 = vmatpush.bf16.xpose.msrb.mxu3 %v4406_v1 }
 0x366   : > { %v3954_v55 = vadd.f32 %v3890_v59, %v3822_v33  ;;  %v4444_v59 = vsel %vm1679_vm1, %v4010_v44, 0 }
 0x368   : > { %v3986_v24 = vmax.f32 %v3954_v55, 0.0 }
 0x36a   : > { %6835 = vmatmul.msk.f32.gmra.mxu1 %vm1679_vm1, %v3986_v24  ;;  %6867 = vmatmul.msk.f32.gmra.mxu2 %vm1679_vm1, %v3986_v24 }
 0x36b   : > { %6818 = vmatmul.msk.f32.gmra.mxu0 %vm1679_vm1, %v8046_v8  ;;  %v3749_v47 = vpop.f32.mrf.mxu0 }
 0x36c   : > { %v3823_v12 = vadd.f32 %v3749_v47, %v7782_v7 }
 0x36e   : > { %v3955_v62 = vadd.f32 %v3891_v35, %v3823_v12 }
 0x370   : > { %v3987_v52 = vmax.f32 %v3955_v62, 0.0 }
 0x372   : > { %6836 = vmatmul.msk.f32.gmra.mxu1 %vm1679_vm1, %v3987_v52  ;;  %6868 = vmatmul.msk.f32.gmra.mxu2 %vm1679_vm1, %v3987_v52 }
 0x373   : > { %6819 = vmatmul.msk.f32.gmra.mxu0 %vm1679_vm1, %v8071_v58  ;;  %v3752_v8 = vpop.f32.mrf.mxu0 }
 0x374   : > { %v3824_v7 = vadd.f32 %v3752_v8, %v7797_v37  ;;  %v4425_v37 = vsel %vm1679_vm1, %v4009_v17, 0 }
 0x375   : > { %4434 = vmatpush.bf16.xpose.msra.mxu3 %v4425_v37 }
 0x376   : > { %v3956_v4 = vadd.f32 %v3892_v6, %v3824_v7  ;;  %v4463_v6 = vsel %vm1679_vm1, %v4011_v30, 0 }
 0x378   : > { %v3988_v48 = vmax.f32 %v3956_v4, 0.0 }
 0x37a   : > { %6837 = vmatmul.msk.f32.gmra.mxu1 %vm1679_vm1, %v3988_v48  ;;  %6869 = vmatmul.msk.f32.gmra.mxu2 %vm1679_vm1, %v3988_v48 }
 0x37b   : > { %6820 = vmatmul.msk.f32.gmra.mxu0 %vm1679_vm1, %v8138_v46  ;;  %v3755_v41 = vpop.f32.mrf.mxu0  ;;  %v4026_v46 = vld [vmem:[%s8123_s16 + $0x12] sm:$0x1] }
 0x37c   : > { %v3825_v58 = vadd.f32 %v3755_v41, %v7809_v53  ;;  %v4729_v53 = vsel %vm1679_vm1, %v4025_v45, 0  ;;  %v4748_v13 = vsel %vm1679_vm1, %v4026_v46, 0 }
 0x37d   : > { %4738 = vmatpush.bf16.xpose.msrb.mxu1 %v4729_v53  ;;  %4757 = vmatpush.bf16.xpose.msrb.mxu2 %v4748_v13 }
 0x37e   : > { %v3957_v3 = vadd.f32 %v3893_v36, %v3825_v58 }
 0x380   : > { %v3989_v5 = vmax.f32 %v3957_v3, 0.0 }
 0x382   : > { %6838 = vmatmul.msk.f32.gmra.mxu1 %vm1679_vm1, %v3989_v5  ;;  %6870 = vmatmul.msk.f32.gmra.mxu2 %vm1679_vm1, %v3989_v5  ;;  %v4012_v5 = vld [vmem:[%s8123_s16 + $0x4] sm:$0x1] }
 0x383   : > { %6821 = vmatmul.msk.f32.gmra.mxu0 %vm1679_vm1, %v8077_v11  ;;  %v4482_v13 = vsel %vm1679_vm1, %v4012_v5, 0 }
 0x388   : > { %v3758_v23 = vpop.f32.mrf.mxu0 }
 0x389   : > { %v3826_v21 = vadd.f32 %v3758_v23, %v7823_v63 }
 0x38b   : > { %v3958_v49 = vadd.f32 %v3894_v27, %v3826_v21  ;;  %6822 = vmatmul.msk.f32.gmra.mxu0 %vm1679_vm1, %v8080_v61 }
 0x38d   : > { %v3990_v11 = vmax.f32 %v3958_v49, 0.0 }
 0x38f   : > { %6839 = vmatmul.msk.f32.gmra.mxu1 %vm1679_vm1, %v3990_v11  ;;  %6871 = vmatmul.msk.f32.gmra.mxu2 %vm1679_vm1, %v3990_v11 }
 0x393   : > { %6823 = vmatmul.msk.f32.gmra.mxu0 %vm1679_vm1, %v8094_v56  ;;  %v8213_v56 = vld [vmem:[%s8086_s28 + $0x10] sm:$0xff] }
 0x394   : > { %v3896_v55 = vperm.slane %v8213_v56, 0  ;;  %v3866_v47 = vrot.slane %v8213_v56, 1  ;;  %v3867_v7 = vrot.slane %v8213_v56, 2  ;;  %v3868_v17 = vrot.slane %v8213_v56, 3 }
 0x395   : > { %v3869_v23 = vrot.slane %v8213_v56, 4 }
 0x396   : > { %v3897_v62 = vperm.slane %v3866_v47, 0  ;;  %v3898_v48 = vperm.slane %v3867_v7, 0  ;;  %v3899_v15 = vperm.slane %v3868_v17, 0 }
 0x397   : > { %v4157_v40 = vpop.f32.mrf.mxu1  ;;  %v3900_v11 = vperm.slane %v3869_v23, 0 }
 0x398   : > { %v3761_v28 = vpop.f32.mrf.mxu0  ;;  %v4370_v63 = vpack.c.bf16 %v4157_v40, %v4157_v40  ;;  %v3870_v40 = vrot.slane %v8213_v56, 5 }
 0x399   : > { %v3827_v61 = vadd.f32 %v3761_v28, %v7835_v14 }
 0x39a   : > { %6889 = vmatmul.msk.bf16.vlgmr.msrb.gmra.mxu3 %vm1679_vm1, %v4370_v63 }
 0x39b   : > { %v3959_v31 = vadd.f32 %v3895_v20, %v3827_v61  ;;  %6824 = vmatmul.msk.f32.gmra.mxu0 %vm1679_vm1, %v8155_v10  ;;  %4453 = vmatpush.bf16.xpose.msrb.mxu3 %v4444_v59  ;;  %v4013_v59 = vld [vmem:[%s8123_s16 + $0x5] sm:$0x1]  ;;  %v3901_v61 = vperm.slane %v3870_v40, 0 }
 0x39d   : > { %v3991_v26 = vmax.f32 %v3959_v31, 0.0  ;;  %v8215_v33 = vpop.f32.mrf.mxu2 }
 0x39f   : > { %6840 = vmatmul.msk.f32.gmra.mxu1 %vm1679_vm1, %v3991_v26  ;;  %6872 = vmatmul.msk.f32.gmra.mxu2 %vm1679_vm1, %v3991_v26  ;;  %v4160_v14 = vpop.f32.mrf.mxu1 }
 0x3a0   : > { %v3764_v51 = vpop.f32.mrf.mxu0  ;;  %v4371_v1 = vpack.c.bf16 %v4160_v14, %v4160_v14  ;;  %v4501_v14 = vsel %vm1679_vm1, %v4013_v59, 0 }
 0x3a1   : > { %v3828_v24 = vadd.f32 %v3764_v51, %v7847_v29 }
 0x3a3   : > { %v3960_v35 = vadd.f32 %v3896_v55, %v3828_v24  ;;  %v3871_v24 = vrot.slane %v8213_v56, 6 }
 0x3a5   : > { %v3992_v10 = vmax.f32 %v3960_v35, 0.0  ;;  %v8222_v12 = vpop.f32.mrf.mxu2 }
 0x3a7   : > { %6841 = vmatmul.msk.f32.gmra.mxu1 %vm1679_vm1, %v3992_v10  ;;  %6873 = vmatmul.msk.f32.gmra.mxu2 %vm1679_vm1, %v3992_v10  ;;  %v4163_v18 = vpop.f32.mrf.mxu1  ;;  %v3902_v10 = vperm.slane %v3871_v24, 0 }
 0x3a8   : > { %v3767_v52 = vpop.f32.mrf.mxu0  ;;  %v4372_v46 = vpack.c.bf16 %v4163_v18, %v4163_v18 }
 0x3a9   : > { %v3829_v8 = vadd.f32 %v3767_v52, %v7856_v39 }
 0x3aa   : > { %6890 = vmatmul.msk.bf16.vlgmr.msra.gmra.mxu3 %vm1679_vm1, %v4371_v1  ;;  %v3872_v1 = vrot.slane %v8213_v56, 7 }
 0x3ab   : > { %v3961_v29 = vadd.f32 %v3897_v62, %v3829_v8  ;;  %4472 = vmatpush.bf16.xpose.msra.mxu3 %v4463_v6  ;;  %v4014_v6 = vld [vmem:[%s8123_s16 + $0x6] sm:$0x1] }
 0x3ad   : > { %v3993_v4 = vmax.f32 %v3961_v29, 0.0  ;;  %v8231_v32 = vpop.f32.mrf.mxu2  ;;  %v3903_v29 = vperm.slane %v3872_v1, 0 }
 0x3af   : > { %6842 = vmatmul.msk.f32.gmra.mxu1 %vm1679_vm1, %v3993_v4  ;;  %6874 = vmatmul.msk.f32.gmra.mxu2 %vm1679_vm1, %v3993_v4  ;;  %v4166_v36 = vpop.f32.mrf.mxu1 }
 0x3b0   : > { %v3770_v41 = vpop.f32.mrf.mxu0  ;;  %v4373_v26 = vpack.c.bf16 %v4166_v36, %v4166_v36 }
 0x3b1   : > { %v3830_v58 = vadd.f32 %v3770_v41, %v7866_v54  ;;  %v8284_v41 = vld [vmem:[%s8086_s28 + $0x18] sm:$0xff]  ;;  %s7129_s28 = smov 8  }
 0x3b2   : > { %v3875_v59 = vrot.slane %v8284_v41, 3 }
 0x3b3   : > { %v3962_v39 = vadd.f32 %v3898_v48, %v3830_v58  ;;  %v4520_v48 = vsel %vm1679_vm1, %v4014_v6, 0 }
 0x3b5   : > { %v3994_v3 = vmax.f32 %v3962_v39, 0.0  ;;  %v8237_v37 = vpop.f32.mrf.mxu2  ;;  %v3904_v39 = vperm.slane %v8284_v41, 0 }
 0x3b7   : > { %6843 = vmatmul.msk.f32.gmra.mxu1 %vm1679_vm1, %v3994_v3  ;;  %6875 = vmatmul.msk.f32.gmra.mxu2 %vm1679_vm1, %v3994_v3  ;;  %v4169_v45 = vpop.f32.mrf.mxu1 }
 0x3b8   : > { %v3773_v53 = vpop.f32.mrf.mxu0  ;;  %v4374_v7 = vpack.c.bf16 %v4169_v45, %v4169_v45 }
 0x3b9   : > { %v3831_v27 = vadd.f32 %v3773_v53, %v7878_v0  ;;  %v4015_v53 = vld [vmem:[%s8123_s16 + $0x7] sm:$0x1] }
 0x3ba   : > { %6891 = vmatmul.msk.bf16.vlgmr.msrb.gmra.mxu3 %vm1679_vm1, %v4372_v46  ;;  %v4539_v23 = vsel %vm1679_vm1, %v4015_v53, 0 }
 0x3bb   : > { %v3963_v54 = vadd.f32 %v3899_v15, %v3831_v27  ;;  %4491 = vmatpush.bf16.xpose.msrb.mxu3 %v4482_v13  ;;  %v3873_v15 = vrot.slane %v8284_v41, 1 }
 0x3bd   : > { %v3995_v21 = vmax.f32 %v3963_v54, 0.0  ;;  %v8246_v49 = vpop.f32.mrf.mxu2  ;;  %v3905_v13 = vperm.slane %v3873_v15, 0 }
 0x3bf   : > { %6844 = vmatmul.msk.f32.gmra.mxu1 %vm1679_vm1, %v3995_v21  ;;  %6876 = vmatmul.msk.f32.gmra.mxu2 %vm1679_vm1, %v3995_v21  ;;  %v8250_v50 = vpop.f32.mrf.mxu1 }
 0x3c0   : > { %v3776_v44 = vpop.f32.mrf.mxu0  ;;  %v4375_v27 = vpack.c.bf16 %v8250_v50, %v8250_v50 }
 0x3c1   : > { %v3832_v0 = vadd.f32 %v3776_v44, %v7890_v22  ;;  %v3874_v44 = vrot.slane %v8284_v41, 2 }
 0x3c3   : > { %v3964_v20 = vadd.f32 %v3900_v11, %v3832_v0  ;;  %v3906_v50 = vperm.slane %v3874_v44, 0 }
 0x3c5   : > { %v3996_v28 = vmax.f32 %v3964_v20, 0.0  ;;  %v8254_v63 = vpop.f32.mrf.mxu2 }
 0x3c7   : > { %6845 = vmatmul.msk.f32.gmra.mxu1 %vm1679_vm1, %v3996_v28  ;;  %6877 = vmatmul.msk.f32.gmra.mxu2 %vm1679_vm1, %v3996_v28  ;;  %v8259_v31 = vpop.f32.mrf.mxu1 }
 0x3c8   : > { %v3779_v55 = vpop.f32.mrf.mxu0 }
 0x3c9   : > { %v3833_v22 = vadd.f32 %v3779_v55, %v7899_v34  ;;  %v4016_v55 = vld [vmem:[%s8123_s16 + $0x8] sm:$0x1] }
 0x3ca   : > { %6892 = vmatmul.msk.bf16.vlgmr.msra.gmra.mxu3 %vm1679_vm1, %v4373_v26 }
 0x3cb   : > { %v3965_v51 = vadd.f32 %v3901_v61, %v3833_v22  ;;  %4510 = vmatpush.bf16.xpose.msra.mxu3 %v4501_v14  ;;  %v3907_v14 = vperm.slane %v3875_v59, 0  ;;  %v4376_v22 = vpack.c.bf16 %v8259_v31, %v8259_v31 }
 0x3cd   : > { %v3997_v35 = vmax.f32 %v3965_v51, 0.0  ;;  %v8265_v47 = vpop.f32.mrf.mxu2 }
 0x3cf   : > { %6846 = vmatmul.msk.f32.gmra.mxu1 %vm1679_vm1, %v3997_v35  ;;  %6878 = vmatmul.msk.f32.gmra.mxu2 %vm1679_vm1, %v3997_v35  ;;  %v8269_v62 = vpop.f32.mrf.mxu1 }
 0x3d0   : > { %v3782_v30 = vpop.f32.mrf.mxu0 }
 0x3d1   : > { %v3834_v34 = vadd.f32 %v3782_v30, %v7912_v42  ;;  %v3876_v30 = vrot.slane %v8284_v41, 4 }
 0x3d3   : > { %v3966_v18 = vadd.f32 %v3902_v10, %v3834_v34  ;;  %v3908_v31 = vperm.slane %v3876_v30, 0 }
 0x3d5   : > { %v3998_v52 = vmax.f32 %v3966_v18, 0.0  ;;  %v8274_v8 = vpop.f32.mrf.mxu2 }
 0x3d7   : > { %6847 = vmatmul.msk.f32.gmra.mxu1 %vm1679_vm1, %v3998_v52  ;;  %6879 = vmatmul.msk.f32.gmra.mxu2 %vm1679_vm1, %v3998_v52  ;;  %v8280_v42 = vpop.f32.mrf.mxu1 }
 0x3d8   : > { %v3785_v4 = vpop.f32.mrf.mxu0  ;;  %v4378_v44 = vpack.c.bf16 %v8280_v42, %v8280_v42 }
 0x3d9   : > { %v3835_v36 = vadd.f32 %v3785_v4, %v7924_v9  ;;  %v4017_v4 = vld [vmem:[%s8123_s16 + $0x9] sm:$0x1] }
 0x3da   : > { %6893 = vmatmul.msk.bf16.vlgmr.msrb.gmra.mxu3 %vm1679_vm1, %v4374_v7 }
 0x3db   : > { %v3967_v56 = vadd.f32 %v3903_v29, %v3835_v36  ;;  %4529 = vmatpush.bf16.xpose.msrb.mxu3 %v4520_v48  ;;  %v3877_v29 = vrot.slane %v8284_v41, 5  ;;  %v4377_v36 = vpack.c.bf16 %v8269_v62, %v8269_v62 }
 0x3dd   : > { %v3999_v58 = vmax.f32 %v3967_v56, 0.0  ;;  %v8289_v17 = vpop.f32.mrf.mxu2  ;;  %v3909_v48 = vperm.slane %v3877_v29, 0 }
 0x3df   : > { %6848 = vmatmul.msk.f32.gmra.mxu1 %vm1679_vm1, %v3999_v58  ;;  %6880 = vmatmul.msk.f32.gmra.mxu2 %vm1679_vm1, %v3999_v58  ;;  %v8293_v45 = vpop.f32.mrf.mxu1 }
 0x3e0   : > { %v3788_v3 = vpop.f32.mrf.mxu0 }
 0x3e1   : > { %v3836_v9 = vadd.f32 %v3788_v3, %v7948_v38 }
 0x3e3   : > { %v3968_v5 = vadd.f32 %v3904_v39, %v3836_v9  ;;  %v3878_v9 = vrot.slane %v8284_v41, 6 }
 0x3e5   : > { %v4000_v46 = vmax.f32 %v3968_v5, 0.0  ;;  %v8302_v21 = vpop.f32.mrf.mxu2  ;;  %v3910_v62 = vperm.slane %v3878_v9, 0 }
 0x3e7   : > { %6849 = vmatmul.msk.f32.gmra.mxu1 %vm1679_vm1, %v4000_v46  ;;  %6881 = vmatmul.msk.f32.gmra.mxu2 %vm1679_vm1, %v4000_v46  ;;  %v8306_v20 = vpop.f32.mrf.mxu1 }
 0x3e8   : > { %v3791_v54 = vpop.f32.mrf.mxu0 }
 0x3e9   : > { %v3837_v38 = vadd.f32 %v3791_v54, %v7960_v60 }
 0x3ea   : > { %6894 = vmatmul.msk.bf16.vlgmr.msra.gmra.mxu3 %vm1679_vm1, %v4375_v27  ;;  %v3879_v27 = vrot.slane %v8284_v41, 7 }
 0x3eb   : > { %v3969_v11 = vadd.f32 %v3905_v13, %v3837_v38  ;;  %4548 = vmatpush.bf16.xpose.msra.mxu3 %v4539_v23  ;;  %v4018_v38 = vld [vmem:[%s8123_s16 + $0xa] sm:$0x1] }
 0x3ed   : > { %v4001_v0 = vmax.f32 %v3969_v11, 0.0  ;;  %v8312_v61 = vpop.f32.mrf.mxu2  ;;  %v3911_v11 = vperm.slane %v3879_v27, 0  ;;  %v4021_v27 = vld [vmem:[%s8123_s16 + $0xd] sm:$0x1] }
 0x3ef   : > { %6850 = vmatmul.msk.f32.gmra.mxu1 %vm1679_vm1, %v4001_v0  ;;  %6882 = vmatmul.msk.f32.gmra.mxu2 %vm1679_vm1, %v4001_v0  ;;  %v8319_v51 = vpop.f32.mrf.mxu1 }
 0x3f0   : > { %v3794_v40 = vpop.f32.mrf.mxu0 }
 0x3f1   : > { %v3838_v60 = vadd.f32 %v3794_v40, %v7969_v2  ;;  %v4558_v2 = vsel %vm1679_vm1, %v4016_v55, 0 }
 0x3f3   : > { %v3970_v28 = vadd.f32 %v3906_v50, %v3838_v60 }
 0x3f5   : > { %v4002_v26 = vmax.f32 %v3970_v28, 0.0  ;;  %v8325_v18 = vpop.f32.mrf.mxu2 }
 0x3f7   : > { %6851 = vmatmul.msk.f32.gmra.mxu1 %vm1679_vm1, %v4002_v26  ;;  %6883 = vmatmul.msk.f32.gmra.mxu2 %vm1679_vm1, %v4002_v26  ;;  %v8330_v6 = vpop.f32.mrf.mxu1  ;;  %v4028_v26 = vld [vmem:[%s8123_s16 + $0x14] sm:$0x1] }
 0x3f8   : > { %v3797_v24 = vpop.f32.mrf.mxu0  ;;  %v4786_v42 = vsel %vm1679_vm1, %v4028_v26, 0 }
 0x3f9   : > { %v3839_v35 = vadd.f32 %v3797_v24, %v7977_v25  ;;  %4795 = vmatpush.bf16.xpose.msrb.mxu0 %v4786_v42  ;;  %v4019_v24 = vld [vmem:[%s8123_s16 + $0xb] sm:$0x1] }
 0x3fa   : > { %6895 = vmatmul.msk.bf16.vlgmr.msrb.gmra.mxu3 %vm1679_vm1, %v4376_v22  ;;  %v4615_v30 = vsel %vm1679_vm1, %v4019_v24, 0  ;;  %v4036_v24 = vld [vmem:[%s8123_s16 + $0x1c] sm:$0x1] }
 0x3fb   : > { %v3971_v10 = vadd.f32 %v3907_v14, %v3839_v35  ;;  %4567 = vmatpush.bf16.xpose.msrb.mxu3 %v4558_v2  ;;  %v4029_v2 = vld [vmem:[%s8123_s16 + $0x15] sm:$0x1] }
 0x3fc   : > { %v4805_v35 = vsel %vm1679_vm1, %v4029_v2, 0  ;;  %v4382_v2 = vpack.c.bf16 %v8330_v6, %v8330_v6  ;;  %v4023_v6 = vld [vmem:[%s8123_s16 + $0xf] sm:$0x1] }
 0x3fd   : > { %v4003_v34 = vmax.f32 %v3971_v10, 0.0  ;;  %v8338_v56 = vpop.f32.mrf.mxu2  ;;  %v4379_v10 = vpack.c.bf16 %v8293_v45, %v8293_v45  ;;  %4814 = vmatpush.bf16.xpose.msra.mxu1 %v4805_v35 }
 0x3ff   : > { %6852 = vmatmul.msk.f32.gmra.mxu1 %vm1679_vm1, %v4003_v34  ;;  %6884 = vmatmul.msk.f32.gmra.mxu2 %vm1679_vm1, %v4003_v34  ;;  %v8344_v5 = vpop.f32.mrf.mxu1 }
 0x400   : > { %v3800_v1 = vpop.f32.mrf.mxu0 }
 0x401   : > { %v3840_v52 = vadd.f32 %v3800_v1, %v7988_v43  ;;  %v4577_v43 = vsel %vm1679_vm1, %v4017_v4, 0 }
 0x403   : > { %v3972_v25 = vadd.f32 %v3908_v31, %v3840_v52 }
 0x405   : > { %v4004_v7 = vmax.f32 %v3972_v25, 0.0  ;;  %v8349_v13 = vpop.f32.mrf.mxu2  ;;  %v4030_v25 = vld [vmem:[%s8123_s16 + $0x16] sm:$0x1] }
 0x406   : > { %v4824_v29 = vsel %vm1679_vm1, %v4030_v25, 0 }
 0x407   : > { %6853 = vmatmul.msk.f32.gmra.mxu1 %vm1679_vm1, %v4004_v7  ;;  %6885 = vmatmul.msk.f32.gmra.mxu2 %vm1679_vm1, %v4004_v7 }
 0x408   : > { %v3803_v58 = vpop.f32.mrf.mxu0  ;;  %4833 = vmatpush.bf16.xpose.msra.mxu2 %v4824_v29 }
 0x409   : > { %v3841_v39 = vadd.f32 %v3803_v58, %v7995_v19  ;;  %v4380_v58 = vpack.c.bf16 %v8306_v20, %v8306_v20 }
 0x40a   : > { %6896 = vmatmul.msk.bf16.vlgmr.msra.gmra.mxu3 %vm1679_vm1, %v4377_v36  ;;  %v4020_v36 = vld [vmem:[%s8123_s16 + $0xc] sm:$0x1] }
 0x40b   : > { %v3973_v3 = vadd.f32 %v3909_v48, %v3841_v39  ;;  %4586 = vmatpush.bf16.xpose.msra.mxu3 %v4577_v43  ;;  %v4634_v43 = vsel %vm1679_vm1, %v4020_v36, 0  ;;  %v5010_v36 = vld [vmem:[%s8894_s13] sm:$0x3] }
 0x40c   : > { %v8352_v54 = vpop.f32.mrf.mxu1 }
 0x40d   : > { %v4005_v15 = vmax.f32 %v3973_v3, 0.0 }
 0x40f   : > { %6854 = vmatmul.msk.f32.gmra.mxu1 %vm1679_vm1, %v4005_v15  ;;  %6886 = vmatmul.msk.f32.gmra.mxu2 %vm1679_vm1, %v4005_v15  ;;  %v4032_v15 = vld [vmem:[%s8123_s16 + $0x18] sm:$0x1] }
 0x410   : > { %v3806_v46 = vpop.f32.mrf.mxu0 }
 0x411   : > { %v3842_v53 = vadd.f32 %v3806_v46, %v8006_v57  ;;  %v4596_v57 = vsel %vm1679_vm1, %v4018_v38, 0 }
 0x412   : > { %v8361_v40 = vpop.f32.mrf.mxu2 }
 0x413   : > { %v3974_v19 = vadd.f32 %v3910_v62, %v3842_v53  ;;  %v4862_v62 = vsel %vm1679_vm1, %v4032_v15, 0  ;;  %v4691_v15 = vsel %vm1679_vm1, %v4023_v6, 0 }
 0x415   : > { %v4006_v23 = vmax.f32 %v3974_v19, 0.0 }
 0x417   : > { %6855 = vmatmul.msk.f32.gmra.mxu1 %vm1679_vm1, %v4006_v23  ;;  %6887 = vmatmul.msk.f32.gmra.mxu2 %vm1679_vm1, %v4006_v23  ;;  %v4033_v23 = vld [vmem:[%s8123_s16 + $0x19] sm:$0x1] }
 0x418   : > { %v3809_v0 = vpop.f32.mrf.mxu0  ;;  %v4881_v38 = vsel %vm1679_vm1, %v4033_v23, 0 }
 0x419   : > { %v3843_v50 = vadd.f32 %v3809_v0, %v8014_v16 }
 0x41a   : > { %6897 = vmatmul.msk.bf16.vlgmr.msrb.gmra.mxu3 %vm1679_vm1, %v4378_v44  ;;  %v4653_v44 = vsel %vm1679_vm1, %v4021_v27, 0  ;;  %v4038_v27 = vld [vmem:[%s8123_s16 + $0x1e] sm:$0x1] }
 0x41b   : > { %v3975_v41 = vadd.f32 %v3911_v11, %v3843_v50  ;;  %4605 = vmatpush.bf16.xpose.msrb.mxu3 %v4596_v57  ;;  %v4381_v11 = vpack.c.bf16 %v8319_v51, %v8319_v51  ;;  %v4976_v23 = vsel %vm1679_vm1, %v4038_v27, 0 }
 0x41c   : > { %v8364_v60 = vpop.f32.mrf.mxu1 }
 0x41d   : > { %v4007_v28 = vmax.f32 %v3975_v41, 0.0  ;;  %v8366_v59 = vpop.f32.mrf.mxu3 }
 0x41f   : > { %6856 = vmatmul.msk.f32.gmra.mxu1 %vm1679_vm1, %v4007_v28  ;;  %6888 = vmatmul.msk.f32.gmra.mxu2 %vm1679_vm1, %v4007_v28  ;;  %v4034_v28 = vld [vmem:[%s8123_s16 + $0x1a] sm:$0x1] }
 0x420   : > { %v4900_v26 = vsel %vm1679_vm1, %v4034_v28, 0 }
 0x422   : > { %v8372_v16 = vpop.f32.mrf.mxu2 }
 0x424   : > { %v4205_v55 = vpop.f32.mrf.mxu1 }
 0x425   : > { %v4386_v14 = vpack.c.bf16 %v4205_v55, %v4205_v55  ;;  %v4419_v22 = vpop.f32.mrf.mxu3 }
 0x426   : > { %v4022_v22 = vld [vmem:[%s8123_s16 + $0xe] sm:$0x1] }
 0x427   : > { %6905 = vmatmul.msk.bf16.vlgmr.msra.gmra.mxu0 %vm1679_vm1, %v4386_v14  ;;  %v4672_v35 = vsel %vm1679_vm1, %v4022_v22, 0 }
 0x428   : > { %4871 = vmatpush.bf16.xpose.msra.mxu0 %v4862_v62 }
 0x42a   : > { %v8381_v34 = vpop.f32.mrf.mxu2  ;;  %6898 = vmatmul.msk.bf16.vlgmr.msra.gmra.mxu3 %vm1679_vm1, %v4379_v10  ;;  %v4938_v10 = vsel %vm1679_vm1, %v4036_v24, 0 }
 0x42b   : > { %4624 = vmatpush.bf16.xpose.msra.mxu3 %v4615_v30 }
 0x42c   : > { %v4208_v31 = vpop.f32.mrf.mxu1 }
 0x42d   : > { %v4387_v1 = vpack.c.bf16 %v4208_v31, %v4208_v31  ;;  %v8384_v52 = vpop.f32.mrf.mxu3 }
 0x42f   : > { %6906 = vmatmul.msk.bf16.vlgmr.msrb.gmra.mxu1 %vm1679_vm1, %v4387_v1 }
 0x430   : > { %4890 = vmatpush.bf16.xpose.msrb.mxu1 %v4881_v38 }
 0x432   : > { %v8389_v45 = vpop.f32.mrf.mxu2 }
 0x434   : > { %v4211_v7 = vpop.f32.mrf.mxu1 }
 0x435   : > { %v4388_v4 = vpack.c.bf16 %v4211_v7, %v4211_v7  ;;  %v4438_v48 = vpop.f32.mrf.mxu3 }
 0x436   : > { %v4037_v48 = vld [vmem:[%s8123_s16 + $0x1d] sm:$0x1] }
 0x437   : > { %6907 = vmatmul.msk.bf16.vlgmr.msrb.gmra.mxu2 %vm1679_vm1, %v4388_v4 }
 0x438   : > { %4909 = vmatpush.bf16.xpose.msrb.mxu2 %v4900_v26 }
 0x43a   : > { %v8396_v39 = vpop.f32.mrf.mxu2  ;;  %6899 = vmatmul.msk.bf16.vlgmr.msrb.gmra.mxu3 %vm1679_vm1, %v4380_v58  ;;  %v4957_v58 = vsel %vm1679_vm1, %v4037_v48, 0 }
 0x43b   : > { %4643 = vmatpush.bf16.xpose.msrb.mxu3 %v4634_v43  ;;  %v4383_v43 = vpack.c.bf16 %v8344_v5, %v8344_v5 }
 0x43c   : > { %v8399_v3 = vpop.f32.mrf.mxu1 }
 0x43d   : > { %v8401_v9 = vpop.f32.mrf.mxu3 }
 0x442   : > { %v8405_v46 = vpop.f32.mrf.mxu2 }
 0x444   : > { %v4217_v53 = vpop.f32.mrf.mxu1 }
 0x445   : > { %v4390_v20 = vpack.c.bf16 %v4217_v53, %v4217_v53  ;;  %v4457_v19 = vpop.f32.mrf.mxu3 }
 0x447   : > { %6909 = vmatmul.msk.bf16.vlgmr.msrb.gmra.mxu0 %vm1679_vm1, %v4390_v20 }
 0x448   : > { %4947 = vmatpush.bf16.xpose.msrb.mxu0 %v4938_v10 }
 0x44a   : > { %v8414_v0 = vpop.f32.mrf.mxu2  ;;  %6900 = vmatmul.msk.bf16.vlgmr.msra.gmra.mxu3 %vm1679_vm1, %v4381_v11 }
 0x44b   : > { %4662 = vmatpush.bf16.xpose.msra.mxu3 %v4653_v44  ;;  %v4027_v44 = vld [vmem:[%s8123_s16 + $0x13] sm:$0x1] }
 0x44c   : > { %v4220_v57 = vpop.f32.mrf.mxu1  ;;  %v4767_v28 = vsel %vm1679_vm1, %v4027_v44, 0 }
 0x44d   : > { %v4391_v50 = vpack.c.bf16 %v4220_v57, %v4220_v57  ;;  %v8417_v41 = vpop.f32.mrf.mxu3 }
 0x44f   : > { %6910 = vmatmul.msk.bf16.vlgmr.msra.gmra.mxu1 %vm1679_vm1, %v4391_v50  ;;  %v4384_v50 = vpack.c.bf16 %v8352_v54, %v8352_v54 }
 0x450   : > { %4966 = vmatpush.bf16.xpose.msra.mxu1 %v4957_v58 }
 0x452   : > { %v8422_v51 = vpop.f32.mrf.mxu2 }
 0x454   : > { %v4223_v42 = vpop.f32.mrf.mxu1 }
 0x455   : > { %v4392_v55 = vpack.c.bf16 %v4223_v42, %v4223_v42  ;;  %v4476_v14 = vpop.f32.mrf.mxu3 }
 0x457   : > { %6911 = vmatmul.msk.bf16.vlgmr.msra.gmra.mxu2 %vm1679_vm1, %v4392_v55 }
 0x458   : > { %4985 = vmatpush.bf16.xpose.msra.mxu2 %v4976_v23 }
 0x45a   : > { %v8431_v30 = vpop.f32.mrf.mxu2  ;;  %6901 = vmatmul.msk.bf16.vlgmr.msrb.gmra.mxu3 %vm1679_vm1, %v4382_v2  ;;  %v4031_v2 = vld [vmem:[%s8123_s16 + $0x17] sm:$0x1] }
 0x45b   : > { %4681 = vmatpush.bf16.xpose.msrb.mxu3 %v4672_v35  ;;  %v4385_v35 = vpack.c.bf16 %v8364_v60, %v8364_v60  ;;  %v4843_v54 = vsel %vm1679_vm1, %v4031_v2, 0  ;;  %v4035_v60 = vld [vmem:[%s8123_s16 + $0x1b] sm:$0x1] }
 0x45c   : > { %v8434_v31 = vpop.f32.mrf.mxu1 }
 0x45d   : > { %v8436_v1 = vpop.f32.mrf.mxu3 }
 0x462   : > { %v8438_v25 = vpop.f32.mrf.mxu2 }
 0x464   : > { %v4229_v29 = vpop.f32.mrf.mxu1 }
 0x465   : > { %v4394_v7 = vpack.c.bf16 %v4229_v29, %v4229_v29  ;;  %v4495_v4 = vpop.f32.mrf.mxu3 }
 0x467   : > { %6913 = vmatmul.msk.bf16.vlgmr.msra.gmra.mxu0 %vm1679_vm1, %v4394_v7 }
 0x468   : > { %6921 = vmatpush.msk.msra.mxu0 %vm5108_vm2, %v5010_v36 }
 0x46a   : > { %6902 = vmatmul.msk.bf16.vlgmr.msra.gmra.mxu3 %vm1679_vm1, %v4383_v43  ;;  %v8451_v62 = vpop.f32.mrf.mxu2  ;;  %v4389_v43 = vpack.c.bf16 %v8399_v3, %v8399_v3 }
 0x46b   : > { %4700 = vmatpush.bf16.xpose.msra.mxu3 %v4691_v15  ;;  %v4919_v15 = vsel %vm1679_vm1, %v4035_v60, 0 }
 0x46c   : > { %v4232_v53 = vpop.f32.mrf.mxu1 }
 0x46d   : > { %v4395_v20 = vpack.c.bf16 %v4232_v53, %v4232_v53  ;;  %v8453_v19 = vpop.f32.mrf.mxu3 }
 0x46f   : > { %6914 = vmatmul.msk.bf16.vlgmr.msrb.gmra.mxu1 %vm1679_vm1, %v4395_v20 }
 0x472   : > { %v8459_v57 = vpop.f32.mrf.mxu2 }
 0x474   : > { %v4235_v5 = vpop.f32.mrf.mxu1 }
 0x475   : > { %v4396_v38 = vpack.c.bf16 %v4235_v5, %v4235_v5  ;;  %v4514_v11 = vpop.f32.mrf.mxu3 }
 0x477   : > { %6915 = vmatmul.msk.bf16.vlgmr.msrb.gmra.mxu2 %vm1679_vm1, %v4396_v38  ;;  %v4039_v38 = vld [vmem:[%s8123_s16 + $0x1f] sm:$0x1] }
 0x478   : > { %v4995_v11 = vsel %vm1679_vm1, %v4039_v38, 0 }
 0x47a   : > { %6903 = vmatmul.msk.bf16.vlgmr.msrb.gmra.mxu3 %vm1679_vm1, %v4384_v50  ;;  %v8466_v55 = vpop.f32.mrf.mxu2 }
 0x47b   : > { %4776 = vmatpush.bf16.xpose.msrb.mxu3 %v4767_v28 }
 0x47c   : > { %v4238_v26 = vpop.f32.mrf.mxu1 }
 0x47d   : > { %v4531_v42 = vpop.f32.mrf.mxu3 }
 0x482   : > { %v8473_v10 = vpop.f32.mrf.mxu2 }
 0x484   : > { %v4241_v14 = vpop.f32.mrf.mxu1 }
 0x485   : > { %v4398_v22 = vpack.c.bf16 %v4241_v14, %v4241_v14  ;;  %v4533_v24 = vpop.f32.mrf.mxu3 }
 0x487   : > { %6917 = vmatmul.msk.bf16.vlgmr.msrb.gmra.mxu0 %vm1679_vm1, %v4398_v22 }
 0x48a   : > { %6904 = vmatmul.msk.bf16.vlgmr.msra.gmra.mxu3 %vm1679_vm1, %v4385_v35  ;;  %v8477_v6 = vpop.f32.mrf.mxu2 }
 0x48b   : > { %4852 = vmatpush.bf16.xpose.msra.mxu3 %v4843_v54 }
 0x48c   : > { %v4244_v29 = vpop.f32.mrf.mxu1 }
 0x48d   : > { %v4399_v7 = vpack.c.bf16 %v4244_v29, %v4244_v29  ;;  %v4550_v4 = vpop.f32.mrf.mxu3 }
 0x48f   : > { %6918 = vmatmul.msk.bf16.vlgmr.msra.gmra.mxu1 %vm1679_vm1, %v4399_v7 }
 0x492   : > { %v8487_v20 = vpop.f32.mrf.mxu2 }
 0x494   : > { %v4247_v48 = vpop.f32.mrf.mxu1 }
 0x495   : > { %v4400_v36 = vpack.c.bf16 %v4247_v48, %v4247_v48  ;;  %v4552_v58 = vpop.f32.mrf.mxu3 }
 0x497   : > { %6919 = vmatmul.msk.bf16.vlgmr.msra.gmra.mxu2 %vm1679_vm1, %v4400_v36  ;;  %6922 = vmatmul.msk.f32.vlgmr.msra.gmra.mxu0 %vm5011_vm3, %v8366_v59  ;;  %v4393_v59 = vpack.c.bf16 %v8434_v31, %v8434_v31  ;;  %v4397_v31 = vpack.c.bf16 %v4238_v26, %v4238_v26 }
 0x49a   : > { %6908 = vmatmul.msk.bf16.vlgmr.msrb.gmra.mxu3 %vm1679_vm1, %v4389_v43  ;;  %v8498_v3 = vpop.f32.mrf.mxu2 }
 0x49b   : > { %4928 = vmatpush.bf16.xpose.msrb.mxu3 %v4919_v15 }
 0x49c   : > { %v4250_v27 = vpop.f32.mrf.mxu1 }
 0x49d   : > { %v4569_v53 = vpop.f32.mrf.mxu3 }
 0x49f   : > { %6923 = vmatmul.msk.f32.gmra.mxu0 %vm5011_vm3, %v8384_v52 }
 0x4a2   : > { %v8504_v28 = vpop.f32.mrf.mxu2 }
 0x4a3   : > { %8897 = vst [vmem:[#allocation2_spill] sm:$0xff] %v8504_v28 }
 0x4a4   : > { %v8491_v23 = vpop.f32.mrf.mxu0 }
 0x4a5   : > { %v4571_v5 = vpop.f32.mrf.mxu3 }
 0x4a7   : > { %6924 = vmatmul.msk.f32.gmra.mxu0 %vm5011_vm3, %v8401_v9 }
 0x4aa   : > { %6912 = vmatmul.msk.bf16.vlgmr.msra.gmra.mxu3 %vm1679_vm1, %v4393_v59 }
 0x4ab   : > { %5004 = vmatpush.bf16.xpose.msra.mxu3 %v4995_v11 }
 0x4ac   : > { %v4723_v44 = vpop.f32.mrf.mxu0  ;;  %v4740_v52 = vpop.f32.mrf.mxu1 }
 0x4ad   : > { %v4588_v50 = vpop.f32.mrf.mxu3 }
 0x4af   : > { %6925 = vmatmul.msk.f32.gmra.mxu0 %vm5011_vm3, %v8417_v41  ;;  %v4401_v41 = vpack.c.bf16 %v4250_v27, %v4250_v27 }
 0x4b4   : > { %v4742_v14 = vpop.f32.mrf.mxu1 }
 0x4b5   : > { %v4590_v9 = vpop.f32.mrf.mxu3 }
 0x4b7   : > { %6926 = vmatmul.msk.f32.gmra.mxu0 %vm5011_vm3, %v8436_v1 }
 0x4ba   : > { %v4759_v22 = vpop.f32.mrf.mxu2  ;;  %6916 = vmatmul.msk.bf16.vlgmr.msrb.gmra.mxu3 %vm1679_vm1, %v4397_v31 }
 0x4bd   : > { %v4607_v24 = vpop.f32.mrf.mxu3 }
 0x4bf   : > { %6927 = vmatmul.msk.f32.gmra.mxu0 %vm5011_vm3, %v8453_v19 }
 0x4c2   : > { %v4761_v2 = vpop.f32.mrf.mxu2 }
 0x4c4   : > { %v4797_v35 = vpop.f32.mrf.mxu0 }
 0x4c5   : > { %v4609_v54 = vpop.f32.mrf.mxu3 }
 0x4c7   : > { %6928 = vmatmul.msk.f32.gmra.mxu0 %vm5011_vm3, %v4531_v42 }
 0x4ca   : > { %6920 = vmatmul.msk.bf16.vlgmr.msra.gmra.mxu3 %vm1679_vm1, %v4401_v41 }
 0x4cc   : > { %v4799_v29 = vpop.f32.mrf.mxu0  ;;  %v8513_v7 = vpop.f32.mrf.mxu1 }
 0x4cd   : > { %v4626_v1 = vpop.f32.mrf.mxu3 }
 0x4cf   : > { %6929 = vmatmul.msk.f32.gmra.mxu0 %vm5011_vm3, %v4550_v4 }
 0x4d4   : > { %v4818_v26 = vpop.f32.mrf.mxu1 }
 0x4d5   : > { %v4628_v48 = vpop.f32.mrf.mxu3 }
 0x4d7   : > { %6930 = vmatmul.msk.f32.gmra.mxu0 %vm5011_vm3, %v4569_v53 }
 0x4da   : > { %v8517_v36 = vpop.f32.mrf.mxu2 }
 0x4dd   : > { %v4645_v19 = vpop.f32.mrf.mxu3 }
 0x4df   : > { %6931 = vmatmul.msk.f32.gmra.mxu0 %vm5011_vm3, %v4588_v50 }
 0x4e2   : > { %v4837_v58 = vpop.f32.mrf.mxu2 }
 0x4e4   : > { %v8520_v42 = vpop.f32.mrf.mxu0 }
 0x4e5   : > { %v4647_v60 = vpop.f32.mrf.mxu3 }
 0x4e6   : > { %v5257_v60 = vld [vmem:[%s8549_s25] sm:$0xff] }
 0x4e7   : > { %6932 = vmatmul.msk.f32.gmra.mxu0 %vm5011_vm3, %v4607_v24 }
 0x4ec   : > { %v4875_v43 = vpop.f32.mrf.mxu0  ;;  %v8523_v15 = vpop.f32.mrf.mxu1 }
 0x4ed   : > { %v4664_v27 = vpop.f32.mrf.mxu3 }
 0x4ef   : > { %6933 = vmatmul.msk.f32.gmra.mxu0 %vm5011_vm3, %v4626_v1 }
 0x4f4   : > { %v4894_v4 = vpop.f32.mrf.mxu1 }
 0x4f5   : > { %v4666_v5 = vpop.f32.mrf.mxu3  ;;  %v5267_v4 = vrot.slane %v5257_v60, 3 }
 0x4f7   : > { %6934 = vmatmul.msk.f32.gmra.mxu0 %vm5011_vm3, %v4645_v19 }
 0x4fa   : > { %v8527_v53 = vpop.f32.mrf.mxu2 }
 0x4fd   : > { %v4683_v38 = vpop.f32.mrf.mxu3 }
 0x4ff   : > { %6935 = vmatmul.msk.f32.gmra.mxu0 %vm5011_vm3, %v4664_v27  ;;  %v5265_v27 = vrot.slane %v5257_v60, 1 }
 0x502   : > { %v4913_v59 = vpop.f32.mrf.mxu2 }
 0x503   : > { %v5293_v59 = vperm.slane %v5257_v60, 0 }
 0x504   : > { %v8530_v11 = vpop.f32.mrf.mxu0 }
 0x505   : > { %v4685_v44 = vpop.f32.mrf.mxu3 }
 0x507   : > { %6936 = vmatmul.msk.f32.gmra.mxu0 %vm5011_vm3, %v4683_v38 }
 0x50c   : > { %v4951_v50 = vpop.f32.mrf.mxu0  ;;  %v8533_v14 = vpop.f32.mrf.mxu1 }
 0x50d   : > { %v4702_v9 = vpop.f32.mrf.mxu3  ;;  %v5294_v50 = vperm.slane %v5265_v27, 0 }
 0x50f   : > { %6937 = vmatmul.msk.f32.gmra.mxu0 %vm5011_vm3, %v4702_v9 }
 0x514   : > { %v4970_v31 = vpop.f32.mrf.mxu1  ;;  %v5129_v24 = vpop.f32.mrf.mxu0 }
 0x515   : > { %v4704_v2 = vpop.f32.mrf.mxu3  ;;  %v5225_v38 = vadd.f32 %v5129_v24, %v8215_v33 }
 0x516   : > { %v5296_v2 = vperm.slane %v5267_v4, 0 }
 0x517   : > { %6938 = vmatmul.msk.f32.gmra.mxu0 %vm5011_vm3, %v8491_v23 }
 0x51a   : > { %v8538_v54 = vpop.f32.mrf.mxu2 }
 0x51c   : > { %v5132_v41 = vpop.f32.mrf.mxu0 }
 0x51d   : > { %v4778_v29 = vpop.f32.mrf.mxu3  ;;  %v5226_v44 = vadd.f32 %v5132_v41, %v8222_v12 }
 0x51f   : > { %6939 = vmatmul.msk.f32.gmra.mxu0 %vm5011_vm3, %v4740_v52  ;;  %v5266_v52 = vrot.slane %v5257_v60, 2 }
 0x521   : > { %v5295_v5 = vperm.slane %v5266_v52, 0 }
 0x522   : > { %v4989_v1 = vpop.f32.mrf.mxu2 }
 0x524   : > { %v5135_v26 = vpop.f32.mrf.mxu0 }
 0x525   : > { %v4780_v48 = vpop.f32.mrf.mxu3 }
 0x527   : > { %6940 = vmatmul.msk.f32.gmra.mxu0 %vm5011_vm3, %v4759_v22  ;;  %v5227_v22 = vadd.f32 %v5135_v26, %v8231_v32  ;;  %v5270_v32 = vrot.slane %v5257_v60, 6  ;;  %v5358_v26 = vadd.f32 %v5294_v50, %v5226_v44 }
 0x529   : > { %v5359_v48 = vadd.f32 %v5295_v5, %v5227_v22  ;;  %v5299_v27 = vperm.slane %v5270_v32, 0  ;;  %v5404_v4 = vrot.slane %v5358_v26, 4 }
 0x52b   : > { %v5389_v52 = vrot.slane %v5359_v48, 4 }
 0x52c   : > { %v5138_v19 = vpop.f32.mrf.mxu0 }
 0x52d   : > { %v8542_v58 = vpop.f32.mrf.mxu3  ;;  %v5228_v31 = vadd.f32 %v5138_v19, %v8237_v37  ;;  %v5269_v37 = vrot.slane %v5257_v60, 5 }
 0x52f   : > { %6941 = vmatmul.msk.f32.gmra.mxu0 %vm5011_vm3, %v4778_v29  ;;  %v5268_v29 = vrot.slane %v5257_v60, 4  ;;  %v5360_v24 = vadd.f32 %v5296_v2, %v5228_v31 }
 0x531   : > { %v5297_v41 = vperm.slane %v5268_v29, 0  ;;  %v5271_v29 = vrot.slane %v5257_v60, 7 }
 0x534   : > { %v5141_v23 = vpop.f32.mrf.mxu0 }
 0x535   : > { %v4856_v43 = vpop.f32.mrf.mxu3  ;;  %v5229_v12 = vadd.f32 %v5141_v23, %v8246_v49  ;;  %v5298_v49 = vperm.slane %v5269_v37, 0  ;;  %v5405_v23 = vsel %vm5390_vm4, %v5360_v24, %v5404_v4 }
 0x536   : > { %v7123_v43 = vmov 1983009808  }
 0x537   : > { %6942 = vmatmul.msk.f32.gmra.mxu0 %vm5011_vm3, %v4797_v35  ;;  %v5357_v35 = vadd.f32 %v5293_v59, %v5225_v38  ;;  %v5395_v33 = vunpack.c.l.s4 %v7123_v43  ;;  %v5361_v38 = vadd.f32 %v5297_v41, %v5229_v12 }
 0x539   : > { %v5392_v19 = vrot.slane %v5357_v35, 4  ;;  %v8562_v28 = vunpack.c.0.s8 %v5395_v33  ;;  %v5391_v50 = vsel %vm5390_vm4, %v5389_v52, %v5357_v35  ;;  %v5416_v43 = vrot.slane %v5361_v38, 4 }
 0x53b   : > { %v5393_v5 = vsel %vm5390_vm4, %v5359_v48, %v5392_v19  ;;  %v5397_v35 = vperm.slane %v5391_v50, %v8562_v28  ;;  %v5413_v41 = vperm.slane %v5405_v23, %v8562_v28 }
 0x53c   : > { %v5144_v9 = vpop.f32.mrf.mxu0  ;;  %v5401_v32 = vperm.slane %v5393_v5, %v8562_v28 }
 0x53d   : > { %v8557_v1 = vpop.f32.mrf.mxu3  ;;  %v5230_v31 = vadd.f32 %v5144_v9, %v8254_v63  ;;  %v5300_v9 = vperm.slane %v5271_v29, 0  ;;  %v5440_v5 = vrot.slane %v5397_v35, 4 }
 0x53e   : > { %v5452_v52 = vrot.slane %v5401_v32, 4 }
 0x53f   : > { %6943 = vmatmul.msk.f32.gmra.mxu0 %vm5011_vm3, %v8513_v7  ;;  %v5402_v7 = vrot.slane %v5360_v24, 4  ;;  %v5362_v24 = vadd.f32 %v5298_v49, %v5230_v31 }
 0x541   : > { %v5403_v48 = vsel %vm5390_vm4, %v5402_v7, %v5358_v26  ;;  %v5428_v7 = vrot.slane %v5362_v24, 4 }
 0x544   : > { %v5147_v22 = vpop.f32.mrf.mxu0 }
 0x545   : > { %v5231_v59 = vadd.f32 %v5147_v22, %v8265_v47  ;;  %v4932_v44 = vpop.f32.mrf.mxu3  ;;  %v7124_v47 = vmov 1934713408   ;;  %v5453_v22 = vsel %vm5390_vm4, %v5413_v41, %v5452_v52 }
 0x546   : > { %v5443_v12 = vunpack.c.l.s4 %v7124_v47 }
 0x547   : > { %v5363_v2 = vadd.f32 %v5299_v27, %v5231_v59  ;;  %6944 = vmatmul.msk.f32.gmra.mxu0 %vm5011_vm3, %v8517_v36  ;;  %v5409_v36 = vperm.slane %v5403_v48, %v8562_v28 }
 0x548   : > { %v8581_v27 = vunpack.c.0.s8 %v5443_v12 }
 0x549   : > { %v5414_v33 = vrot.slane %v5363_v2, 4  ;;  %v5417_v63 = vsel %vm5390_vm4, %v5363_v2, %v5416_v43  ;;  %v5438_v23 = vrot.slane %v5409_v36, 4  ;;  %v5450_v43 = vrot.slane %v5413_v41, 4 }
 0x54a   : > { %v5425_v4 = vperm.slane %v5417_v63, %v8562_v28  ;;  %v5461_v49 = vperm.slane %v5453_v22, %v8581_v27 }
 0x54b   : > { %v5415_v37 = vsel %vm5390_vm4, %v5414_v33, %v5361_v38  ;;  %v5441_v38 = vsel %vm5390_vm4, %v5409_v36, %v5440_v5 }
 0x54c   : > { %v5150_v60 = vpop.f32.mrf.mxu0  ;;  %v5421_v44 = vperm.slane %v5415_v37, %v8562_v28  ;;  %v5476_v2 = vrot.slane %v5425_v4, 4  ;;  %v5449_v48 = vperm.slane %v5441_v38, %v8581_v27  ;;  %v5500_v52 = vrot.slane %v5461_v49, 4 }
 0x54d   : > { %v5232_v26 = vadd.f32 %v5150_v60, %v8274_v8  ;;  %v8579_v19 = vpop.f32.mrf.mxu3  ;;  %v5439_v37 = vsel %vm5390_vm4, %v5438_v23, %v5397_v35 }
 0x54e   : > { %v5464_v12 = vrot.slane %v5421_v44, 4  ;;  %v5492_v22 = vrot.slane %v5449_v48, 4  ;;  %v5445_v35 = vperm.slane %v5439_v37, %v8581_v27 }
 0x54f   : > { %v5364_v59 = vadd.f32 %v5300_v9, %v5232_v26  ;;  %6945 = vmatmul.msk.f32.gmra.mxu0 %vm5011_vm3, %v8542_v58 }
 0x551   : > { %v5426_v50 = vrot.slane %v5364_v59, 4  ;;  %v5429_v8 = vsel %vm5390_vm4, %v5364_v59, %v5428_v7  ;;  %v5451_v7 = vsel %vm5390_vm4, %v5450_v43, %v5401_v32 }
 0x552   : > { %v5437_v31 = vperm.slane %v5429_v8, %v8562_v28  ;;  %v5457_v8 = vperm.slane %v5451_v7, %v8581_v27 }
 0x553   : > { %v5427_v29 = vsel %vm5390_vm4, %v5426_v50, %v5362_v24 }
 0x554   : > { %v5153_v33 = vpop.f32.mrf.mxu0  ;;  %v5477_v58 = vsel %vm5390_vm4, %v5437_v31, %v5476_v2  ;;  %v5433_v47 = vperm.slane %v5427_v29, %v8562_v28  ;;  %v5474_v60 = vrot.slane %v5437_v31, 4  ;;  %v5488_v31 = vrot.slane %v5445_v35, 4 }
 0x555   : > { %v5008_v63 = vpop.f32.mrf.mxu3  ;;  %v5485_v9 = vperm.slane %v5477_v58, %v8581_v27  ;;  %v5496_v29 = vrot.slane %v5457_v8, 4 }
 0x556   : > { %v5465_v36 = vsel %vm5390_vm4, %v5433_v47, %v5464_v12  ;;  %v5462_v26 = vrot.slane %v5433_v47, 4 }
 0x557   : > { %6946 = vmatmul.msk.f32.gmra.mxu0 %vm5011_vm3, %v8520_v42  ;;  %v5501_v41 = vsel %vm5390_vm4, %v5485_v9, %v5500_v52  ;;  %v5473_v24 = vperm.slane %v5465_v36, %v8581_v27  ;;  %v5475_v42 = vsel %vm5390_vm4, %v5474_v60, %v5425_v4  ;;  %v5498_v47 = vrot.slane %v5485_v9, 4  ;;  %v5258_v60 = vld [vmem:[%s8549_s25 + $0x8] sm:$0xff] }
 0x558   : > { %5938 = vrot.lane.b32.xlu0 %v5501_v41, %s7125_s26  ;;  %v5463_v5 = vsel %vm5390_vm4, %v5462_v26, %v5421_v44  ;;  %v5481_v44 = vperm.slane %v5475_v42, %v8581_v27  ;;  %v5272_v36 = vrot.slane %v5258_v60, 1  ;;  %v5274_v37 = vrot.slane %v5258_v60, 3 }
 0x559   : > { %v5493_v59 = vsel %vm5390_vm4, %v5473_v24, %v5492_v22  ;;  %v5469_v38 = vperm.slane %v5463_v5, %v8581_v27  ;;  %v5499_v12 = vsel %vm5390_vm4, %v5498_v47, %v5461_v49  ;;  %v5490_v52 = vrot.slane %v5473_v24, 4 }
 0x55a   : > { %5874 = vrot.lane.b32.xlu2 %v5493_v59, %s7126_s24  ;;  %v5497_v4 = vsel %vm5390_vm4, %v5481_v44, %v5496_v29  ;;  %v5494_v43 = vrot.slane %v5481_v44, 4  ;;  %v5273_v49 = vrot.slane %v5258_v60, 2  ;;  %v5233_v26 = vadd.f32 %v5153_v33, %v8289_v17 }
 0x55b   : > { %v5486_v50 = vrot.slane %v5469_v38, 4  ;;  %v5489_v2 = vsel %vm5390_vm4, %v5469_v38, %v5488_v31  ;;  %v5491_v9 = vsel %vm5390_vm4, %v5490_v52, %v5449_v48  ;;  %v5301_v41 = vperm.slane %v5258_v60, 0 }
 0x55c   : > { %v5156_v23 = vpop.f32.mrf.mxu0  ;;  %v5302_v22 = vperm.slane %v5272_v36, 0  ;;  %v5304_v59 = vperm.slane %v5274_v37, 0  ;;  %v5276_v31 = vrot.slane %v5258_v60, 5 }
 0x55d   : > { %v8614_v32 = vsel %vm5390_vm4, %v5486_v50, %v5445_v35  ;;  %v5234_v24 = vadd.f32 %v5156_v23, %v8302_v21  ;;  %v5275_v35 = vrot.slane %v5258_v60, 4  ;;  %v5365_v38 = vadd.f32 %v5301_v41, %v5233_v26 }
 0x55f   : > { %6947 = vmatmul.msk.f32.gmra.mxu0 %vm5011_vm3, %v8523_v15  ;;  %v5495_v15 = vsel %vm5390_vm4, %v5494_v43, %v5457_v8  ;;  %v5366_v42 = vadd.f32 %v5302_v22, %v5234_v24  ;;  %v5305_v21 = vperm.slane %v5275_v35, 0  ;;  %v5504_v8 = vrot.slane %v5365_v38, 4 }
 0x560   : > { %5842 = vrot.lane.b32.xlu0 %v5489_v2, %s7127_s21  ;;  %v5306_v43 = vperm.slane %v5276_v31, 0 }
 0x561   : > { %v5516_v23 = vrot.slane %v5366_v42, 4 }
 0x562   : > { %5906 = vrot.lane.b32.xlu2 %v5497_v4, %s7128_s27 }
 0x564   : > { %v5159_v58 = vpop.f32.mrf.mxu0 }
 0x565   : > { %v5235_v48 = vadd.f32 %v5159_v58, %v8312_v61 }
 0x567   : > { %6948 = vmatmul.msk.f32.gmra.mxu0 %vm5011_vm3, %v8527_v53 }
 0x568   : > { %5890 = vrot.lane.b32.xlu0 %v5495_v15, %s7129_s28 }
 0x56a   : > { %5922 = vrot.lane.b32.xlu2 %v5499_v12, %s7130_s29 }
 0x56c   : > { %v5162_v63 = vpop.f32.mrf.mxu0 }
 0x56d   : > { %v5236_v7 = vadd.f32 %v5162_v63, %v8325_v18 }
 0x56f   : > { %6949 = vmatmul.msk.f32.gmra.mxu0 %vm5011_vm3, %v8557_v1  ;;  %v5303_v1 = vperm.slane %v5273_v49, 0  ;;  %v5368_v17 = vadd.f32 %v5304_v59, %v5236_v7 }
 0x571   : > { %v5367_v50 = vadd.f32 %v5303_v1, %v5235_v48  ;;  %v5517_v2 = vsel %vm5390_vm4, %v5368_v17, %v5516_v23 }
 0x572   : > { %5858 = vrot.lane.b32.xlu2 %v5491_v9, %s7131_s19  ;;  %v5525_v12 = vperm.slane %v5517_v2, %v8562_v28  ;;  %v5514_v9 = vrot.slane %v5368_v17, 4 }
 0x573   : > { %v5505_v18 = vsel %vm5390_vm4, %v5367_v50, %v5504_v8  ;;  %v5502_v47 = vrot.slane %v5367_v50, 4 }
 0x574   : > { %v5165_v53 = vpop.f32.mrf.mxu0  ;;  %v5513_v15 = vperm.slane %v5505_v18, %v8562_v28  ;;  %v5562_v37 = vrot.slane %v5525_v12, 4  ;;  %v5515_v41 = vsel %vm5390_vm4, %v5514_v9, %v5366_v42 }
 0x575   : > { %v5237_v33 = vadd.f32 %v5165_v53, %v8338_v56  ;;  %v5278_v56 = vrot.slane %v5258_v60, 7  ;;  %v5521_v35 = vperm.slane %v5515_v41, %v8562_v28 }
 0x576   : > { %v5564_v49 = vrot.slane %v5513_v15, 4  ;;  %v5563_v59 = vsel %vm5390_vm4, %v5562_v37, %v5513_v15 }
 0x577   : > { %6950 = vmatmul.msk.f32.gmra.mxu0 %vm5011_vm3, %v8530_v11  ;;  %v5277_v11 = vrot.slane %v5258_v60, 6  ;;  %v5369_v29 = vadd.f32 %v5305_v21, %v5237_v33  ;;  %v5569_v21 = vperm.slane %v5563_v59, %v8581_v27 }
 0x578   : > { %v5565_v22 = vsel %vm5390_vm4, %v5525_v12, %v5564_v49 }
 0x579   : > { %v5307_v44 = vperm.slane %v5277_v11, 0  ;;  %v5528_v63 = vrot.slane %v5369_v29, 4  ;;  %v5573_v42 = vperm.slane %v5565_v22, %v8581_v27  ;;  %v5608_v15 = vrot.slane %v5569_v21, 4 }
 0x57b   : > { %v5612_v2 = vrot.slane %v5573_v42, 4 }
 0x57c   : > { %v5168_v5 = vpop.f32.mrf.mxu0 }
 0x57f   : > { %6951 = vmatmul.msk.f32.gmra.mxu0 %vm5011_vm3, %v8533_v14  ;;  %v5238_v14 = vadd.f32 %v5168_v5, %v8349_v13  ;;  %v5503_v13 = vsel %vm5390_vm4, %v5502_v47, %v5365_v38 }
 0x580   : > { %v5509_v1 = vperm.slane %v5503_v13, %v8562_v28 }
 0x581   : > { %v5370_v53 = vadd.f32 %v5306_v43, %v5238_v14 }
 0x582   : > { %v5552_v17 = vrot.slane %v5509_v1, 4 }
 0x583   : > { %v5540_v5 = vrot.slane %v5370_v53, 4 }
 0x584   : > { %v5171_v61 = vpop.f32.mrf.mxu0 }
 0x585   : > { %v5239_v4 = vadd.f32 %v5171_v61, %v8361_v40  ;;  %v5308_v40 = vperm.slane %v5278_v56, 0  ;;  %v5550_v61 = vrot.slane %v5521_v35, 4 }
 0x587   : > { %v5371_v58 = vadd.f32 %v5307_v44, %v5239_v4  ;;  %6952 = vmatmul.msk.f32.gmra.mxu0 %vm5011_vm3, %v8538_v54 }
 0x589   : > { %v5526_v52 = vrot.slane %v5371_v58, 4  ;;  %v5529_v36 = vsel %vm5390_vm4, %v5371_v58, %v5528_v63 }
 0x58a   : > { %v5537_v24 = vperm.slane %v5529_v36, %v8562_v28  ;;  %v5551_v36 = vsel %vm5390_vm4, %v5550_v61, %v5509_v1 }
 0x58b   : > { %v5527_v54 = vsel %vm5390_vm4, %v5526_v52, %v5369_v29  ;;  %v5553_v29 = vsel %vm5390_vm4, %v5521_v35, %v5552_v17  ;;  %v5557_v49 = vperm.slane %v5551_v36, %v8581_v27 }
 0x58c   : > { %v5174_v26 = vpop.f32.mrf.mxu0  ;;  %v5533_v7 = vperm.slane %v5527_v54, %v8562_v28  ;;  %v5588_v11 = vrot.slane %v5537_v24, 4  ;;  %v5561_v12 = vperm.slane %v5553_v29, %v8581_v27 }
 0x58d   : > { %v5240_v60 = vadd.f32 %v5174_v26, %v8372_v16 }
 0x58e   : > { %v5576_v44 = vrot.slane %v5533_v7, 4  ;;  %v5604_v26 = vrot.slane %v5561_v12, 4 }
 0x58f   : > { %v5372_v48 = vadd.f32 %v5308_v40, %v5240_v60  ;;  %6953 = vmatmul.msk.f32.gmra.mxu0 %vm5011_vm3, %v8579_v19 }
 0x591   : > { %v5538_v16 = vrot.slane %v5372_v48, 4  ;;  %v5541_v38 = vsel %vm5390_vm4, %v5372_v48, %v5540_v5  ;;  %v5600_v48 = vrot.slane %v5557_v49, 4 }
 0x592   : > { %v5549_v50 = vperm.slane %v5541_v38, %v8562_v28 }
 0x593   : > { %v5539_v33 = vsel %vm5390_vm4, %v5538_v16, %v5370_v53  ;;  %v5259_v16 = vld [vmem:[%s8549_s25 + $0x10] sm:$0xff] }
 0x594   : > { %v5545_v19 = vperm.slane %v5539_v33, %v8562_v28  ;;  %v5586_v8 = vrot.slane %v5549_v50, 4  ;;  %v5177_v23 = vpop.f32.mrf.mxu0  ;;  %v5589_v31 = vsel %vm5390_vm4, %v5549_v50, %v5588_v11  ;;  %v5280_v38 = vrot.slane %v5259_v16, 2 }
 0x595   : > { %v5597_v18 = vperm.slane %v5589_v31, %v8581_v27  ;;  %v5281_v11 = vrot.slane %v5259_v16, 3  ;;  %v5279_v50 = vrot.slane %v5259_v16, 1  ;;  %v5282_v61 = vrot.slane %v5259_v16, 4 }
 0x596   : > { %v5587_v4 = vsel %vm5390_vm4, %v5586_v8, %v5537_v24  ;;  %v5577_v14 = vsel %vm5390_vm4, %v5545_v19, %v5576_v44  ;;  %v5574_v43 = vrot.slane %v5545_v19, 4  ;;  %v5311_v33 = vperm.slane %v5280_v38, 0 }
 0x597   : > { %v5613_v58 = vsel %vm5390_vm4, %v5597_v18, %v5612_v2  ;;  %v5610_v56 = vrot.slane %v5597_v18, 4  ;;  %v5593_v47 = vperm.slane %v5587_v4, %v8581_v27  ;;  %v5585_v53 = vperm.slane %v5577_v14, %v8581_v27 }
 0x598   : > { %5940 = vrot.lane.b32.xlu0 %v5613_v58, %s7125_s26  ;;  %v5575_v63 = vsel %vm5390_vm4, %v5574_v43, %v5533_v7  ;;  %v5309_v19 = vperm.slane %v5259_v16, 0  ;;  %v5312_v44 = vperm.slane %v5281_v11, 0  ;;  %v5310_v2 = vperm.slane %v5279_v50, 0 }
 0x599   : > { %v5611_v52 = vsel %vm5390_vm4, %v5610_v56, %v5573_v42  ;;  %v5609_v9 = vsel %vm5390_vm4, %v5593_v47, %v5608_v15  ;;  %v5581_v40 = vperm.slane %v5575_v63, %v8581_v27  ;;  %v5606_v54 = vrot.slane %v5593_v47, 4 }
 0x59a   : > { %5924 = vrot.lane.b32.xlu2 %v5611_v52, %s7130_s29  ;;  %5908 = vrot.lane.b32.xlu1 %v5609_v9, %s7128_s27  ;;  %v5602_v60 = vrot.slane %v5585_v53, 4  ;;  %v5605_v24 = vsel %vm5390_vm4, %v5585_v53, %v5604_v26  ;;  %v5284_v4 = vrot.slane %v5259_v16, 6  ;;  %v5313_v56 = vperm.slane %v5282_v61, 0 }
 0x59b   : > { %v5598_v37 = vrot.slane %v5581_v40, 4  ;;  %v5607_v22 = vsel %vm5390_vm4, %v5606_v54, %v5569_v21  ;;  %v5601_v7 = vsel %vm5390_vm4, %v5581_v40, %v5600_v48  ;;  %v5241_v21 = vadd.f32 %v5177_v23, %v8381_v34 }
 0x59c   : > { %v5180_v13 = vpop.f32.mrf.mxu0  ;;  %v5603_v1 = vsel %vm5390_vm4, %v5602_v60, %v5561_v12  ;;  %v5283_v34 = vrot.slane %v5259_v16, 5  ;;  %v5315_v15 = vperm.slane %v5284_v4, 0 }
 0x59d   : > { %v8688_v41 = vsel %vm5390_vm4, %v5598_v37, %v5557_v49  ;;  %v5242_v18 = vadd.f32 %v5180_v13, %v8389_v45  ;;  %v5373_v14 = vadd.f32 %v5309_v19, %v5241_v21  ;;  %v5285_v49 = vrot.slane %v5259_v16, 7 }
 0x59e   : > { %v5314_v36 = vperm.slane %v5283_v34, 0 }
 0x59f   : > { %v5616_v12 = vrot.slane %v5373_v14, 4 }
 0x5a0   : > { %5876 = vrot.lane.b32.xlu0 %v5605_v24, %s7126_s24 }
 0x5a2   : > { %5892 = vrot.lane.b32.xlu1 %v5607_v22, %s7129_s28  ;;  %5860 = vrot.lane.b32.xlu2 %v5603_v1, %s7131_s19 }
 0x5a4   : > { %v5183_v5 = vpop.f32.mrf.mxu0 }
 0x5a5   : > { %v5243_v17 = vadd.f32 %v5183_v5, %v8396_v39  ;;  %v5374_v39 = vadd.f32 %v5310_v2, %v5242_v18 }
 0x5a7   : > { %v5375_v29 = vadd.f32 %v5311_v33, %v5243_v17  ;;  %v5628_v9 = vrot.slane %v5374_v39, 4 }
 0x5a8   : > { %5844 = vrot.lane.b32.xlu0 %v5601_v7, %s7127_s21 }
 0x5a9   : > { %v5614_v23 = vrot.slane %v5375_v29, 4  ;;  %v5617_v53 = vsel %vm5390_vm4, %v5375_v29, %v5616_v12 }
 0x5aa   : > { %v5625_v26 = vperm.slane %v5617_v53, %v8562_v28 }
 0x5ab   : > { %v5615_v40 = vsel %vm5390_vm4, %v5614_v23, %v5373_v14 }
 0x5ac   : > { %v5186_v59 = vpop.f32.mrf.mxu0  ;;  %v5676_v38 = vrot.slane %v5625_v26, 4 }
 0x5ad   : > { %v5244_v31 = vadd.f32 %v5186_v59, %v8405_v46 }
 0x5af   : > { %v5376_v43 = vadd.f32 %v5312_v44, %v5244_v31 }
 0x5b1   : > { %v5626_v63 = vrot.slane %v5376_v43, 4  ;;  %v5629_v37 = vsel %vm5390_vm4, %v5376_v43, %v5628_v9 }
 0x5b2   : > { %v5637_v1 = vperm.slane %v5629_v37, %v8562_v28 }
 0x5b3   : > { %v5627_v54 = vsel %vm5390_vm4, %v5626_v63, %v5374_v39 }
 0x5b4   : > { %v5189_v35 = vpop.f32.mrf.mxu0  ;;  %v8699_v42 = vpop.permute.xlu2 %5874  ;;  %v5633_v7 = vperm.slane %v5627_v54, %v8562_v28  ;;  %v5674_v44 = vrot.slane %v5637_v1, 4 }
 0x5b5   : > { %v5245_v58 = vadd.f32 %v5189_v35, %v8414_v0 }
 0x5b6   : > { %v5662_v2 = vrot.slane %v5633_v7, 4  ;;  %v5675_v63 = vsel %vm5390_vm4, %v5674_v44, %v5625_v26 }
 0x5b7   : > { %v5377_v52 = vadd.f32 %v5313_v56, %v5245_v58 }
 0x5b9   : > { %v5640_v60 = vrot.slane %v5377_v52, 4 }
 0x5bc   : > { %v5192_v8 = vpop.f32.mrf.mxu0  ;;  %v8706_v47 = vpop.permute.xlu2 %5906 }
 0x5bd   : > { %v5246_v0 = vadd.f32 %v5192_v8, %v8422_v51  ;;  %v5316_v51 = vperm.slane %v5285_v49, 0  ;;  %v5677_v8 = vsel %vm5390_vm4, %v5637_v1, %v5676_v38 }
 0x5be   : > { %v5685_v14 = vperm.slane %v5677_v8, %v8581_v27 }
 0x5bf   : > { %v5378_v5 = vadd.f32 %v5314_v36, %v5246_v0 }
 0x5c0   : > { %v5724_v36 = vrot.slane %v5685_v14, 4 }
 0x5c1   : > { %v5652_v33 = vrot.slane %v5378_v5, 4 }
 0x5c4   : > { %v5195_v46 = vpop.f32.mrf.mxu0  ;;  %v8721_v59 = vpop.permute.xlu2 %5922 }
 0x5c5   : > { %v5247_v45 = vadd.f32 %v5195_v46, %v8431_v30  ;;  %v5621_v30 = vperm.slane %v5615_v40, %v8562_v28 }
 0x5c7   : > { %v5379_v13 = vadd.f32 %v5315_v15, %v5247_v45  ;;  %v5664_v50 = vrot.slane %v5621_v30, 4  ;;  %v5663_v9 = vsel %vm5390_vm4, %v5662_v2, %v5621_v30 }
 0x5c8   : > { %v5669_v38 = vperm.slane %v5663_v9, %v8581_v27 }
 0x5c9   : > { %v5638_v24 = vrot.slane %v5379_v13, 4  ;;  %v5641_v48 = vsel %vm5390_vm4, %v5379_v13, %v5640_v60  ;;  %v5665_v31 = vsel %vm5390_vm4, %v5633_v7, %v5664_v50 }
 0x5ca   : > { %v8716_v22 = vpop.permute.xlu0 %5938  ;;  %v5649_v17 = vperm.slane %v5641_v48, %v8562_v28  ;;  %v5673_v58 = vperm.slane %v5665_v31, %v8581_v27  ;;  %v5712_v31 = vrot.slane %v5669_v38, 4 }
 0x5cb   : > { %v5639_v35 = vsel %vm5390_vm4, %v5638_v24, %v5377_v52 }
 0x5cc   : > { %v5198_v16 = vpop.f32.mrf.mxu0  ;;  %v5645_v21 = vperm.slane %v5639_v35, %v8562_v28  ;;  %v5700_v29 = vrot.slane %v5649_v17, 4  ;;  %v5859_v52 = vpop.permute.xlu2 %5858  ;;  %v5716_v13 = vrot.slane %v5673_v58, 4 }
 0x5cd   : > { %v5248_v11 = vadd.f32 %v5198_v16, %v8438_v25 }
 0x5ce   : > { %v5688_v56 = vrot.slane %v5645_v21, 4 }
 0x5cf   : > { %v5380_v19 = vadd.f32 %v5316_v51, %v5248_v11 }
 0x5d1   : > { %v5650_v61 = vrot.slane %v5380_v19, 4  ;;  %v5653_v18 = vsel %vm5390_vm4, %v5380_v19, %v5652_v33 }
 0x5d2   : > { %v5661_v4 = vperm.slane %v5653_v18, %v8562_v28  ;;  %v5843_v25 = vpop.permute.xlu0 %5842  ;;  %v5260_v18 = vld [vmem:[%s8549_s25 + $0x18] sm:$0xff] }
 0x5d3   : > { %v5651_v43 = vsel %vm5390_vm4, %v5650_v61, %v5378_v5  ;;  %v5950_v23 = vsel %vm5011_vm3, %v8614_v32, %v5843_v25  ;;  %v5681_v5 = vperm.slane %v5675_v63, %v8581_v27  ;;  %v5287_v2 = vrot.slane %v5260_v18, 2 }
 0x5d4   : > { %v5657_v39 = vperm.slane %v5651_v43, %v8562_v28  ;;  %v5698_v34 = vrot.slane %v5661_v4, 4  ;;  %v8737_v15 = vpop.f32.mrf.mxu0  ;;  %v5701_v12 = vsel %vm5390_vm4, %v5661_v4, %v5700_v29  ;;  %v5955_v40 = vsel %vm5954_vm5, %v5950_v23, %v5859_v52 }
 0x5d5   : > { %v5709_v46 = vperm.slane %v5701_v12, %v8581_v27  ;;  %v5960_v1 = vsel %vm5959_vm6, %v5955_v40, %v8699_v42  ;;  %v5720_v33 = vrot.slane %v5681_v5, 4  ;;  %v5286_v29 = vrot.slane %v5260_v18, 1 }
 0x5d6   : > { %v5689_v45 = vsel %vm5390_vm4, %v5657_v39, %v5688_v56  ;;  %v5686_v53 = vrot.slane %v5657_v39, 4  ;;  %v5699_v49 = vsel %vm5390_vm4, %v5698_v34, %v5649_v17  ;;  %v5288_v4 = vrot.slane %v5260_v18, 3 }
 0x5d7   : > { %v5722_v0 = vrot.slane %v5709_v46, 4  ;;  %v5697_v32 = vperm.slane %v5689_v45, %v8581_v27  ;;  %v8749_v26 = vsel %vm5390_vm4, %v5709_v46, %v5724_v36  ;;  %v5705_v35 = vperm.slane %v5699_v49, %v8581_v27 }
 0x5d8   : > { %v5687_v37 = vsel %vm5390_vm4, %v5686_v53, %v5645_v21  ;;  %v5320_v34 = vperm.slane %v5288_v4, 0  ;;  %v5291_v46 = vrot.slane %v5260_v18, 6  ;;  %v5249_v63 = vadd.f32 %v8737_v15, %v8451_v62 }
 0x5d9   : > { %v5723_v54 = vsel %vm5390_vm4, %v5722_v0, %v5685_v14  ;;  %v5717_v60 = vsel %vm5390_vm4, %v5697_v32, %v5716_v13  ;;  %v5714_v24 = vrot.slane %v5697_v32, 4  ;;  %v5693_v48 = vperm.slane %v5687_v37, %v8581_v27 }
 0x5da   : > { %v5891_v30 = vpop.permute.xlu0 %5890  ;;  %5926 = vrot.lane.b32.xlu2 %v5723_v54, %s7130_s29  ;;  %5878 = vrot.lane.b32.xlu1 %v5717_v60, %s7126_s24  ;;  %v5718_v21 = vrot.slane %v5705_v35, 4  ;;  %v5721_v19 = vsel %vm5390_vm4, %v5705_v35, %v5720_v33  ;;  %v5319_v14 = vperm.slane %v5287_v2, 0  ;;  %v5317_v52 = vperm.slane %v5260_v18, 0 }
 0x5db   : > { %v5965_v51 = vsel %vm5964_vm7, %v5960_v1, %v5891_v30  ;;  %v5715_v7 = vsel %vm5390_vm4, %v5714_v24, %v5673_v58  ;;  %v5710_v11 = vrot.slane %v5693_v48, 4  ;;  %v5713_v44 = vsel %vm5390_vm4, %v5693_v48, %v5712_v31 }
 0x5dc   : > { %v5970_v16 = vsel %vm5969_vm8, %v5965_v51, %v8706_v47  ;;  %5862 = vrot.lane.b32.xlu0 %v5715_v7, %s7131_s19  ;;  %v5204_v42 = vpop.f32.mrf.mxu0  ;;  %v5719_v8 = vsel %vm5390_vm4, %v5718_v21, %v5681_v5  ;;  %v5318_v58 = vperm.slane %v5286_v29, 0  ;;  %v5289_v53 = vrot.slane %v5260_v18, 4 }
 0x5dd   : > { %v5975_v50 = vsel %vm5974_vm9, %v5970_v16, %v8721_v59  ;;  %v8775_v17 = vsel %vm5390_vm4, %v5710_v11, %v5669_v38  ;;  %v5250_v43 = vadd.f32 %v5204_v42, %v8459_v57  ;;  %v5290_v36 = vrot.slane %v5260_v18, 5 }
 0x5de   : > { %v5980_v47 = vsel %vm5979_vm10, %v5975_v50, %v8716_v22  ;;  %v5323_v40 = vperm.slane %v5291_v46, 0  ;;  %v5381_v0 = vadd.f32 %v5317_v52, %v5249_v63  ;;  %v5321_v37 = vperm.slane %v5289_v53, 0  ;;  %v8898_v50 = vld [vmem:[#allocation2_spill] sm:$0xff] }
 0x5df   : > { %5984 = vst.msk [vmem:[%s8770_s17] sm:$0xff] %vm753_vm0, %v5980_v47  ;;  %v5382_v12 = vadd.f32 %v5318_v58, %v5250_v43  ;;  %v5322_v54 = vperm.slane %v5290_v36, 0  ;;  %v5292_v24 = vrot.slane %v5260_v18, 7 }
 0x5e0   : > { %v5728_v1 = vrot.slane %v5381_v0, 4 }
 0x5e1   : > { %v5324_v42 = vperm.slane %v5292_v24, 0 }
 0x5e2   : > { %5910 = vrot.lane.b32.xlu1 %v5721_v19, %s7128_s27 }
 0x5e4   : > { %5894 = vrot.lane.b32.xlu0 %v5719_v8, %s7129_s28  ;;  %v5207_v59 = vpop.f32.mrf.mxu0 }
 0x5e5   : > { %v5251_v25 = vadd.f32 %v5207_v59, %v8466_v55  ;;  %v5740_v55 = vrot.slane %v5382_v12, 4 }
 0x5e7   : > { %v5383_v23 = vadd.f32 %v5319_v14, %v5251_v25 }
 0x5e9   : > { %v5726_v9 = vrot.slane %v5383_v23, 4 }
 0x5ea   : > { %5846 = vrot.lane.b32.xlu1 %v5713_v44, %s7127_s21 }
 0x5eb   : > { %v5727_v49 = vsel %vm5390_vm4, %v5726_v9, %v5381_v0 }
 0x5ec   : > { %v5210_v61 = vpop.f32.mrf.mxu0  ;;  %v5733_v51 = vperm.slane %v5727_v49, %v8562_v28 }
 0x5ed   : > { %v5252_v39 = vadd.f32 %v5210_v61, %v8473_v10 }
 0x5ee   : > { %v5776_v21 = vrot.slane %v5733_v51, 4 }
 0x5ef   : > { %v5384_v45 = vadd.f32 %v5320_v34, %v5252_v39 }
 0x5f1   : > { %v5738_v32 = vrot.slane %v5384_v45, 4  ;;  %v5741_v13 = vsel %vm5390_vm4, %v5384_v45, %v5740_v55 }
 0x5f2   : > { %v5749_v30 = vperm.slane %v5741_v13, %v8562_v28 }
 0x5f3   : > { %v5739_v5 = vsel %vm5390_vm4, %v5738_v32, %v5382_v12 }
 0x5f4   : > { %v5213_v22 = vpop.f32.mrf.mxu0 }
 0x5f5   : > { %v5253_v62 = vadd.f32 %v5213_v22, %v8477_v6  ;;  %v5745_v6 = vperm.slane %v5739_v5, %v8562_v28  ;;  %v5925_v22 = vpop.permute.xlu2 %5924 }
 0x5f7   : > { %v5385_v35 = vadd.f32 %v5321_v37, %v5253_v62  ;;  %v5777_v61 = vsel %vm5390_vm4, %v5745_v6, %v5776_v21  ;;  %v5774_v14 = vrot.slane %v5745_v6, 4 }
 0x5f8   : > { %v5785_v39 = vperm.slane %v5777_v61, %v8581_v27 }
 0x5f9   : > { %v5752_v19 = vrot.slane %v5385_v35, 4  ;;  %v5775_v0 = vsel %vm5390_vm4, %v5774_v14, %v5733_v51 }
 0x5fa   : > { %v5828_v55 = vrot.slane %v5785_v39, 4  ;;  %v5781_v24 = vperm.slane %v5775_v0, %v8581_v27 }
 0x5fc   : > { %v5216_v56 = vpop.f32.mrf.mxu0 }
 0x5fd   : > { %v5254_v15 = vadd.f32 %v5216_v56, %v8487_v20  ;;  %v5786_v20 = vrot.slane %v5749_v30, 4  ;;  %v5861_v62 = vpop.permute.xlu2 %5860 }
 0x5ff   : > { %v5386_v16 = vadd.f32 %v5322_v54, %v5254_v15 }
 0x601   : > { %v5764_v8 = vrot.slane %v5386_v16, 4 }
 0x604   : > { %v5219_v57 = vpop.f32.mrf.mxu0 }
 0x605   : > { %v5255_v10 = vadd.f32 %v5219_v57, %v8498_v3  ;;  %v5729_v3 = vsel %vm5390_vm4, %v5383_v23, %v5728_v1 }
 0x606   : > { %v5737_v33 = vperm.slane %v5729_v3, %v8562_v28 }
 0x607   : > { %v5387_v60 = vadd.f32 %v5323_v40, %v5255_v10 }
 0x608   : > { %v5787_v44 = vsel %vm5390_vm4, %v5786_v20, %v5737_v33  ;;  %v5788_v40 = vrot.slane %v5737_v33, 4 }
 0x609   : > { %v5750_v48 = vrot.slane %v5387_v60, 4  ;;  %v5753_v18 = vsel %vm5390_vm4, %v5387_v60, %v5752_v19  ;;  %v5793_v56 = vperm.slane %v5787_v44, %v8581_v27 }
 0x60a   : > { %v8801_v7 = vpop.permute.xlu0 %5940  ;;  %v5761_v34 = vperm.slane %v5753_v18, %v8562_v28  ;;  %v5789_v54 = vsel %vm5390_vm4, %v5749_v30, %v5788_v40 }
 0x60b   : > { %v5751_v11 = vsel %vm5390_vm4, %v5750_v48, %v5385_v35  ;;  %v5832_v53 = vrot.slane %v5793_v56, 4  ;;  %v5797_v30 = vperm.slane %v5789_v54, %v8581_v27 }
 0x60c   : > { %v5222_v38 = vpop.f32.mrf.mxu0  ;;  %v5757_v31 = vperm.slane %v5751_v11, %v8562_v28  ;;  %v5909_v43 = vpop.permute.xlu1 %5908  ;;  %v5812_v49 = vrot.slane %v5761_v34, 4 }
 0x60d   : > { %v5256_v47 = vadd.f32 %v5222_v38, %v8898_v50  ;;  %v5836_v11 = vrot.slane %v5797_v30, 4 }
 0x60e   : > { %v5800_v46 = vrot.slane %v5757_v31, 4 }
 0x60f   : > { %v5388_v59 = vadd.f32 %v5324_v42, %v5256_v47  ;;  %v5824_v42 = vrot.slane %v5781_v24, 4 }
 0x611   : > { %v5762_v2 = vrot.slane %v5388_v59, 4  ;;  %v5765_v29 = vsel %vm5390_vm4, %v5388_v59, %v5764_v8 }
 0x612   : > { %v5773_v4 = vperm.slane %v5765_v29, %v8562_v28  ;;  %v5877_v25 = vpop.permute.xlu0 %5876 }
 0x613   : > { %v5763_v58 = vsel %vm5390_vm4, %v5762_v2, %v5386_v16 }
 0x614   : > { %v5769_v23 = vperm.slane %v5763_v58, %v8562_v28  ;;  %v5810_v12 = vrot.slane %v5773_v4, 4  ;;  %v5813_v48 = vsel %vm5390_vm4, %v5773_v4, %v5812_v49  ;;  %v5893_v51 = vpop.permute.xlu1 %5892 }
 0x615   : > { %v5821_v6 = vperm.slane %v5813_v48, %v8581_v27 }
 0x616   : > { %v5811_v63 = vsel %vm5390_vm4, %v5810_v12, %v5761_v34  ;;  %v5801_v52 = vsel %vm5390_vm4, %v5769_v23, %v5800_v46  ;;  %v5798_v45 = vrot.slane %v5769_v23, 4 }
 0x617   : > { %v5817_v9 = vperm.slane %v5811_v63, %v8581_v27  ;;  %v5809_v36 = vperm.slane %v5801_v52, %v8581_v27  ;;  %v5837_v47 = vsel %vm5390_vm4, %v5821_v6, %v5836_v11  ;;  %v5834_v21 = vrot.slane %v5821_v6, 4 }
 0x618   : > { %v5799_v57 = vsel %vm5390_vm4, %v5798_v45, %v5757_v31 }
 0x619   : > { %v5833_v28 = vsel %vm5390_vm4, %v5817_v9, %v5832_v53  ;;  %v5829_v32 = vsel %vm5390_vm4, %v5809_v36, %v5828_v55  ;;  %v5830_v13 = vrot.slane %v5817_v9, 4  ;;  %v5805_v10 = vperm.slane %v5799_v57, %v8581_v27 }
 0x61a   : > { %v5845_v37 = vpop.permute.xlu0 %5844  ;;  %5912 = vrot.lane.b32.xlu1 %v5833_v28, %s7128_s27  ;;  %5880 = vrot.lane.b32.xlu2 %v5829_v32, %s7126_s24  ;;  %v5826_v27 = vrot.slane %v5809_v36, 4  ;;  %v5835_v19 = vsel %vm5390_vm4, %v5834_v21, %v5797_v30 }
 0x61b   : > { %v5951_v15 = vsel %vm5011_vm3, %v8688_v41, %v5845_v37  ;;  %v5831_v60 = vsel %vm5390_vm4, %v5830_v13, %v5793_v56  ;;  %v5822_v1 = vrot.slane %v5805_v10, 4  ;;  %v5825_v38 = vsel %vm5390_vm4, %v5805_v10, %v5824_v42 }
 0x61c   : > { %v5956_v5 = vsel %vm5954_vm5, %v5951_v15, %v5861_v62  ;;  %5896 = vrot.lane.b32.xlu0 %v5831_v60, %s7129_s28  ;;  %v5827_v33 = vsel %vm5390_vm4, %v5826_v27, %v5785_v39 }
 0x61d   : > { %v5961_v3 = vsel %vm5959_vm6, %v5956_v5, %v5877_v25  ;;  %v5823_v35 = vsel %vm5390_vm4, %v5822_v1, %v5781_v24 }
 0x61e   : > { %v5966_v41 = vsel %vm5964_vm7, %v5961_v3, %v5893_v51 }
 0x61f   : > { %v5971_v16 = vsel %vm5969_vm8, %v5966_v41, %v5909_v43 }
 0x620   : > { %v5976_v20 = vsel %vm5974_vm9, %v5971_v16, %v5925_v22 }
 0x621   : > { %v5981_v50 = vsel %vm5979_vm10, %v5976_v20, %v8801_v7 }
 0x622   : > { %5942 = vrot.lane.b32.xlu2 %v8749_v26, %s7125_s26  ;;  %5848 = vrot.lane.b32.xlu1 %v5825_v38, %s7127_s21  ;;  %5985 = vst.msk [vmem:[%s8770_s17 + $0x8] sm:$0xff] %vm753_vm0, %v5981_v50 }
 0x624   : > { %5944 = vrot.lane.b32.xlu0 %v5837_v47, %s7125_s26 }
 0x62a   : > { %5864 = vrot.lane.b32.xlu1 %v5827_v33, %s7131_s19 }
 0x632   : > { %5928 = vrot.lane.b32.xlu1 %v5835_v19, %s7130_s29 }
 0x634   : > { %v5927_v31 = vpop.permute.xlu2 %5926 }
 0x64c   : > { %v5879_v26 = vpop.permute.xlu1 %5878 }
 0x64e   : > { %v5863_v59 = vpop.permute.xlu0 %5862 }
 0x654   : > { %v5911_v7 = vpop.permute.xlu1 %5910 }
 0x656   : > { %v5895_v2 = vpop.permute.xlu0 %5894 }
 0x65c   : > { %v5847_v8 = vpop.permute.xlu1 %5846 }
 0x65d   : > { %v5952_v44 = vsel %vm5011_vm3, %v8775_v17, %v5847_v8 }
 0x65e   : > { %v5957_v61 = vsel %vm5954_vm5, %v5952_v44, %v5863_v59 }
 0x65f   : > { %v5962_v22 = vsel %vm5959_vm6, %v5957_v61, %v5879_v26 }
 0x660   : > { %v5967_v29 = vsel %vm5964_vm7, %v5962_v22, %v5895_v2 }
 0x661   : > { %v5972_v4 = vsel %vm5969_vm8, %v5967_v29, %v5911_v7 }
 0x662   : > { %v5977_v25 = vsel %vm5974_vm9, %v5972_v4, %v5927_v31 }
 0x674   : > { %v5881_v18 = vpop.permute.xlu2 %5880 }
 0x67c   : > { %v5943_v14 = vpop.permute.xlu2 %5942 }
 0x67d   : > { %v5982_v43 = vsel %vm5979_vm10, %v5977_v25, %v5943_v14 }
 0x67e   : > { %5986 = vst.msk [vmem:[%s8770_s17 + $0x10] sm:$0xff] %vm753_vm0, %v5982_v43 }
 0x68c   : > { %v5913_v58 = vpop.permute.xlu1 %5912 }
 0x68e   : > { %v5897_v56 = vpop.permute.xlu0 %5896 }
 0x694   : > { %v5849_v17 = vpop.permute.xlu1 %5848 }
 0x695   : > { %v5953_v39 = vsel %vm5011_vm3, %v5823_v35, %v5849_v17 }
 0x696   : > { %v5945_v45 = vpop.permute.xlu0 %5944 }
 0x69c   : > { %v5865_v34 = vpop.permute.xlu1 %5864 }
 0x69d   : > { %v5958_v23 = vsel %vm5954_vm5, %v5953_v39, %v5865_v34 }
 0x69e   : > { %v5963_v12 = vsel %vm5959_vm6, %v5958_v23, %v5881_v18 }
 0x69f   : > { %v5968_v46 = vsel %vm5964_vm7, %v5963_v12, %v5897_v56 }
 0x6a0   : > { %v5973_v52 = vsel %vm5969_vm8, %v5968_v46, %v5913_v58 }
 0x6a4   : > { %v5929_v63 = vpop.permute.xlu1 %5928 }
 0x6a5   : > { %v5978_v9 = vsel %vm5974_vm9, %v5973_v52, %v5929_v63 }
 0x6a6   : > { %v5983_v53 = vsel %vm5979_vm10, %v5978_v9, %v5945_v45 }
 0x6a7   : > { %5987 = vst.msk [vmem:[%s8770_s17 + $0x18] sm:$0xff] %vm753_vm0, %v5983_v53 }
 0x6a8 PF: > { %s25_s18 = sadd.s32 1, %s7121_s18  }
 0x6a9   : > { %p22_p5 = scmp.ge.s32.totalorder %s25_s18, 4  }
 0x6ab   :  { %24 = sbr.rel (!%p22_p5) target bundleno = 1 (0x1), region = 125 }

</bundles_post_ra>
